<compile_context>
chip_gen: v5e
topology: v5e:2x2
jax: 0.10.0
libtpu: 0.0.40
codegen_flags: <defaults>
</compile_context>

<pallas_src>
import functools

import numpy as np

import jax
import jax.numpy as jnp
from jax.experimental import pallas as pl
from jax.experimental.pallas import tpu as pltpu


# Tap order matches the (kh, kw) layout of the pre-split conv weights.
_TAPS = tuple((dy, dx) for dy in (-1, 0, 1) for dx in (-1, 0, 1))


# ----------------------------------------------------------------------------
# Kernel 1: fused conv stack (3x 3x3 'same' conv + ReLU), one sample per step.
# ----------------------------------------------------------------------------
def _fused_conv_kernel(masks_ref, x_ref, w1_ref, b1_ref, w2_ref, b2_ref,
                       w3_ref, b3_ref, o_ref, *, height, width):
    hw = height * width
    # 9 tiny per-tap boundary masks (HW, 1) f32, shared by all three convs.
    masks = [masks_ref[k] for k in range(9)]

    def conv3x3(x, w_ref, b_ref):
        """x: (HW, Cin) f32; w_ref: (9, Cin, Cout) bf16; b_ref: (1, Cout) f32."""
        acc = None
        for k, (dy, dx) in enumerate(_TAPS):
            off = dy * width + dx
            if off == 0:
                shifted = x                       # center tap: mask is all-ones
            else:
                # shifted[p] = x[p + off]  (wrapped rows killed by the mask)
                shifted = pltpu.roll(x, (-off) % hw, axis=0) * masks[k]
            t = jnp.dot(shifted.astype(jnp.bfloat16), w_ref[k],
                        preferred_element_type=jnp.float32)
            acc = t if acc is None else acc + t
        return jnp.maximum(acc + b_ref[...], 0.0)

    h = conv3x3(x_ref[...], w1_ref, b1_ref)       # (HW, 32)
    h = conv3x3(h, w2_ref, b2_ref)                # (HW, 64)
    h = conv3x3(h, w3_ref, b3_ref)                # (HW, 128)
    o_ref[...] = h.astype(o_ref.dtype)            # bf16, lane-dense


# ----------------------------------------------------------------------------
# Kernel 2: fused dense hidden layers + dueling head, K-tiled weight stream.
# ----------------------------------------------------------------------------
def _dense_head_kernel(f_ref, w1_ref, b1_ref, w2_ref, b2_ref, o_ref, acc_ref,
                       *, actions):
    k = pl.program_id(0)

    @pl.when(k == 0)
    def _init():
        acc_ref[...] = jnp.zeros_like(acc_ref)

    # Streamed bf16 K-chunk of the combined [value | advantage] hidden layer.
    acc_ref[...] += jnp.dot(f_ref[...], w1_ref[...],
                            preferred_element_type=jnp.float32)

    @pl.when(k == pl.num_programs(0) - 1)
    def _finalize():
        h = jnp.maximum(acc_ref[...] + b1_ref[...], 0.0)          # (B, 512) f32
        va = jnp.dot(h.astype(jnp.bfloat16), w2_ref[...],
                     preferred_element_type=jnp.float32)
        va = va + b2_ref[...]                                     # (B, 128)
        v = va[:, 0:1]                                            # value head
        a = va[:, 1:1 + actions]                                  # advantage head
        q = v + a - jnp.sum(a, axis=1, keepdims=True) * (1.0 / actions)
        o_ref[...] = q.astype(o_ref.dtype)


# ----------------------------------------------------------------------------
# One-time prep (weight re-layout + boundary masks) and wrappers
# ----------------------------------------------------------------------------
def build_tap_masks(height, width):
    """(9, HW, 1) 0/1 masks: valid source rows for each 3x3 tap (zero pad)."""
    hw = height * width
    m = np.zeros((9, hw, 1), np.float32)
    for k, (dy, dx) in enumerate(_TAPS):
        for y in range(height):
            for x in range(width):
                if 0 <= y + dy < height and 0 <= x + dx < width:
                    m[k, y * width + x, 0] = 1.0
    return jnp.asarray(m)


def prepare_params(params, view, actions):
    """One-time weight re-layout (done at init, not per-forward)."""
    hw = view * view

    def conv_taps(w):                  # (Cout, Cin, 3, 3) -> (9, Cin, Cout) bf16
        co, ci = w.shape[0], w.shape[1]
        return (jnp.transpose(w, (2, 3, 1, 0))
                .reshape(9, ci, co).astype(jnp.bfloat16))

    # Combined hidden layer: concat value/advantage columns, permute rows from
    # PyTorch's NCHW-flatten order (c*HW + p) to our NHWC-flatten order
    # (p*128 + c), stream in bf16 (weight streaming is the bottleneck).
    p = np.arange(hw)
    c = np.arange(128)
    nchw_rows = (c[None, :] * hw + p[:, None]).reshape(-1)        # new -> old
    w1 = jnp.concatenate([params["v1_w"], params["a1_w"]], axis=1)[nchw_rows, :]
    b1 = jnp.concatenate([params["v1_b"], params["a1_b"]]).reshape(1, 512)

    # Final projections packed into one lane-dense block matrix:
    #   column 0           : value head      (uses h[:, :256])
    #   columns 1..actions : advantage head  (uses h[:, 256:])
    w2 = jnp.zeros((512, 128), jnp.float32)
    w2 = w2.at[:256, 0:1].set(params["v2_w"])
    w2 = w2.at[256:, 1:1 + actions].set(params["a2_w"])
    b2 = jnp.zeros((1, 128), jnp.float32)
    b2 = b2.at[0, 0].set(params["v2_b"][0])
    b2 = b2.at[0, 1:1 + actions].set(params["a2_b"])

    return {
        "c1_w": conv_taps(params["c1_w"]), "c1_b": params["c1_b"].reshape(1, -1),
        "c2_w": conv_taps(params["c2_w"]), "c2_b": params["c2_b"].reshape(1, -1),
        "c3_w": conv_taps(params["c3_w"]), "c3_b": params["c3_b"].reshape(1, -1),
        "w1": w1.astype(jnp.bfloat16),
        "b1": b1.astype(jnp.float32),
        "w2": w2.astype(jnp.bfloat16),
        "b2": b2,
        "masks": build_tap_masks(view, view),
    }


def dueling_cnn_forward(x_nchw, prep, *, actions):
    """Exact semantics of DuelingCNN.forward; output shape (B, actions)."""
    batch, in_ch, height, width = x_nchw.shape
    hw = height * width
    r = batch * hw
    dim = 128 * hw

    # NCHW -> (b*y*x, c) rows; a few KiB of XLA glue.
    x2d = jnp.transpose(x_nchw, (0, 2, 3, 1)).reshape(r, in_ch)

    h3 = pl.pallas_call(
        functools.partial(_fused_conv_kernel, height=height, width=width),
        out_shape=jax.ShapeDtypeStruct((r, 128), jnp.bfloat16),
        grid=(batch,),
        in_specs=[
            pl.BlockSpec((9, hw, 1), lambda b: (0, 0, 0)),        # tap masks
            pl.BlockSpec((hw, in_ch), lambda b: (b, 0)),          # one sample
            pl.BlockSpec(prep["c1_w"].shape, lambda b: (0, 0, 0)),
            pl.BlockSpec(prep["c1_b"].shape, lambda b: (0, 0)),
            pl.BlockSpec(prep["c2_w"].shape, lambda b: (0, 0, 0)),
            pl.BlockSpec(prep["c2_b"].shape, lambda b: (0, 0)),
            pl.BlockSpec(prep["c3_w"].shape, lambda b: (0, 0, 0)),
            pl.BlockSpec(prep["c3_b"].shape, lambda b: (0, 0)),
        ],
        out_specs=pl.BlockSpec((hw, 128), lambda b: (b, 0)),
        compiler_params=pltpu.CompilerParams(
            dimension_semantics=("parallel",)),
    )(prep["masks"], x2d, prep["c1_w"], prep["c1_b"], prep["c2_w"],
      prep["c2_b"], prep["c3_w"], prep["c3_b"])

    # (b*HW, 128) -> (b, HW*128): the NHWC-flatten feature order the permuted
    # dense weights expect (tiny bf16 relayout between the two kernels).
    f = h3.reshape(batch, dim)

    # Fewer, larger K tiles: per-grid-step overhead matters for a weight-
    # stream-bound kernel; 2x4 MiB double-buffered bf16 fits all generations.
    if dim % 4096 == 0:
        tk = 4096
    elif dim % 2048 == 0:
        tk = 2048
    else:
        tk = dim
    nk = dim // tk

    return pl.pallas_call(
        functools.partial(_dense_head_kernel, actions=actions),
        out_shape=jax.ShapeDtypeStruct((batch, actions), jnp.float32),
        grid=(nk,),
        in_specs=[
            pl.BlockSpec((batch, tk), lambda k: (0, k)),          # f chunk
            pl.BlockSpec((tk, 512), lambda k: (k, 0)),            # streamed w1
            pl.BlockSpec((1, 512), lambda k: (0, 0)),             # b1
            pl.BlockSpec((512, 128), lambda k: (0, 0)),           # packed head w
            pl.BlockSpec((1, 128), lambda k: (0, 0)),             # packed head b
        ],
        out_specs=pl.BlockSpec((batch, actions), lambda k: (0, 0)),
        scratch_shapes=[pltpu.VMEM((batch, 512), jnp.float32)],
        compiler_params=pltpu.CompilerParams(
            dimension_semantics=("arbitrary",)),
    )(f, prep["w1"], prep["b1"], prep["w2"], prep["b2"])


# ----------------------------------------------------------------------------
# Deterministic parameter init + pure-JAX reference
# ----------------------------------------------------------------------------
def init_params(key, in_ch, actions, view):
    ks = jax.random.split(key, 20)

    def unif(k, shape, fan_in):
        s = 1.0 / jnp.sqrt(jnp.float32(fan_in))
        return jax.random.uniform(k, shape, jnp.float32, -s, s)

    dim = 128 * view * view
    return {
        "c1_w": unif(ks[0], (32, in_ch, 3, 3), in_ch * 9),
        "c1_b": unif(ks[1], (32,), in_ch * 9),
        "c2_w": unif(ks[2], (64, 32, 3, 3), 32 * 9),
        "c2_b": unif(ks[3], (64,), 32 * 9),
        "c3_w": unif(ks[4], (128, 64, 3, 3), 64 * 9),
        "c3_b": unif(ks[5], (128,), 64 * 9),
        "v1_w": unif(ks[6], (dim, 256), dim),
        "v1_b": unif(ks[7], (256,), dim),
        "v2_w": unif(ks[8], (256, 1), 256),
        "v2_b": unif(ks[9], (1,), 256),
        "a1_w": unif(ks[10], (dim, 256), dim),
        "a1_b": unif(ks[11], (256,), dim),
        "a2_w": unif(ks[12], (256, actions), 256),
        "a2_b": unif(ks[13], (actions,), 256),
    }


def reference_forward(x_nchw, p):
    def conv(x, w, b):
        y = jax.lax.conv_general_dilated(
            x, w, (1, 1), "SAME",
            dimension_numbers=("NCHW", "OIHW", "NCHW"))
        return jax.nn.relu(y + b[None, :, None, None])

    h = conv(x_nchw, p["c1_w"], p["c1_b"])
    h = conv(h, p["c2_w"], p["c2_b"])
    h = conv(h, p["c3_w"], p["c3_b"])
    f = h.reshape(h.shape[0], -1)
    hv = jax.nn.relu(f @ p["v1_w"] + p["v1_b"])
    ha = jax.nn.relu(f @ p["a1_w"] + p["a1_b"])
    v = hv @ p["v2_w"] + p["v2_b"]
    a = ha @ p["a2_w"] + p["a2_b"]
    return v + a - a.mean(axis=1, keepdims=True)


# ----------------------------------------------------------------------------
if __name__ == "__main__":
    B, in_ch, view, actions = 2, 4, 8, 6      # dim = 128*8*8 = 8192

    key = jax.random.PRNGKey(0)
    kx, kp = jax.random.split(key)
    x = jax.random.normal(kx, (B, in_ch, view, view), jnp.float32)  # NCHW input
    params = init_params(kp, in_ch, actions, view)

    prep = prepare_params(params, view, actions)   # one-time weight re-layout

    fwd = jax.jit(functools.partial(dueling_cnn_forward, actions=actions))
    q = jax.block_until_ready(fwd(x, prep))

    assert q.shape == (B, actions), q.shape
    assert bool(jnp.all(jnp.isfinite(q)))

    # bf16 weight streaming + bf16 features over an 8192-deep reduction:
    # documented looser tolerance vs the f32 reference (RL-inference grade).
    q_ref = reference_forward(x, params)
    max_err = float(jnp.max(jnp.abs(q - q_ref)))
    assert bool(jnp.allclose(q, q_ref, rtol=5e-2, atol=5e-2)), max_err

    print("KERNEL_OK")
</pallas_src>

<mosaic_0001>
module attributes {stable_mosaic.version = 11 : i64} {
  func.func @_fused_conv_kernel(%arg0: i32, %arg1: memref<9x64x1xf32, #tpu.memory_space<vmem>>, %arg2: memref<64x4xf32, #tpu.memory_space<vmem>>, %arg3: memref<9x4x32xbf16, #tpu.memory_space<vmem>>, %arg4: memref<1x32xf32, #tpu.memory_space<vmem>>, %arg5: memref<9x32x64xbf16, #tpu.memory_space<vmem>>, %arg6: memref<1x64xf32, #tpu.memory_space<vmem>>, %arg7: memref<9x64x128xbf16, #tpu.memory_space<vmem>>, %arg8: memref<1x128xf32, #tpu.memory_space<vmem>>, %arg9: memref<64x128xbf16, #tpu.memory_space<vmem>>) attributes {dimension_semantics = [#tpu.dimension_semantics<parallel>], iteration_bounds = array<i64: 2>, scalar_prefetch = 0 : i64, scratch_operands = 0 : i64, tpu.core_type = #tpu.core_type<tc>, window_params = [{pipeline_mode = #tpu.pipeline_mode<synchronous>, transform_indices = @transform_0, window_bounds = array<i64: 9, 64, 1>}, {transform_indices = @transform_1, window_bounds = array<i64: 64, 4>}, {pipeline_mode = #tpu.pipeline_mode<synchronous>, transform_indices = @transform_2, window_bounds = array<i64: 9, 4, 32>}, {pipeline_mode = #tpu.pipeline_mode<synchronous>, transform_indices = @transform_3, window_bounds = array<i64: 1, 32>}, {pipeline_mode = #tpu.pipeline_mode<synchronous>, transform_indices = @transform_4, window_bounds = array<i64: 9, 32, 64>}, {pipeline_mode = #tpu.pipeline_mode<synchronous>, transform_indices = @transform_5, window_bounds = array<i64: 1, 64>}, {pipeline_mode = #tpu.pipeline_mode<synchronous>, transform_indices = @transform_6, window_bounds = array<i64: 9, 64, 128>}, {pipeline_mode = #tpu.pipeline_mode<synchronous>, transform_indices = @transform_7, window_bounds = array<i64: 1, 128>}, {transform_indices = @transform_8, window_bounds = array<i64: 64, 128>}]} {
    %c0 = arith.constant 0 : index
    %c0_0 = arith.constant 0 : index
    %c0_1 = arith.constant 0 : index
    %0 = vector.load %arg1[%c0, %c0_0, %c0_1] : memref<9x64x1xf32, #tpu.memory_space<vmem>>, vector<1x64x1xf32>
    %1 = vector.shape_cast %0 : vector<1x64x1xf32> to vector<64x1xf32>
    %c1 = arith.constant 1 : index
    %c0_2 = arith.constant 0 : index
    %c0_3 = arith.constant 0 : index
    %2 = vector.load %arg1[%c1, %c0_2, %c0_3] : memref<9x64x1xf32, #tpu.memory_space<vmem>>, vector<1x64x1xf32>
    %3 = vector.shape_cast %2 : vector<1x64x1xf32> to vector<64x1xf32>
    %c2 = arith.constant 2 : index
    %c0_4 = arith.constant 0 : index
    %c0_5 = arith.constant 0 : index
    %4 = vector.load %arg1[%c2, %c0_4, %c0_5] : memref<9x64x1xf32, #tpu.memory_space<vmem>>, vector<1x64x1xf32>
    %5 = vector.shape_cast %4 : vector<1x64x1xf32> to vector<64x1xf32>
    %c3 = arith.constant 3 : index
    %c0_6 = arith.constant 0 : index
    %c0_7 = arith.constant 0 : index
    %6 = vector.load %arg1[%c3, %c0_6, %c0_7] : memref<9x64x1xf32, #tpu.memory_space<vmem>>, vector<1x64x1xf32>
    %7 = vector.shape_cast %6 : vector<1x64x1xf32> to vector<64x1xf32>
    %c5 = arith.constant 5 : index
    %c0_8 = arith.constant 0 : index
    %c0_9 = arith.constant 0 : index
    %8 = vector.load %arg1[%c5, %c0_8, %c0_9] : memref<9x64x1xf32, #tpu.memory_space<vmem>>, vector<1x64x1xf32>
    %9 = vector.shape_cast %8 : vector<1x64x1xf32> to vector<64x1xf32>
    %c6 = arith.constant 6 : index
    %c0_10 = arith.constant 0 : index
    %c0_11 = arith.constant 0 : index
    %10 = vector.load %arg1[%c6, %c0_10, %c0_11] : memref<9x64x1xf32, #tpu.memory_space<vmem>>, vector<1x64x1xf32>
    %11 = vector.shape_cast %10 : vector<1x64x1xf32> to vector<64x1xf32>
    %c7 = arith.constant 7 : index
    %c0_12 = arith.constant 0 : index
    %c0_13 = arith.constant 0 : index
    %12 = vector.load %arg1[%c7, %c0_12, %c0_13] : memref<9x64x1xf32, #tpu.memory_space<vmem>>, vector<1x64x1xf32>
    %13 = vector.shape_cast %12 : vector<1x64x1xf32> to vector<64x1xf32>
    %c8 = arith.constant 8 : index
    %c0_14 = arith.constant 0 : index
    %c0_15 = arith.constant 0 : index
    %14 = vector.load %arg1[%c8, %c0_14, %c0_15] : memref<9x64x1xf32, #tpu.memory_space<vmem>>, vector<1x64x1xf32>
    %15 = vector.shape_cast %14 : vector<1x64x1xf32> to vector<64x1xf32>
    %c0_16 = arith.constant 0 : index
    %c0_17 = arith.constant 0 : index
    %16 = vector.load %arg2[%c0_16, %c0_17] : memref<64x4xf32, #tpu.memory_space<vmem>>, vector<64x4xf32>
    %c9_i32 = arith.constant 9 : i32
    %17 = tpu.dynamic_rotate %16 by %c9_i32 dim 0 : vector<64x4xf32>, i32 -> vector<64x4xf32>
    %18 = vector.broadcast %1 : vector<64x1xf32> to vector<64x4xf32>
    %19 = arith.mulf %17, %18 : vector<64x4xf32>
    %20 = arith.truncf %19 : vector<64x4xf32> to vector<64x4xbf16>
    %c0_18 = arith.constant 0 : index
    %c0_19 = arith.constant 0 : index
    %c0_20 = arith.constant 0 : index
    %21 = vector.load %arg3[%c0_18, %c0_19, %c0_20] : memref<9x4x32xbf16, #tpu.memory_space<vmem>>, vector<1x4x32xbf16>
    %22 = vector.shape_cast %21 : vector<1x4x32xbf16> to vector<4x32xbf16>
    %cst = arith.constant dense<0.000000e+00> : vector<64x32xf32>
    %23 = tpu.matmul %20, %22, %cst {dimension_numbers = #tpu.dot_dimension_numbers<[1], [0], [0], [1], [0, 0, 1, 1], [], []>} : vector<64x4xbf16>, vector<4x32xbf16>, vector<64x32xf32> -> vector<64x32xf32>
    %c8_i32 = arith.constant 8 : i32
    %24 = tpu.dynamic_rotate %16 by %c8_i32 dim 0 : vector<64x4xf32>, i32 -> vector<64x4xf32>
    %25 = vector.broadcast %3 : vector<64x1xf32> to vector<64x4xf32>
    %26 = arith.mulf %24, %25 : vector<64x4xf32>
    %27 = arith.truncf %26 : vector<64x4xf32> to vector<64x4xbf16>
    %c1_21 = arith.constant 1 : index
    %c0_22 = arith.constant 0 : index
    %c0_23 = arith.constant 0 : index
    %28 = vector.load %arg3[%c1_21, %c0_22, %c0_23] : memref<9x4x32xbf16, #tpu.memory_space<vmem>>, vector<1x4x32xbf16>
    %29 = vector.shape_cast %28 : vector<1x4x32xbf16> to vector<4x32xbf16>
    %cst_24 = arith.constant dense<0.000000e+00> : vector<64x32xf32>
    %30 = tpu.matmul %27, %29, %cst_24 {dimension_numbers = #tpu.dot_dimension_numbers<[1], [0], [0], [1], [0, 0, 1, 1], [], []>} : vector<64x4xbf16>, vector<4x32xbf16>, vector<64x32xf32> -> vector<64x32xf32>
    %31 = arith.addf %23, %30 : vector<64x32xf32>
    %c7_i32 = arith.constant 7 : i32
    %32 = tpu.dynamic_rotate %16 by %c7_i32 dim 0 : vector<64x4xf32>, i32 -> vector<64x4xf32>
    %33 = vector.broadcast %5 : vector<64x1xf32> to vector<64x4xf32>
    %34 = arith.mulf %32, %33 : vector<64x4xf32>
    %35 = arith.truncf %34 : vector<64x4xf32> to vector<64x4xbf16>
    %c2_25 = arith.constant 2 : index
    %c0_26 = arith.constant 0 : index
    %c0_27 = arith.constant 0 : index
    %36 = vector.load %arg3[%c2_25, %c0_26, %c0_27] : memref<9x4x32xbf16, #tpu.memory_space<vmem>>, vector<1x4x32xbf16>
    %37 = vector.shape_cast %36 : vector<1x4x32xbf16> to vector<4x32xbf16>
    %cst_28 = arith.constant dense<0.000000e+00> : vector<64x32xf32>
    %38 = tpu.matmul %35, %37, %cst_28 {dimension_numbers = #tpu.dot_dimension_numbers<[1], [0], [0], [1], [0, 0, 1, 1], [], []>} : vector<64x4xbf16>, vector<4x32xbf16>, vector<64x32xf32> -> vector<64x32xf32>
    %39 = arith.addf %31, %38 : vector<64x32xf32>
    %c1_i32 = arith.constant 1 : i32
    %40 = tpu.dynamic_rotate %16 by %c1_i32 dim 0 : vector<64x4xf32>, i32 -> vector<64x4xf32>
    %41 = vector.broadcast %7 : vector<64x1xf32> to vector<64x4xf32>
    %42 = arith.mulf %40, %41 : vector<64x4xf32>
    %43 = arith.truncf %42 : vector<64x4xf32> to vector<64x4xbf16>
    %c3_29 = arith.constant 3 : index
    %c0_30 = arith.constant 0 : index
    %c0_31 = arith.constant 0 : index
    %44 = vector.load %arg3[%c3_29, %c0_30, %c0_31] : memref<9x4x32xbf16, #tpu.memory_space<vmem>>, vector<1x4x32xbf16>
    %45 = vector.shape_cast %44 : vector<1x4x32xbf16> to vector<4x32xbf16>
    %cst_32 = arith.constant dense<0.000000e+00> : vector<64x32xf32>
    %46 = tpu.matmul %43, %45, %cst_32 {dimension_numbers = #tpu.dot_dimension_numbers<[1], [0], [0], [1], [0, 0, 1, 1], [], []>} : vector<64x4xbf16>, vector<4x32xbf16>, vector<64x32xf32> -> vector<64x32xf32>
    %47 = arith.addf %39, %46 : vector<64x32xf32>
    %48 = arith.truncf %16 : vector<64x4xf32> to vector<64x4xbf16>
    %c4 = arith.constant 4 : index
    %c0_33 = arith.constant 0 : index
    %c0_34 = arith.constant 0 : index
    %49 = vector.load %arg3[%c4, %c0_33, %c0_34] : memref<9x4x32xbf16, #tpu.memory_space<vmem>>, vector<1x4x32xbf16>
    %50 = vector.shape_cast %49 : vector<1x4x32xbf16> to vector<4x32xbf16>
    %cst_35 = arith.constant dense<0.000000e+00> : vector<64x32xf32>
    %51 = tpu.matmul %48, %50, %cst_35 {dimension_numbers = #tpu.dot_dimension_numbers<[1], [0], [0], [1], [0, 0, 1, 1], [], []>} : vector<64x4xbf16>, vector<4x32xbf16>, vector<64x32xf32> -> vector<64x32xf32>
    %52 = arith.addf %47, %51 : vector<64x32xf32>
    %c63_i32 = arith.constant 63 : i32
    %53 = tpu.dynamic_rotate %16 by %c63_i32 dim 0 : vector<64x4xf32>, i32 -> vector<64x4xf32>
    %54 = vector.broadcast %9 : vector<64x1xf32> to vector<64x4xf32>
    %55 = arith.mulf %53, %54 : vector<64x4xf32>
    %56 = arith.truncf %55 : vector<64x4xf32> to vector<64x4xbf16>
    %c5_36 = arith.constant 5 : index
    %c0_37 = arith.constant 0 : index
    %c0_38 = arith.constant 0 : index
    %57 = vector.load %arg3[%c5_36, %c0_37, %c0_38] : memref<9x4x32xbf16, #tpu.memory_space<vmem>>, vector<1x4x32xbf16>
    %58 = vector.shape_cast %57 : vector<1x4x32xbf16> to vector<4x32xbf16>
    %cst_39 = arith.constant dense<0.000000e+00> : vector<64x32xf32>
    %59 = tpu.matmul %56, %58, %cst_39 {dimension_numbers = #tpu.dot_dimension_numbers<[1], [0], [0], [1], [0, 0, 1, 1], [], []>} : vector<64x4xbf16>, vector<4x32xbf16>, vector<64x32xf32> -> vector<64x32xf32>
    %60 = arith.addf %52, %59 : vector<64x32xf32>
    %c57_i32 = arith.constant 57 : i32
    %61 = tpu.dynamic_rotate %16 by %c57_i32 dim 0 : vector<64x4xf32>, i32 -> vector<64x4xf32>
    %62 = vector.broadcast %11 : vector<64x1xf32> to vector<64x4xf32>
    %63 = arith.mulf %61, %62 : vector<64x4xf32>
    %64 = arith.truncf %63 : vector<64x4xf32> to vector<64x4xbf16>
    %c6_40 = arith.constant 6 : index
    %c0_41 = arith.constant 0 : index
    %c0_42 = arith.constant 0 : index
    %65 = vector.load %arg3[%c6_40, %c0_41, %c0_42] : memref<9x4x32xbf16, #tpu.memory_space<vmem>>, vector<1x4x32xbf16>
    %66 = vector.shape_cast %65 : vector<1x4x32xbf16> to vector<4x32xbf16>
    %cst_43 = arith.constant dense<0.000000e+00> : vector<64x32xf32>
    %67 = tpu.matmul %64, %66, %cst_43 {dimension_numbers = #tpu.dot_dimension_numbers<[1], [0], [0], [1], [0, 0, 1, 1], [], []>} : vector<64x4xbf16>, vector<4x32xbf16>, vector<64x32xf32> -> vector<64x32xf32>
    %68 = arith.addf %60, %67 : vector<64x32xf32>
    %c56_i32 = arith.constant 56 : i32
    %69 = tpu.dynamic_rotate %16 by %c56_i32 dim 0 : vector<64x4xf32>, i32 -> vector<64x4xf32>
    %70 = vector.broadcast %13 : vector<64x1xf32> to vector<64x4xf32>
    %71 = arith.mulf %69, %70 : vector<64x4xf32>
    %72 = arith.truncf %71 : vector<64x4xf32> to vector<64x4xbf16>
    %c7_44 = arith.constant 7 : index
    %c0_45 = arith.constant 0 : index
    %c0_46 = arith.constant 0 : index
    %73 = vector.load %arg3[%c7_44, %c0_45, %c0_46] : memref<9x4x32xbf16, #tpu.memory_space<vmem>>, vector<1x4x32xbf16>
    %74 = vector.shape_cast %73 : vector<1x4x32xbf16> to vector<4x32xbf16>
    %cst_47 = arith.constant dense<0.000000e+00> : vector<64x32xf32>
    %75 = tpu.matmul %72, %74, %cst_47 {dimension_numbers = #tpu.dot_dimension_numbers<[1], [0], [0], [1], [0, 0, 1, 1], [], []>} : vector<64x4xbf16>, vector<4x32xbf16>, vector<64x32xf32> -> vector<64x32xf32>
    %76 = arith.addf %68, %75 : vector<64x32xf32>
    %c55_i32 = arith.constant 55 : i32
    %77 = tpu.dynamic_rotate %16 by %c55_i32 dim 0 : vector<64x4xf32>, i32 -> vector<64x4xf32>
    %78 = vector.broadcast %15 : vector<64x1xf32> to vector<64x4xf32>
    %79 = arith.mulf %77, %78 : vector<64x4xf32>
    %80 = arith.truncf %79 : vector<64x4xf32> to vector<64x4xbf16>
    %c8_48 = arith.constant 8 : index
    %c0_49 = arith.constant 0 : index
    %c0_50 = arith.constant 0 : index
    %81 = vector.load %arg3[%c8_48, %c0_49, %c0_50] : memref<9x4x32xbf16, #tpu.memory_space<vmem>>, vector<1x4x32xbf16>
    %82 = vector.shape_cast %81 : vector<1x4x32xbf16> to vector<4x32xbf16>
    %cst_51 = arith.constant dense<0.000000e+00> : vector<64x32xf32>
    %83 = tpu.matmul %80, %82, %cst_51 {dimension_numbers = #tpu.dot_dimension_numbers<[1], [0], [0], [1], [0, 0, 1, 1], [], []>} : vector<64x4xbf16>, vector<4x32xbf16>, vector<64x32xf32> -> vector<64x32xf32>
    %84 = arith.addf %76, %83 : vector<64x32xf32>
    %c0_52 = arith.constant 0 : index
    %c0_53 = arith.constant 0 : index
    %85 = vector.load %arg4[%c0_52, %c0_53] : memref<1x32xf32, #tpu.memory_space<vmem>>, vector<1x32xf32>
    %86 = vector.broadcast %85 : vector<1x32xf32> to vector<64x32xf32>
    %87 = arith.addf %84, %86 : vector<64x32xf32>
    %cst_54 = arith.constant 0.000000e+00 : f32
    %88 = vector.broadcast %cst_54 : f32 to vector<64x32xf32>
    %89 = arith.maximumf %87, %88 : vector<64x32xf32>
    %c9_i32_55 = arith.constant 9 : i32
    %90 = tpu.dynamic_rotate %89 by %c9_i32_55 dim 0 : vector<64x32xf32>, i32 -> vector<64x32xf32>
    %91 = vector.broadcast %1 : vector<64x1xf32> to vector<64x32xf32>
    %92 = arith.mulf %90, %91 : vector<64x32xf32>
    %93 = arith.truncf %92 : vector<64x32xf32> to vector<64x32xbf16>
    %c0_56 = arith.constant 0 : index
    %c0_57 = arith.constant 0 : index
    %c0_58 = arith.constant 0 : index
    %94 = vector.load %arg5[%c0_56, %c0_57, %c0_58] : memref<9x32x64xbf16, #tpu.memory_space<vmem>>, vector<1x32x64xbf16>
    %95 = vector.shape_cast %94 : vector<1x32x64xbf16> to vector<32x64xbf16>
    %cst_59 = arith.constant dense<0.000000e+00> : vector<64x64xf32>
    %96 = tpu.matmul %93, %95, %cst_59 {dimension_numbers = #tpu.dot_dimension_numbers<[1], [0], [0], [1], [0, 0, 1, 1], [], []>} : vector<64x32xbf16>, vector<32x64xbf16>, vector<64x64xf32> -> vector<64x64xf32>
    %c8_i32_60 = arith.constant 8 : i32
    %97 = tpu.dynamic_rotate %89 by %c8_i32_60 dim 0 : vector<64x32xf32>, i32 -> vector<64x32xf32>
    %98 = vector.broadcast %3 : vector<64x1xf32> to vector<64x32xf32>
    %99 = arith.mulf %97, %98 : vector<64x32xf32>
    %100 = arith.truncf %99 : vector<64x32xf32> to vector<64x32xbf16>
    %c1_61 = arith.constant 1 : index
    %c0_62 = arith.constant 0 : index
    %c0_63 = arith.constant 0 : index
    %101 = vector.load %arg5[%c1_61, %c0_62, %c0_63] : memref<9x32x64xbf16, #tpu.memory_space<vmem>>, vector<1x32x64xbf16>
    %102 = vector.shape_cast %101 : vector<1x32x64xbf16> to vector<32x64xbf16>
    %cst_64 = arith.constant dense<0.000000e+00> : vector<64x64xf32>
    %103 = tpu.matmul %100, %102, %cst_64 {dimension_numbers = #tpu.dot_dimension_numbers<[1], [0], [0], [1], [0, 0, 1, 1], [], []>} : vector<64x32xbf16>, vector<32x64xbf16>, vector<64x64xf32> -> vector<64x64xf32>
    %104 = arith.addf %96, %103 : vector<64x64xf32>
    %c7_i32_65 = arith.constant 7 : i32
    %105 = tpu.dynamic_rotate %89 by %c7_i32_65 dim 0 : vector<64x32xf32>, i32 -> vector<64x32xf32>
    %106 = vector.broadcast %5 : vector<64x1xf32> to vector<64x32xf32>
    %107 = arith.mulf %105, %106 : vector<64x32xf32>
    %108 = arith.truncf %107 : vector<64x32xf32> to vector<64x32xbf16>
    %c2_66 = arith.constant 2 : index
    %c0_67 = arith.constant 0 : index
    %c0_68 = arith.constant 0 : index
    %109 = vector.load %arg5[%c2_66, %c0_67, %c0_68] : memref<9x32x64xbf16, #tpu.memory_space<vmem>>, vector<1x32x64xbf16>
    %110 = vector.shape_cast %109 : vector<1x32x64xbf16> to vector<32x64xbf16>
    %cst_69 = arith.constant dense<0.000000e+00> : vector<64x64xf32>
    %111 = tpu.matmul %108, %110, %cst_69 {dimension_numbers = #tpu.dot_dimension_numbers<[1], [0], [0], [1], [0, 0, 1, 1], [], []>} : vector<64x32xbf16>, vector<32x64xbf16>, vector<64x64xf32> -> vector<64x64xf32>
    %112 = arith.addf %104, %111 : vector<64x64xf32>
    %c1_i32_70 = arith.constant 1 : i32
    %113 = tpu.dynamic_rotate %89 by %c1_i32_70 dim 0 : vector<64x32xf32>, i32 -> vector<64x32xf32>
    %114 = vector.broadcast %7 : vector<64x1xf32> to vector<64x32xf32>
    %115 = arith.mulf %113, %114 : vector<64x32xf32>
    %116 = arith.truncf %115 : vector<64x32xf32> to vector<64x32xbf16>
    %c3_71 = arith.constant 3 : index
    %c0_72 = arith.constant 0 : index
    %c0_73 = arith.constant 0 : index
    %117 = vector.load %arg5[%c3_71, %c0_72, %c0_73] : memref<9x32x64xbf16, #tpu.memory_space<vmem>>, vector<1x32x64xbf16>
    %118 = vector.shape_cast %117 : vector<1x32x64xbf16> to vector<32x64xbf16>
    %cst_74 = arith.constant dense<0.000000e+00> : vector<64x64xf32>
    %119 = tpu.matmul %116, %118, %cst_74 {dimension_numbers = #tpu.dot_dimension_numbers<[1], [0], [0], [1], [0, 0, 1, 1], [], []>} : vector<64x32xbf16>, vector<32x64xbf16>, vector<64x64xf32> -> vector<64x64xf32>
    %120 = arith.addf %112, %119 : vector<64x64xf32>
    %121 = arith.truncf %89 : vector<64x32xf32> to vector<64x32xbf16>
    %c4_75 = arith.constant 4 : index
    %c0_76 = arith.constant 0 : index
    %c0_77 = arith.constant 0 : index
    %122 = vector.load %arg5[%c4_75, %c0_76, %c0_77] : memref<9x32x64xbf16, #tpu.memory_space<vmem>>, vector<1x32x64xbf16>
    %123 = vector.shape_cast %122 : vector<1x32x64xbf16> to vector<32x64xbf16>
    %cst_78 = arith.constant dense<0.000000e+00> : vector<64x64xf32>
    %124 = tpu.matmul %121, %123, %cst_78 {dimension_numbers = #tpu.dot_dimension_numbers<[1], [0], [0], [1], [0, 0, 1, 1], [], []>} : vector<64x32xbf16>, vector<32x64xbf16>, vector<64x64xf32> -> vector<64x64xf32>
    %125 = arith.addf %120, %124 : vector<64x64xf32>
    %c63_i32_79 = arith.constant 63 : i32
    %126 = tpu.dynamic_rotate %89 by %c63_i32_79 dim 0 : vector<64x32xf32>, i32 -> vector<64x32xf32>
    %127 = vector.broadcast %9 : vector<64x1xf32> to vector<64x32xf32>
    %128 = arith.mulf %126, %127 : vector<64x32xf32>
    %129 = arith.truncf %128 : vector<64x32xf32> to vector<64x32xbf16>
    %c5_80 = arith.constant 5 : index
    %c0_81 = arith.constant 0 : index
    %c0_82 = arith.constant 0 : index
    %130 = vector.load %arg5[%c5_80, %c0_81, %c0_82] : memref<9x32x64xbf16, #tpu.memory_space<vmem>>, vector<1x32x64xbf16>
    %131 = vector.shape_cast %130 : vector<1x32x64xbf16> to vector<32x64xbf16>
    %cst_83 = arith.constant dense<0.000000e+00> : vector<64x64xf32>
    %132 = tpu.matmul %129, %131, %cst_83 {dimension_numbers = #tpu.dot_dimension_numbers<[1], [0], [0], [1], [0, 0, 1, 1], [], []>} : vector<64x32xbf16>, vector<32x64xbf16>, vector<64x64xf32> -> vector<64x64xf32>
    %133 = arith.addf %125, %132 : vector<64x64xf32>
    %c57_i32_84 = arith.constant 57 : i32
    %134 = tpu.dynamic_rotate %89 by %c57_i32_84 dim 0 : vector<64x32xf32>, i32 -> vector<64x32xf32>
    %135 = vector.broadcast %11 : vector<64x1xf32> to vector<64x32xf32>
    %136 = arith.mulf %134, %135 : vector<64x32xf32>
    %137 = arith.truncf %136 : vector<64x32xf32> to vector<64x32xbf16>
    %c6_85 = arith.constant 6 : index
    %c0_86 = arith.constant 0 : index
    %c0_87 = arith.constant 0 : index
    %138 = vector.load %arg5[%c6_85, %c0_86, %c0_87] : memref<9x32x64xbf16, #tpu.memory_space<vmem>>, vector<1x32x64xbf16>
    %139 = vector.shape_cast %138 : vector<1x32x64xbf16> to vector<32x64xbf16>
    %cst_88 = arith.constant dense<0.000000e+00> : vector<64x64xf32>
    %140 = tpu.matmul %137, %139, %cst_88 {dimension_numbers = #tpu.dot_dimension_numbers<[1], [0], [0], [1], [0, 0, 1, 1], [], []>} : vector<64x32xbf16>, vector<32x64xbf16>, vector<64x64xf32> -> vector<64x64xf32>
    %141 = arith.addf %133, %140 : vector<64x64xf32>
    %c56_i32_89 = arith.constant 56 : i32
    %142 = tpu.dynamic_rotate %89 by %c56_i32_89 dim 0 : vector<64x32xf32>, i32 -> vector<64x32xf32>
    %143 = vector.broadcast %13 : vector<64x1xf32> to vector<64x32xf32>
    %144 = arith.mulf %142, %143 : vector<64x32xf32>
    %145 = arith.truncf %144 : vector<64x32xf32> to vector<64x32xbf16>
    %c7_90 = arith.constant 7 : index
    %c0_91 = arith.constant 0 : index
    %c0_92 = arith.constant 0 : index
    %146 = vector.load %arg5[%c7_90, %c0_91, %c0_92] : memref<9x32x64xbf16, #tpu.memory_space<vmem>>, vector<1x32x64xbf16>
    %147 = vector.shape_cast %146 : vector<1x32x64xbf16> to vector<32x64xbf16>
    %cst_93 = arith.constant dense<0.000000e+00> : vector<64x64xf32>
    %148 = tpu.matmul %145, %147, %cst_93 {dimension_numbers = #tpu.dot_dimension_numbers<[1], [0], [0], [1], [0, 0, 1, 1], [], []>} : vector<64x32xbf16>, vector<32x64xbf16>, vector<64x64xf32> -> vector<64x64xf32>
    %149 = arith.addf %141, %148 : vector<64x64xf32>
    %c55_i32_94 = arith.constant 55 : i32
    %150 = tpu.dynamic_rotate %89 by %c55_i32_94 dim 0 : vector<64x32xf32>, i32 -> vector<64x32xf32>
    %151 = vector.broadcast %15 : vector<64x1xf32> to vector<64x32xf32>
    %152 = arith.mulf %150, %151 : vector<64x32xf32>
    %153 = arith.truncf %152 : vector<64x32xf32> to vector<64x32xbf16>
    %c8_95 = arith.constant 8 : index
    %c0_96 = arith.constant 0 : index
    %c0_97 = arith.constant 0 : index
    %154 = vector.load %arg5[%c8_95, %c0_96, %c0_97] : memref<9x32x64xbf16, #tpu.memory_space<vmem>>, vector<1x32x64xbf16>
    %155 = vector.shape_cast %154 : vector<1x32x64xbf16> to vector<32x64xbf16>
    %cst_98 = arith.constant dense<0.000000e+00> : vector<64x64xf32>
    %156 = tpu.matmul %153, %155, %cst_98 {dimension_numbers = #tpu.dot_dimension_numbers<[1], [0], [0], [1], [0, 0, 1, 1], [], []>} : vector<64x32xbf16>, vector<32x64xbf16>, vector<64x64xf32> -> vector<64x64xf32>
    %157 = arith.addf %149, %156 : vector<64x64xf32>
    %c0_99 = arith.constant 0 : index
    %c0_100 = arith.constant 0 : index
    %158 = vector.load %arg6[%c0_99, %c0_100] : memref<1x64xf32, #tpu.memory_space<vmem>>, vector<1x64xf32>
    %159 = vector.broadcast %158 : vector<1x64xf32> to vector<64x64xf32>
    %160 = arith.addf %157, %159 : vector<64x64xf32>
    %cst_101 = arith.constant 0.000000e+00 : f32
    %161 = vector.broadcast %cst_101 : f32 to vector<64x64xf32>
    %162 = arith.maximumf %160, %161 : vector<64x64xf32>
    %c9_i32_102 = arith.constant 9 : i32
    %163 = tpu.dynamic_rotate %162 by %c9_i32_102 dim 0 : vector<64x64xf32>, i32 -> vector<64x64xf32>
    %164 = vector.broadcast %1 : vector<64x1xf32> to vector<64x64xf32>
    %165 = arith.mulf %163, %164 : vector<64x64xf32>
    %166 = arith.truncf %165 : vector<64x64xf32> to vector<64x64xbf16>
    %c0_103 = arith.constant 0 : index
    %c0_104 = arith.constant 0 : index
    %c0_105 = arith.constant 0 : index
    %167 = vector.load %arg7[%c0_103, %c0_104, %c0_105] : memref<9x64x128xbf16, #tpu.memory_space<vmem>>, vector<1x64x128xbf16>
    %168 = vector.shape_cast %167 : vector<1x64x128xbf16> to vector<64x128xbf16>
    %cst_106 = arith.constant dense<0.000000e+00> : vector<64x128xf32>
    %169 = tpu.matmul %166, %168, %cst_106 {dimension_numbers = #tpu.dot_dimension_numbers<[1], [0], [0], [1], [0, 0, 1, 1], [], []>} : vector<64x64xbf16>, vector<64x128xbf16>, vector<64x128xf32> -> vector<64x128xf32>
    %c8_i32_107 = arith.constant 8 : i32
    %170 = tpu.dynamic_rotate %162 by %c8_i32_107 dim 0 : vector<64x64xf32>, i32 -> vector<64x64xf32>
    %171 = vector.broadcast %3 : vector<64x1xf32> to vector<64x64xf32>
    %172 = arith.mulf %170, %171 : vector<64x64xf32>
    %173 = arith.truncf %172 : vector<64x64xf32> to vector<64x64xbf16>
    %c1_108 = arith.constant 1 : index
    %c0_109 = arith.constant 0 : index
    %c0_110 = arith.constant 0 : index
    %174 = vector.load %arg7[%c1_108, %c0_109, %c0_110] : memref<9x64x128xbf16, #tpu.memory_space<vmem>>, vector<1x64x128xbf16>
    %175 = vector.shape_cast %174 : vector<1x64x128xbf16> to vector<64x128xbf16>
    %cst_111 = arith.constant dense<0.000000e+00> : vector<64x128xf32>
    %176 = tpu.matmul %173, %175, %cst_111 {dimension_numbers = #tpu.dot_dimension_numbers<[1], [0], [0], [1], [0, 0, 1, 1], [], []>} : vector<64x64xbf16>, vector<64x128xbf16>, vector<64x128xf32> -> vector<64x128xf32>
    %177 = arith.addf %169, %176 : vector<64x128xf32>
    %c7_i32_112 = arith.constant 7 : i32
    %178 = tpu.dynamic_rotate %162 by %c7_i32_112 dim 0 : vector<64x64xf32>, i32 -> vector<64x64xf32>
    %179 = vector.broadcast %5 : vector<64x1xf32> to vector<64x64xf32>
    %180 = arith.mulf %178, %179 : vector<64x64xf32>
    %181 = arith.truncf %180 : vector<64x64xf32> to vector<64x64xbf16>
    %c2_113 = arith.constant 2 : index
    %c0_114 = arith.constant 0 : index
    %c0_115 = arith.constant 0 : index
    %182 = vector.load %arg7[%c2_113, %c0_114, %c0_115] : memref<9x64x128xbf16, #tpu.memory_space<vmem>>, vector<1x64x128xbf16>
    %183 = vector.shape_cast %182 : vector<1x64x128xbf16> to vector<64x128xbf16>
    %cst_116 = arith.constant dense<0.000000e+00> : vector<64x128xf32>
    %184 = tpu.matmul %181, %183, %cst_116 {dimension_numbers = #tpu.dot_dimension_numbers<[1], [0], [0], [1], [0, 0, 1, 1], [], []>} : vector<64x64xbf16>, vector<64x128xbf16>, vector<64x128xf32> -> vector<64x128xf32>
    %185 = arith.addf %177, %184 : vector<64x128xf32>
    %c1_i32_117 = arith.constant 1 : i32
    %186 = tpu.dynamic_rotate %162 by %c1_i32_117 dim 0 : vector<64x64xf32>, i32 -> vector<64x64xf32>
    %187 = vector.broadcast %7 : vector<64x1xf32> to vector<64x64xf32>
    %188 = arith.mulf %186, %187 : vector<64x64xf32>
    %189 = arith.truncf %188 : vector<64x64xf32> to vector<64x64xbf16>
    %c3_118 = arith.constant 3 : index
    %c0_119 = arith.constant 0 : index
    %c0_120 = arith.constant 0 : index
    %190 = vector.load %arg7[%c3_118, %c0_119, %c0_120] : memref<9x64x128xbf16, #tpu.memory_space<vmem>>, vector<1x64x128xbf16>
    %191 = vector.shape_cast %190 : vector<1x64x128xbf16> to vector<64x128xbf16>
    %cst_121 = arith.constant dense<0.000000e+00> : vector<64x128xf32>
    %192 = tpu.matmul %189, %191, %cst_121 {dimension_numbers = #tpu.dot_dimension_numbers<[1], [0], [0], [1], [0, 0, 1, 1], [], []>} : vector<64x64xbf16>, vector<64x128xbf16>, vector<64x128xf32> -> vector<64x128xf32>
    %193 = arith.addf %185, %192 : vector<64x128xf32>
    %194 = arith.truncf %162 : vector<64x64xf32> to vector<64x64xbf16>
    %c4_122 = arith.constant 4 : index
    %c0_123 = arith.constant 0 : index
    %c0_124 = arith.constant 0 : index
    %195 = vector.load %arg7[%c4_122, %c0_123, %c0_124] : memref<9x64x128xbf16, #tpu.memory_space<vmem>>, vector<1x64x128xbf16>
    %196 = vector.shape_cast %195 : vector<1x64x128xbf16> to vector<64x128xbf16>
    %cst_125 = arith.constant dense<0.000000e+00> : vector<64x128xf32>
    %197 = tpu.matmul %194, %196, %cst_125 {dimension_numbers = #tpu.dot_dimension_numbers<[1], [0], [0], [1], [0, 0, 1, 1], [], []>} : vector<64x64xbf16>, vector<64x128xbf16>, vector<64x128xf32> -> vector<64x128xf32>
    %198 = arith.addf %193, %197 : vector<64x128xf32>
    %c63_i32_126 = arith.constant 63 : i32
    %199 = tpu.dynamic_rotate %162 by %c63_i32_126 dim 0 : vector<64x64xf32>, i32 -> vector<64x64xf32>
    %200 = vector.broadcast %9 : vector<64x1xf32> to vector<64x64xf32>
    %201 = arith.mulf %199, %200 : vector<64x64xf32>
    %202 = arith.truncf %201 : vector<64x64xf32> to vector<64x64xbf16>
    %c5_127 = arith.constant 5 : index
    %c0_128 = arith.constant 0 : index
    %c0_129 = arith.constant 0 : index
    %203 = vector.load %arg7[%c5_127, %c0_128, %c0_129] : memref<9x64x128xbf16, #tpu.memory_space<vmem>>, vector<1x64x128xbf16>
    %204 = vector.shape_cast %203 : vector<1x64x128xbf16> to vector<64x128xbf16>
    %cst_130 = arith.constant dense<0.000000e+00> : vector<64x128xf32>
    %205 = tpu.matmul %202, %204, %cst_130 {dimension_numbers = #tpu.dot_dimension_numbers<[1], [0], [0], [1], [0, 0, 1, 1], [], []>} : vector<64x64xbf16>, vector<64x128xbf16>, vector<64x128xf32> -> vector<64x128xf32>
    %206 = arith.addf %198, %205 : vector<64x128xf32>
    %c57_i32_131 = arith.constant 57 : i32
    %207 = tpu.dynamic_rotate %162 by %c57_i32_131 dim 0 : vector<64x64xf32>, i32 -> vector<64x64xf32>
    %208 = vector.broadcast %11 : vector<64x1xf32> to vector<64x64xf32>
    %209 = arith.mulf %207, %208 : vector<64x64xf32>
    %210 = arith.truncf %209 : vector<64x64xf32> to vector<64x64xbf16>
    %c6_132 = arith.constant 6 : index
    %c0_133 = arith.constant 0 : index
    %c0_134 = arith.constant 0 : index
    %211 = vector.load %arg7[%c6_132, %c0_133, %c0_134] : memref<9x64x128xbf16, #tpu.memory_space<vmem>>, vector<1x64x128xbf16>
    %212 = vector.shape_cast %211 : vector<1x64x128xbf16> to vector<64x128xbf16>
    %cst_135 = arith.constant dense<0.000000e+00> : vector<64x128xf32>
    %213 = tpu.matmul %210, %212, %cst_135 {dimension_numbers = #tpu.dot_dimension_numbers<[1], [0], [0], [1], [0, 0, 1, 1], [], []>} : vector<64x64xbf16>, vector<64x128xbf16>, vector<64x128xf32> -> vector<64x128xf32>
    %214 = arith.addf %206, %213 : vector<64x128xf32>
    %c56_i32_136 = arith.constant 56 : i32
    %215 = tpu.dynamic_rotate %162 by %c56_i32_136 dim 0 : vector<64x64xf32>, i32 -> vector<64x64xf32>
    %216 = vector.broadcast %13 : vector<64x1xf32> to vector<64x64xf32>
    %217 = arith.mulf %215, %216 : vector<64x64xf32>
    %218 = arith.truncf %217 : vector<64x64xf32> to vector<64x64xbf16>
    %c7_137 = arith.constant 7 : index
    %c0_138 = arith.constant 0 : index
    %c0_139 = arith.constant 0 : index
    %219 = vector.load %arg7[%c7_137, %c0_138, %c0_139] : memref<9x64x128xbf16, #tpu.memory_space<vmem>>, vector<1x64x128xbf16>
    %220 = vector.shape_cast %219 : vector<1x64x128xbf16> to vector<64x128xbf16>
    %cst_140 = arith.constant dense<0.000000e+00> : vector<64x128xf32>
    %221 = tpu.matmul %218, %220, %cst_140 {dimension_numbers = #tpu.dot_dimension_numbers<[1], [0], [0], [1], [0, 0, 1, 1], [], []>} : vector<64x64xbf16>, vector<64x128xbf16>, vector<64x128xf32> -> vector<64x128xf32>
    %222 = arith.addf %214, %221 : vector<64x128xf32>
    %c55_i32_141 = arith.constant 55 : i32
    %223 = tpu.dynamic_rotate %162 by %c55_i32_141 dim 0 : vector<64x64xf32>, i32 -> vector<64x64xf32>
    %224 = vector.broadcast %15 : vector<64x1xf32> to vector<64x64xf32>
    %225 = arith.mulf %223, %224 : vector<64x64xf32>
    %226 = arith.truncf %225 : vector<64x64xf32> to vector<64x64xbf16>
    %c8_142 = arith.constant 8 : index
    %c0_143 = arith.constant 0 : index
    %c0_144 = arith.constant 0 : index
    %227 = vector.load %arg7[%c8_142, %c0_143, %c0_144] : memref<9x64x128xbf16, #tpu.memory_space<vmem>>, vector<1x64x128xbf16>
    %228 = vector.shape_cast %227 : vector<1x64x128xbf16> to vector<64x128xbf16>
    %cst_145 = arith.constant dense<0.000000e+00> : vector<64x128xf32>
    %229 = tpu.matmul %226, %228, %cst_145 {dimension_numbers = #tpu.dot_dimension_numbers<[1], [0], [0], [1], [0, 0, 1, 1], [], []>} : vector<64x64xbf16>, vector<64x128xbf16>, vector<64x128xf32> -> vector<64x128xf32>
    %230 = arith.addf %222, %229 : vector<64x128xf32>
    %c0_146 = arith.constant 0 : index
    %c0_147 = arith.constant 0 : index
    %231 = vector.load %arg8[%c0_146, %c0_147] : memref<1x128xf32, #tpu.memory_space<vmem>>, vector<1x128xf32>
    %232 = vector.broadcast %231 : vector<1x128xf32> to vector<64x128xf32>
    %233 = arith.addf %230, %232 : vector<64x128xf32>
    %cst_148 = arith.constant 0.000000e+00 : f32
    %234 = vector.broadcast %cst_148 : f32 to vector<64x128xf32>
    %235 = arith.maximumf %233, %234 : vector<64x128xf32>
    %236 = arith.truncf %235 : vector<64x128xf32> to vector<64x128xbf16>
    %c0_149 = arith.constant 0 : index
    %c0_150 = arith.constant 0 : index
    %237 = vector.load %arg9[%c0_149, %c0_150] : memref<64x128xbf16, #tpu.memory_space<vmem>>, vector<64x128xbf16>
    tpu.vector_store %arg9[%c0_149, %c0_150], %236 {strides = array<i32>} : memref<64x128xbf16, #tpu.memory_space<vmem>>, vector<64x128xbf16>,
    return
  }
  func.func @transform_0(%arg0: i32) -> (i32, i32, i32) {
    %c0_i32 = arith.constant 0 : i32
    %c0_i32_0 = arith.constant 0 : i32
    %c0_i32_1 = arith.constant 0 : i32
    %c0_i32_2 = arith.constant 0 : i32
    return %c0_i32, %c0_i32_0, %c0_i32_1 : i32, i32, i32
  }
  func.func @transform_1(%arg0: i32) -> (i32, i32) {
    %c0_i32 = arith.constant 0 : i32
    %c0_i32_0 = arith.constant 0 : i32
    return %arg0, %c0_i32 : i32, i32
  }
  func.func @transform_2(%arg0: i32) -> (i32, i32, i32) {
    %c0_i32 = arith.constant 0 : i32
    %c0_i32_0 = arith.constant 0 : i32
    %c0_i32_1 = arith.constant 0 : i32
    %c0_i32_2 = arith.constant 0 : i32
    return %c0_i32, %c0_i32_0, %c0_i32_1 : i32, i32, i32
  }
  func.func @transform_3(%arg0: i32) -> (i32, i32) {
    %c0_i32 = arith.constant 0 : i32
    %c0_i32_0 = arith.constant 0 : i32
    %c0_i32_1 = arith.constant 0 : i32
    return %c0_i32, %c0_i32_0 : i32, i32
  }
  func.func @transform_4(%arg0: i32) -> (i32, i32, i32) {
    %c0_i32 = arith.constant 0 : i32
    %c0_i32_0 = arith.constant 0 : i32
    %c0_i32_1 = arith.constant 0 : i32
    %c0_i32_2 = arith.constant 0 : i32
    return %c0_i32, %c0_i32_0, %c0_i32_1 : i32, i32, i32
  }
  func.func @transform_5(%arg0: i32) -> (i32, i32) {
    %c0_i32 = arith.constant 0 : i32
    %c0_i32_0 = arith.constant 0 : i32
    %c0_i32_1 = arith.constant 0 : i32
    return %c0_i32, %c0_i32_0 : i32, i32
  }
  func.func @transform_6(%arg0: i32) -> (i32, i32, i32) {
    %c0_i32 = arith.constant 0 : i32
    %c0_i32_0 = arith.constant 0 : i32
    %c0_i32_1 = arith.constant 0 : i32
    %c0_i32_2 = arith.constant 0 : i32
    return %c0_i32, %c0_i32_0, %c0_i32_1 : i32, i32, i32
  }
  func.func @transform_7(%arg0: i32) -> (i32, i32) {
    %c0_i32 = arith.constant 0 : i32
    %c0_i32_0 = arith.constant 0 : i32
    %c0_i32_1 = arith.constant 0 : i32
    return %c0_i32, %c0_i32_0 : i32, i32
  }
  func.func @transform_8(%arg0: i32) -> (i32, i32) {
    %c0_i32 = arith.constant 0 : i32
    %c0_i32_0 = arith.constant 0 : i32
    return %arg0, %c0_i32 : i32, i32
  }
}

module attributes {stable_mosaic.version = 11 : i64} {
  func.func @_dense_head_kernel(%arg0: i32, %arg1: memref<2x4096xbf16, #tpu.memory_space<vmem>>, %arg2: memref<4096x512xbf16, #tpu.memory_space<vmem>>, %arg3: memref<1x512xf32, #tpu.memory_space<vmem>>, %arg4: memref<512x128xbf16, #tpu.memory_space<vmem>>, %arg5: memref<1x128xf32, #tpu.memory_space<vmem>>, %arg6: memref<2x6xf32, #tpu.memory_space<vmem>>, %arg7: memref<2x512xf32, #tpu.memory_space<vmem>>) attributes {dimension_semantics = [#tpu.dimension_semantics<arbitrary>], iteration_bounds = array<i64: 2>, scalar_prefetch = 0 : i64, scratch_operands = 1 : i64, tpu.core_type = #tpu.core_type<tc>, window_params = [{transform_indices = @transform_0, window_bounds = array<i64: 2, 4096>}, {transform_indices = @transform_1, window_bounds = array<i64: 4096, 512>}, {pipeline_mode = #tpu.pipeline_mode<synchronous>, transform_indices = @transform_2, window_bounds = array<i64: 1, 512>}, {pipeline_mode = #tpu.pipeline_mode<synchronous>, transform_indices = @transform_3, window_bounds = array<i64: 512, 128>}, {pipeline_mode = #tpu.pipeline_mode<synchronous>, transform_indices = @transform_4, window_bounds = array<i64: 1, 128>}, {pipeline_mode = #tpu.pipeline_mode<synchronous>, transform_indices = @transform_5, window_bounds = array<i64: 2, 6>}]} {
    %c0_i32 = arith.constant 0 : i32
    %0 = arith.cmpi eq, %arg0, %c0_i32 : i32
    %1 = arith.extui %0 : i1 to i32
    %c0_i32_0 = arith.constant 0 : i32
    %2 = arith.cmpi ne, %1, %c0_i32_0 : i32
    scf.if %2 {
      %cst_9 = arith.constant 0.000000e+00 : f32
      %12 = vector.broadcast %cst_9 : f32 to vector<2x512xf32>
      %c0_10 = arith.constant 0 : index
      %c0_11 = arith.constant 0 : index
      %13 = vector.load %arg7[%c0_10, %c0_11] : memref<2x512xf32, #tpu.memory_space<vmem>>, vector<2x512xf32>
      tpu.vector_store %arg7[%c0_10, %c0_11], %12 {strides = array<i32>} : memref<2x512xf32, #tpu.memory_space<vmem>>, vector<2x512xf32>,
    } else {
    }
    %c0 = arith.constant 0 : index
    %c0_1 = arith.constant 0 : index
    %3 = vector.load %arg7[%c0, %c0_1] : memref<2x512xf32, #tpu.memory_space<vmem>>, vector<2x512xf32>
    %c0_2 = arith.constant 0 : index
    %c0_3 = arith.constant 0 : index
    %4 = vector.load %arg1[%c0_2, %c0_3] : memref<2x4096xbf16, #tpu.memory_space<vmem>>, vector<2x4096xbf16>
    %c0_4 = arith.constant 0 : index
    %c0_5 = arith.constant 0 : index
    %5 = vector.load %arg2[%c0_4, %c0_5] : memref<4096x512xbf16, #tpu.memory_space<vmem>>, vector<4096x512xbf16>
    %cst = arith.constant dense<0.000000e+00> : vector<2x512xf32>
    %6 = tpu.matmul %4, %5, %cst {dimension_numbers = #tpu.dot_dimension_numbers<[1], [0], [0], [1], [0, 0, 1, 1], [], []>} : vector<2x4096xbf16>, vector<4096x512xbf16>, vector<2x512xf32> -> vector<2x512xf32>
    %7 = arith.addf %3, %6 : vector<2x512xf32>
    %c0_6 = arith.constant 0 : index
    %c0_7 = arith.constant 0 : index
    %8 = vector.load %arg7[%c0_6, %c0_7] : memref<2x512xf32, #tpu.memory_space<vmem>>, vector<2x512xf32>
    tpu.vector_store %arg7[%c0_6, %c0_7], %7 {strides = array<i32>} : memref<2x512xf32, #tpu.memory_space<vmem>>, vector<2x512xf32>,
    %c1_i32 = arith.constant 1 : i32
    %9 = arith.cmpi eq, %arg0, %c1_i32 : i32
    %10 = arith.extui %9 : i1 to i32
    %c0_i32_8 = arith.constant 0 : i32
    %11 = arith.cmpi ne, %10, %c0_i32_8 : i32
    scf.if %11 {
      %c0_9 = arith.constant 0 : index
      %c0_10 = arith.constant 0 : index
      %12 = vector.load %arg7[%c0_9, %c0_10] : memref<2x512xf32, #tpu.memory_space<vmem>>, vector<2x512xf32>
      %c0_11 = arith.constant 0 : index
      %c0_12 = arith.constant 0 : index
      %13 = vector.load %arg3[%c0_11, %c0_12] : memref<1x512xf32, #tpu.memory_space<vmem>>, vector<1x512xf32>
      %14 = vector.broadcast %13 : vector<1x512xf32> to vector<2x512xf32>
      %15 = arith.addf %12, %14 : vector<2x512xf32>
      %cst_13 = arith.constant 0.000000e+00 : f32
      %16 = vector.broadcast %cst_13 : f32 to vector<2x512xf32>
      %17 = arith.maximumf %15, %16 : vector<2x512xf32>
      %18 = arith.truncf %17 : vector<2x512xf32> to vector<2x512xbf16>
      %c0_14 = arith.constant 0 : index
      %c0_15 = arith.constant 0 : index
      %19 = vector.load %arg4[%c0_14, %c0_15] : memref<512x128xbf16, #tpu.memory_space<vmem>>, vector<512x128xbf16>
      %cst_16 = arith.constant dense<0.000000e+00> : vector<2x128xf32>
      %20 = tpu.matmul %18, %19, %cst_16 {dimension_numbers = #tpu.dot_dimension_numbers<[1], [0], [0], [1], [0, 0, 1, 1], [], []>} : vector<2x512xbf16>, vector<512x128xbf16>, vector<2x128xf32> -> vector<2x128xf32>
      %c0_17 = arith.constant 0 : index
      %c0_18 = arith.constant 0 : index
      %21 = vector.load %arg5[%c0_17, %c0_18] : memref<1x128xf32, #tpu.memory_space<vmem>>, vector<1x128xf32>
      %22 = vector.broadcast %21 : vector<1x128xf32> to vector<2x128xf32>
      %23 = arith.addf %20, %22 : vector<2x128xf32>
      %24 = vector.extract_strided_slice %23 {offsets = [0, 0], sizes = [2, 1], strides = [1, 1]} : vector<2x128xf32> to vector<2x1xf32>
      %25 = vector.extract_strided_slice %23 {offsets = [0, 1], sizes = [2, 6], strides = [1, 1]} : vector<2x128xf32> to vector<2x6xf32>
      %26 = vector.broadcast %24 : vector<2x1xf32> to vector<2x6xf32>
      %27 = arith.addf %26, %25 : vector<2x6xf32>
      %cst_19 = arith.constant dense<0.000000e+00> : vector<2xf32>
      %28 = vector.multi_reduction <add>, %25, %cst_19 [1] : vector<2x6xf32> to vector<2xf32>
      %29 = vector.shape_cast %28 : vector<2xf32> to vector<2x1xf32>
      %cst_20 = arith.constant 0.166666672 : f32
      %30 = vector.broadcast %cst_20 : f32 to vector<2x1xf32>
      %31 = arith.mulf %29, %30 : vector<2x1xf32>
      %32 = vector.broadcast %31 : vector<2x1xf32> to vector<2x6xf32>
      %33 = arith.subf %27, %32 : vector<2x6xf32>
      %c0_21 = arith.constant 0 : index
      %c0_22 = arith.constant 0 : index
      %34 = vector.load %arg6[%c0_21, %c0_22] : memref<2x6xf32, #tpu.memory_space<vmem>>, vector<2x6xf32>
      tpu.vector_store %arg6[%c0_21, %c0_22], %33 {strides = array<i32>} : memref<2x6xf32, #tpu.memory_space<vmem>>, vector<2x6xf32>,
    } else {
    }
    return
  }
  func.func @transform_0(%arg0: i32) -> (i32, i32) {
    %c0_i32 = arith.constant 0 : i32
    %c0_i32_0 = arith.constant 0 : i32
    return %c0_i32, %arg0 : i32, i32
  }
  func.func @transform_1(%arg0: i32) -> (i32, i32) {
    %c0_i32 = arith.constant 0 : i32
    %c0_i32_0 = arith.constant 0 : i32
    return %arg0, %c0_i32 : i32, i32
  }
  func.func @transform_2(%arg0: i32) -> (i32, i32) {
    %c0_i32 = arith.constant 0 : i32
    %c0_i32_0 = arith.constant 0 : i32
    %c0_i32_1 = arith.constant 0 : i32
    return %c0_i32, %c0_i32_0 : i32, i32
  }
  func.func @transform_3(%arg0: i32) -> (i32, i32) {
    %c0_i32 = arith.constant 0 : i32
    %c0_i32_0 = arith.constant 0 : i32
    %c0_i32_1 = arith.constant 0 : i32
    return %c0_i32, %c0_i32_0 : i32, i32
  }
  func.func @transform_4(%arg0: i32) -> (i32, i32) {
    %c0_i32 = arith.constant 0 : i32
    %c0_i32_0 = arith.constant 0 : i32
    %c0_i32_1 = arith.constant 0 : i32
    return %c0_i32, %c0_i32_0 : i32, i32
  }
  func.func @transform_5(%arg0: i32) -> (i32, i32) {
    %c0_i32 = arith.constant 0 : i32
    %c0_i32_0 = arith.constant 0 : i32
    %c0_i32_1 = arith.constant 0 : i32
    return %c0_i32, %c0_i32_0 : i32, i32
  }
}

</mosaic_0001>

<bundles_post_ra>
// kernel: dueling_cnn_forward.2
= control target key start
LH: loop header
LB: loop body
LE: loop exit
PB: predicated region body
PF: predicated region fallthrough
CT: control target
= control target key end

     0   :  { %13 = vsyncpa [#allocation3], 0  ;;  %s5751_s0 = inlined_call_operand.vmem [shape: f32[9,64,1], index: 0, kind: input, shape index: {}]   ;;  %s5752_s1 = inlined_call_operand.vmem [shape: f32[128,4], index: 1, kind: input, shape index: {}]   ;;  %s5753_s2 = inlined_call_operand.hbm [shape: bf16[9,4,32], index: 2, kind: input, shape index: {}]   ;;  %s5754_s3 = inlined_call_operand.hbm [shape: f32[1,32], index: 3, kind: input, shape index: {}]   ;;  %s5755_s4 = inlined_call_operand.hbm [shape: bf16[9,32,64], index: 4, kind: input, shape index: {}]   ;;  %s5756_s5 = inlined_call_operand.hbm [shape: f32[1,64], index: 5, kind: input, shape index: {}]   ;;  %s5757_s6 = inlined_call_operand.hbm [shape: bf16[9,64,128], index: 6, kind: input, shape index: {}]   ;;  %s5758_s7 = inlined_call_operand.hbm [shape: f32[1,128], index: 7, kind: input, shape index: {}]   ;;  %s5759_s8 = inlined_call_operand.vmem [shape: bf16[128,128], index: 8, kind: output, shape index: {}]  }
   0x1   :  { %14 = vsyncpa [#allocation5], 0 }
   0x2   :  { %15 = vsyncpa [#allocation8], 0 }
   0x3   :  { %16 = vsyncpa [#allocation11], 0  ;;  %s3989_s27 = smov 0  }
   0x4 LB: > { %s255_s30 = sshll.u32 %s5754_s3, 4  ;;  %s3166_s9 = sadd.s32 4294967295, %s3931_s27   ;;  %s3931_s27 = sphi %s3989_s27, %s22_s27   ;;  %s256_s30 = int_to_ptr.hbm [resolvable:$true] %s255_s30 }
   0x5   : > { %p3168_p0 = scmp.ge.s32.totalorder %s3931_s27, 1  ;;  %p226_p1 = scmp.lt.s32.totalorder %s3931_s27, 3 }
   0x6   : > { %p4002_p2 = scmp.eq.s32.totalorder %s3166_s9, 0  ;;  %s3933_s12 = smov [#allocation4]  }
   0x7   : > { %p4006_p3 = pnand %p3168_p0, %p226_p1  ;;  %s257_s13 = sshll.u32 %s3933_s12, 4  ;;  %s258_s13 = int_to_ptr.vmem [resolvable:$true] %s257_s13 }
   0x8   : > { %s281_s16 = sshll.u32 %s5756_s5, 4  ;;  %s240_s19 = sshll.u32 %s5753_s2, 4  ;;  %s282_s16 = int_to_ptr.hbm [resolvable:$true] %s281_s16  ;;  %s241_s19 = int_to_ptr.hbm [resolvable:$true] %s240_s19 }
   0x9   : > { %p3673_p4 = pneg %p4006_p3  ;;  %s3934_s21 = smov [#allocation7]  }
   0xa   : > { %s283_s22 = sshll.u32 %s3934_s21, 4  ;;  %s3935_s23 = smov [#allocation2]   ;;  %s284_s22 = int_to_ptr.vmem [resolvable:$true] %s283_s22 }
   0xb   : > { %p4020_p5 = pnand %p4002_p2, %p3673_p4  ;;  %s242_s24 = sshll.u32 %s3935_s23, 4  ;;  %s243_s24 = int_to_ptr.vmem [resolvable:$true] %s242_s24 }
   0xc   : > { %s3936_s25 = smov 32   ;;  %s3937_s26 = smov 2  }
   0xd   : > { %3679 = dma.hbm_to_vmem [thread:$0]  (!%p4020_p5), %s256_s30, 16, %s258_s13, [#allocation5]  }
   0xe   : > { %3685 = dma.hbm_to_vmem [thread:$0]  (!%p4020_p5), %s282_s16, 16, %s284_s22, [#allocation8]  }
   0xf   : > { %3676 = dma.hbm_to_vmem [thread:$0]  (!%p4020_p5), %s241_s19, 288, %s243_s24, [#allocation3], %s3936_s25, %s3936_s25, %s3937_s26  }
  0x10   : > { %s266_s12 = sshll.u32 %s5755_s4, 4  ;;  %s3938_s14 = smov [#allocation6]   ;;  %s267_s12 = int_to_ptr.hbm [resolvable:$true] %s266_s12 }
  0x11   : > { %s268_s15 = sshll.u32 %s3938_s14, 4  ;;  %s292_s16 = sshll.u32 %s5757_s6, 4  ;;  %s269_s15 = int_to_ptr.vmem [resolvable:$true] %s268_s15  ;;  %s293_s16 = int_to_ptr.hbm [resolvable:$true] %s292_s16 }
  0x12   : > { %s3939_s17 = smov 64   ;;  %s3940_s18 = smov 4  }
  0x13   : > { %3682 = dma.hbm_to_vmem [thread:$0]  (!%p4020_p5), %s267_s12, 2304, %s269_s15, [#allocation5], %s3939_s17, %s3939_s17, %s3940_s18  }
  0x14   : > { %s3941_s21 = smov [#allocation9]   ;;  %s307_s24 = sshll.u32 %s5758_s7, 4  ;;  %s308_s24 = int_to_ptr.hbm [resolvable:$true] %s307_s24 }
  0x15   : > { %s294_s19 = sshll.u32 %s3941_s21, 4  ;;  %s3942_s25 = smov [#allocation10]   ;;  %s295_s19 = int_to_ptr.vmem [resolvable:$true] %s294_s19 }
  0x16   : > { %3688 = dma.hbm_to_vmem [thread:$0]  (!%p4020_p5), %s293_s16, 4608, %s295_s19, [#allocation8], %s3939_s17, %s3939_s17, %s3940_s18  }
  0x17   : > { %s309_s26 = sshll.u32 %s3942_s25, 4  ;;  %331 = sbr.rel (%p4006_p3) target bundleno = 1122 (0x462), region = 52  ;;  %s310_s26 = int_to_ptr.vmem [resolvable:$true] %s309_s26 }
  0x18   : > { %3691 = dma.hbm_to_vmem [thread:$0]  (!%p4020_p5), %s308_s24, 16, %s310_s26, [#allocation11]  }
  0x1c   : > { %3914 = dma.done.wait (%p4002_p2), [#allocation3], 288  }
  0x1d   : > { %3916 = vsyncadd (%p4002_p2), [#allocation3], 4294967008 }
  0x1e   : > { %3918 = dma.done.wait (%p4002_p2), [#allocation5], 2320  }
  0x1f   : > { %3920 = vsyncadd (%p4002_p2), [#allocation5], 4294964976 }
  0x20   : > { %3922 = dma.done.wait (%p4002_p2), [#allocation8], 4624  }
  0x21   : > { %3924 = vsyncadd (%p4002_p2), [#allocation8], 4294962672 }
  0x22   : > { %3926 = dma.done.wait (%p4002_p2), [#allocation11], 16  }
  0x23   : > { %3928 = vsyncadd (%p4002_p2), [#allocation11], 4294967280  ;;  %v3943_v0 = vmov 0   ;;  %v3191_v1 = vld [vmem:[%s5751_s0 + $0x60] sm:$0xff]  ;;  %v3189_v2 = vld [vmem:[%s5751_s0 + $0x50] sm:$0xff]  ;;  %vm622_vm0 = vcmask 1041408  }
  0x24   : > { %3725 = vset.pattern.permute.xlu2 %v3943_v0  ;;  %3724 = vset.pattern.permute.xlu1 %v3943_v0  ;;  %v3187_v3 = vld [vmem:[%s5751_s0 + $0x40] sm:$0xff]  ;;  %v3192_v4 = vld [vmem:[%s5751_s0 + $0x68] sm:$0xff]  ;;  %v3190_v5 = vld [vmem:[%s5751_s0 + $0x58] sm:$0xff]  ;;  %s3183_s12 = sshll.u32 %s3166_s9, 3  ;;  %vm609_vm1 = vcmask 31744   ;;  %vm1491_vm4 = vcmask 261120  }
  0x25   : > { %3723 = vset.pattern.permute.xlu0 %v3943_v0  ;;  %577 = vperm.xlu2 %3725, %v3191_v1   ;;  %v3188_v6 = vld [vmem:[%s5751_s0 + $0x48] sm:$0xff]  ;;  %v3193_v7 = vld [vmem:[%s5751_s0 + $0x70] sm:$0xff]  ;;  %v404_v8 = vld [vmem:[%s5751_s0] sm:$0xff]  ;;  %p392_p6 = scmp.lt.s32.totalorder %s3183_s12, 15  ;;  %vm2241_vm5 = vcmask 523264  }
  0x26   : > { %567 = vperm.xlu0 %3723, %v3189_v2   ;;  %557 = vperm.xlu1 %3724, %v3187_v3   ;;  %v405_v9 = vld [vmem:[%s5751_s0 + $0x8] sm:$0xff]  ;;  %v3194_v11 = vld [vmem:[%s5751_s0 + $0x78] sm:$0xff]  ;;  %v3195_v12 = vld [vmem:[%s5751_s0 + $0x80] sm:$0xff] }
  0x27   : > { %v3196_v10 = vld [vmem:[%s5751_s0 + $0x88] sm:$0xff]  ;;  %v3197_v13 = vld [vmem:[%s5751_s0 + $0x90] sm:$0xff]  ;;  %v3203_v14 = vld [vmem:[%s5751_s0 + $0xc0] sm:$0xff]  ;;  %s6186_s12 = smov (!%p392_p6, %s3183_s12), 15 }
  0x28   : > { %v3204_v15 = vld [vmem:[%s5751_s0 + $0xc8] sm:$0xff]  ;;  %v3206_v16 = vld [vmem:[%s5751_s0 + $0xd8] sm:$0xff]  ;;  %v3205_v18 = vld [vmem:[%s5751_s0 + $0xd0] sm:$0xff]  ;;  %s3184_s16 = sshll.u32 %s6186_s12, 3  ;;  %s3186_s18 = sshll.u32 %s6186_s12, 2 }
  0x29   : > { %v3198_v17 = vld [vmem:[%s5751_s0 + $0x98] sm:$0xff]  ;;  %v3199_v19 = vld [vmem:[%s5751_s0 + $0xa0] sm:$0xff]  ;;  %v406_v20 = vld [vmem:[%s5751_s0 + $0x10] sm:$0xff]  ;;  %s4221_s21 = scalar_lea.vmem %s5752_s1, %s3184_s16  ;;  %s5725_s23 = scalar_lea.vmem %s5759_s8, %s3186_s18 }
  0x2a   : > { %v407_v21 = vld [vmem:[%s5751_s0 + $0x18] sm:$0xff]  ;;  %v3208_v22 = vld [vmem:[%s5751_s0 + $0xe8] sm:$0xff]  ;;  %v3207_v24 = vld [vmem:[%s5751_s0 + $0xe0] sm:$0xff] }
  0x2b   : > { %v3200_v23 = vld [vmem:[%s5751_s0 + $0xa8] sm:$0xff]  ;;  %v3201_v25 = vld [vmem:[%s5751_s0 + $0xb0] sm:$0xff]  ;;  %v408_v26 = vld [vmem:[%s5751_s0 + $0x20] sm:$0xff] }
  0x2c   : > { %v409_v27 = vld [vmem:[%s5751_s0 + $0x28] sm:$0xff]  ;;  %v3210_v28 = vld [vmem:[%s5751_s0 + $0xf8] sm:$0xff]  ;;  %v3209_v30 = vld [vmem:[%s5751_s0 + $0xf0] sm:$0xff] }
  0x2d   : > { %582 = vperm.xlu2 %3725, %v3192_v4   ;;  %v3202_v29 = vld [vmem:[%s5751_s0 + $0xb8] sm:$0xff]  ;;  %v3219_v31 = vld [vmem:[%s5751_s0 + $0x180] sm:$0xff]  ;;  %v410_v32 = vld [vmem:[%s5751_s0 + $0x30] sm:$0xff] }
  0x2e   : > { %572 = vperm.xlu0 %3723, %v3190_v5   ;;  %562 = vperm.xlu1 %3724, %v3188_v6   ;;  %v411_v33 = vld [vmem:[%s5751_s0 + $0x38] sm:$0xff]  ;;  %v3228_v34 = vld [vmem:[%s5751_s0 + $0x1c8] sm:$0xff]  ;;  %v3227_v36 = vld [vmem:[%s5751_s0 + $0x1c0] sm:$0xff] }
  0x2f   : > { %v3220_v35 = vld [vmem:[%s5751_s0 + $0x188] sm:$0xff]  ;;  %v608_v38 = vld [vmem:[#allocation2 + $0x2] sm:$0x3]  ;;  %v875_v43 = vld [vmem:[#allocation2 + $0x6] sm:$0x3] }
  0x30   : > { %v624_v39 = vsel %vm622_vm0, %v608_v38, 0  ;;  %v3235_v40 = vld [vmem:[%s5751_s0 + $0x200] sm:$0xff]  ;;  %v3212_v42 = vld [vmem:[%s5751_s0 + $0x148] sm:$0xff]  ;;  %v889_v44 = vsel %vm622_vm0, %v875_v43, 0  ;;  %v3222_v46 = vld [vmem:[%s5751_s0 + $0x198] sm:$0xff] }
  0x31   : > { %v3211_v41 = vld [vmem:[%s5751_s0 + $0x140] sm:$0xff]  ;;  %633 = vmatpush.bf16.msra.mxu0 %v624_v39  ;;  %3646 = vmatpush.bf16.msra.mxu3 %v624_v39  ;;  %v3236_v47 = vld [vmem:[%s5751_s0 + $0x208] sm:$0xff]  ;;  %v3221_v48 = vld [vmem:[%s5751_s0 + $0x190] sm:$0xff] }
  0x32   : > { %v554_v49 = vld [vmem:[#allocation2] sm:$0x3]  ;;  %v3213_v52 = vld [vmem:[%s5751_s0 + $0x150] sm:$0xff]  ;;  %v3230_v54 = vld [vmem:[%s5751_s0 + $0x1d8] sm:$0xff] }
  0x33   : > { %v668_v50 = vsel %vm622_vm0, %v554_v49, 0  ;;  %v3229_v53 = vld [vmem:[%s5751_s0 + $0x1d0] sm:$0xff]  ;;  %v3238_v58 = vld [vmem:[%s5751_s0 + $0x218] sm:$0xff]  ;;  %v769_v61 = vld [vmem:[#allocation2 + $0x4] sm:$0x3] }
  0x34   : > { %3647 = vmatpush.bf16.msra.mxu1 %v668_v50  ;;  %v3214_v59 = vld [vmem:[%s5751_s0 + $0x158] sm:$0xff]  ;;  %v3237_v60 = vld [vmem:[%s5751_s0 + $0x210] sm:$0xff]  ;;  %v783_v63 = vsel %vm622_vm0, %v769_v61, 0  ;;  %v4237_v0 = vld [vmem:[%s4221_s21 + $0x8] sm:$0xff] }
  0x35   : > { %587 = vperm.xlu2 %3725, %v3193_v7   ;;  %898 = vmatpush.bf16.msrb.mxu3 %v889_v44  ;;  %v4233_v62 = vld [vmem:[%s4221_s21 + $0x38] sm:$0xff]  ;;  %v4240_v1 = vld [vmem:[%s4221_s21 + $0x10] sm:$0xff]  ;;  %v4243_v2 = vld [vmem:[%s4221_s21] sm:$0xff] }
  0x36   : > { %504 = vperm.xlu0 %3723, %v404_v8   ;;  %509 = vperm.xlu1 %3724, %v405_v9   ;;  %v491_v9 = vlaneseq  ;;  %v933_v39 = vld [vmem:[#allocation2 + $0x8] sm:$0x3]  ;;  %v3239_v44 = vld [vmem:[%s5751_s0 + $0x220] sm:$0xff] }
  0x37   : > { %677 = vmatpush.bf16.msrb.mxu0 %v668_v50  ;;  %3648 = vmatpush.bf16.msra.mxu2 %v783_v63  ;;  %v3240_v43 = vld [vmem:[%s5751_s0 + $0x228] sm:$0xff]  ;;  %v706_v50 = vrot.slane %v4233_v62, 1 }
  0x3d   : > { %723 = vperm.xlu2 %3725, %v3196_v10  }
  0x3e   : > { %592 = vperm.xlu0 %3723, %v3194_v11   ;;  %718 = vperm.xlu1 %3724, %v3195_v12   ;;  %v3231_v12 = vld [vmem:[%s5751_s0 + $0x1e0] sm:$0xff] }
  0x45   : > { %728 = vperm.xlu2 %3725, %v3197_v13  }
  0x46   : > { %824 = vperm.xlu0 %3723, %v3203_v14   ;;  %829 = vperm.xlu1 %3724, %v3204_v15   ;;  %v3224_v14 = vld [vmem:[%s5751_s0 + $0x1a8] sm:$0xff]  ;;  %v3223_v15 = vld [vmem:[%s5751_s0 + $0x1a0] sm:$0xff] }
  0x4d   : > { %839 = vperm.xlu2 %3725, %v3206_v16   ;;  %v4269_v16 = vshrl.u32 %v491_v9, 7 }
  0x4e   : > { %733 = vperm.xlu0 %3723, %v3198_v17   ;;  %834 = vperm.xlu1 %3724, %v3205_v18   ;;  %v4273_v17 = vld [vmem:[%s4221_s21 + $0x30] sm:$0xff] }
  0x4f   : > { %5920 = vst [vmem:[#allocation25_spill] sm:$0xff] %v4269_v16  ;;  %vm493_vm2 = vcmp.lt.s32.totalorder %v4269_v16, 1  ;;  %vm707_vm3 = vcmp.lt.s32.totalorder %v4269_v16, 7 }
  0x55   : > { %738 = vperm.xlu2 %3725, %v3199_v19  }
  0x56   : > { %514 = vperm.xlu0 %3723, %v406_v20   ;;  %519 = vperm.xlu1 %3724, %v407_v21   ;;  %v483_v20 = vrot.slane %v4243_v2, 7  ;;  %v490_v21 = vrot.slane %v4233_v62, 7 }
  0x5d   : > { %849 = vperm.xlu2 %3725, %v3208_v22  }
  0x5e   : > { %743 = vperm.xlu0 %3723, %v3200_v23   ;;  %844 = vperm.xlu1 %3724, %v3207_v24   ;;  %v5760_v23 = vrot.slane %v4273_v17, 7  ;;  %v3216_v24 = vld [vmem:[%s5751_s0 + $0x168] sm:$0xff] }
  0x65   : > { %748 = vperm.xlu2 %3725, %v3201_v25   ;;  %v4289_v25 = vld [vmem:[%s4221_s21 + $0x20] sm:$0xff] }
  0x66   : > { %524 = vperm.xlu0 %3723, %v408_v26   ;;  %529 = vperm.xlu1 %3724, %v409_v27   ;;  %v3215_v26 = vld [vmem:[%s5751_s0 + $0x160] sm:$0xff]  ;;  %v3232_v27 = vld [vmem:[%s5751_s0 + $0x1e8] sm:$0xff] }
  0x6d   : > { %859 = vperm.xlu2 %3725, %v3210_v28   ;;  %v4301_v28 = vsel %vm493_vm2, %v490_v21, %v483_v20 }
  0x6e   : > { %753 = vperm.xlu0 %3723, %v3202_v29   ;;  %854 = vperm.xlu1 %3724, %v3209_v30   ;;  %v4307_v29 = vsel %vm493_vm2, %v5760_v23, %v490_v21  ;;  %v4310_v30 = vld [vmem:[%s4221_s21 + $0x18] sm:$0xff] }
  0x6f   : > { %v702_v61 = vrot.slane %v4310_v30, 1 }
  0x75   : > { %1094 = vperm.xlu2 %3725, %v3219_v31  }
  0x76   : > { %534 = vperm.xlu0 %3723, %v410_v32   ;;  %539 = vperm.xlu1 %3724, %v411_v33  }
  0x7d   : > { %1205 = vperm.xlu2 %3725, %v3228_v34  }
  0x7e   : > { %1099 = vperm.xlu0 %3723, %v3220_v35   ;;  %1200 = vperm.xlu1 %3724, %v3227_v36  }
  0x7f   : > { %v4171_v37 = vpop.permute.xlu2 %577 }
  0x80   : > { %5911 = vst [vmem:[#allocation16_spill] sm:$0xff] %v4171_v37  ;;  %v599_v31 = vmul.f32 %v4171_v37, %v4310_v30 }
  0x85   : > { %1306 = vperm.xlu2 %3725, %v3235_v40  }
  0x86   : > { %988 = vperm.xlu0 %3723, %v3211_v41   ;;  %993 = vperm.xlu1 %3724, %v3212_v42   ;;  %v3225_v41 = vld [vmem:[%s5751_s0 + $0x1b0] sm:$0xff] }
  0x87   : > { %v4184_v45 = vpop.permute.xlu2 %582 }
  0x88   : > { %5912 = vst [vmem:[#allocation17_spill] sm:$0xff] %v4184_v45  ;;  %v600_v32 = vmul.f32 %v4184_v45, %v4289_v25 }
  0x8a   : > { %v605_v40 = vpack.c.bf16 %v600_v32, %v599_v31  ;;  %v1357_v31 = vld [vmem:[#allocation2 + $0x10] sm:$0x3]  ;;  %v1145_v32 = vld [vmem:[#allocation2 + $0xc] sm:$0x3] }
  0x8d   : > { %1109 = vperm.xlu2 %3725, %v3222_v46   ;;  %v947_v46 = vsel %vm622_vm0, %v933_v39, 0  ;;  %v3241_v39 = vld [vmem:[%s5751_s0 + $0x230] sm:$0xff] }
  0x8e   : > { %1311 = vperm.xlu0 %3723, %v3236_v47   ;;  %1104 = vperm.xlu1 %3724, %v3221_v48   ;;  %v1251_v47 = vld [vmem:[#allocation2 + $0xe] sm:$0x3] }
  0x8f   : > { %v4198_v51 = vpop.permute.xlu2 %587  ;;  %v1265_v48 = vsel %vm622_vm0, %v1251_v47, 0  ;;  %v1371_v47 = vsel %vm622_vm0, %v1357_v31, 0 }
  0x90   : > { %5913 = vst [vmem:[#allocation18_spill] sm:$0xff] %v4198_v51 }
  0x95   : > { %998 = vperm.xlu2 %3725, %v3213_v52  }
  0x96   : > { %1210 = vperm.xlu0 %3723, %v3229_v53   ;;  %1215 = vperm.xlu1 %3724, %v3230_v54   ;;  %v700_v53 = vrot.slane %v4237_v0, 1  ;;  %v701_v54 = vrot.slane %v4240_v1, 1 }
  0x97   : > { %v4212_v55 = vpop.permute.xlu2 %723 }
  0x98   : > { %5914 = vst [vmem:[#allocation19_spill] sm:$0xff] %v4212_v55  ;;  %v4214_v56 = vpop.permute.xlu0 %567  ;;  %v4216_v57 = vpop.permute.xlu1 %557  ;;  %v4371_v9 = vsel %vm707_vm3, %v700_v53, %v701_v54 }
  0x99   : > { %5915 = vst [vmem:[#allocation20_spill] sm:$0xff] %v4214_v56  ;;  %v595_v3 = vmul.f32 %v4216_v57, %v4233_v62  ;;  %v597_v6 = vmul.f32 %v4214_v56, %v4237_v0 }
  0x9a   : > { %5916 = vst [vmem:[#allocation21_spill] sm:$0xff] %v4216_v57 }
  0x9d   : > { %1321 = vperm.xlu2 %3725, %v3238_v58   ;;  %v699_v58 = vrot.slane %v4243_v2, 1 }
  0x9e   : > { %1003 = vperm.xlu0 %3723, %v3214_v59   ;;  %1316 = vperm.xlu1 %3724, %v3237_v60   ;;  %v3234_v60 = vld [vmem:[%s5751_s0 + $0x1f8] sm:$0xff] }
  0x9f   : > { %v4247_v4 = vpop.permute.xlu2 %728 }
  0xa0   : > { %5917 = vst [vmem:[#allocation22_spill] sm:$0xff] %v4247_v4  ;;  %v4249_v5 = vpop.permute.xlu0 %572  ;;  %v4255_v8 = vpop.permute.xlu1 %562  ;;  %v758_v21 = vmul.f32 %v4247_v4, %v4371_v9 }
  0xa1   : > { %5918 = vst [vmem:[#allocation23_spill] sm:$0xff] %v4249_v5  ;;  %v598_v7 = vmul.f32 %v4249_v5, %v4240_v1  ;;  %v596_v10 = vmul.f32 %v4255_v8, %v4243_v2 }
  0xa2   : > { %5919 = vst [vmem:[#allocation24_spill] sm:$0xff] %v4255_v8 }
  0xa3   : > { %v604_v11 = vpack.c.bf16 %v598_v7, %v597_v6  ;;  %v603_v13 = vpack.c.bf16 %v596_v10, %v595_v3  ;;  %v3226_v3 = vld [vmem:[%s5751_s0 + $0x1b8] sm:$0xff]  ;;  %v4364_v6 = vsel %vm707_vm3, %v706_v50, %v699_v58  ;;  %v4367_v7 = vld [vmem:[%s4221_s21 + $0x28] sm:$0xff]  ;;  %v4375_v10 = vsel %vm707_vm3, %v701_v54, %v702_v61 }
  0xa4   : > { %v488_v23 = vrot.slane %v4367_v7, 7 }
  0xa5   : > { %3244 = vmatmul.msk.bf16.vlgmr.msra.gmra.mxu3 %vm609_vm1, %v604_v11  ;;  %3243 = vmatmul.msk.bf16.vlgmr.msra.gmra.mxu0 %vm609_vm1, %v603_v13  ;;  %v4379_v11 = vsel %vm707_vm3, %v699_v58, %v700_v53  ;;  %v485_v53 = vrot.slane %v4240_v1, 7 }
  0xa6   : > { %1220 = vperm.xlu2 %3725, %v3231_v12   ;;  %1119 = vperm.xlu1 %3724, %v3224_v14  }
  0xa7   : > { %1114 = vperm.xlu0 %3723, %v3223_v15   ;;  %v4275_v18 = vpop.permute.xlu2 %839  ;;  %792 = vmatpush.bf16.msra.mxu0 %v783_v63  ;;  %v3233_v63 = vld [vmem:[%s5751_s0 + $0x1f0] sm:$0xff]  ;;  %v601_v15 = vmul.f32 %v4198_v51, %v4367_v7 }
  0xa8   : > { %5921 = vst [vmem:[#allocation26_spill] sm:$0xff] %v4275_v18  ;;  %v4277_v19 = vpop.permute.xlu0 %504  ;;  %v4281_v22 = vpop.permute.xlu1 %509  ;;  %1274 = vmatpush.bf16.msra.mxu3 %v1265_v48  ;;  %v1039_v48 = vld [vmem:[#allocation2 + $0xa] sm:$0x3] }
  0xa9   : > { %5922 = vst [vmem:[#allocation27_spill] sm:$0xff] %v4277_v19  ;;  %v543_v33 = vmul.f32 %v4281_v22, %v4301_v28  ;;  %v542_v34 = vmul.f32 %v4277_v19, %v4307_v29  ;;  %v1053_v54 = vsel %vm622_vm0, %v1039_v48, 0  ;;  %v487_v48 = vrot.slane %v4289_v25, 7 }
  0xaa   : > { %5923 = vst [vmem:[#allocation28_spill] sm:$0xff] %v4281_v22  ;;  %1062 = vmatpush.bf16.msrb.mxu1 %v1053_v54 }
  0xab   : > { %v550_v42 = vpack.c.bf16 %v543_v33, %v542_v34 }
  0xae   : > { %1013 = vperm.xlu2 %3725, %v3216_v24   ;;  %1008 = vperm.xlu1 %3724, %v3215_v26  }
  0xaf   : > { %1225 = vperm.xlu0 %3723, %v3232_v27   ;;  %v4322_v36 = vpop.permute.xlu2 %738  ;;  %v757_v27 = vmul.f32 %v4212_v55, %v4379_v11 }
  0xb0   : > { %v4320_v35 = vpop.permute.xlu0 %592  ;;  %5925 = vst [vmem:[#allocation30_spill] sm:$0xff] %v4322_v36  ;;  %v4324_v38 = vpop.permute.xlu1 %718 }
  0xb1   : > { %5924 = vst [vmem:[#allocation29_spill] sm:$0xff] %v4320_v35  ;;  %v602_v12 = vmul.f32 %v4320_v35, %v4273_v17  ;;  %v756_v13 = vmul.f32 %v4324_v38, %v4364_v6 }
  0xb2   : > { %5926 = vst [vmem:[#allocation31_spill] sm:$0xff] %v4324_v38 }
  0xb3   : > { %v606_v33 = vpack.c.bf16 %v602_v12, %v601_v15 }
  0xb5   : > { %3245 = vmatmul.msk.bf16.gmra.mxu3 %vm609_vm1, %v605_v40  ;;  %3247 = vmatmul.msk.bf16.vlgmr.msrb.gmra.mxu0 %vm609_vm1, %v550_v42  ;;  %v1159_v40 = vsel %vm622_vm0, %v1145_v32, 0  ;;  %v484_v42 = vrot.slane %v4237_v0, 7 }
  0xb6   : > { %1124 = vperm.xlu2 %3725, %v3225_v41   ;;  %1331 = vperm.xlu1 %3724, %v3240_v43   ;;  %v764_v41 = vpack.c.bf16 %v757_v27, %v756_v13  ;;  %v3218_v43 = vld [vmem:[%s5751_s0 + $0x178] sm:$0xff]  ;;  %v703_v13 = vrot.slane %v4289_v25, 1 }
  0xb7   : > { %1326 = vperm.xlu0 %3723, %v3239_v44   ;;  %956 = vmatpush.bf16.msrb.mxu0 %v947_v46  ;;  %v4348_v59 = vpop.permute.xlu2 %849  ;;  %v3217_v44 = vld [vmem:[%s5751_s0 + $0x170] sm:$0xff]  ;;  %v4420_v58 = vsel %vm493_vm2, %v483_v20, %v484_v42  ;;  %v704_v20 = vrot.slane %v4367_v7, 1 }
  0xb8   : > { %v4339_v49 = vpop.permute.xlu0 %824  ;;  %v4342_v52 = vpop.permute.xlu1 %829  ;;  %5929 = vst [vmem:[#allocation34_spill] sm:$0xff] %v4348_v59  ;;  %1168 = vmatpush.bf16.msrb.mxu2 %v1159_v40  ;;  %v4441_v27 = vsel %vm707_vm3, %v702_v61, %v703_v13 }
  0xb9   : > { %5927 = vst [vmem:[#allocation32_spill] sm:$0xff] %v4339_v49  ;;  %v4446_v31 = vsel %vm707_vm3, %v703_v13, %v704_v20  ;;  %v863_v32 = vmul.f32 %v4342_v52, %v4420_v58  ;;  %v760_v61 = vmul.f32 %v4322_v36, %v4441_v27 }
  0xba   : > { %5928 = vst [vmem:[#allocation33_spill] sm:$0xff] %v4342_v52 }
  0xbe   : > { %1235 = vperm.xlu2 %3725, %v3234_v60   ;;  %1230 = vperm.xlu1 %3724, %v3233_v63   ;;  %v4426_v63 = vsel %vm493_vm2, %v484_v42, %v485_v53  ;;  %v928_v42 = vpack.c.bf16 %v4237_v0, %v4243_v2 }
  0xbf   : > { %1129 = vperm.xlu0 %3723, %v3226_v3   ;;  %v4408_v46 = vpop.permute.xlu2 %748 }
  0xc0   : > { %v4385_v14 = vpop.permute.xlu0 %733  ;;  %v4391_v24 = vpop.permute.xlu1 %834  ;;  %5932 = vst [vmem:[#allocation37_spill] sm:$0xff] %v4408_v46 }
  0xc1   : > { %5930 = vst [vmem:[#allocation35_spill] sm:$0xff] %v4385_v14  ;;  %v759_v26 = vmul.f32 %v4385_v14, %v4375_v10 }
  0xc2   : > { %5931 = vst [vmem:[#allocation36_spill] sm:$0xff] %v4391_v24 }
  0xc3   : > { %v765_v34 = vpack.c.bf16 %v759_v26, %v758_v21  ;;  %v3242_v26 = vld [vmem:[%s5751_s0 + $0x238] sm:$0xff] }
  0xc5   : > { %3246 = vmatmul.msk.bf16.gmra.mxu3 %vm609_vm1, %v606_v33  ;;  %3252 = vmatmul.msk.bf16.vlgmr.msra.gmra.mxu2 %vm609_vm1, %v765_v34  ;;  %v862_v33 = vmul.f32 %v4339_v49, %v4301_v28 }
  0xc6   : > { %3251 = vmatmul.msk.bf16.vlgmr.msra.gmra.mxu0 %vm609_vm1, %v764_v41  ;;  %1336 = vperm.xlu2 %3725, %v3241_v39  }
  0xc7   : > { %1023 = vperm.xlu1 %3724, %v3218_v43   ;;  %1018 = vperm.xlu0 %3723, %v3217_v44   ;;  %v4452_v34 = vpop.permute.xlu2 %859  ;;  %v870_v43 = vpack.c.bf16 %v863_v32, %v862_v33  ;;  %v705_v32 = vrot.slane %v4273_v17, 1 }
  0xc8   : > { %v4422_v60 = vpop.permute.xlu0 %514  ;;  %1380 = vmatpush.bf16.msra.mxu0 %v1371_v47  ;;  %v4428_v3 = vpop.permute.xlu1 %519  ;;  %5935 = vst [vmem:[#allocation40_spill] sm:$0xff] %v4452_v34  ;;  %v486_v47 = vrot.slane %v4310_v30, 7 }
  0xc9   : > { %5933 = vst [vmem:[#allocation38_spill] sm:$0xff] %v4422_v60  ;;  %v544_v12 = vmul.f32 %v4422_v60, %v4420_v58  ;;  %v545_v15 = vmul.f32 %v4428_v3, %v4426_v63 }
  0xca   : > { %5934 = vst [vmem:[#allocation39_spill] sm:$0xff] %v4428_v3  ;;  %v498_v54 = vsel %vm493_vm2, %v485_v53, %v486_v47  ;;  %v4491_v53 = vsel %vm707_vm3, %v705_v32, %v706_v50 }
  0xcb   : > { %v551_v21 = vpack.c.bf16 %v545_v15, %v544_v12  ;;  %v497_v15 = vsel %vm493_vm2, %v486_v47, %v487_v48 }
  0xcd   : > { %3248 = vmatmul.msk.bf16.vlgmr.msra.gmra.mxu1 %vm609_vm1, %v551_v21 }
  0xcf   : > { %1341 = vperm.xlu0 %3723, %v3242_v26   ;;  %v4473_v13 = vpop.permute.xlu2 %1094 }
  0xd0   : > { %v4454_v39 = vpop.permute.xlu0 %743  ;;  %v4458_v40 = vpop.permute.xlu1 %844  ;;  %5939 = vst [vmem:[#allocation44_spill] sm:$0xff] %v4473_v13 }
  0xd1   : > { %5936 = vst [vmem:[#allocation41_spill] sm:$0xff] %v4454_v39  ;;  %v761_v41 = vmul.f32 %v4454_v39, %v4446_v31 }
  0xd2   : > { %5937 = vst [vmem:[#allocation42_spill] sm:$0xff] %v4458_v40 }
  0xd3   : > { %v766_v44 = vpack.c.bf16 %v761_v41, %v760_v61  ;;  %v4484_v41 = vsel %vm707_vm3, %v704_v20, %v705_v32 }
  0xd4   : > { %v762_v47 = vmul.f32 %v4408_v46, %v4484_v41  ;;  %v496_v46 = vsel %vm493_vm2, %v487_v48, %v488_v23  ;;  %v866_v48 = vmul.f32 %v4458_v40, %v497_v15 }
  0xd5   : > { %3253 = vmatmul.msk.bf16.gmra.mxu2 %vm609_vm1, %v766_v44  ;;  %3255 = vmatmul.msk.bf16.vlgmr.msrb.gmra.mxu3 %vm609_vm1, %v870_v43  ;;  %v865_v44 = vmul.f32 %v4275_v18, %v498_v54 }
  0xd6   : > { %3259 = vmatmul.msk.bf16.vlgmr.msrb.gmra.mxu0 %vm609_vm1, %v928_v42  ;;  %v864_v42 = vmul.f32 %v4391_v24, %v4426_v63 }
  0xd7   : > { %v4506_v50 = vpop.permute.xlu2 %1205 }
  0xd8   : > { %v4471_v12 = vpop.permute.xlu0 %524  ;;  %v4477_v21 = vpop.permute.xlu1 %529  ;;  %5943 = vst [vmem:[#allocation48_spill] sm:$0xff] %v4506_v50 }
  0xd9   : > { %5938 = vst [vmem:[#allocation43_spill] sm:$0xff] %v4471_v12  ;;  %v546_v26 = vmul.f32 %v4471_v12, %v498_v54  ;;  %v547_v33 = vmul.f32 %v4477_v21, %v497_v15 }
  0xda   : > { %5940 = vst [vmem:[#allocation45_spill] sm:$0xff] %v4477_v21 }
  0xdb   : > { %v552_v61 = vpack.c.bf16 %v547_v33, %v546_v26  ;;  %v929_v33 = vpack.c.bf16 %v4310_v30, %v4240_v1 }
  0xdd   : > { %3249 = vmatmul.msk.bf16.gmra.mxu1 %vm609_vm1, %v552_v61  ;;  %v871_v61 = vpack.c.bf16 %v865_v44, %v864_v42 }
  0xe0   : > { %v4495_v43 = vpop.permute.xlu0 %753  ;;  %v4500_v20 = vpop.permute.xlu1 %854 }
  0xe1   : > { %5941 = vst [vmem:[#allocation46_spill] sm:$0xff] %v4495_v43  ;;  %v763_v26 = vmul.f32 %v4495_v43, %v4491_v53  ;;  %v5945_v43 = vrot.slane %v4273_v17, 7 }
  0xe2   : > { %5942 = vst [vmem:[#allocation47_spill] sm:$0xff] %v4500_v20 }
  0xe3   : > { %v767_v32 = vpack.c.bf16 %v763_v26, %v762_v47  ;;  %v495_v35 = vsel %vm493_vm2, %v488_v23, %v5945_v43  ;;  %v1132_v23 = vmul.f32 %v4473_v13, %v4420_v58 }
  0xe5   : > { %3254 = vmatmul.msk.bf16.gmra.mxu2 %vm609_vm1, %v767_v32  ;;  %3256 = vmatmul.msk.bf16.gmra.mxu3 %vm609_vm1, %v871_v61  ;;  %v4524_v32 = vpop.permute.xlu2 %1306  ;;  %v867_v61 = vmul.f32 %v4348_v59, %v496_v46 }
  0xe6   : > { %3260 = vmatmul.msk.bf16.gmra.mxu0 %vm609_vm1, %v929_v33  ;;  %5947 = vst [vmem:[#allocation51_spill] sm:$0xff] %v4524_v32 }
  0xe7   : > { %v872_v39 = vpack.c.bf16 %v867_v61, %v866_v48  ;;  %v869_v61 = vmul.f32 %v4452_v34, %v4307_v29 }
  0xe8   : > { %v4514_v51 = vpop.permute.xlu0 %534  ;;  %v4520_v47 = vpop.permute.xlu1 %539 }
  0xe9   : > { %5944 = vst [vmem:[#allocation49_spill] sm:$0xff] %v4514_v51  ;;  %v548_v42 = vmul.f32 %v4514_v51, %v496_v46  ;;  %v549_v44 = vmul.f32 %v4520_v47, %v495_v35 }
  0xea   : > { %5946 = vst [vmem:[#allocation50_spill] sm:$0xff] %v4520_v47 }
  0xeb   : > { %v553_v26 = vpack.c.bf16 %v549_v44, %v548_v42  ;;  %v930_v42 = vpack.c.bf16 %v4367_v7, %v4289_v25 }
  0xed   : > { %3250 = vmatmul.msk.bf16.gmra.mxu1 %vm609_vm1, %v553_v26  ;;  %v4542_v26 = vpop.permute.xlu2 %1109 }
  0xee   : > { %5950 = vst [vmem:[#allocation54_spill] sm:$0xff] %v4542_v26 }
  0xf0   : > { %v4528_v33 = vpop.permute.xlu0 %1099  ;;  %v4533_v43 = vpop.permute.xlu1 %1200 }
  0xf1   : > { %5948 = vst [vmem:[#allocation52_spill] sm:$0xff] %v4528_v33  ;;  %v1133_v36 = vmul.f32 %v4528_v33, %v4426_v63 }
  0xf2   : > { %5949 = vst [vmem:[#allocation53_spill] sm:$0xff] %v4533_v43 }
  0xf3   : > { %v1140_v44 = vpack.c.bf16 %v1133_v36, %v1132_v23 }
  0xf5   : > { %3257 = vmatmul.msk.bf16.gmra.mxu3 %vm609_vm1, %v872_v39  ;;  %3267 = vmatmul.msk.bf16.vlgmr.msrb.gmra.mxu2 %vm609_vm1, %v1140_v44  ;;  %v868_v39 = vmul.f32 %v4500_v20, %v495_v35  ;;  %v4558_v23 = vpop.permute.xlu2 %998  ;;  %v1135_v44 = vmul.f32 %v4542_v26, %v497_v15 }
  0xf6   : > { %3261 = vmatmul.msk.bf16.gmra.mxu0 %vm609_vm1, %v930_v42  ;;  %5954 = vst [vmem:[#allocation58_spill] sm:$0xff] %v4558_v23 }
  0xf8   : > { %v4544_v40 = vpop.permute.xlu0 %988  ;;  %v4546_v58 = vpop.permute.xlu1 %993 }
  0xf9   : > { %5951 = vst [vmem:[#allocation55_spill] sm:$0xff] %v4544_v40  ;;  %v1026_v63 = vmul.f32 %v4544_v40, %v4379_v11  ;;  %v1027_v59 = vmul.f32 %v4546_v58, %v4371_v9 }
  0xfa   : > { %5952 = vst [vmem:[#allocation56_spill] sm:$0xff] %v4546_v58 }
  0xfb   : > { %v1034_v36 = vpack.c.bf16 %v1027_v59, %v1026_v63  ;;  %v931_v59 = vpack.c.bf16 %v4233_v62, %v4273_v17  ;;  %v873_v63 = vpack.c.bf16 %v869_v61, %v868_v39  ;;  %v1028_v61 = vmul.f32 %v4558_v23, %v4375_v10 }
  0xfd   : > { %3263 = vmatmul.msk.bf16.vlgmr.msrb.gmra.mxu1 %vm609_vm1, %v1034_v36  ;;  %v4573_v45 = vpop.permute.xlu2 %1321 }
  0xfe   : > { %5958 = vst [vmem:[#allocation62_spill] sm:$0xff] %v4573_v45 }
 0x100   : > { %v4554_v48 = vpop.permute.xlu0 %1311  ;;  %v4560_v42 = vpop.permute.xlu1 %1104 }
 0x101   : > { %5953 = vst [vmem:[#allocation57_spill] sm:$0xff] %v4554_v48  ;;  %v1134_v37 = vmul.f32 %v4560_v42, %v498_v54  ;;  %v1238_v54 = vmul.f32 %v4533_v43, %v4237_v0  ;;  %v1345_v15 = vmul.f32 %v4554_v48, %v4375_v10 }
 0x102   : > { %5955 = vst [vmem:[#allocation59_spill] sm:$0xff] %v4560_v42 }
 0x103   : > { %v1141_v36 = vpack.c.bf16 %v1135_v44, %v1134_v37  ;;  %v1239_v37 = vmul.f32 %v4506_v50, %v4240_v1 }
 0x105   : > { %3258 = vmatmul.msk.bf16.gmra.mxu3 %vm609_vm1, %v873_v63  ;;  %3268 = vmatmul.msk.bf16.gmra.mxu2 %vm609_vm1, %v1141_v36  ;;  %v1344_v63 = vmul.f32 %v4524_v32, %v4371_v9  ;;  %v1246_v0 = vpack.c.bf16 %v1239_v37, %v1238_v54  ;;  %v4591_v4 = vpop.permute.xlu2 %1220 }
 0x106   : > { %3262 = vmatmul.msk.bf16.gmra.mxu0 %vm609_vm1, %v931_v59  ;;  %5961 = vst [vmem:[#allocation65_spill] sm:$0xff] %v4591_v4 }
 0x107   : > { %v1352_v24 = vpack.c.bf16 %v1345_v15, %v1344_v63 }
 0x108   : > { %v4569_v20 = vpop.permute.xlu0 %1210  ;;  %v4571_v34 = vpop.permute.xlu1 %1215 }
 0x109   : > { %5956 = vst [vmem:[#allocation60_spill] sm:$0xff] %v4569_v20  ;;  %v1241_v15 = vmul.f32 %v4571_v34, %v4289_v25  ;;  %v1240_v37 = vmul.f32 %v4569_v20, %v4310_v30 }
 0x10a   : > { %5957 = vst [vmem:[#allocation61_spill] sm:$0xff] %v4571_v34 }
 0x10d   : > { %v4603_v54 = vpop.permute.xlu2 %1013 }
 0x10e   : > { %5964 = vst [vmem:[#allocation68_spill] sm:$0xff] %v4603_v54 }
 0x110   : > { %v4579_v39 = vpop.permute.xlu0 %1003  ;;  %v4585_v44 = vpop.permute.xlu1 %1316 }
 0x111   : > { %5959 = vst [vmem:[#allocation63_spill] sm:$0xff] %v4579_v39  ;;  %v1029_v59 = vmul.f32 %v4579_v39, %v4441_v27 }
 0x112   : > { %5960 = vst [vmem:[#allocation64_spill] sm:$0xff] %v4585_v44 }
 0x113   : > { %v1035_v36 = vpack.c.bf16 %v1029_v59, %v1028_v61 }
 0x115   : > { %3264 = vmatmul.msk.bf16.gmra.mxu1 %vm609_vm1, %v1035_v36  ;;  %3271 = vmatmul.msk.bf16.vlgmr.msra.gmra.mxu3 %vm609_vm1, %v1246_v0 }
 0x116   : > { %3275 = vmatmul.msk.bf16.vlgmr.msra.gmra.mxu0 %vm609_vm1, %v1352_v24  ;;  %v1346_v24 = vmul.f32 %v4585_v44, %v4441_v27 }
 0x118   : > { %v4596_v1 = vpop.permute.xlu1 %1119 }
 0x119   : > { %5962 = vst [vmem:[#allocation66_spill] sm:$0xff] %v4596_v1  ;;  %v4598_v10 = vpop.permute.xlu0 %1114  ;;  %v1137_v18 = vmul.f32 %v4596_v1, %v495_v35  ;;  %v1031_v35 = vmul.f32 %v4603_v54, %v4484_v41 }
 0x11a   : > { %5963 = vst [vmem:[#allocation67_spill] sm:$0xff] %v4598_v10  ;;  %v1136_v14 = vmul.f32 %v4598_v10, %v496_v46  ;;  %v1247_v46 = vpack.c.bf16 %v1241_v15, %v1240_v37 }
 0x11c   : > { %v1142_v9 = vpack.c.bf16 %v1137_v18, %v1136_v14  ;;  %v1347_v18 = vmul.f32 %v4573_v45, %v4446_v31 }
 0x11e   : > { %3269 = vmatmul.msk.bf16.gmra.mxu2 %vm609_vm1, %v1142_v9  ;;  %v1353_v30 = vpack.c.bf16 %v1347_v18, %v1346_v24  ;;  %v4628_v9 = vpop.permute.xlu2 %1124  ;;  %v1242_v18 = vmul.f32 %v4591_v4, %v4367_v7 }
 0x11f   : > { %5969 = vst [vmem:[#allocation73_spill] sm:$0xff] %v4628_v9 }
 0x120   : > { %v4611_v61 = vpop.permute.xlu1 %1008 }
 0x121   : > { %5965 = vst [vmem:[#allocation69_spill] sm:$0xff] %v4611_v61  ;;  %v4613_v59 = vpop.permute.xlu0 %1225  ;;  %v1030_v14 = vmul.f32 %v4611_v61, %v4446_v31 }
 0x122   : > { %5966 = vst [vmem:[#allocation70_spill] sm:$0xff] %v4613_v59  ;;  %v635_v25 = vpop.f32.mrf.mxu0  ;;  %v1243_v31 = vmul.f32 %v4613_v59, %v4273_v17  ;;  %v3571_v59 = vld [vmem:[#allocation6 + $0x10] sm:$0xff] }
 0x123   : > { %v1036_v63 = vpack.c.bf16 %v1031_v35, %v1030_v14 }
 0x125   : > { %3272 = vmatmul.msk.bf16.gmra.mxu3 %vm609_vm1, %v1247_v46  ;;  %3265 = vmatmul.msk.bf16.gmra.mxu1 %vm609_vm1, %v1036_v63  ;;  %v1138_v46 = vmul.f32 %v4628_v9, %v4307_v29 }
 0x126   : > { %3276 = vmatmul.msk.bf16.gmra.mxu0 %vm609_vm1, %v1353_v30  ;;  %v1248_v30 = vpack.c.bf16 %v1243_v31, %v1242_v18 }
 0x128   : > { %v640_v27 = vpop.f32.mrf.mxu3  ;;  %v4624_v0 = vpop.permute.xlu1 %1331 }
 0x129   : > { %5967 = vst [vmem:[#allocation71_spill] sm:$0xff] %v4624_v0  ;;  %v4626_v36 = vpop.permute.xlu0 %1326  ;;  %v1349_v15 = vmul.f32 %v4624_v0, %v4491_v53 }
 0x12a   : > { %5968 = vst [vmem:[#allocation72_spill] sm:$0xff] %v4626_v36  ;;  %v4630_v56 = vpop.f32.mrf.mxu0  ;;  %v1348_v37 = vmul.f32 %v4626_v36, %v4484_v41  ;;  %v4650_v36 = vpop.permute.xlu2 %1235 }
 0x12b   : > { %5972 = vst [vmem:[#allocation76_spill] sm:$0xff] %v4650_v36 }
 0x12c   : > { %v1354_v41 = vpack.c.bf16 %v1349_v15, %v1348_v37 }
 0x130   : > { %v4638_v24 = vpop.f32.mrf.mxu3  ;;  %v4642_v35 = vpop.permute.xlu1 %1230 }
 0x131   : > { %5970 = vst [vmem:[#allocation74_spill] sm:$0xff] %v4642_v35  ;;  %v4644_v14 = vpop.permute.xlu0 %1129 }
 0x132   : > { %5971 = vst [vmem:[#allocation75_spill] sm:$0xff] %v4644_v14  ;;  %v1139_v17 = vmul.f32 %v4644_v14, %v4301_v28  ;;  %v679_v63 = vpop.f32.mrf.mxu0  ;;  %v4666_v37 = vpop.permute.xlu2 %1336 }
 0x133   : > { %v680_v5 = vadd.f32 %v679_v63, %v635_v25  ;;  %5975 = vst [vmem:[#allocation79_spill] sm:$0xff] %v4666_v37 }
 0x134   : > { %v1143_v0 = vpack.c.bf16 %v1139_v17, %v1138_v46  ;;  %v1245_v46 = vmul.f32 %v4650_v36, %v4243_v2 }
 0x135   : > { %3273 = vmatmul.msk.bf16.gmra.mxu3 %vm609_vm1, %v1248_v30 }
 0x136   : > { %3270 = vmatmul.msk.bf16.gmra.mxu2 %vm609_vm1, %v1143_v0  ;;  %3277 = vmatmul.msk.bf16.gmra.mxu0 %vm609_vm1, %v1354_v41  ;;  %v1244_v0 = vmul.f32 %v4642_v35, %v4233_v62 }
 0x138   : > { %v645_v7 = vpop.f32.mrf.mxu3  ;;  %v1249_v41 = vpack.c.bf16 %v1245_v46, %v1244_v0 }
 0x139   : > { %v4655_v49 = vpop.permute.xlu1 %1023  ;;  %v4657_v29 = vpop.permute.xlu0 %1018 }
 0x13a   : > { %5973 = vst [vmem:[#allocation77_spill] sm:$0xff] %v4655_v49  ;;  %v1033_v28 = vmul.f32 %v4655_v49, %v4364_v6  ;;  %v1032_v25 = vmul.f32 %v4657_v29, %v4491_v53  ;;  %v4663_v31 = vpop.f32.mrf.mxu0  ;;  %v1350_v53 = vmul.f32 %v4666_v37, %v4364_v6 }
 0x13b   : > { %5974 = vst [vmem:[#allocation78_spill] sm:$0xff] %v4657_v29 }
 0x13c   : > { %v1037_v15 = vpack.c.bf16 %v1033_v28, %v1032_v25 }
 0x13e   : > { %3266 = vmatmul.msk.bf16.gmra.mxu1 %vm609_vm1, %v1037_v15 }
 0x140   : > { %v4670_v18 = vpop.f32.mrf.mxu3 }
 0x141   : > { %v4674_v17 = vpop.permute.xlu0 %1341 }
 0x142   : > { %5976 = vst [vmem:[#allocation80_spill] sm:$0xff] %v4674_v17  ;;  %v1351_v63 = vmul.f32 %v4674_v17, %v4379_v11 }
 0x143   : > { %v794_v30 = vpop.f32.mrf.mxu0 }
 0x144   : > { %v1355_v28 = vpack.c.bf16 %v1351_v63, %v1350_v53  ;;  %v814_v25 = vadd.f32 %v794_v30, %v680_v5 }
 0x145   : > { %3274 = vmatmul.msk.bf16.gmra.mxu3 %vm609_vm1, %v1249_v41 }
 0x146   : > { %3278 = vmatmul.msk.bf16.gmra.mxu0 %vm609_vm1, %v1355_v28 }
 0x148   : > { %v650_v62 = vpop.f32.mrf.mxu3  ;;  %v799_v15 = vpop.f32.mrf.mxu2 }
 0x14a   : > { %v684_v14 = vpop.f32.mrf.mxu1 }
 0x14b   : > { %v796_v2 = vpop.f32.mrf.mxu0  ;;  %v685_v29 = vadd.f32 %v684_v14, %v640_v27 }
 0x14d   : > { %v816_v36 = vadd.f32 %v799_v15, %v685_v29 }
 0x150   : > { %v4682_v9 = vpop.f32.mrf.mxu3  ;;  %v4684_v6 = vpop.f32.mrf.mxu2 }
 0x152   : > { %v686_v37 = vpop.f32.mrf.mxu1 }
 0x153   : > { %v958_v11 = vpop.f32.mrf.mxu0 }
 0x158   : > { %v804_v17 = vpop.f32.mrf.mxu2  ;;  %v900_v0 = vpop.f32.mrf.mxu3 }
 0x159   : > { %v920_v46 = vadd.f32 %v900_v0, %v814_v25 }
 0x15a   : > { %v689_v5 = vpop.f32.mrf.mxu1 }
 0x15b   : > { %v960_v53 = vpop.f32.mrf.mxu0  ;;  %v978_v63 = vadd.f32 %v958_v11, %v920_v46  ;;  %v690_v30 = vadd.f32 %v689_v5, %v645_v7 }
 0x15d   : > { %v818_v41 = vadd.f32 %v804_v17, %v690_v30  ;;  %v3572_v30 = vld [vmem:[#allocation6 + $0x18] sm:$0xff] }
 0x15e   : > { %1510 = vmatpush.bf16.msra.mxu1 %v3572_v30 }
 0x160   : > { %v902_v28 = vpop.f32.mrf.mxu3  ;;  %v4686_v49 = vpop.f32.mrf.mxu2 }
 0x162   : > { %v4688_v38 = vpop.f32.mrf.mxu1  ;;  %1511 = vmatpush.bf16.msra.mxu1 %v3571_v59 }
 0x163   : > { %v963_v27 = vpop.f32.mrf.mxu0 }
 0x168   : > { %v905_v14 = vpop.f32.mrf.mxu3  ;;  %v809_v52 = vpop.f32.mrf.mxu2 }
 0x169   : > { %v922_v29 = vadd.f32 %v905_v14, %v816_v36 }
 0x16a   : > { %v694_v15 = vpop.f32.mrf.mxu1 }
 0x16b   : > { %v965_v22 = vpop.f32.mrf.mxu0  ;;  %v980_v19 = vadd.f32 %v963_v27, %v922_v29  ;;  %v695_v35 = vadd.f32 %v694_v15, %v650_v62 }
 0x16d   : > { %v820_v55 = vadd.f32 %v809_v52, %v695_v35 }
 0x170   : > { %v907_v25 = vpop.f32.mrf.mxu3  ;;  %v4698_v36 = vpop.f32.mrf.mxu2 }
 0x172   : > { %v4690_v7 = vpop.f32.mrf.mxu1 }
 0x173   : > { %v968_v0 = vpop.f32.mrf.mxu0 }
 0x178   : > { %v910_v57 = vpop.f32.mrf.mxu3 }
 0x179   : > { %v924_v11 = vadd.f32 %v910_v57, %v818_v41  ;;  %v1170_v57 = vpop.f32.mrf.mxu2 }
 0x17a   : > { %v1064_v62 = vpop.f32.mrf.mxu1 }
 0x17b   : > { %v4692_v17 = vpop.f32.mrf.mxu0  ;;  %v4694_v46 = vadd.f32 %v968_v0, %v924_v11  ;;  %v682_v0 = vadd.f32 %v4663_v31, %v4630_v56  ;;  %v1084_v10 = vadd.f32 %v1064_v62, %v978_v63 }
 0x17d   : > { %v815_v11 = vadd.f32 %v796_v2, %v682_v0 }
 0x17f   : > { %v921_v1 = vadd.f32 %v902_v28, %v815_v11 }
 0x180   : > { %v4696_v5 = vpop.f32.mrf.mxu3 }
 0x181   : > { %v1172_v54 = vpop.f32.mrf.mxu2  ;;  %v979_v47 = vadd.f32 %v960_v53, %v921_v1 }
 0x182   : > { %v1066_v41 = vpop.f32.mrf.mxu1 }
 0x183   : > { %v973_v14 = vpop.f32.mrf.mxu0 }
 0x188   : > { %v915_v27 = vpop.f32.mrf.mxu3 }
 0x189   : > { %v926_v52 = vadd.f32 %v915_v27, %v820_v55  ;;  %v1190_v55 = vadd.f32 %v1170_v57, %v1084_v10  ;;  %v1085_v27 = vadd.f32 %v1066_v41, %v979_v47  ;;  %v1175_v45 = vpop.f32.mrf.mxu2 }
 0x18b   : > { %v4700_v35 = vpop.f32.mrf.mxu0  ;;  %v4702_v29 = vadd.f32 %v973_v14, %v926_v52  ;;  %v687_v52 = vadd.f32 %v686_v37, %v4638_v24  ;;  %v1191_v4 = vadd.f32 %v1172_v54, %v1085_v27 }
 0x18c   : > { %5977 = vst [vmem:[#allocation81_spill] sm:$0xff] %v4700_v35  ;;  %v4709_v35 = vld [vmem:[#allocation4] ss:$0 sm:$0xff] }
 0x18d   : > { %v817_v63 = vadd.f32 %v4684_v6, %v687_v52 }
 0x190   : > { %v4704_v15 = vpop.f32.mrf.mxu3 }
 0x192   : > { %v1069_v30 = vpop.f32.mrf.mxu1 }
 0x193   : > { %v1382_v8 = vpop.f32.mrf.mxu0  ;;  %v1086_v28 = vadd.f32 %v1069_v30, %v980_v19 }
 0x195   : > { %v1192_v37 = vadd.f32 %v1175_v45, %v1086_v28  ;;  %v692_v45 = vadd.f32 %v4688_v38, %v4670_v18 }
 0x198   : > { %v1276_v61 = vpop.f32.mrf.mxu3 }
 0x199   : > { %v1296_v14 = vadd.f32 %v1276_v61, %v1190_v55  ;;  %v923_v61 = vadd.f32 %v907_v25, %v817_v63 }
 0x19a   : > { %v1071_v31 = vpop.f32.mrf.mxu1 }
 0x19b   : > { %v1384_v51 = vpop.f32.mrf.mxu0  ;;  %v1402_v44 = vadd.f32 %v1382_v8, %v1296_v14  ;;  %v981_v62 = vadd.f32 %v965_v22, %v923_v61 }
 0x19d   : > { %v1414_v47 = vadd.f32 %v4709_v35, %v1402_v44  ;;  %v1087_v19 = vadd.f32 %v1071_v31, %v981_v62  ;;  %v819_v31 = vadd.f32 %v4686_v49, %v692_v45 }
 0x19f   : > { %v4716_v8 = vmax.f32 %v1414_v47, 0.0 }
 0x1a0   : > { %v1278_v56 = vpop.f32.mrf.mxu3 }
 0x1a1   : > { %v1297_v2 = vadd.f32 %v1278_v56, %v1191_v4  ;;  %v1177_v4 = vpop.f32.mrf.mxu2  ;;  %v5854_v0 = vrot.slane %v4716_v8, 7  ;;  %v5853_v55 = vrot.slane %v4716_v8, 1 }
 0x1a2   : > { %v1193_v30 = vadd.f32 %v1177_v4, %v1087_v19 }
 0x1a3   : > { %v1403_v1 = vadd.f32 %v1384_v51, %v1297_v2  ;;  %v1387_v10 = vpop.f32.mrf.mxu0  ;;  %v1074_v51 = vpop.f32.mrf.mxu1 }
 0x1a4   : > { %v1088_v63 = vadd.f32 %v1074_v51, %v4694_v46 }
 0x1a5   : > { %v1415_v24 = vadd.f32 %v4709_v35, %v1403_v1 }
 0x1a7   : > { %v4714_v54 = vmax.f32 %v1415_v24, 0.0 }
 0x1a8   : > { %v1281_v53 = vpop.f32.mrf.mxu3 }
 0x1a9   : > { %v1298_v57 = vadd.f32 %v1281_v53, %v1192_v37  ;;  %v1431_v44 = vrot.slane %v4714_v54, 7  ;;  %v1587_v22 = vrot.slane %v4714_v54, 1  ;;  %v4737_v52 = vmul.f32 %v4714_v54, %v4533_v43  ;;  %v1180_v2 = vpop.f32.mrf.mxu2 }
 0x1ab   : > { %v1404_v6 = vadd.f32 %v1387_v10, %v1298_v57  ;;  %v1389_v41 = vpop.f32.mrf.mxu0  ;;  %v4733_v14 = vsel %vm493_vm2, %v5854_v0, %v1431_v44  ;;  %v4750_v28 = vsel %vm707_vm3, %v5853_v55, %v1587_v22  ;;  %v925_v57 = vadd.f32 %v4696_v5, %v819_v31  ;;  %v1076_v4 = vpop.f32.mrf.mxu1 }
 0x1ac   : > { %v4759_v61 = vmul.f32 %v4733_v14, %v4422_v60  ;;  %v4769_v37 = vmul.f32 %v4733_v14, %v4473_v13  ;;  %v4783_v51 = vmul.f32 %v4750_v28, %v4544_v40  ;;  %v1194_v5 = vadd.f32 %v1180_v2, %v1088_v63  ;;  %v5999_v13 = vld [vmem:[#allocation21_spill] sm:$0xff] }
 0x1ad   : > { %v1416_v25 = vadd.f32 %v4709_v35, %v1404_v6  ;;  %v983_v31 = vadd.f32 %v4692_v17, %v925_v57  ;;  %v697_v63 = vadd.f32 %v4690_v7, %v4682_v9  ;;  %v3569_v17 = vld [vmem:[#allocation6] sm:$0xff] }
 0x1ae   : > { %v3573_v57 = vld [vmem:[#allocation6 + $0x20] sm:$0xff] }
 0x1af   : > { %v4726_v11 = vmax.f32 %v1416_v25, 0.0  ;;  %v6001_v60 = vld [vmem:[#allocation33_spill] sm:$0xff] }
 0x1b0   : > { %v1283_v27 = vpop.f32.mrf.mxu3 }
 0x1b1   : > { %v4741_v38 = vmul.f32 %v4726_v11, %v4506_v50  ;;  %v1299_v18 = vadd.f32 %v1283_v27, %v1193_v30  ;;  %v1432_v56 = vrot.slane %v4726_v11, 7  ;;  %v1588_v1 = vrot.slane %v4726_v11, 1  ;;  %v3570_v30 = vld [vmem:[#allocation6 + $0x8] sm:$0xff]  ;;  %v1182_v45 = vpop.f32.mrf.mxu2 }
 0x1b2   : > { %v3574_v27 = vld [vmem:[#allocation6 + $0x28] sm:$0xff]  ;;  %1563 = vmatpush.bf16.msra.mxu2 %v3570_v30 }
 0x1b3   : > { %v1405_v10 = vadd.f32 %v1389_v41, %v1299_v18  ;;  %v4755_v47 = vsel %vm493_vm2, %v1431_v44, %v1432_v56  ;;  %v1392_v46 = vpop.f32.mrf.mxu0  ;;  %v4777_v62 = vsel %vm707_vm3, %v1587_v22, %v1588_v1  ;;  %v3576_v18 = vld [vmem:[#allocation6 + $0x38] sm:$0xff]  ;;  %1649 = vmatpush.bf16.msrb.mxu3 %v3574_v27  ;;  %v6002_v50 = vld [vmem:[#allocation74_spill] sm:$0xff] }
 0x1b4   : > { %v4765_v24 = vmul.f32 %v4755_v47, %v4428_v3  ;;  %v4773_v53 = vmul.f32 %v4755_v47, %v4528_v33  ;;  %v4787_v6 = vmul.f32 %v4777_v62, %v4546_v58  ;;  %1727 = vmatpush.bf16.msrb.mxu0 %v3576_v18 }
 0x1b5   : > { %v1417_v19 = vadd.f32 %v4709_v35, %v1405_v10 }
 0x1b6   : > { %1564 = vmatpush.bf16.msra.mxu2 %v3569_v17 }
 0x1b7   : > { %v4793_v25 = vmax.f32 %v1417_v19, 0.0  ;;  %v1089_v19 = vadd.f32 %v1076_v4, %v983_v31  ;;  %1650 = vmatpush.bf16.msrb.mxu3 %v3573_v57 }
 0x1b8   : > { %v1286_v22 = vpop.f32.mrf.mxu3 }
 0x1b9   : > { %v1300_v10 = vadd.f32 %v1286_v22, %v1194_v5  ;;  %v1589_v49 = vrot.slane %v4793_v25, 1  ;;  %v3575_v5 = vld [vmem:[#allocation6 + $0x30] sm:$0xff]  ;;  %v4809_v22 = vmul.f32 %v4777_v62, %v4524_v32  ;;  %v1433_v27 = vrot.slane %v4793_v25, 7 }
 0x1ba   : > { %v1195_v31 = vadd.f32 %v1182_v45, %v1089_v19  ;;  %1728 = vmatpush.bf16.msrb.mxu0 %v3575_v5 }
 0x1bb   : > { %v1406_v59 = vadd.f32 %v1392_v46, %v1300_v10  ;;  %v4803_v2 = vsel %vm707_vm3, %v1588_v1, %v1589_v49  ;;  %5978 = vst [vmem:[#allocation82_spill] sm:$0xff] %v4809_v22  ;;  %v1079_v30 = vpop.f32.mrf.mxu1  ;;  %v3578_v1 = vld [vmem:[#allocation6 + $0x48] sm:$0xff]  ;;  %v1394_v18 = vpop.f32.mrf.mxu0  ;;  %v821_v10 = vadd.f32 %v4698_v36, %v697_v63 }
 0x1bc   : > { %v4813_v4 = vmul.f32 %v4803_v2, %v4554_v48  ;;  %1797 = vmatpush.bf16.msrb.mxu1 %v3578_v1  ;;  %v1090_v36 = vadd.f32 %v1079_v30, %v4702_v29  ;;  %v4856_v29 = vmul.f32 %v4803_v2, %v4558_v23  ;;  %v5990_v48 = vld [vmem:[#allocation50_spill] sm:$0xff] }
 0x1bd   : > { %v1418_v46 = vadd.f32 %v4709_v35, %v1406_v59  ;;  %v4824_v59 = vsel %vm493_vm2, %v1432_v56, %v1433_v27  ;;  %v927_v57 = vadd.f32 %v4704_v15, %v821_v10  ;;  %v1185_v15 = vpop.f32.mrf.mxu2 }
 0x1be   : > { %5979 = vst [vmem:[#allocation83_spill] sm:$0xff] %v4813_v4  ;;  %v4848_v63 = vmul.f32 %v4824_v59, %v4471_v12  ;;  %v1196_v9 = vadd.f32 %v1185_v15, %v1090_v36  ;;  %v6008_v4 = vld [vmem:[#allocation32_spill] sm:$0xff] }
 0x1bf   : > { %v4819_v7 = vmax.f32 %v1418_v46, 0.0  ;;  %v4831_v46 = vmul.f32 %v4793_v25, %v4569_v20 }
 0x1c0   : > { %v1288_v44 = vpop.f32.mrf.mxu3 }
 0x1c1   : > { %v1301_v41 = vadd.f32 %v1288_v44, %v1195_v31  ;;  %v1434_v55 = vrot.slane %v4819_v7, 7  ;;  %v1590_v17 = vrot.slane %v4819_v7, 1  ;;  %v4835_v45 = vmul.f32 %v4819_v7, %v4571_v34 }
 0x1c3   : > { %v1407_v44 = vadd.f32 %v1394_v18, %v1301_v41  ;;  %v4840_v56 = vsel %vm493_vm2, %v1433_v27, %v1434_v55  ;;  %v4844_v19 = vsel %vm707_vm3, %v1589_v49, %v1590_v17  ;;  %v4860_v41 = vmul.f32 %v4824_v59, %v4560_v42  ;;  %v1081_v10 = vpop.f32.mrf.mxu1  ;;  %v1397_v42 = vpop.f32.mrf.mxu0 }
 0x1c4   : > { %v4852_v5 = vmul.f32 %v4840_v56, %v4477_v21  ;;  %v4865_v30 = vmul.f32 %v4844_v19, %v4579_v39  ;;  %v4869_v1 = vmul.f32 %v4840_v56, %v4542_v26  ;;  %v5980_v26 = vld [vmem:[#allocation81_spill] sm:$0xff] }
 0x1c5   : > { %v1419_v49 = vadd.f32 %v4709_v35, %v1407_v44  ;;  %v985_v23 = vadd.f32 %v5980_v26, %v927_v57  ;;  %v5981_v44 = vld [vmem:[#allocation64_spill] sm:$0xff]  ;;  %v5983_v26 = vld [vmem:[#allocation62_spill] sm:$0xff] }
 0x1c6   : > { %v4893_v20 = vmul.f32 %v4844_v19, %v5981_v44 }
 0x1c7   : > { %v4875_v31 = vmax.f32 %v1419_v49, 0.0  ;;  %v1091_v49 = vadd.f32 %v1081_v10, %v985_v23 }
 0x1c8   : > { %v1291_v39 = vpop.f32.mrf.mxu3  ;;  %5982 = vst [vmem:[#allocation81_spill] sm:$0xff] %v4893_v20 }
 0x1c9   : > { %v1302_v21 = vadd.f32 %v1291_v39, %v1196_v9  ;;  %v1591_v27 = vrot.slane %v4875_v31, 1  ;;  %v1435_v0 = vrot.slane %v4875_v31, 7  ;;  %v1187_v9 = vpop.f32.mrf.mxu2 }
 0x1cb   : > { %v1408_v12 = vadd.f32 %v1397_v42, %v1302_v21  ;;  %v4887_v36 = vsel %vm707_vm3, %v1590_v17, %v1591_v27  ;;  %v1197_v21 = vadd.f32 %v1187_v9, %v1091_v49  ;;  %v4906_v10 = vsel %vm493_vm2, %v1434_v55, %v1435_v0  ;;  %v1399_v44 = vpop.f32.mrf.mxu0 }
 0x1cc   : > { %v4897_v39 = vmul.f32 %v4887_v36, %v5983_v26  ;;  %v5985_v26 = vld [vmem:[#allocation70_spill] sm:$0xff] }
 0x1cd   : > { %v1420_v15 = vadd.f32 %v4709_v35, %v1408_v12 }
 0x1ce   : > { %5984 = vst [vmem:[#allocation84_spill] sm:$0xff] %v4897_v39  ;;  %v6004_v39 = vrot.slane %v4716_v8, 1 }
 0x1cf   : > { %v4899_v57 = vmax.f32 %v1420_v15, 0.0 }
 0x1d0   : > { %v1293_v42 = vpop.f32.mrf.mxu3 }
 0x1d1   : > { %v1436_v12 = vrot.slane %v4899_v57, 7  ;;  %v1303_v17 = vadd.f32 %v1293_v42, %v1197_v21  ;;  %v1592_v18 = vrot.slane %v4899_v57, 1  ;;  %v4911_v34 = vmul.f32 %v4899_v57, %v5985_v26  ;;  %v5987_v21 = vld [vmem:[#allocation65_spill] sm:$0xff] }
 0x1d2   : > { %v4923_v55 = vmul.f32 %v4875_v31, %v5987_v21  ;;  %v5989_v42 = vld [vmem:[#allocation49_spill] sm:$0xff]  ;;  %v5993_v21 = vld [vmem:[#allocation67_spill] sm:$0xff] }
 0x1d3   : > { %5986 = vst [vmem:[#allocation85_spill] sm:$0xff] %v4911_v34  ;;  %v1409_v15 = vadd.f32 %v1399_v44, %v1303_v17  ;;  %v4915_v49 = vsel %vm493_vm2, %v1435_v0, %v1436_v12  ;;  %v4919_v9 = vsel %vm707_vm3, %v1591_v27, %v1592_v18  ;;  %v4927_v23 = vmul.f32 %v4906_v10, %v5989_v42  ;;  %v5991_v44 = vld [vmem:[#allocation69_spill] sm:$0xff]  ;;  %v5992_v17 = vld [vmem:[#allocation68_spill] sm:$0xff]  ;;  %v5995_v42 = vld [vmem:[#allocation66_spill] sm:$0xff] }
 0x1d4   : > { %5988 = vst [vmem:[#allocation86_spill] sm:$0xff] %v4923_v55  ;;  %v4931_v26 = vmul.f32 %v4915_v49, %v5990_v48  ;;  %v4935_v0 = vmul.f32 %v4887_v36, %v5991_v44  ;;  %v4939_v27 = vmul.f32 %v4919_v9, %v5992_v17  ;;  %v4944_v58 = vmul.f32 %v4906_v10, %v5993_v21  ;;  %v6000_v17 = vld [vmem:[#allocation19_spill] sm:$0xff] }
 0x1d5   : > { %v1421_v32 = vadd.f32 %v4709_v35, %v1409_v15  ;;  %v4948_v40 = vmul.f32 %v4915_v49, %v5995_v42  ;;  %v5998_v15 = vld [vmem:[#allocation24_spill] sm:$0xff]  ;;  %v1681_v35 = vmul.f32 %v4733_v14, %v6001_v60  ;;  %v6005_v14 = vld [vmem:[#allocation27_spill] sm:$0xff] }
 0x1d6   : > { %5994 = vst [vmem:[#allocation87_spill] sm:$0xff] %v4944_v58  ;;  %v1463_v21 = vmul.f32 %v4716_v8, %v5998_v15 }
 0x1d7   : > { %5996 = vst [vmem:[#allocation88_spill] sm:$0xff] %v4948_v40  ;;  %v4956_v33 = vmax.f32 %v1421_v32, 0.0  ;;  %v1603_v32 = vmul.f32 %v4750_v28, %v6000_v17 }
 0x1d9   : > { %5997 = vst [vmem:[#allocation89_spill] sm:$0xff] %v4956_v33  ;;  %v1437_v42 = vrot.slane %v4956_v33, 7  ;;  %v1593_v3 = vrot.slane %v4956_v33, 1  ;;  %v1462_v48 = vmul.f32 %v4956_v33, %v5999_v13  ;;  %v4974_v15 = vmul.f32 %v4956_v33, %v6002_v50  ;;  %v6006_v50 = vld [vmem:[#allocation28_spill] sm:$0xff]  ;;  %v3577_v33 = vld [vmem:[#allocation6 + $0x40] sm:$0xff] }
 0x1da   : > { %v6003_v13 = vrot.slane %v4716_v8, 7  ;;  %1798 = vmatpush.bf16.msrb.mxu1 %v3577_v33 }
 0x1db   : > { %v1470_v43 = vpack.c.bf16 %v1463_v21, %v1462_v48  ;;  %v4978_v20 = vsel %vm493_vm2, %v1436_v12, %v1437_v42  ;;  %v1601_v17 = vsel %vm707_vm3, %v1593_v3, %v6004_v39  ;;  %v6007_v48 = vld [vmem:[#allocation31_spill] sm:$0xff]  ;;  %v6010_v39 = vld [vmem:[#allocation73_spill] sm:$0xff] }
 0x1dc   : > { %v1445_v44 = vsel %vm493_vm2, %v1437_v42, %v6003_v13  ;;  %v1446_v60 = vmul.f32 %v4978_v20, %v6005_v14  ;;  %v1602_v21 = vmul.f32 %v1601_v17, %v6007_v48  ;;  %v4996_v13 = vsel %vm707_vm3, %v1592_v18, %v1593_v3  ;;  %v6009_v42 = vld [vmem:[#allocation77_spill] sm:$0xff]  ;;  %v6011_v14 = vld [vmem:[#allocation76_spill] sm:$0xff]  ;;  %v6013_v3 = vld [vmem:[#allocation75_spill] sm:$0xff] }
 0x1dd   : > { %v1447_v22 = vmul.f32 %v1445_v44, %v6006_v50  ;;  %v1680_v12 = vmul.f32 %v1445_v44, %v6008_v4  ;;  %3287 = vmatmul.msk.bf16.vlgmr.msra.gmra.mxu1 %vm1491_vm4, %v1470_v43  ;;  %v4999_v55 = vmul.f32 %v1601_v17, %v6009_v42  ;;  %v5003_v34 = vmul.f32 %v4978_v20, %v6010_v39  ;;  %v6012_v43 = vld [vmem:[#allocation78_spill] sm:$0xff]  ;;  %v6014_v39 = vld [vmem:[#allocation80_spill] sm:$0xff] }
 0x1de   : > { %v5007_v50 = vmul.f32 %v4716_v8, %v6011_v14  ;;  %v1610_v4 = vpack.c.bf16 %v1603_v32, %v1602_v21  ;;  %v5011_v16 = vmul.f32 %v4996_v13, %v6012_v43  ;;  %v5014_v18 = vmul.f32 %v1445_v44, %v6013_v3  ;;  %v6017_v44 = vld [vmem:[#allocation79_spill] sm:$0xff] }
 0x1df   : > { %v1454_v48 = vpack.c.bf16 %v1447_v22, %v1446_v60  ;;  %v1688_v58 = vpack.c.bf16 %v1681_v35, %v1680_v12  ;;  %v5020_v40 = vmul.f32 %v4750_v28, %v6014_v39  ;;  %v6015_v60 = vld [vmem:[#allocation72_spill] sm:$0xff]  ;;  %v6016_v22 = vld [vmem:[#allocation71_spill] sm:$0xff]  ;;  %v5033_v32 = vmul.f32 %v1601_v17, %v6017_v44  ;;  %v6021_v28 = vld [vmem:[#allocation26_spill] sm:$0xff] }
 0x1e0   : > { %3311 = vmatmul.msk.bf16.vlgmr.msrb.gmra.mxu3 %vm1491_vm4, %v1610_v4  ;;  %v5026_v33 = vmul.f32 %v4919_v9, %v6015_v60  ;;  %v5030_v35 = vmul.f32 %v4996_v13, %v6016_v22  ;;  %v6018_v12 = vld [vmem:[#allocation23_spill] sm:$0xff]  ;;  %v6019_v22 = vld [vmem:[#allocation20_spill] sm:$0xff]  ;;  %v1683_v39 = vmul.f32 %v4824_v59, %v6021_v28 }
 0x1e1   : > { %3299 = vmatmul.msk.bf16.vlgmr.msra.gmra.mxu2 %vm1491_vm4, %v1454_v48  ;;  %3323 = vmatmul.msk.bf16.vlgmr.msrb.gmra.mxu0 %vm1491_vm4, %v1688_v58  ;;  %v1465_v42 = vmul.f32 %v4726_v11, %v6018_v12  ;;  %v1464_v17 = vmul.f32 %v4714_v54, %v6019_v22  ;;  %v6020_v44 = vld [vmem:[#allocation35_spill] sm:$0xff]  ;;  %v6022_v48 = vld [vmem:[#allocation22_spill] sm:$0xff]  ;;  %v6023_v4 = vld [vmem:[#allocation36_spill] sm:$0xff]  ;;  %v6024_v22 = vpack.c.bf16 %v4765_v24, %v4759_v61 }
 0x1e2   : > { %v1605_v58 = vmul.f32 %v4803_v2, %v6020_v44  ;;  %v1604_v3 = vmul.f32 %v4777_v62, %v6022_v48  ;;  %v1682_v21 = vmul.f32 %v4755_v47, %v6023_v4  ;;  %v3580_v2 = vld [vmem:[#allocation6 + $0x58] sm:$0xff]  ;;  %v3582_v59 = vld [vmem:[#allocation6 + $0x68] sm:$0xff] }
 0x1e3   : > { %v1471_v60 = vpack.c.bf16 %v1465_v42, %v1464_v17  ;;  %v3584_v42 = vld [vmem:[#allocation6 + $0x78] sm:$0xff]  ;;  %1875 = vmatpush.bf16.msrb.mxu2 %v3580_v2  ;;  %1953 = vmatpush.bf16.msra.mxu3 %v3582_v59  ;;  %v6030_v17 = vld [vmem:[#allocation42_spill] sm:$0xff]  ;;  %v3579_v2 = vld [vmem:[#allocation6 + $0x50] sm:$0xff] }
 0x1e4   : > { %v1611_v43 = vpack.c.bf16 %v1605_v58, %v1604_v3  ;;  %v1689_v12 = vpack.c.bf16 %v1683_v39, %v1682_v21  ;;  %2031 = vmatpush.bf16.msra.mxu0 %v3584_v42  ;;  %v6025_v62 = vld [vmem:[#allocation17_spill] sm:$0xff]  ;;  %v6026_v3 = vld [vmem:[#allocation16_spill] sm:$0xff]  ;;  %v6029_v21 = vld [vmem:[#allocation30_spill] sm:$0xff]  ;;  %v1684_v58 = vmul.f32 %v4840_v56, %v6030_v17 }
 0x1e5   : > { %v1467_v47 = vmul.f32 %v4819_v7, %v6025_v62  ;;  %v1466_v39 = vmul.f32 %v4793_v25, %v6026_v3  ;;  %v3581_v59 = vld [vmem:[#allocation6 + $0x60] sm:$0xff]  ;;  %v3583_v62 = vld [vmem:[#allocation6 + $0x70] sm:$0xff]  ;;  %v3586_v3 = vld [vmem:[#allocation6 + $0x88] sm:$0xff] }
 0x1e6   : > { %2109 = vmatpush.bf16.msra.mxu1 %v3586_v3  ;;  %v6032_v56 = vld [vmem:[#allocation29_spill] sm:$0xff] }
 0x1e7   : > { %v1472_v24 = vpack.c.bf16 %v1467_v47, %v1466_v39  ;;  %1876 = vmatpush.bf16.msrb.mxu2 %v3579_v2  ;;  %1954 = vmatpush.bf16.msra.mxu3 %v3581_v59  ;;  %v6034_v39 = vld [vmem:[#allocation46_spill] sm:$0xff]  ;;  %v6038_v2 = vpack.c.bf16 %v4931_v26, %v4927_v23  ;;  %v6041_v26 = vpack.c.bf16 %v4773_v53, %v4769_v37  ;;  %v6049_v53 = vld [vmem:[#allocation88_spill] sm:$0xff] }
 0x1e8   : > { %2032 = vmatpush.bf16.msra.mxu0 %v3583_v62  ;;  %v6042_v23 = vpack.c.bf16 %v4741_v38, %v4737_v52  ;;  %v6045_v37 = vpack.c.bf16 %v4869_v1, %v4860_v41  ;;  %v6046_v52 = vpack.c.bf16 %v4835_v45, %v4831_v46  ;;  %v6048_v38 = vpack.c.bf16 %v4939_v27, %v4935_v0  ;;  %v6055_v45 = vld [vmem:[#allocation89_spill] sm:$0xff]  ;;  %v6060_v0 = vld [vmem:[#allocation83_spill] sm:$0xff] }
 0x1e9   : > { %v6057_v41 = vpack.c.bf16 %v4999_v55, %v5011_v16  ;;  %v6059_v1 = vpack.c.bf16 %v5007_v50, %v4974_v15  ;;  %v6063_v15 = vld [vmem:[#allocation84_spill] sm:$0xff] }
 0x1ed   : > { %3288 = vmatmul.msk.bf16.gmra.mxu1 %vm1491_vm4, %v1471_v60  ;;  %v6027_v60 = vld [vmem:[#allocation41_spill] sm:$0xff] }
 0x1ee   : > { %v1607_v61 = vmul.f32 %v4887_v36, %v6027_v60  ;;  %v6031_v36 = vpack.c.bf16 %v4852_v5, %v4848_v63  ;;  %v6036_v5 = vld [vmem:[#allocation37_spill] sm:$0xff] }
 0x1f0   : > { %3312 = vmatmul.msk.bf16.gmra.mxu3 %vm1491_vm4, %v1611_v43 }
 0x1f1   : > { %3300 = vmatmul.msk.bf16.gmra.mxu2 %vm1491_vm4, %v6024_v22  ;;  %3324 = vmatmul.msk.bf16.gmra.mxu0 %vm1491_vm4, %v1689_v12  ;;  %v6028_v22 = vld [vmem:[#allocation34_spill] sm:$0xff]  ;;  %v1606_v12 = vmul.f32 %v4844_v19, %v6029_v21  ;;  %v1469_v19 = vmul.f32 %v4899_v57, %v6032_v56 }
 0x1f2   : > { %v1685_v43 = vmul.f32 %v4906_v10, %v6028_v22  ;;  %v6033_v10 = vld [vmem:[#allocation18_spill] sm:$0xff] }
 0x1f3   : > { %v1612_v42 = vpack.c.bf16 %v1607_v61, %v1606_v12  ;;  %v1468_v47 = vmul.f32 %v4875_v31, %v6033_v10  ;;  %v1609_v61 = vmul.f32 %v4996_v13, %v6034_v39  ;;  %v1608_v12 = vmul.f32 %v4919_v9, %v6036_v5  ;;  %v3585_v9 = vld [vmem:[#allocation6 + $0x80] sm:$0xff] }
 0x1f4   : > { %v1690_v4 = vpack.c.bf16 %v1685_v43, %v1684_v58  ;;  %v6035_v43 = vld [vmem:[#allocation40_spill] sm:$0xff]  ;;  %2110 = vmatpush.bf16.msra.mxu1 %v3585_v9 }
 0x1f5   : > { %v1687_v63 = vmul.f32 %v4978_v20, %v6035_v43  ;;  %v1613_v3 = vpack.c.bf16 %v1609_v61, %v1608_v12  ;;  %v6039_v20 = vpack.c.bf16 %v4714_v54, %v4716_v8  ;;  %v6043_v54 = vpack.c.bf16 %v4793_v25, %v4726_v11  ;;  %v6052_v25 = vld [vmem:[#allocation85_spill] sm:$0xff] }
 0x1f6   : > { %v6044_v8 = vpack.c.bf16 %v4865_v30, %v4856_v29  ;;  %v6047_v11 = vpack.c.bf16 %v4875_v31, %v4819_v7  ;;  %v6053_v29 = vld [vmem:[#allocation86_spill] sm:$0xff]  ;;  %v6056_v7 = vpack.c.bf16 %v6055_v45, %v4899_v57  ;;  %v6058_v30 = vpack.c.bf16 %v5014_v18, %v5003_v34  ;;  %v6064_v61 = vld [vmem:[#allocation81_spill] sm:$0xff] }
 0x1f7   : > { %v6054_v46 = vpack.c.bf16 %v6052_v25, %v6053_v29  ;;  %v6061_v57 = vld [vmem:[#allocation82_spill] sm:$0xff] }
 0x1f8   : > { %v6062_v27 = vpack.c.bf16 %v6060_v0, %v6061_v57 }
 0x1fd   : > { %3289 = vmatmul.msk.bf16.gmra.mxu1 %vm1491_vm4, %v1472_v24  ;;  %v1473_v24 = vpack.c.bf16 %v1469_v19, %v1468_v47 }
 0x200   : > { %3313 = vmatmul.msk.bf16.gmra.mxu3 %vm1491_vm4, %v1612_v42 }
 0x201   : > { %3301 = vmatmul.msk.bf16.gmra.mxu2 %vm1491_vm4, %v6031_v36  ;;  %3325 = vmatmul.msk.bf16.gmra.mxu0 %vm1491_vm4, %v1690_v4  ;;  %v6037_v4 = vld [vmem:[#allocation47_spill] sm:$0xff] }
 0x202   : > { %v1686_v62 = vmul.f32 %v4915_v49, %v6037_v4  ;;  %v6040_v49 = vpack.c.bf16 %v4787_v6, %v4783_v51  ;;  %v6050_v51 = vld [vmem:[#allocation87_spill] sm:$0xff] }
 0x203   : > { %v6051_v6 = vpack.c.bf16 %v6049_v53, %v6050_v51 }
 0x204   : > { %v1691_v58 = vpack.c.bf16 %v1687_v63, %v1686_v62 }
 0x20d   : > { %3290 = vmatmul.msk.bf16.gmra.mxu1 %vm1491_vm4, %v1473_v24  ;;  %v6065_v24 = vpack.c.bf16 %v6063_v15, %v6064_v61  ;;  %v3594_v61 = vld [vmem:[#allocation9 + $0x38] sm:$0xff] }
 0x20e   : > { %2258 = vmatpush.bf16.msra.mxu2 %v3594_v61 }
 0x210   : > { %3314 = vmatmul.msk.bf16.gmra.mxu3 %vm1491_vm4, %v1613_v3 }
 0x211   : > { %3302 = vmatmul.msk.bf16.gmra.mxu2 %vm1491_vm4, %v6038_v2  ;;  %3326 = vmatmul.msk.bf16.gmra.mxu0 %vm1491_vm4, %v1691_v58 }
 0x21d   : > { %3335 = vmatmul.msk.bf16.vlgmr.msrb.gmra.mxu1 %vm1491_vm4, %v6039_v20 }
 0x220   : > { %3359 = vmatmul.msk.bf16.vlgmr.msra.gmra.mxu3 %vm1491_vm4, %v6041_v26 }
 0x221   : > { %3347 = vmatmul.msk.bf16.vlgmr.msrb.gmra.mxu2 %vm1491_vm4, %v6040_v49  ;;  %3371 = vmatmul.msk.bf16.vlgmr.msra.gmra.mxu0 %vm1491_vm4, %v6042_v23 }
 0x22d   : > { %3336 = vmatmul.msk.bf16.gmra.mxu1 %vm1491_vm4, %v6043_v54  ;;  %v6066_v54 = vpack.c.bf16 %v5030_v35, %v5026_v33  ;;  %v6067_v33 = vpack.c.bf16 %v5020_v40, %v5033_v32 }
 0x230   : > { %3360 = vmatmul.msk.bf16.gmra.mxu3 %vm1491_vm4, %v6045_v37 }
 0x231   : > { %3348 = vmatmul.msk.bf16.gmra.mxu2 %vm1491_vm4, %v6044_v8  ;;  %3372 = vmatmul.msk.bf16.gmra.mxu0 %vm1491_vm4, %v6046_v52 }
 0x23d   : > { %3337 = vmatmul.msk.bf16.gmra.mxu1 %vm1491_vm4, %v6047_v11 }
 0x240   : > { %3361 = vmatmul.msk.bf16.gmra.mxu3 %vm1491_vm4, %v6051_v6 }
 0x241   : > { %3349 = vmatmul.msk.bf16.gmra.mxu2 %vm1491_vm4, %v6048_v38  ;;  %3373 = vmatmul.msk.bf16.gmra.mxu0 %vm1491_vm4, %v6054_v46 }
 0x24d   : > { %3338 = vmatmul.msk.bf16.gmra.mxu1 %vm1491_vm4, %v6056_v7 }
 0x250   : > { %3362 = vmatmul.msk.bf16.gmra.mxu3 %vm1491_vm4, %v6058_v30 }
 0x251   : > { %3350 = vmatmul.msk.bf16.gmra.mxu2 %vm1491_vm4, %v6057_v41  ;;  %3374 = vmatmul.msk.bf16.gmra.mxu0 %vm1491_vm4, %v6059_v1 }
 0x25a   : > { %v1513_v31 = vpop.f32.mrf.mxu1 }
 0x25d   : > { %3383 = vmatmul.msk.bf16.vlgmr.msra.gmra.mxu1 %vm1491_vm4, %v6062_v27 }
 0x25e   : > { %v1730_v13 = vpop.f32.mrf.mxu0 }
 0x262   : > { %v1515_v16 = vpop.f32.mrf.mxu1 }
 0x263   : > { %v1652_v59 = vpop.f32.mrf.mxu3 }
 0x264   : > { %v1566_v55 = vpop.f32.mrf.mxu2 }
 0x265   : > { %v1567_v42 = vadd.f32 %v1566_v55, %v1513_v31 }
 0x266   : > { %v5169_v34 = vpop.f32.mrf.mxu0 }
 0x267   : > { %v1672_v36 = vadd.f32 %v1652_v59, %v1567_v42 }
 0x269   : > { %v1750_v18 = vadd.f32 %v1730_v13, %v1672_v36 }
 0x26a   : > { %v1518_v19 = vpop.f32.mrf.mxu1 }
 0x26b   : > { %v1654_v50 = vpop.f32.mrf.mxu3 }
 0x26c   : > { %v1568_v47 = vpop.f32.mrf.mxu2 }
 0x26d   : > { %3384 = vmatmul.msk.bf16.gmra.mxu1 %vm1491_vm4, %v6065_v24 }
 0x26e   : > { %v1735_v63 = vpop.f32.mrf.mxu0 }
 0x272   : > { %v5175_v12 = vpop.f32.mrf.mxu1 }
 0x273   : > { %v1657_v3 = vpop.f32.mrf.mxu3 }
 0x274   : > { %v1571_v62 = vpop.f32.mrf.mxu2 }
 0x275   : > { %v1572_v58 = vadd.f32 %v1571_v62, %v1518_v19 }
 0x276   : > { %v5177_v20 = vpop.f32.mrf.mxu0 }
 0x277   : > { %v1674_v2 = vadd.f32 %v1657_v3, %v1572_v58 }
 0x279   : > { %v1752_v9 = vadd.f32 %v1735_v63, %v1674_v2  ;;  %v1569_v2 = vadd.f32 %v1568_v47, %v1515_v16 }
 0x27a   : > { %v1523_v49 = vpop.f32.mrf.mxu1 }
 0x27b   : > { %v5179_v23 = vpop.f32.mrf.mxu3 }
 0x27c   : > { %v1573_v26 = vpop.f32.mrf.mxu2 }
 0x27d   : > { %3385 = vmatmul.msk.bf16.gmra.mxu1 %vm1491_vm4, %v6066_v54  ;;  %v3593_v54 = vld [vmem:[#allocation9 + $0x30] sm:$0xff] }
 0x27e   : > { %v1740_v8 = vpop.f32.mrf.mxu0  ;;  %2259 = vmatpush.bf16.msra.mxu2 %v3593_v54 }
 0x282   : > { %v5185_v37 = vpop.f32.mrf.mxu1 }
 0x283   : > { %v1662_v11 = vpop.f32.mrf.mxu3 }
 0x284   : > { %v1576_v52 = vpop.f32.mrf.mxu2 }
 0x285   : > { %v1577_v38 = vadd.f32 %v1576_v52, %v1523_v49  ;;  %v1673_v49 = vadd.f32 %v1654_v50, %v1569_v2 }
 0x286   : > { %v5191_v46 = vpop.f32.mrf.mxu0 }
 0x287   : > { %v1676_v53 = vadd.f32 %v1662_v11, %v1577_v38  ;;  %v1751_v38 = vadd.f32 %v5169_v34, %v1673_v49  ;;  %v3592_v34 = vld [vmem:[#allocation9 + $0x28] sm:$0xff] }
 0x288   : > { %2260 = vmatpush.bf16.msra.mxu2 %v3592_v34 }
 0x289   : > { %v1754_v51 = vadd.f32 %v1740_v8, %v1676_v53 }
 0x28a   : > { %v1528_v6 = vpop.f32.mrf.mxu1 }
 0x28b   : > { %v5189_v29 = vpop.f32.mrf.mxu3 }
 0x28c   : > { %v5187_v25 = vpop.f32.mrf.mxu2 }
 0x28d   : > { %3386 = vmatmul.msk.bf16.gmra.mxu1 %vm1491_vm4, %v6067_v33 }
 0x28e   : > { %v1745_v1 = vpop.f32.mrf.mxu0 }
 0x292   : > { %v5197_v35 = vpop.f32.mrf.mxu1 }
 0x293   : > { %v1667_v41 = vpop.f32.mrf.mxu3 }
 0x294   : > { %v1581_v45 = vpop.f32.mrf.mxu2 }
 0x295   : > { %v1582_v7 = vadd.f32 %v1581_v45, %v1528_v6 }
 0x296   : > { %v5205_v19 = vpop.f32.mrf.mxu0 }
 0x297   : > { %v1678_v30 = vadd.f32 %v1667_v41, %v1582_v7  ;;  %v1574_v41 = vadd.f32 %v1573_v26, %v5175_v12 }
 0x299   : > { %v1756_v31 = vadd.f32 %v1745_v1, %v1678_v30 }
 0x29a   : > { %v1800_v0 = vpop.f32.mrf.mxu1 }
 0x29b   : > { %v1820_v57 = vadd.f32 %v1800_v0, %v1750_v18  ;;  %v5201_v40 = vpop.f32.mrf.mxu3  ;;  %v1675_v0 = vadd.f32 %v5179_v23, %v1574_v41 }
 0x29c   : > { %v5199_v42 = vpop.f32.mrf.mxu2 }
 0x29d   : > { %v1753_v12 = vadd.f32 %v5177_v20, %v1675_v0  ;;  %v3591_v0 = vld [vmem:[#allocation9 + $0x20] sm:$0xff] }
 0x29e   : > { %v2034_v18 = vpop.f32.mrf.mxu0  ;;  %2261 = vmatpush.bf16.msra.mxu2 %v3591_v0 }
 0x2a2   : > { %v1802_v27 = vpop.f32.mrf.mxu1 }
 0x2a3   : > { %v1956_v63 = vpop.f32.mrf.mxu3 }
 0x2a4   : > { %v1878_v15 = vpop.f32.mrf.mxu2 }
 0x2a5   : > { %v1898_v53 = vadd.f32 %v1878_v15, %v1820_v57 }
 0x2a6   : > { %v2036_v52 = vpop.f32.mrf.mxu0 }
 0x2a7   : > { %v1976_v6 = vadd.f32 %v1956_v63, %v1898_v53 }
 0x2a9   : > { %v2054_v50 = vadd.f32 %v2034_v18, %v1976_v6 }
 0x2aa   : > { %v1805_v13 = vpop.f32.mrf.mxu1 }
 0x2ab   : > { %v1822_v55 = vadd.f32 %v1805_v13, %v1752_v9  ;;  %v1958_v9 = vpop.f32.mrf.mxu3 }
 0x2ac   : > { %v1880_v62 = vpop.f32.mrf.mxu2 }
 0x2ae   : > { %v2039_v16 = vpop.f32.mrf.mxu0 }
 0x2b2   : > { %v1807_v59 = vpop.f32.mrf.mxu1 }
 0x2b3   : > { %v1961_v45 = vpop.f32.mrf.mxu3  ;;  %v1823_v18 = vadd.f32 %v1807_v59, %v1753_v12  ;;  %v6073_v12 = vld [vmem:[#allocation38_spill] sm:$0xff] }
 0x2b4   : > { %v1883_v11 = vpop.f32.mrf.mxu2 }
 0x2b5   : > { %v1900_v13 = vadd.f32 %v1883_v11, %v1822_v55  ;;  %v1579_v55 = vadd.f32 %v5187_v25, %v5185_v37 }
 0x2b7   : > { %v1978_v26 = vadd.f32 %v1961_v45, %v1900_v13  ;;  %v1677_v59 = vadd.f32 %v5189_v29, %v1579_v55  ;;  %v3590_v13 = vld [vmem:[#allocation9 + $0x18] sm:$0xff] }
 0x2b8   : > { %2323 = vmatpush.bf16.msrb.mxu3 %v3590_v13  ;;  %v6076_v55 = vld [vmem:[#allocation39_spill] sm:$0xff] }
 0x2b9   : > { %v2056_v54 = vadd.f32 %v2039_v16, %v1978_v26 }
 0x2ba   : > { %v1810_v36 = vpop.f32.mrf.mxu1 }
 0x2bb   : > { %v5203_v32 = vadd.f32 %v1810_v36, %v1754_v51  ;;  %v1821_v51 = vadd.f32 %v1802_v27, %v1751_v38  ;;  %v1963_v27 = vpop.f32.mrf.mxu3 }
 0x2bc   : > { %v1885_v47 = vpop.f32.mrf.mxu2 }
 0x2bd   : > { %v1899_v33 = vadd.f32 %v1880_v62, %v1821_v51  ;;  %v2041_v62 = vpop.f32.mrf.mxu0 }
 0x2bf   : > { %v1977_v30 = vadd.f32 %v1958_v9, %v1899_v33  ;;  %v1901_v9 = vadd.f32 %v1885_v47, %v1823_v18 }
 0x2c1   : > { %v2055_v36 = vadd.f32 %v2036_v52, %v1977_v30  ;;  %v1979_v38 = vadd.f32 %v1963_v27, %v1901_v9 }
 0x2c2   : > { %v5207_v24 = vpop.f32.mrf.mxu1 }
 0x2c3   : > { %v1966_v53 = vpop.f32.mrf.mxu3 }
 0x2c5   : > { %v2044_v41 = vpop.f32.mrf.mxu0 }
 0x2ca   : > { %v1815_v3 = vpop.f32.mrf.mxu1 }
 0x2cb   : > { %v5209_v58 = vadd.f32 %v1815_v3, %v1756_v31  ;;  %v5215_v31 = vld [vmem:[#allocation7] ss:$0 sm:$0xff]  ;;  %v1888_v3 = vpop.f32.mrf.mxu2 }
 0x2cc   : > { %v1902_v30 = vadd.f32 %v1888_v3, %v5203_v32  ;;  %v6071_v32 = vld [vmem:[#allocation48_spill] sm:$0xff] }
 0x2d2   : > { %v5211_v8 = vpop.f32.mrf.mxu1 }
 0x2d3   : > { %v1890_v16 = vpop.f32.mrf.mxu2 }
 0x2da   : > { %v2112_v7 = vpop.f32.mrf.mxu1 }
 0x2db   : > { %v2132_v1 = vadd.f32 %v2112_v7, %v2054_v50  ;;  %v1755_v7 = vadd.f32 %v5191_v46, %v1677_v59  ;;  %v6069_v46 = vld [vmem:[#allocation53_spill] sm:$0xff] }
 0x2dd   : > { %v2144_v15 = vadd.f32 %v5215_v31, %v2132_v1  ;;  %v2057_v1 = vadd.f32 %v2041_v62, %v1979_v38  ;;  %v6074_v62 = vld [vmem:[#allocation44_spill] sm:$0xff]  ;;  %v6079_v38 = vld [vmem:[#allocation55_spill] sm:$0xff]  ;;  %v1825_v13 = vadd.f32 %v5207_v24, %v1755_v7 }
 0x2df   : > { %v5221_v2 = vmax.f32 %v2144_v15, 0.0 }
 0x2e1   : > { %v5885_v51 = vrot.slane %v5221_v2, 7  ;;  %v5884_v29 = vrot.slane %v5221_v2, 1 }
 0x2e2   : > { %v2114_v57 = vpop.f32.mrf.mxu1 }
 0x2e3   : > { %v2133_v61 = vadd.f32 %v2114_v57, %v2055_v36  ;;  %v3598_v36 = vld [vmem:[#allocation9 + $0x58] sm:$0xff] }
 0x2e4   : > { %2425 = vmatpush.bf16.msrb.mxu0 %v3598_v36 }
 0x2e5   : > { %v2145_v63 = vadd.f32 %v5215_v31, %v2133_v61  ;;  %v3602_v61 = vld [vmem:[#allocation9 + $0x78] sm:$0xff] }
 0x2e6   : > { %2519 = vmatpush.bf16.msrb.mxu1 %v3602_v61  ;;  %v3601_v61 = vld [vmem:[#allocation9 + $0x70] sm:$0xff] }
 0x2e7   : > { %v5223_v23 = vmax.f32 %v2145_v63, 0.0 }
 0x2e9   : > { %v2161_v20 = vrot.slane %v5223_v23, 7  ;;  %v2349_v33 = vrot.slane %v5223_v23, 1  ;;  %v5255_v57 = vmul.f32 %v5223_v23, %v6069_v46 }
 0x2ea   : > { %v2117_v52 = vpop.f32.mrf.mxu1  ;;  %2520 = vmatpush.bf16.msrb.mxu1 %v3601_v61  ;;  %v3587_v61 = vld [vmem:[#allocation9] sm:$0xff] }
 0x2eb   : > { %v2134_v11 = vadd.f32 %v2117_v52, %v2056_v54  ;;  %v5238_v25 = vsel %vm493_vm2, %v5885_v51, %v2161_v20  ;;  %v5251_v34 = vsel %vm707_vm3, %v5884_v29, %v2349_v33  ;;  %6070 = vst [vmem:[#allocation76_spill] sm:$0xff] %v5255_v57  ;;  %v6077_v54 = vld [vmem:[#allocation52_spill] sm:$0xff] }
 0x2ec   : > { %v5263_v26 = vmul.f32 %v5238_v25, %v6073_v12  ;;  %v5273_v3 = vmul.f32 %v5238_v25, %v6074_v62  ;;  %v3600_v12 = vld [vmem:[#allocation9 + $0x68] sm:$0xff] }
 0x2ed   : > { %v2146_v6 = vadd.f32 %v5215_v31, %v2134_v11 }
 0x2ee   : > { %6075 = vst [vmem:[#allocation26_spill] sm:$0xff] %v5273_v3  ;;  %2521 = vmatpush.bf16.msrb.mxu1 %v3600_v12 }
 0x2ef   : > { %v5240_v45 = vmax.f32 %v2146_v6, 0.0  ;;  %v5290_v6 = vmul.f32 %v5251_v34, %v6079_v38  ;;  %v1893_v38 = vpop.f32.mrf.mxu2 }
 0x2f1   : > { %v2162_v47 = vrot.slane %v5240_v45, 7  ;;  %v2350_v50 = vrot.slane %v5240_v45, 1  ;;  %v5259_v27 = vmul.f32 %v5240_v45, %v6071_v32  ;;  %6080 = vst [vmem:[#allocation41_spill] sm:$0xff] %v5290_v6  ;;  %v3589_v32 = vld [vmem:[#allocation9 + $0x10] sm:$0xff] }
 0x2f2   : > { %v2119_v15 = vpop.f32.mrf.mxu1  ;;  %2324 = vmatpush.bf16.msrb.mxu3 %v3589_v32  ;;  %v6084_v32 = vld [vmem:[#allocation57_spill] sm:$0xff] }
 0x2f3   : > { %6072 = vst [vmem:[#allocation35_spill] sm:$0xff] %v5259_v27  ;;  %v2135_v63 = vadd.f32 %v2119_v15, %v2057_v1  ;;  %v5269_v18 = vsel %vm493_vm2, %v2161_v20, %v2162_v47  ;;  %v5285_v11 = vsel %vm707_vm3, %v2349_v33, %v2350_v50  ;;  %v1980_v20 = vadd.f32 %v1966_v53, %v1902_v30  ;;  %v6081_v1 = vld [vmem:[#allocation56_spill] sm:$0xff]  ;;  %v1968_v30 = vpop.f32.mrf.mxu3  ;;  %v3597_v15 = vld [vmem:[#allocation9 + $0x50] sm:$0xff] }
 0x2f4   : > { %v5277_v9 = vmul.f32 %v5269_v18, %v6076_v55  ;;  %v5281_v52 = vmul.f32 %v5269_v18, %v6077_v54  ;;  %v5294_v0 = vmul.f32 %v5285_v11, %v6081_v1  ;;  %2426 = vmatpush.bf16.msrb.mxu0 %v3597_v15  ;;  %v1584_v55 = vadd.f32 %v5199_v42, %v5197_v35  ;;  %v3588_v53 = vld [vmem:[#allocation9 + $0x8] sm:$0xff] }
 0x2f5   : > { %v2147_v59 = vadd.f32 %v5215_v31, %v2135_v63  ;;  %v1903_v63 = vadd.f32 %v1890_v16, %v1825_v13  ;;  %v2058_v7 = vadd.f32 %v2044_v41, %v1980_v20  ;;  %v3596_v33 = vld [vmem:[#allocation9 + $0x48] sm:$0xff]  ;;  %v6082_v20 = vld [vmem:[#allocation51_spill] sm:$0xff] }
 0x2f6   : > { %6078 = vst [vmem:[#allocation22_spill] sm:$0xff] %v5281_v52  ;;  %v5318_v13 = vmul.f32 %v5285_v11, %v6082_v20  ;;  %2325 = vmatpush.bf16.msrb.mxu3 %v3588_v53  ;;  %v3604_v52 = vld [vmem:[#allocation9 + $0x88] sm:$0xff] }
 0x2f7   : > { %v5303_v46 = vmax.f32 %v2147_v59, 0.0  ;;  %v2046_v59 = vpop.f32.mrf.mxu0  ;;  %v1981_v41 = vadd.f32 %v1968_v30, %v1903_v63  ;;  %v1904_v30 = vadd.f32 %v1893_v38, %v5209_v58  ;;  %v3599_v63 = vld [vmem:[#allocation9 + $0x60] sm:$0xff]  ;;  %v6086_v58 = vld [vmem:[#allocation61_spill] sm:$0xff] }
 0x2f8   : > { %6083 = vst [vmem:[#allocation34_spill] sm:$0xff] %v5318_v13  ;;  %2427 = vmatpush.bf16.msrb.mxu0 %v3596_v33  ;;  %2522 = vmatpush.bf16.msrb.mxu1 %v3599_v63  ;;  %v1895_v63 = vpop.f32.mrf.mxu2 }
 0x2f9   : > { %v2351_v24 = vrot.slane %v5303_v46, 1  ;;  %v2163_v42 = vrot.slane %v5303_v46, 7  ;;  %v2059_v62 = vadd.f32 %v2046_v59, %v1981_v41 }
 0x2fa   : > { %v2122_v54 = vpop.f32.mrf.mxu1  ;;  %2326 = vmatpush.bf16.msrb.mxu3 %v3587_v61 }
 0x2fb   : > { %v2136_v1 = vadd.f32 %v2122_v54, %v2058_v7  ;;  %v5314_v16 = vsel %vm707_vm3, %v2350_v50, %v2351_v24  ;;  %v3595_v7 = vld [vmem:[#allocation9 + $0x40] sm:$0xff]  ;;  %v1679_v50 = vadd.f32 %v5201_v40, %v1584_v55  ;;  %v3606_v54 = vld [vmem:[#allocation9 + $0x98] sm:$0xff]  ;;  %v1971_v49 = vpop.f32.mrf.mxu3  ;;  %v5338_v40 = vsel %vm493_vm2, %v2162_v47, %v2163_v42 }
 0x2fc   : > { %v5322_v35 = vmul.f32 %v5314_v16, %v6084_v32  ;;  %2605 = vmatpush.bf16.msrb.mxu2 %v3606_v54  ;;  %2428 = vmatpush.bf16.msrb.mxu0 %v3595_v7  ;;  %v1982_v59 = vadd.f32 %v1971_v49, %v1904_v30  ;;  %v6088_v47 = vld [vmem:[#allocation60_spill] sm:$0xff]  ;;  %v6090_v7 = vld [vmem:[#allocation43_spill] sm:$0xff] }
 0x2fd   : > { %v2148_v15 = vadd.f32 %v5215_v31, %v2136_v1  ;;  %v1757_v55 = vadd.f32 %v5205_v19, %v1679_v50  ;;  %v5355_v61 = vmul.f32 %v5303_v46, %v6088_v47  ;;  %v5359_v54 = vmul.f32 %v5338_v40, %v6090_v7  ;;  %v6091_v19 = vld [vmem:[#allocation45_spill] sm:$0xff]  ;;  %v6094_v50 = vld [vmem:[#allocation63_spill] sm:$0xff]  ;;  %v6098_v7 = vld [vmem:[#allocation54_spill] sm:$0xff] }
 0x2fe   : > { %6085 = vst [vmem:[#allocation30_spill] sm:$0xff] %v5322_v35 }
 0x2ff   : > { %v5330_v32 = vmax.f32 %v2148_v15, 0.0  ;;  %6089 = vst [vmem:[#allocation29_spill] sm:$0xff] %v5355_v61  ;;  %v2049_v30 = vpop.f32.mrf.mxu0  ;;  %v1827_v20 = vadd.f32 %v5211_v8, %v1757_v55 }
 0x300   : > { %v2060_v51 = vadd.f32 %v2049_v30, %v1982_v59  ;;  %v6102_v59 = vld [vmem:[#allocation62_spill] sm:$0xff] }
 0x301   : > { %v2164_v53 = vrot.slane %v5330_v32, 7  ;;  %v2352_v33 = vrot.slane %v5330_v32, 1  ;;  %v5342_v12 = vmul.f32 %v5330_v32, %v6086_v58  ;;  %v1905_v29 = vadd.f32 %v1895_v63, %v1827_v20  ;;  %v6100_v20 = vld [vmem:[#allocation64_spill] sm:$0xff] }
 0x302   : > { %v2124_v38 = vpop.f32.mrf.mxu1 }
 0x303   : > { %6087 = vst [vmem:[#allocation42_spill] sm:$0xff] %v5342_v12  ;;  %v2137_v1 = vadd.f32 %v2124_v38, %v2059_v62  ;;  %v5347_v41 = vsel %vm493_vm2, %v2163_v42, %v2164_v53  ;;  %v5351_v15 = vsel %vm707_vm3, %v2351_v24, %v2352_v33  ;;  %v6092_v62 = vld [vmem:[#allocation58_spill] sm:$0xff]  ;;  %v6096_v38 = vld [vmem:[#allocation59_spill] sm:$0xff]  ;;  %v1973_v8 = vpop.f32.mrf.mxu3 }
 0x304   : > { %v5363_v49 = vmul.f32 %v5347_v41, %v6091_v19  ;;  %v5367_v42 = vmul.f32 %v5314_v16, %v6092_v62  ;;  %v5371_v24 = vmul.f32 %v5351_v15, %v6094_v50  ;;  %v5376_v47 = vmul.f32 %v5338_v40, %v6096_v38  ;;  %v3605_v38 = vld [vmem:[#allocation9 + $0x90] sm:$0xff] }
 0x305   : > { %v2149_v58 = vadd.f32 %v5215_v31, %v2137_v1  ;;  %v5380_v19 = vmul.f32 %v5347_v41, %v6098_v7  ;;  %v1983_v36 = vadd.f32 %v1973_v8, %v1905_v29  ;;  %v5404_v63 = vmul.f32 %v5351_v15, %v6100_v20  ;;  %2606 = vmatpush.bf16.msrb.mxu2 %v3605_v38  ;;  %v6104_v20 = vld [vmem:[#allocation70_spill] sm:$0xff] }
 0x306   : > { %6093 = vst [vmem:[#allocation18_spill] sm:$0xff] %v5367_v42 }
 0x307   : > { %6095 = vst [vmem:[#allocation46_spill] sm:$0xff] %v5371_v24  ;;  %v5389_v1 = vmax.f32 %v2149_v58, 0.0  ;;  %v2051_v62 = vpop.f32.mrf.mxu0  ;;  %v6120_v24 = vld [vmem:[#allocation21_spill] sm:$0xff] }
 0x308   : > { %6097 = vst [vmem:[#allocation40_spill] sm:$0xff] %v5376_v47 }
 0x309   : > { %6099 = vst [vmem:[#allocation37_spill] sm:$0xff] %v5380_v19  ;;  %v2353_v7 = vrot.slane %v5389_v1, 1  ;;  %v2165_v58 = vrot.slane %v5389_v1, 7  ;;  %2607 = vmatpush.bf16.msrb.mxu2 %v3604_v52 }
 0x30a   : > { %v2127_v13 = vpop.f32.mrf.mxu1  ;;  %6101 = vst [vmem:[#allocation47_spill] sm:$0xff] %v5404_v63 }
 0x30b   : > { %v2138_v55 = vadd.f32 %v2127_v13, %v2060_v51  ;;  %v5398_v50 = vsel %vm707_vm3, %v2352_v33, %v2353_v7  ;;  %v2061_v13 = vadd.f32 %v2051_v62, %v1983_v36  ;;  %v6106_v62 = vld [vmem:[#allocation65_spill] sm:$0xff] }
 0x30c   : > { %v5408_v30 = vmul.f32 %v5398_v50, %v6102_v59  ;;  %v5434_v29 = vmul.f32 %v5389_v1, %v6106_v62  ;;  %v6114_v62 = vld [vmem:[#allocation67_spill] sm:$0xff] }
 0x30d   : > { %v2150_v35 = vadd.f32 %v5215_v31, %v2138_v55  ;;  %v5418_v55 = vsel %vm493_vm2, %v2164_v53, %v2165_v58  ;;  %v6108_v53 = vld [vmem:[#allocation49_spill] sm:$0xff] }
 0x30e   : > { %6103 = vst [vmem:[#allocation88_spill] sm:$0xff] %v5408_v30  ;;  %v5438_v63 = vmul.f32 %v5418_v55, %v6108_v53  ;;  %v5455_v47 = vmul.f32 %v5418_v55, %v6114_v62  ;;  %v6116_v53 = vld [vmem:[#allocation66_spill] sm:$0xff] }
 0x30f   : > { %v5410_v51 = vmax.f32 %v2150_v35, 0.0  ;;  %6107 = vst [vmem:[#allocation85_spill] sm:$0xff] %v5434_v29  ;;  %v6122_v29 = vld [vmem:[#allocation33_spill] sm:$0xff] }
 0x310   : > { %6115 = vst [vmem:[#allocation83_spill] sm:$0xff] %v5455_v47 }
 0x311   : > { %v2166_v33 = vrot.slane %v5410_v51, 7  ;;  %v2354_v8 = vrot.slane %v5410_v51, 1  ;;  %v5422_v59 = vmul.f32 %v5410_v51, %v6104_v20  ;;  %v6109_v20 = vld [vmem:[#allocation50_spill] sm:$0xff] }
 0x312   : > { %v2129_v61 = vpop.f32.mrf.mxu1 }
 0x313   : > { %6105 = vst [vmem:[#allocation87_spill] sm:$0xff] %v5422_v59  ;;  %v2139_v35 = vadd.f32 %v2129_v61, %v2061_v13  ;;  %v5426_v38 = vsel %vm493_vm2, %v2165_v58, %v2166_v33  ;;  %v5430_v36 = vsel %vm707_vm3, %v2353_v7, %v2354_v8  ;;  %v6110_v61 = vld [vmem:[#allocation69_spill] sm:$0xff]  ;;  %v6112_v13 = vld [vmem:[#allocation68_spill] sm:$0xff]  ;;  %v6123_v59 = vld [vmem:[#allocation74_spill] sm:$0xff] }
 0x314   : > { %v5442_v30 = vmul.f32 %v5426_v38, %v6109_v20  ;;  %v5446_v58 = vmul.f32 %v5398_v50, %v6110_v61  ;;  %v5450_v7 = vmul.f32 %v5430_v36, %v6112_v13  ;;  %v5459_v19 = vmul.f32 %v5426_v38, %v6116_v53  ;;  %v6121_v13 = vld [vmem:[#allocation19_spill] sm:$0xff] }
 0x315   : > { %v2151_v12 = vadd.f32 %v5215_v31, %v2139_v35  ;;  %v6119_v35 = vld [vmem:[#allocation24_spill] sm:$0xff]  ;;  %v2459_v31 = vmul.f32 %v5238_v25, %v6122_v29  ;;  %v6126_v25 = vld [vmem:[#allocation27_spill] sm:$0xff] }
 0x316   : > { %6111 = vst [vmem:[#allocation86_spill] sm:$0xff] %v5446_v58  ;;  %v2197_v62 = vmul.f32 %v5221_v2, %v6119_v35 }
 0x317   : > { %6113 = vst [vmem:[#allocation89_spill] sm:$0xff] %v5450_v7  ;;  %v5467_v42 = vmax.f32 %v2151_v12, 0.0  ;;  %v2365_v12 = vmul.f32 %v5251_v34, %v6121_v13  ;;  %v6128_v7 = vld [vmem:[#allocation31_spill] sm:$0xff] }
 0x318   : > { %6117 = vst [vmem:[#allocation82_spill] sm:$0xff] %v5459_v19  ;;  %v6125_v19 = vrot.slane %v5221_v2, 1 }
 0x319   : > { %6118 = vst [vmem:[#allocation84_spill] sm:$0xff] %v5467_v42  ;;  %v2167_v53 = vrot.slane %v5467_v42, 7  ;;  %v2196_v57 = vmul.f32 %v5467_v42, %v6120_v24  ;;  %v2355_v20 = vrot.slane %v5467_v42, 1  ;;  %v5485_v35 = vmul.f32 %v5467_v42, %v6123_v59  ;;  %v6127_v59 = vld [vmem:[#allocation28_spill] sm:$0xff] }
 0x31a   : > { %v6124_v24 = vrot.slane %v5221_v2, 7 }
 0x31b   : > { %v5489_v47 = vsel %vm493_vm2, %v2166_v33, %v2167_v53  ;;  %v2363_v13 = vsel %vm707_vm3, %v2355_v20, %v6125_v19  ;;  %v2204_v58 = vpack.c.bf16 %v2197_v62, %v2196_v57  ;;  %v6129_v33 = vld [vmem:[#allocation32_spill] sm:$0xff]  ;;  %v6131_v57 = vld [vmem:[#allocation73_spill] sm:$0xff]  ;;  %v5518_v62 = vmul.f32 %v5221_v2, %v6011_v14 }
 0x31c   : > { %v2175_v61 = vsel %vm493_vm2, %v2167_v53, %v6124_v24  ;;  %v2176_v29 = vmul.f32 %v5489_v47, %v6126_v25  ;;  %v2364_v27 = vmul.f32 %v2363_v13, %v6128_v7  ;;  %v5507_v53 = vsel %vm707_vm3, %v2354_v8, %v2355_v20  ;;  %v6130_v24 = vld [vmem:[#allocation77_spill] sm:$0xff]  ;;  %v6133_v8 = vld [vmem:[#allocation75_spill] sm:$0xff]  ;;  %v6135_v14 = vld [vmem:[#allocation72_spill] sm:$0xff] }
 0x31d   : > { %v2177_v42 = vmul.f32 %v2175_v61, %v6127_v59  ;;  %v2458_v3 = vmul.f32 %v2175_v61, %v6129_v33  ;;  %3403 = vmatmul.msk.bf16.vlgmr.msra.gmra.mxu2 %vm2241_vm5, %v2204_v58  ;;  %v5510_v6 = vmul.f32 %v2363_v13, %v6130_v24  ;;  %v5514_v19 = vmul.f32 %v5489_v47, %v6131_v57  ;;  %v6132_v58 = vld [vmem:[#allocation78_spill] sm:$0xff]  ;;  %v6134_v24 = vld [vmem:[#allocation80_spill] sm:$0xff] }
 0x31e   : > { %v2372_v25 = vpack.c.bf16 %v2365_v12, %v2364_v27  ;;  %v5522_v37 = vmul.f32 %v5507_v53, %v6132_v58  ;;  %v5525_v20 = vmul.f32 %v2175_v61, %v6133_v8  ;;  %v2837_v33 = vpack.c.bf16 %v5518_v62, %v5485_v35  ;;  %v6139_v58 = vld [vmem:[#allocation20_spill] sm:$0xff]  ;;  %v6181_v62 = vld [vmem:[#allocation47_spill] sm:$0xff] }
 0x31f   : > { %v2184_v7 = vpack.c.bf16 %v2177_v42, %v2176_v29  ;;  %v2466_v59 = vpack.c.bf16 %v2459_v31, %v2458_v3  ;;  %v5531_v57 = vmul.f32 %v5251_v34, %v6134_v24  ;;  %v5537_v27 = vmul.f32 %v5430_v36, %v6135_v14  ;;  %v6136_v3 = vld [vmem:[#allocation71_spill] sm:$0xff]  ;;  %v6180_v35 = vld [vmem:[#allocation88_spill] sm:$0xff] }
 0x320   : > { %3443 = vmatmul.msk.bf16.vlgmr.msrb.gmra.mxu0 %vm2241_vm5, %v2372_v25  ;;  %v5541_v52 = vmul.f32 %v5507_v53, %v6136_v3  ;;  %v6137_v42 = vld [vmem:[#allocation79_spill] sm:$0xff]  ;;  %v2649_v34 = vpack.c.bf16 %v5510_v6, %v5522_v37  ;;  %v2743_v31 = vpack.c.bf16 %v5525_v20, %v5514_v19  ;;  %v2461_v24 = vmul.f32 %v5338_v40, %v6021_v28  ;;  %v6140_v3 = vld [vmem:[#allocation36_spill] sm:$0xff]  ;;  %v6142_v40 = vld [vmem:[#allocation17_spill] sm:$0xff] }
 0x321   : > { %3423 = vmatmul.msk.bf16.vlgmr.msrb.gmra.mxu3 %vm2241_vm5, %v2184_v7  ;;  %v5544_v61 = vmul.f32 %v2363_v13, %v6137_v42  ;;  %3463 = vmatmul.msk.bf16.vlgmr.msrb.gmra.mxu1 %vm2241_vm5, %v2466_v59  ;;  %v6138_v7 = vld [vmem:[#allocation23_spill] sm:$0xff]  ;;  %v2198_v13 = vmul.f32 %v5223_v23, %v6139_v58  ;;  %v2367_v59 = vmul.f32 %v5314_v16, %v6020_v44  ;;  %v3617_v16 = vld [vmem:[#allocation9 + $0xf0] sm:$0xff] }
 0x322   : > { %v2199_v25 = vmul.f32 %v5240_v45, %v6138_v7  ;;  %v2366_v14 = vmul.f32 %v5285_v11, %v6022_v48  ;;  %v2460_v42 = vmul.f32 %v5269_v18, %v6140_v3  ;;  %v3603_v29 = vld [vmem:[#allocation9 + $0x80] sm:$0xff]  ;;  %v6141_v58 = vpack.c.bf16 %v5277_v9, %v5263_v26  ;;  %v3610_v44 = vld [vmem:[#allocation9 + $0xb8] sm:$0xff]  ;;  %v3609_v11 = vld [vmem:[#allocation9 + $0xb0] sm:$0xff] }
 0x323   : > { %2608 = vmatpush.bf16.msrb.mxu2 %v3603_v29  ;;  %v3614_v28 = vld [vmem:[#allocation9 + $0xd8] sm:$0xff]  ;;  %2699 = vmatpush.bf16.msra.mxu3 %v3610_v44  ;;  %v3613_v18 = vld [vmem:[#allocation9 + $0xd0] sm:$0xff]  ;;  %v2201_v29 = vmul.f32 %v5330_v32, %v6142_v40  ;;  %v3608_v26 = vld [vmem:[#allocation9 + $0xa8] sm:$0xff]  ;;  %v2462_v3 = vmul.f32 %v5347_v41, %v6030_v17  ;;  %v2202_v17 = vmul.f32 %v5389_v1, %v6033_v10 }
 0x324   : > { %v2205_v8 = vpack.c.bf16 %v2199_v25, %v2198_v13  ;;  %v2373_v7 = vpack.c.bf16 %v2367_v59, %v2366_v14  ;;  %v2467_v12 = vpack.c.bf16 %v2461_v24, %v2460_v42  ;;  %v3618_v48 = vld [vmem:[#allocation9 + $0xf8] sm:$0xff]  ;;  %2793 = vmatpush.bf16.msra.mxu0 %v3614_v28  ;;  %v3612_v9 = vld [vmem:[#allocation9 + $0xc8] sm:$0xff]  ;;  %v2369_v59 = vmul.f32 %v5398_v50, %v6027_v60  ;;  %v3607_v42 = vld [vmem:[#allocation9 + $0xa0] sm:$0xff] }
 0x325   : > { %2887 = vmatpush.bf16.msra.mxu1 %v3618_v48  ;;  %v3616_v25 = vld [vmem:[#allocation9 + $0xe8] sm:$0xff]  ;;  %v2463_v24 = vmul.f32 %v5418_v55, %v6028_v22  ;;  %v2368_v14 = vmul.f32 %v5351_v15, %v6029_v21  ;;  %v3615_v44 = vld [vmem:[#allocation9 + $0xe0] sm:$0xff]  ;;  %v3622_v60 = vld [vmem:[#allocation9 + $0x118] sm:$0xff]  ;;  %v6144_v22 = vpack.c.bf16 %v5363_v49, %v5359_v54  ;;  %v2203_v21 = vmul.f32 %v5410_v51, %v6032_v56 }
 0x326   : > { %v6143_v13 = vld [vmem:[#allocation16_spill] sm:$0xff]  ;;  %v2371_v41 = vmul.f32 %v5507_v53, %v6034_v39  ;;  %v2465_v54 = vmul.f32 %v5489_v47, %v6035_v43  ;;  %v2370_v49 = vmul.f32 %v5430_v36, %v6036_v5  ;;  %v2464_v55 = vmul.f32 %v5426_v38, %v6037_v4  ;;  %v3621_v28 = vld [vmem:[#allocation9 + $0x110] sm:$0xff]  ;;  %v6152_v38 = vld [vmem:[#allocation35_spill] sm:$0xff] }
 0x327   : > { %2700 = vmatpush.bf16.msra.mxu3 %v3609_v11  ;;  %v2468_v50 = vpack.c.bf16 %v2463_v24, %v2462_v3  ;;  %2981 = vmatpush.bf16.msra.mxu2 %v3622_v60  ;;  %v2207_v15 = vpack.c.bf16 %v2203_v21, %v2202_v17  ;;  %v6145_v10 = vpack.c.bf16 %v5442_v30, %v5438_v63  ;;  %v3620_v43 = vld [vmem:[#allocation9 + $0x108] sm:$0xff]  ;;  %v6149_v47 = vld [vmem:[#allocation22_spill] sm:$0xff] }
 0x328   : > { %2794 = vmatpush.bf16.msra.mxu0 %v3613_v18  ;;  %v2375_v56 = vpack.c.bf16 %v2371_v41, %v2370_v49  ;;  %v2469_v48 = vpack.c.bf16 %v2465_v54, %v2464_v55  ;;  %v6146_v39 = vpack.c.bf16 %v5223_v23, %v5221_v2  ;;  %v6147_v5 = vld [vmem:[#allocation41_spill] sm:$0xff]  ;;  %v6150_v63 = vld [vmem:[#allocation26_spill] sm:$0xff]  ;;  %v6153_v36 = vld [vmem:[#allocation76_spill] sm:$0xff]  ;;  %v6155_v2 = vpack.c.bf16 %v5303_v46, %v5240_v45 }
 0x329   : > { %2888 = vmatpush.bf16.msra.mxu1 %v3617_v16  ;;  %v6148_v4 = vpack.c.bf16 %v5294_v0, %v6147_v5  ;;  %v6151_v30 = vpack.c.bf16 %v6149_v47, %v6150_v63  ;;  %v6154_v53 = vpack.c.bf16 %v6152_v38, %v6153_v36  ;;  %v3619_v23 = vld [vmem:[#allocation9 + $0x100] sm:$0xff]  ;;  %v6156_v0 = vld [vmem:[#allocation46_spill] sm:$0xff]  ;;  %v6159_v16 = vld [vmem:[#allocation37_spill] sm:$0xff]  ;;  %v6165_v45 = vpack.c.bf16 %v5389_v1, %v5330_v32 }
 0x32a   : > { %v6157_v11 = vld [vmem:[#allocation18_spill] sm:$0xff]  ;;  %v6160_v40 = vld [vmem:[#allocation40_spill] sm:$0xff]  ;;  %v6173_v3 = vld [vmem:[#allocation85_spill] sm:$0xff] }
 0x32b   : > { %2701 = vmatpush.bf16.msra.mxu3 %v3608_v26  ;;  %2982 = vmatpush.bf16.msra.mxu2 %v3621_v28  ;;  %v6158_v18 = vpack.c.bf16 %v6156_v0, %v6157_v11  ;;  %v6162_v26 = vld [vmem:[#allocation42_spill] sm:$0xff] }
 0x32c   : > { %2795 = vmatpush.bf16.msra.mxu0 %v3612_v9  ;;  %v6163_v9 = vld [vmem:[#allocation29_spill] sm:$0xff] }
 0x32d   : > { %3404 = vmatmul.msk.bf16.gmra.mxu2 %vm2241_vm5, %v2205_v8  ;;  %2889 = vmatpush.bf16.msra.mxu1 %v3616_v25  ;;  %v6164_v25 = vpack.c.bf16 %v6162_v26, %v6163_v9 }
 0x32f   : > { %2702 = vmatpush.bf16.msra.mxu3 %v3607_v42  ;;  %2983 = vmatpush.bf16.msra.mxu2 %v3620_v43  ;;  %v6183_v43 = vpack.c.bf16 %v5541_v52, %v5537_v27  ;;  %v6184_v27 = vpack.c.bf16 %v5531_v57, %v5544_v61 }
 0x330   : > { %3444 = vmatmul.msk.bf16.gmra.mxu0 %vm2241_vm5, %v2373_v7  ;;  %v3611_v7 = vld [vmem:[#allocation9 + $0xc0] sm:$0xff] }
 0x331   : > { %3424 = vmatmul.msk.bf16.gmra.mxu3 %vm2241_vm5, %v6141_v58  ;;  %3464 = vmatmul.msk.bf16.gmra.mxu1 %vm2241_vm5, %v2467_v12  ;;  %v2200_v12 = vmul.f32 %v5303_v46, %v6143_v13  ;;  %v2374_v58 = vpack.c.bf16 %v2369_v59, %v2368_v14  ;;  %v6166_v46 = vld [vmem:[#allocation89_spill] sm:$0xff]  ;;  %v6167_v13 = vld [vmem:[#allocation86_spill] sm:$0xff]  ;;  %v6172_v14 = vld [vmem:[#allocation87_spill] sm:$0xff] }
 0x332   : > { %2796 = vmatpush.bf16.msra.mxu0 %v3611_v7  ;;  %2890 = vmatpush.bf16.msra.mxu1 %v3615_v44  ;;  %v6169_v59 = vld [vmem:[#allocation82_spill] sm:$0xff]  ;;  %v6174_v42 = vpack.c.bf16 %v6172_v14, %v6173_v3  ;;  %v6175_v7 = vld [vmem:[#allocation84_spill] sm:$0xff] }
 0x333   : > { %v2206_v8 = vpack.c.bf16 %v2201_v29, %v2200_v12  ;;  %2984 = vmatpush.bf16.msra.mxu2 %v3619_v23  ;;  %v6161_v29 = vpack.c.bf16 %v6159_v16, %v6160_v40  ;;  %v6168_v12 = vpack.c.bf16 %v6166_v46, %v6167_v13  ;;  %v6176_v32 = vpack.c.bf16 %v6175_v7, %v5410_v51  ;;  %v6178_v51 = vld [vmem:[#allocation34_spill] sm:$0xff] }
 0x33d   : > { %3405 = vmatmul.msk.bf16.gmra.mxu2 %vm2241_vm5, %v2206_v8  ;;  %v6170_v8 = vld [vmem:[#allocation83_spill] sm:$0xff] }
 0x33e   : > { %v6171_v24 = vpack.c.bf16 %v6169_v59, %v6170_v8 }
 0x340   : > { %3445 = vmatmul.msk.bf16.gmra.mxu0 %vm2241_vm5, %v2374_v58  ;;  %v6177_v58 = vld [vmem:[#allocation30_spill] sm:$0xff] }
 0x341   : > { %3425 = vmatmul.msk.bf16.gmra.mxu3 %vm2241_vm5, %v6144_v22  ;;  %3465 = vmatmul.msk.bf16.gmra.mxu1 %vm2241_vm5, %v2468_v50  ;;  %v6179_v44 = vpack.c.bf16 %v6177_v58, %v6178_v51 }
 0x34d   : > { %3406 = vmatmul.msk.bf16.gmra.mxu2 %vm2241_vm5, %v2207_v15 }
 0x350   : > { %3446 = vmatmul.msk.bf16.gmra.mxu0 %vm2241_vm5, %v2375_v56 }
 0x351   : > { %3426 = vmatmul.msk.bf16.gmra.mxu3 %vm2241_vm5, %v6145_v10  ;;  %3466 = vmatmul.msk.bf16.gmra.mxu1 %vm2241_vm5, %v2469_v48 }
 0x35d   : > { %3483 = vmatmul.msk.bf16.vlgmr.msrb.gmra.mxu2 %vm2241_vm5, %v6146_v39 }
 0x360   : > { %3523 = vmatmul.msk.bf16.vlgmr.msra.gmra.mxu0 %vm2241_vm5, %v6151_v30 }
 0x361   : > { %3503 = vmatmul.msk.bf16.vlgmr.msra.gmra.mxu3 %vm2241_vm5, %v6148_v4  ;;  %3543 = vmatmul.msk.bf16.vlgmr.msra.gmra.mxu1 %vm2241_vm5, %v6154_v53 }
 0x36d   : > { %3484 = vmatmul.msk.bf16.gmra.mxu2 %vm2241_vm5, %v6155_v2 }
 0x370   : > { %3524 = vmatmul.msk.bf16.gmra.mxu0 %vm2241_vm5, %v6161_v29 }
 0x371   : > { %3504 = vmatmul.msk.bf16.gmra.mxu3 %vm2241_vm5, %v6158_v18  ;;  %3544 = vmatmul.msk.bf16.gmra.mxu1 %vm2241_vm5, %v6164_v25 }
 0x37d   : > { %3485 = vmatmul.msk.bf16.gmra.mxu2 %vm2241_vm5, %v6165_v45 }
 0x380   : > { %3525 = vmatmul.msk.bf16.gmra.mxu0 %vm2241_vm5, %v6171_v24 }
 0x381   : > { %3505 = vmatmul.msk.bf16.gmra.mxu3 %vm2241_vm5, %v6168_v12  ;;  %3545 = vmatmul.msk.bf16.gmra.mxu1 %vm2241_vm5, %v6174_v42 }
 0x38d   : > { %3486 = vmatmul.msk.bf16.gmra.mxu2 %vm2241_vm5, %v6176_v32 }
 0x390   : > { %3526 = vmatmul.msk.bf16.gmra.mxu0 %vm2241_vm5, %v2743_v31 }
 0x391   : > { %3506 = vmatmul.msk.bf16.gmra.mxu3 %vm2241_vm5, %v2649_v34  ;;  %3546 = vmatmul.msk.bf16.gmra.mxu1 %vm2241_vm5, %v2837_v33  ;;  %v6182_v33 = vpack.c.bf16 %v6180_v35, %v6181_v62 }
 0x39d   : > { %v2430_v1 = vpop.f32.mrf.mxu0  ;;  %3563 = vmatmul.msk.bf16.vlgmr.msra.gmra.mxu2 %vm2241_vm5, %v6179_v44 }
 0x39e   : > { %v2524_v60 = vpop.f32.mrf.mxu1 }
 0x3a0   : > { %v2263_v6 = vpop.f32.mrf.mxu2 }
 0x3a4   : > { %v2328_v37 = vpop.f32.mrf.mxu3 }
 0x3a5   : > { %v2329_v34 = vadd.f32 %v2328_v37, %v2263_v6  ;;  %v2432_v50 = vpop.f32.mrf.mxu0 }
 0x3a6   : > { %v2526_v19 = vpop.f32.mrf.mxu1 }
 0x3a7   : > { %v2450_v22 = vadd.f32 %v2430_v1, %v2329_v34 }
 0x3a8   : > { %v2265_v20 = vpop.f32.mrf.mxu2 }
 0x3a9   : > { %v2544_v31 = vadd.f32 %v2524_v60, %v2450_v22 }
 0x3ac   : > { %v2330_v21 = vpop.f32.mrf.mxu3 }
 0x3ad   : > { %v2435_v17 = vpop.f32.mrf.mxu0  ;;  %3564 = vmatmul.msk.bf16.gmra.mxu2 %vm2241_vm5, %v6182_v33  ;;  %v2331_v51 = vadd.f32 %v2330_v21, %v2265_v20 }
 0x3ae   : > { %v2529_v41 = vpop.f32.mrf.mxu1 }
 0x3af   : > { %v2451_v60 = vadd.f32 %v2432_v50, %v2331_v51 }
 0x3b0   : > { %v2268_v15 = vpop.f32.mrf.mxu2 }
 0x3b1   : > { %v2545_v22 = vadd.f32 %v2526_v19, %v2451_v60 }
 0x3b4   : > { %v2333_v54 = vpop.f32.mrf.mxu3 }
 0x3b5   : > { %v2334_v49 = vadd.f32 %v2333_v54, %v2268_v15  ;;  %v2437_v28 = vpop.f32.mrf.mxu0 }
 0x3b6   : > { %v5684_v10 = vpop.f32.mrf.mxu1 }
 0x3b7   : > { %v2452_v55 = vadd.f32 %v2435_v17, %v2334_v49 }
 0x3b8   : > { %v2270_v56 = vpop.f32.mrf.mxu2 }
 0x3b9   : > { %v2546_v48 = vadd.f32 %v2529_v41, %v2452_v55 }
 0x3bc   : > { %v2335_v39 = vpop.f32.mrf.mxu3 }
 0x3bd   : > { %3565 = vmatmul.msk.bf16.gmra.mxu2 %vm2241_vm5, %v6183_v43  ;;  %v2440_v4 = vpop.f32.mrf.mxu0  ;;  %v2336_v54 = vadd.f32 %v2335_v39, %v2270_v56  ;;  %v5716_v43 = vld [vmem:[#allocation10] ss:$0 sm:$0xff] }
 0x3be   : > { %v2534_v47 = vpop.f32.mrf.mxu1 }
 0x3c0   : > { %v2273_v5 = vpop.f32.mrf.mxu2 }
 0x3c4   : > { %v2338_v63 = vpop.f32.mrf.mxu3 }
 0x3c5   : > { %v2339_v30 = vadd.f32 %v2338_v63, %v2273_v5  ;;  %v5692_v2 = vpop.f32.mrf.mxu0 }
 0x3c6   : > { %v5696_v0 = vpop.f32.mrf.mxu1 }
 0x3c7   : > { %v2454_v38 = vadd.f32 %v2440_v4, %v2339_v30 }
 0x3c8   : > { %v5690_v36 = vpop.f32.mrf.mxu2 }
 0x3c9   : > { %v2548_v53 = vadd.f32 %v2534_v47, %v2454_v38 }
 0x3cc   : > { %v5694_v23 = vpop.f32.mrf.mxu3 }
 0x3cd   : > { %3566 = vmatmul.msk.bf16.gmra.mxu2 %vm2241_vm5, %v6184_v27  ;;  %v2445_v16 = vpop.f32.mrf.mxu0 }
 0x3ce   : > { %v2539_v29 = vpop.f32.mrf.mxu1 }
 0x3d0   : > { %v2278_v52 = vpop.f32.mrf.mxu2 }
 0x3d4   : > { %v2343_v11 = vpop.f32.mrf.mxu3 }
 0x3d5   : > { %v2344_v18 = vadd.f32 %v2343_v11, %v2278_v52  ;;  %v5708_v24 = vpop.f32.mrf.mxu0 }
 0x3d6   : > { %v5710_v14 = vpop.f32.mrf.mxu1 }
 0x3d7   : > { %v2456_v40 = vadd.f32 %v2445_v16, %v2344_v18 }
 0x3d8   : > { %v5702_v26 = vpop.f32.mrf.mxu2 }
 0x3d9   : > { %v2550_v9 = vadd.f32 %v2539_v29, %v2456_v40  ;;  %v2341_v40 = vadd.f32 %v5694_v23, %v5690_v36 }
 0x3dc   : > { %v5704_v8 = vpop.f32.mrf.mxu3 }
 0x3dd   : > { %v2798_v7 = vpop.f32.mrf.mxu0 }
 0x3de   : > { %v2892_v32 = vpop.f32.mrf.mxu1 }
 0x3e0   : > { %v2610_v25 = vpop.f32.mrf.mxu2 }
 0x3e1   : > { %v2630_v45 = vadd.f32 %v2610_v25, %v2544_v31 }
 0x3e4   : > { %v2704_v3 = vpop.f32.mrf.mxu3 }
 0x3e5   : > { %v2800_v6 = vpop.f32.mrf.mxu0  ;;  %v2724_v17 = vadd.f32 %v2704_v3, %v2630_v45  ;;  %v2455_v45 = vadd.f32 %v5692_v2, %v2341_v40 }
 0x3e6   : > { %v2894_v34 = vpop.f32.mrf.mxu1 }
 0x3e7   : > { %v2818_v62 = vadd.f32 %v2798_v7, %v2724_v17  ;;  %v2549_v3 = vadd.f32 %v5696_v0, %v2455_v45 }
 0x3e8   : > { %v2612_v46 = vpop.f32.mrf.mxu2 }
 0x3e9   : > { %v2631_v35 = vadd.f32 %v2612_v46, %v2545_v22  ;;  %v2912_v20 = vadd.f32 %v2892_v32, %v2818_v62 }
 0x3ec   : > { %v2706_v1 = vpop.f32.mrf.mxu3 }
 0x3ed   : > { %v2725_v33 = vadd.f32 %v2706_v1, %v2631_v35  ;;  %v2803_v41 = vpop.f32.mrf.mxu0 }
 0x3ee   : > { %v2897_v55 = vpop.f32.mrf.mxu1 }
 0x3ef   : > { %v2819_v49 = vadd.f32 %v2800_v6, %v2725_v33 }
 0x3f0   : > { %v2615_v13 = vpop.f32.mrf.mxu2 }
 0x3f1   : > { %v2632_v12 = vadd.f32 %v2615_v13, %v2546_v48  ;;  %v2453_v48 = vadd.f32 %v2437_v28, %v2336_v54  ;;  %v2913_v5 = vadd.f32 %v2894_v34, %v2819_v49 }
 0x3f3   : > { %v2547_v19 = vadd.f32 %v5684_v10, %v2453_v48 }
 0x3f4   : > { %v2709_v31 = vpop.f32.mrf.mxu3 }
 0x3f5   : > { %v2805_v30 = vpop.f32.mrf.mxu0  ;;  %v2726_v38 = vadd.f32 %v2709_v31, %v2632_v12  ;;  %v2346_v31 = vadd.f32 %v5704_v8, %v5702_v26 }
 0x3f6   : > { %v2899_v39 = vpop.f32.mrf.mxu1 }
 0x3f7   : > { %v2820_v10 = vadd.f32 %v2803_v41, %v2726_v38 }
 0x3f8   : > { %v2617_v59 = vpop.f32.mrf.mxu2 }
 0x3fc   : > { %v2711_v21 = vpop.f32.mrf.mxu3 }
 0x3fd   : > { %v2808_v25 = vpop.f32.mrf.mxu0 }
 0x3fe   : > { %v2902_v13 = vpop.f32.mrf.mxu1 }
 0x400   : > { %v2620_v57 = vpop.f32.mrf.mxu2 }
 0x401   : > { %v5706_v61 = vadd.f32 %v2620_v57, %v2548_v53  ;;  %v2633_v53 = vadd.f32 %v2617_v59, %v2547_v19 }
 0x403   : > { %v2727_v11 = vadd.f32 %v2711_v21, %v2633_v53 }
 0x404   : > { %v2714_v28 = vpop.f32.mrf.mxu3 }
 0x405   : > { %v2821_v29 = vadd.f32 %v2805_v30, %v2727_v11  ;;  %v2728_v1 = vadd.f32 %v2714_v28, %v5706_v61  ;;  %v2810_v60 = vpop.f32.mrf.mxu0  ;;  %v2457_v61 = vadd.f32 %v5708_v24, %v2346_v31 }
 0x406   : > { %v2904_v0 = vpop.f32.mrf.mxu1 }
 0x407   : > { %v2915_v12 = vadd.f32 %v2899_v39, %v2821_v29  ;;  %v2822_v2 = vadd.f32 %v2808_v25, %v2728_v1  ;;  %v2551_v54 = vadd.f32 %v5710_v14, %v2457_v61 }
 0x408   : > { %v2622_v42 = vpop.f32.mrf.mxu2 }
 0x409   : > { %v2635_v36 = vadd.f32 %v2622_v42, %v2549_v3  ;;  %v2916_v62 = vadd.f32 %v2902_v13, %v2822_v2 }
 0x40c   : > { %v2716_v59 = vpop.f32.mrf.mxu3 }
 0x40d   : > { %v2729_v6 = vadd.f32 %v2716_v59, %v2635_v36  ;;  %v2813_v41 = vpop.f32.mrf.mxu0 }
 0x40e   : > { %v2907_v21 = vpop.f32.mrf.mxu1 }
 0x40f   : > { %v2823_v35 = vadd.f32 %v2810_v60, %v2729_v6 }
 0x410   : > { %v2625_v58 = vpop.f32.mrf.mxu2 }
 0x411   : > { %v5712_v44 = vadd.f32 %v2625_v58, %v2550_v9  ;;  %v2914_v9 = vadd.f32 %v2897_v55, %v2820_v10  ;;  %v2917_v33 = vadd.f32 %v2904_v0, %v2823_v35 }
 0x414   : > { %v2719_v17 = vpop.f32.mrf.mxu3 }
 0x415   : > { %v2815_v14 = vpop.f32.mrf.mxu0 }
 0x416   : > { %v2909_v53 = vpop.f32.mrf.mxu1 }
 0x418   : > { %v5714_v37 = vpop.f32.mrf.mxu2 }
 0x419   : > { %v2637_v26 = vadd.f32 %v5714_v37, %v2551_v54 }
 0x41c   : > { %v2721_v48 = vpop.f32.mrf.mxu3 }
 0x420   : > { %v2986_v15 = vpop.f32.mrf.mxu2 }
 0x421   : > { %v3006_v50 = vadd.f32 %v2986_v15, %v2912_v20  ;;  %v2730_v20 = vadd.f32 %v2719_v17, %v5712_v44 }
 0x423   : > { %v3018_v47 = vadd.f32 %v5716_v43, %v3006_v50 }
 0x425   : > { %v3026_v27 = vmax.f32 %v3018_v47, 0.0 }
 0x428   : > { %v2988_v4 = vpop.f32.mrf.mxu2 }
 0x429   : > { %v3007_v63 = vadd.f32 %v2988_v4, %v2913_v5  ;;  %v2824_v5 = vadd.f32 %v2813_v41, %v2730_v20  ;;  %v2731_v4 = vadd.f32 %v2721_v48, %v2637_v26 }
 0x42b   : > { %v3019_v56 = vadd.f32 %v5716_v43, %v3007_v63  ;;  %v2825_v63 = vadd.f32 %v2815_v14, %v2731_v4  ;;  %v2918_v30 = vadd.f32 %v2907_v21, %v2824_v5 }
 0x42d   : > { %v3027_v52 = vmax.f32 %v3019_v56, 0.0  ;;  %v2919_v44 = vadd.f32 %v2909_v53, %v2825_v63 }
 0x42f   : > { %v3626_v18 = vpack.c.bf16 %v3027_v52, %v3026_v27 }
 0x430   : > { %v2991_v16 = vpop.f32.mrf.mxu2 }
 0x431   : > { %3627 = vst [vmem:[%s5725_s23] sm:$0xff] %v3626_v18   ;;  %v3008_v46 = vadd.f32 %v2991_v16, %v2914_v9 }
 0x433   : > { %v3020_v7 = vadd.f32 %v5716_v43, %v3008_v46 }
 0x435   : > { %v3028_v58 = vmax.f32 %v3020_v7, 0.0 }
 0x438   : > { %v2993_v57 = vpop.f32.mrf.mxu2 }
 0x439   : > { %v3009_v32 = vadd.f32 %v2993_v57, %v2915_v12 }
 0x43b   : > { %v3021_v23 = vadd.f32 %v5716_v43, %v3009_v32 }
 0x43d   : > { %v3029_v51 = vmax.f32 %v3021_v23, 0.0 }
 0x43f   : > { %v3631_v34 = vpack.c.bf16 %v3029_v51, %v3028_v58 }
 0x440   : > { %v2996_v22 = vpop.f32.mrf.mxu2 }
 0x441   : > { %3643 = vst [vmem:[%s5725_s23 + $0x8] sm:$0xff] %v3631_v34   ;;  %v3010_v42 = vadd.f32 %v2996_v22, %v2916_v62 }
 0x443   : > { %v3022_v49 = vadd.f32 %v5716_v43, %v3010_v42 }
 0x445   : > { %v3030_v50 = vmax.f32 %v3022_v49, 0.0 }
 0x448   : > { %v2998_v15 = vpop.f32.mrf.mxu2 }
 0x449   : > { %v3011_v55 = vadd.f32 %v2998_v15, %v2917_v33 }
 0x44b   : > { %v3023_v8 = vadd.f32 %v5716_v43, %v3011_v55 }
 0x44d   : > { %v3031_v24 = vmax.f32 %v3023_v8, 0.0 }
 0x44f   : > { %v3636_v19 = vpack.c.bf16 %v3031_v24, %v3030_v50 }
 0x450   : > { %v3001_v47 = vpop.f32.mrf.mxu2 }
 0x451   : > { %3644 = vst [vmem:[%s5725_s23 + $0x10] sm:$0xff] %v3636_v19   ;;  %v3012_v38 = vadd.f32 %v3001_v47, %v2918_v30 }
 0x453   : > { %v3024_v37 = vadd.f32 %v5716_v43, %v3012_v38 }
 0x455   : > { %v3032_v52 = vmax.f32 %v3024_v37, 0.0 }
 0x458   : > { %v3003_v56 = vpop.f32.mrf.mxu2 }
 0x459   : > { %v3013_v39 = vadd.f32 %v3003_v56, %v2919_v44 }
 0x45b   : > { %v3025_v27 = vadd.f32 %v5716_v43, %v3013_v39 }
 0x45d   : > { %v3033_v28 = vmax.f32 %v3025_v27, 0.0 }
 0x45f   : > { %v3641_v10 = vpack.c.bf16 %v3033_v28, %v3032_v52 }
 0x461   : > { %3645 = vst [vmem:[%s5725_s23 + $0x18] sm:$0xff] %v3641_v10  }
 0x462 PF: > { %s22_s27 = sadd.s32 1, %s3931_s27  }
 0x463   : > { %p19_p7 = scmp.ge.s32.totalorder %s22_s27, 4  }
 0x465   :  { %21 = sbr.rel (!%p19_p7) target bundleno = 4 (0x4), region = 138 }
 0x46a   :  { %3072 = vsyncpa [#allocation3], 1 }
 0x46b   :  { %3074 = vsyncpa [#allocation3 + $0x1], 1 }
 0x46c   :  { %3075 = vsyncpa [#allocation5], 1 }
 0x46d   :  { %3076 = vsyncpa [#allocation8], 1 }
 0x46e   :  { %3077 = vsyncpa [#allocation11], 1 }

// kernel: dueling_cnn_forward.3
= control target key start
LH: loop header
LB: loop body
LE: loop exit
PB: predicated region body
PF: predicated region fallthrough
CT: control target
= control target key end

     0   :  { %10 = vsyncpa [#allocation4], 0  ;;  %s16735_s0 = inlined_call_operand.vmem [shape: bf16[2,8192], index: 0, kind: input, shape index: {}]   ;;  %s16736_s1 = inlined_call_operand.hbm [shape: bf16[8192,512], index: 1, kind: input, shape index: {}]   ;;  %s16737_s2 = inlined_call_operand.hbm [shape: f32[1,512], index: 2, kind: input, shape index: {}]   ;;  %s16738_s3 = inlined_call_operand.hbm [shape: bf16[512,128], index: 3, kind: input, shape index: {}]   ;;  %s16739_s4 = inlined_call_operand.hbm [shape: f32[1,128], index: 4, kind: input, shape index: {}]   ;;  %s16740_s5 = inlined_call_operand.hbm [shape: f32[2,6], index: 5, kind: output, shape index: {}]  }
   0x1   :  { %12 = vsyncpa [#allocation4 + $0x1], 0 }
   0x2   :  { %13 = vsyncpa [#allocation7], 0 }
   0x3   :  { %14 = vsyncpa [#allocation10], 0 }
   0x4   :  { %15 = vsyncpa [#allocation5], 0  ;;  %s14321_s18 = smov 0   ;;  %s14323_s19 = smov 0  }
   0x5   :  { %s14325_s20 = smov 0   ;;  %s14327_s21 = smov 0  }
   0x6 LB: > { %s14340_s22 = sadd.s32 4294967295, %s14278_s21   ;;  %p67_p0 = scmp.ne.s32.totalorder %s14270_s19, %s14266_s18  ;;  %s14278_s21 = sphi %s14327_s21, %s16749_s21   ;;  %s14274_s20 = sphi %s14325_s20, %s16748_s20   ;;  %s14270_s19 = sphi %s14323_s19, %s16747_s19   ;;  %s14266_s18 = sphi %s14321_s18, %s16746_s18  }
   0x7   : > { %p68_p1 = scmp.eq.s32.totalorder %s14340_s22, 0  ;;  %p8670_p2 = scmp.ge.s32.totalorder %s14278_s21, 1 }
   0x8   : > { %p162_p3 = scmp.lt.s32.totalorder %s14278_s21, 3  ;;  %p8671_p4 = scmp.ne.s32.totalorder %s14340_s22, 0 }
   0x9   : > { %p14349_p5 = por %p68_p1, %p67_p0  ;;  %s174_s26 = sshll.u32 %s16737_s2, 4  ;;  %s175_s26 = int_to_ptr.hbm [resolvable:$true] %s174_s26 }
   0xa   : > { %p14356_p6 = pnand %p8670_p2, %p162_p3  ;;  %s14280_s28 = smov [#allocation6]  }
   0xb   : > { %s176_s29 = sshll.u32 %s14280_s28, 4  ;;  %s185_s7 = sshll.u32 %s16738_s3, 4  ;;  %s177_s29 = int_to_ptr.vmem [resolvable:$true] %s176_s29  ;;  %s186_s7 = int_to_ptr.hbm [resolvable:$true] %s185_s7 }
   0xc   : > { %p13991_p7 = pneg %p14356_p6  ;;  %s14281_s9 = smov [#allocation8]  }
   0xd   : > { %s187_s10 = sshll.u32 %s14281_s9, 4  ;;  %s14282_s11 = smov 64   ;;  %s188_s10 = int_to_ptr.vmem [resolvable:$true] %s187_s10 }
   0xe   : > { %p14367_p8 = pnand %p13991_p7, %p68_p1  ;;  %s14283_s12 = smov 4  }
   0xf   : > { %s200_s15 = sshll.u32 %s16739_s4, 4  ;;  %s14284_s16 = smov [#allocation9]   ;;  %s201_s15 = int_to_ptr.hbm [resolvable:$true] %s200_s15 }
  0x10   : > { %13994 = dma.hbm_to_vmem [thread:$0]  (!%p14367_p8), %s175_s26, 64, %s177_s29, [#allocation7]  }
  0x11   : > { %13997 = dma.hbm_to_vmem [thread:$0]  (!%p14367_p8), %s186_s7, 4096, %s188_s10, [#allocation7], %s14282_s11, %s14282_s11, %s14283_s12  }
  0x12   : > { %s202_s17 = sshll.u32 %s14284_s16, 4  ;;  %s14381_s18 = sadd.s32 1, %s14278_s21   ;;  %s203_s17 = int_to_ptr.vmem [resolvable:$true] %s202_s17 }
  0x13   : > { %14000 = dma.hbm_to_vmem [thread:$0]  (!%p14367_p8), %s201_s15, 16, %s203_s17, [#allocation10]  }
  0x14   : > { %s51_s24 = ssub.s32 %s14278_s21, %s14381_s18  ;;  %s54_s25 = sadd.s32 1, %s14274_s20 }
  0x15   : > { %p52_p9 = scmp.eq.s32.totalorder %s51_s24, 0  ;;  %p61_p10 = scmp.ne.s32.totalorder %s14274_s20, %s14270_s19 }
  0x16   : > { %p62_p11 = scmp.eq.s32.totalorder %s14278_s21, 0  ;;  %p14008_p12 = scmp.lt.s32.totalorder %s14278_s21, 2 }
  0x17   : > { %s14391_s26 = scalar_select %p52_p9, %s14274_s20, %s54_s25  }
  0x18   : > { %p63_p13 = por %p62_p11, %p61_p10  ;;  %s221_s28 = sand.u32 1, %s14274_s20  }
  0x19   : > { %s8675_s29 = sshll.u32 %s221_s28, 13  ;;  %s12916_s30 = sshll.u32 %s14278_s21, 13 }
  0x1a   : > { %s231_s8 = scalar_lea.hbm %s16736_s1, %s12916_s30  ;;  %s225_s9 = scalar_lea.vmem [#allocation3], %s8675_s29 }
  0x1b   : > { %s234_s10 = sshll.u32 %s225_s9, 4  ;;  %s232_s11 = sshll.u32 %s231_s8, 4  ;;  %s235_s10 = int_to_ptr.vmem [resolvable:$true] %s234_s10  ;;  %s233_s11 = int_to_ptr.hbm [resolvable:$true] %s232_s11 }
  0x1c   : > { %p14398_p0 = pnand %p14008_p12, %p63_p13  ;;  %s222_s13 = scalar_lea.sflag [#allocation4], %s221_s28 }
  0x1d   : > { %s14174_s14 = sshra.s32 %s233_s11, 4  ;;  %s14181_s17 = scalar_lea.hbm %s16736_s1, 16384  ;;  %s14175_s14 = int_to_ptr.hbm [resolvable:$true] %s14174_s14 }
  0x1e   : > { %s14176_s15 = scalar_lea.hbm %s14175_s14, 8192  ;;  %p14178_p3 = pneg %p14398_p0 }
  0x1f   : > { %p14177_p2 = scmp.ne.s32.totalorder %s14175_s14, %s14176_s15  ;;  %p14182_p9 = scmp.lt.s32.totalorder %s14175_s14, %s16736_s1 }
  0x20   : > { %p14183_p10 = scmp.lt.s32.totalorder %s14181_s17, %s14176_s15 }
  0x21   : > { %p14179_p7 = pnand %p14178_p3, %p14177_p2 }
  0x22   : > { %p14184_p11 = por %p14183_p10, %p14182_p9 }
  0x23   : > { %p14180_p8 = pneg %p14179_p7 }
  0x25   : > { %p14185_p12 = pnand %p14184_p11, %p14180_p8 }
  0x27   : > { %14188 = shalt.err (!%p14185_p12)
}
  0x28   : > { %s14285_s28 = smov 256   ;;  %s14286_s29 = smov 16  }
  0x29   : > { %14004 = dma.hbm_to_vmem [thread:$0]  (!%p14398_p0), %s233_s11, 131072, %s235_s10, %s222_s13, %s14285_s28, %s14285_s28, %s14286_s29  }
  0x2a   : > { %246 = sbr.rel (%p14356_p6) target bundleno = 1769 (0x6e9), region = 40  ;;  %s248_s30 = sand.u32 (!%p14356_p6), 1, %s14270_s19  }
  0x2b   : > { %s8680_s6 = sshll.u32 (!%p14356_p6), %s248_s30, 13  ;;  %s249_s7 = scalar_lea.sflag (!%p14356_p6), [#allocation4], %s248_s30 }
  0x2c   : > { %s14415_s8 = scalar_lea.vmem (!%p14356_p6), [#allocation3], %s8680_s6 }
  0x2f   : > { %14249 = dma.done.wait (%p14349_p5), %s249_s7, 131072  }
  0x30   : > { %14251 = vsyncadd (%p14349_p5), %s249_s7, 4294836224 }
  0x31   : > { %14253 = dma.done.wait (%p68_p1), [#allocation7], 4160  }
  0x32   : > { %14255 = vsyncadd (%p68_p1), [#allocation7], 4294963136 }
  0x33   : > { %14257 = dma.done.wait (%p68_p1), [#allocation10], 16  }
  0x34   : > { %14259 = vsyncadd (%p68_p1), [#allocation10], 4294967280  ;;  %s8684_s27 = sshll.u32 %s14340_s22, 5  ;;  %303 = sbr.rel (%p8671_p4) target bundleno = 59 (0x3b), region = 60 }
  0x35   : > { %p295_p6 = scmp.lt.s32.totalorder %s8684_s27, 63 }
  0x37   : > { %s16751_s27 = smov (!%p295_p6, %s8684_s27), 63 }
  0x38   : > { %s14433_s23 = scalar_lea.vmem %s16735_s0, %s16751_s27 }
  0x39   : > { %v14287_v0 = vmov 0.0  }
  0x3a   : > { %304 = vst [vmem:[#allocation2] sm:$0xff] %v14287_v0 }
  0x3b PF: > { %v8800_v1 = vld [vmem:[%s14415_s8 + $0xe0] sm:$0xf]  ;;  %v12947_v2 = vld [vmem:[%s14415_s8 + $0xec] sm:$0xf0]  ;;  %vm8197_vm0 = vcmask 1041408   ;;  %vm8199_vm1 = vcmask 1045508  }
  0x3c   : > { %v8928_v3 = vld [vmem:[%s14415_s8 + $0x1e0] sm:$0xf]  ;;  %v8801_v4 = vor.u32 %v12947_v2, %v8800_v1  ;;  %v12979_v5 = vld [vmem:[%s14415_s8 + $0x1ec] sm:$0xf0]  ;;  %vm8201_vm2 = vcmask 1043456   ;;  %p12782_p1 = scmp.ne.s32.totalorder %s14340_s22, 1 }
  0x3d   : > { %v9056_v6 = vld [vmem:[%s14415_s8 + $0x2e0] sm:$0xf]  ;;  %v13011_v7 = vld [vmem:[%s14415_s8 + $0x2ec] sm:$0xf0]  ;;  %v8929_v8 = vor.u32 %v12979_v5, %v8928_v3  ;;  %s14289_s11 = smov (!%p12782_p1), 127  }
  0x3e   : > { %v9057_v9 = vor.u32 %v13011_v7, %v9056_v6  ;;  %v9184_v10 = vld [vmem:[%s14415_s8 + $0x3e0] sm:$0xf]  ;;  %v13043_v11 = vld [vmem:[%s14415_s8 + $0x3ec] sm:$0xf0]  ;;  %6526 = vmatpush.bf16.msra.mxu0 %v8801_v4 }
  0x3f   : > { %v8784_v12 = vld [vmem:[%s14415_s8 + $0xc0] sm:$0xf]  ;;  %v9185_v13 = vor.u32 %v13043_v11, %v9184_v10  ;;  %v12943_v14 = vld [vmem:[%s14415_s8 + $0xcc] sm:$0xf0]  ;;  %6539 = vmatpush.bf16.msra.mxu1 %v8929_v8 }
  0x40   : > { %v8912_v15 = vld [vmem:[%s14415_s8 + $0x1c0] sm:$0xf]  ;;  %v12975_v16 = vld [vmem:[%s14415_s8 + $0x1cc] sm:$0xf0]  ;;  %6552 = vmatpush.bf16.msra.mxu2 %v9057_v9  ;;  %v8785_v17 = vor.u32 %v12943_v14, %v8784_v12 }
  0x41   : > { %v8913_v18 = vor.u32 %v12975_v16, %v8912_v15  ;;  %v9040_v19 = vld [vmem:[%s14415_s8 + $0x2c0] sm:$0xf]  ;;  %v13007_v20 = vld [vmem:[%s14415_s8 + $0x2cc] sm:$0xf0]  ;;  %6565 = vmatpush.bf16.msra.mxu3 %v9185_v13 }
  0x42   : > { %v9168_v21 = vld [vmem:[%s14415_s8 + $0x3c0] sm:$0xf]  ;;  %v9041_v22 = vor.u32 %v13007_v20, %v9040_v19  ;;  %v13039_v23 = vld [vmem:[%s14415_s8 + $0x3cc] sm:$0xf0]  ;;  %6527 = vmatpush.bf16.msra.mxu0 %v8785_v17 }
  0x43   : > { %v8768_v24 = vld [vmem:[%s14415_s8 + $0xa0] sm:$0xf]  ;;  %v12939_v25 = vld [vmem:[%s14415_s8 + $0xac] sm:$0xf0]  ;;  %v9169_v26 = vor.u32 %v13039_v23, %v9168_v21  ;;  %6540 = vmatpush.bf16.msra.mxu1 %v8913_v18 }
  0x44   : > { %v8896_v27 = vld [vmem:[%s14415_s8 + $0x1a0] sm:$0xf]  ;;  %v12971_v28 = vld [vmem:[%s14415_s8 + $0x1ac] sm:$0xf0]  ;;  %v8769_v30 = vor.u32 %v12939_v25, %v8768_v24  ;;  %6553 = vmatpush.bf16.msra.mxu2 %v9041_v22 }
  0x45   : > { %v9024_v29 = vld [vmem:[%s14415_s8 + $0x2a0] sm:$0xf]  ;;  %v13003_v31 = vld [vmem:[%s14415_s8 + $0x2ac] sm:$0xf0]  ;;  %v8897_v34 = vor.u32 %v12971_v28, %v8896_v27  ;;  %6566 = vmatpush.bf16.msra.mxu3 %v9169_v26 }
  0x46   : > { %v9152_v32 = vld [vmem:[%s14415_s8 + $0x3a0] sm:$0xf]  ;;  %v13035_v33 = vld [vmem:[%s14415_s8 + $0x3ac] sm:$0xf0]  ;;  %v9025_v35 = vor.u32 %v13003_v31, %v9024_v29  ;;  %6528 = vmatpush.bf16.msra.mxu0 %v8769_v30 }
  0x47   : > { %v8752_v36 = vld [vmem:[%s14415_s8 + $0x80] sm:$0xf]  ;;  %v12935_v37 = vld [vmem:[%s14415_s8 + $0x8c] sm:$0xf0]  ;;  %v9153_v39 = vor.u32 %v13035_v33, %v9152_v32  ;;  %6541 = vmatpush.bf16.msra.mxu1 %v8897_v34 }
  0x48   : > { %v8880_v38 = vld [vmem:[%s14415_s8 + $0x180] sm:$0xf]  ;;  %v12967_v40 = vld [vmem:[%s14415_s8 + $0x18c] sm:$0xf0]  ;;  %v8753_v45 = vor.u32 %v12935_v37, %v8752_v36  ;;  %6554 = vmatpush.bf16.msra.mxu2 %v9025_v35 }
  0x49   : > { %v9008_v41 = vld [vmem:[%s14415_s8 + $0x280] sm:$0xf]  ;;  %v12999_v42 = vld [vmem:[%s14415_s8 + $0x28c] sm:$0xf0]  ;;  %v8881_v46 = vor.u32 %v12967_v40, %v8880_v38  ;;  %6567 = vmatpush.bf16.msra.mxu3 %v9153_v39 }
  0x4a   : > { %v9136_v43 = vld [vmem:[%s14415_s8 + $0x380] sm:$0xf]  ;;  %v13031_v44 = vld [vmem:[%s14415_s8 + $0x38c] sm:$0xf0]  ;;  %v9009_v47 = vor.u32 %v12999_v42, %v9008_v41  ;;  %6529 = vmatpush.bf16.msra.mxu0 %v8753_v45 }
  0x4b   : > { %v8736_v48 = vld [vmem:[%s14415_s8 + $0x60] sm:$0xf]  ;;  %v12931_v49 = vld [vmem:[%s14415_s8 + $0x6c] sm:$0xf0]  ;;  %v9137_v51 = vor.u32 %v13031_v44, %v9136_v43  ;;  %6542 = vmatpush.bf16.msra.mxu1 %v8881_v46 }
  0x4c   : > { %v8864_v50 = vld [vmem:[%s14415_s8 + $0x160] sm:$0xf]  ;;  %v12963_v52 = vld [vmem:[%s14415_s8 + $0x16c] sm:$0xf0]  ;;  %v8737_v57 = vor.u32 %v12931_v49, %v8736_v48  ;;  %6555 = vmatpush.bf16.msra.mxu2 %v9009_v47 }
  0x4d   : > { %v8992_v53 = vld [vmem:[%s14415_s8 + $0x260] sm:$0xf]  ;;  %v12995_v54 = vld [vmem:[%s14415_s8 + $0x26c] sm:$0xf0]  ;;  %v8865_v58 = vor.u32 %v12963_v52, %v8864_v50  ;;  %6568 = vmatpush.bf16.msra.mxu3 %v9137_v51 }
  0x4e   : > { %v9120_v55 = vld [vmem:[%s14415_s8 + $0x360] sm:$0xf]  ;;  %v13027_v56 = vld [vmem:[%s14415_s8 + $0x36c] sm:$0xf0]  ;;  %v8993_v59 = vor.u32 %v12995_v54, %v8992_v53  ;;  %6530 = vmatpush.bf16.msra.mxu0 %v8737_v57 }
  0x4f   : > { %v8720_v60 = vld [vmem:[%s14415_s8 + $0x40] sm:$0xf]  ;;  %v12927_v61 = vld [vmem:[%s14415_s8 + $0x4c] sm:$0xf0]  ;;  %v9121_v63 = vor.u32 %v13027_v56, %v9120_v55  ;;  %6543 = vmatpush.bf16.msra.mxu1 %v8865_v58 }
  0x50   : > { %v8848_v62 = vld [vmem:[%s14415_s8 + $0x140] sm:$0xf]  ;;  %v12959_v0 = vld [vmem:[%s14415_s8 + $0x14c] sm:$0xf0]  ;;  %v8721_v5 = vor.u32 %v12927_v61, %v8720_v60  ;;  %6556 = vmatpush.bf16.msra.mxu2 %v8993_v59 }
  0x51   : > { %v8976_v1 = vld [vmem:[%s14415_s8 + $0x240] sm:$0xf]  ;;  %v12991_v2 = vld [vmem:[%s14415_s8 + $0x24c] sm:$0xf0]  ;;  %v8849_v6 = vor.u32 %v12959_v0, %v8848_v62  ;;  %6569 = vmatpush.bf16.msra.mxu3 %v9121_v63 }
  0x52   : > { %v9104_v3 = vld [vmem:[%s14415_s8 + $0x340] sm:$0xf]  ;;  %v13023_v4 = vld [vmem:[%s14415_s8 + $0x34c] sm:$0xf0]  ;;  %v8977_v7 = vor.u32 %v12991_v2, %v8976_v1  ;;  %6531 = vmatpush.bf16.msra.mxu0 %v8721_v5 }
  0x53   : > { %v8704_v8 = vld [vmem:[%s14415_s8 + $0x20] sm:$0xf]  ;;  %v12923_v9 = vld [vmem:[%s14415_s8 + $0x2c] sm:$0xf0]  ;;  %v9105_v11 = vor.u32 %v13023_v4, %v9104_v3  ;;  %6544 = vmatpush.bf16.msra.mxu1 %v8849_v6 }
  0x54   : > { %v8832_v10 = vld [vmem:[%s14415_s8 + $0x120] sm:$0xf]  ;;  %v12955_v12 = vld [vmem:[%s14415_s8 + $0x12c] sm:$0xf0]  ;;  %v8705_v17 = vor.u32 %v12923_v9, %v8704_v8  ;;  %6557 = vmatpush.bf16.msra.mxu2 %v8977_v7 }
  0x55   : > { %v8960_v13 = vld [vmem:[%s14415_s8 + $0x220] sm:$0xf]  ;;  %v12987_v14 = vld [vmem:[%s14415_s8 + $0x22c] sm:$0xf0]  ;;  %v8833_v20 = vor.u32 %v12955_v12, %v8832_v10  ;;  %6570 = vmatpush.bf16.msra.mxu3 %v9105_v11 }
  0x56   : > { %v9088_v15 = vld [vmem:[%s14415_s8 + $0x320] sm:$0xf]  ;;  %v13019_v16 = vld [vmem:[%s14415_s8 + $0x32c] sm:$0xf0]  ;;  %v8961_v21 = vor.u32 %v12987_v14, %v8960_v13  ;;  %6532 = vmatpush.bf16.msra.mxu0 %v8705_v17 }
  0x57   : > { %v8688_v18 = vld [vmem:[%s14415_s8] sm:$0xf]  ;;  %v12919_v19 = vld [vmem:[%s14415_s8 + $0xc] sm:$0xf0]  ;;  %v9089_v25 = vor.u32 %v13019_v16, %v9088_v15  ;;  %6545 = vmatpush.bf16.msra.mxu1 %v8833_v20 }
  0x58   : > { %v8816_v22 = vld [vmem:[%s14415_s8 + $0x100] sm:$0xf]  ;;  %v12951_v23 = vld [vmem:[%s14415_s8 + $0x10c] sm:$0xf0]  ;;  %v8689_v32 = vor.u32 %v12919_v19, %v8688_v18  ;;  %6558 = vmatpush.bf16.msra.mxu2 %v8961_v21 }
  0x59   : > { %v8944_v24 = vld [vmem:[%s14415_s8 + $0x200] sm:$0xf]  ;;  %v12983_v26 = vld [vmem:[%s14415_s8 + $0x20c] sm:$0xf0]  ;;  %v8817_v36 = vor.u32 %v12951_v23, %v8816_v22  ;;  %6571 = vmatpush.bf16.msra.mxu3 %v9089_v25 }
  0x5a   : > { %v9072_v27 = vld [vmem:[%s14415_s8 + $0x300] sm:$0xf]  ;;  %v13015_v28 = vld [vmem:[%s14415_s8 + $0x30c] sm:$0xf0]  ;;  %v8945_v37 = vor.u32 %v12983_v26, %v8944_v24  ;;  %6533 = vmatpush.bf16.msra.mxu0 %v8689_v32 }
  0x5b   : > { %v9312_v29 = vld [vmem:[%s14415_s8 + $0x4e0] sm:$0xf]  ;;  %v13075_v30 = vld [vmem:[%s14415_s8 + $0x4ec] sm:$0xf0]  ;;  %v9073_v40 = vor.u32 %v13015_v28, %v9072_v27  ;;  %6546 = vmatpush.bf16.msra.mxu1 %v8817_v36 }
  0x5c   : > { %v9440_v31 = vld [vmem:[%s14415_s8 + $0x5e0] sm:$0xf]  ;;  %v13107_v33 = vld [vmem:[%s14415_s8 + $0x5ec] sm:$0xf0]  ;;  %v9313_v41 = vor.u32 %v13075_v30, %v9312_v29  ;;  %6559 = vmatpush.bf16.msra.mxu2 %v8945_v37 }
  0x5d   : > { %v9568_v34 = vld [vmem:[%s14415_s8 + $0x6e0] sm:$0xf]  ;;  %v13139_v35 = vld [vmem:[%s14415_s8 + $0x6ec] sm:$0xf0]  ;;  %v9441_v42 = vor.u32 %v13107_v33, %v9440_v31  ;;  %6572 = vmatpush.bf16.msra.mxu3 %v9073_v40 }
  0x5e   : > { %v9696_v38 = vld [vmem:[%s14415_s8 + $0x7e0] sm:$0xf]  ;;  %v13171_v39 = vld [vmem:[%s14415_s8 + $0x7ec] sm:$0xf0]  ;;  %v9569_v43 = vor.u32 %v13139_v35, %v9568_v34  ;;  %6578 = vmatpush.bf16.msrb.mxu0 %v9313_v41 }
  0x5f   : > { %v9296_v44 = vld [vmem:[%s14415_s8 + $0x4c0] sm:$0xf]  ;;  %v13071_v45 = vld [vmem:[%s14415_s8 + $0x4cc] sm:$0xf0]  ;;  %v9697_v47 = vor.u32 %v13171_v39, %v9696_v38  ;;  %6591 = vmatpush.bf16.msrb.mxu1 %v9441_v42 }
  0x60   : > { %v9424_v46 = vld [vmem:[%s14415_s8 + $0x5c0] sm:$0xf]  ;;  %v13103_v48 = vld [vmem:[%s14415_s8 + $0x5cc] sm:$0xf0]  ;;  %v9297_v53 = vor.u32 %v13071_v45, %v9296_v44  ;;  %6604 = vmatpush.bf16.msrb.mxu2 %v9569_v43 }
  0x61   : > { %v9552_v49 = vld [vmem:[%s14415_s8 + $0x6c0] sm:$0xf]  ;;  %v13135_v50 = vld [vmem:[%s14415_s8 + $0x6cc] sm:$0xf0]  ;;  %v9425_v56 = vor.u32 %v13103_v48, %v9424_v46  ;;  %6617 = vmatpush.bf16.msrb.mxu3 %v9697_v47 }
  0x62   : > { %v9680_v51 = vld [vmem:[%s14415_s8 + $0x7c0] sm:$0xf]  ;;  %v13167_v52 = vld [vmem:[%s14415_s8 + $0x7cc] sm:$0xf0]  ;;  %v9553_v57 = vor.u32 %v13135_v50, %v9552_v49  ;;  %6579 = vmatpush.bf16.msrb.mxu0 %v9297_v53 }
  0x63   : > { %v9280_v54 = vld [vmem:[%s14415_s8 + $0x4a0] sm:$0xf]  ;;  %v13067_v55 = vld [vmem:[%s14415_s8 + $0x4ac] sm:$0xf0]  ;;  %v9681_v61 = vor.u32 %v13167_v52, %v9680_v51  ;;  %6592 = vmatpush.bf16.msrb.mxu1 %v9425_v56 }
  0x64   : > { %v9408_v58 = vld [vmem:[%s14415_s8 + $0x5a0] sm:$0xf]  ;;  %v13099_v59 = vld [vmem:[%s14415_s8 + $0x5ac] sm:$0xf0]  ;;  %v9281_v2 = vor.u32 %v13067_v55, %v9280_v54  ;;  %6605 = vmatpush.bf16.msrb.mxu2 %v9553_v57 }
  0x65   : > { %v306_v60 = vld [vmem:[%s14433_s23] sm:$0xff]  ;;  %v9536_v62 = vld [vmem:[%s14415_s8 + $0x6a0] sm:$0xf]  ;;  %v9409_v3 = vor.u32 %v13099_v59, %v9408_v58  ;;  %6618 = vmatpush.bf16.msrb.mxu3 %v9681_v61 }
  0x66   : > { %v13131_v63 = vld [vmem:[%s14415_s8 + $0x6ac] sm:$0xf0]  ;;  %1335 = vst [vmem:[#allocation1] ss:$9 sm:$0xff] %v306_v60  ;;  %v9664_v0 = vld [vmem:[%s14415_s8 + $0x7a0] sm:$0xf]  ;;  %6580 = vmatpush.bf16.msrb.mxu0 %v9281_v2 }
  0x67   : > { %v13163_v1 = vld [vmem:[%s14415_s8 + $0x7ac] sm:$0xf0]  ;;  %v9537_v4 = vor.u32 %v13131_v63, %v9536_v62  ;;  %v9264_v5 = vld [vmem:[%s14415_s8 + $0x480] sm:$0xf]  ;;  %6593 = vmatpush.bf16.msrb.mxu1 %v9409_v3  ;;  %v307_v62 = vld [vmem:[%s14433_s23 + $0x8] sm:$0xff] }
  0x68   : > { %v13063_v6 = vld [vmem:[%s14415_s8 + $0x48c] sm:$0xf0]  ;;  %v9392_v7 = vld [vmem:[%s14415_s8 + $0x580] sm:$0xf]  ;;  %v9665_v8 = vor.u32 %v13163_v1, %v9664_v0 }
  0x69   : > { %v13095_v9 = vld [vmem:[%s14415_s8 + $0x58c] sm:$0xf0]  ;;  %v9520_v10 = vld [vmem:[%s14415_s8 + $0x680] sm:$0xf]  ;;  %v9265_v15 = vor.u32 %v13063_v6, %v9264_v5  ;;  %6606 = vmatpush.bf16.msrb.mxu2 %v9537_v4 }
  0x6a   : > { %v13127_v11 = vld [vmem:[%s14415_s8 + $0x68c] sm:$0xf0]  ;;  %v9648_v12 = vld [vmem:[%s14415_s8 + $0x780] sm:$0xf]  ;;  %v9393_v19 = vor.u32 %v13095_v9, %v9392_v7  ;;  %6619 = vmatpush.bf16.msrb.mxu3 %v9665_v8 }
  0x6b   : > { %v13159_v13 = vld [vmem:[%s14415_s8 + $0x78c] sm:$0xf0]  ;;  %v9248_v14 = vld [vmem:[%s14415_s8 + $0x460] sm:$0xf]  ;;  %v9521_v20 = vor.u32 %v13127_v11, %v9520_v10  ;;  %6581 = vmatpush.bf16.msrb.mxu0 %v9265_v15 }
  0x6c   : > { %v13059_v16 = vld [vmem:[%s14415_s8 + $0x46c] sm:$0xf0]  ;;  %v9376_v17 = vld [vmem:[%s14415_s8 + $0x560] sm:$0xf]  ;;  %v9649_v24 = vor.u32 %v13159_v13, %v9648_v12  ;;  %6594 = vmatpush.bf16.msrb.mxu1 %v9393_v19 }
  0x6d   : > { %v13091_v18 = vld [vmem:[%s14415_s8 + $0x56c] sm:$0xf0]  ;;  %v14538_v21 = vld [vmem:[#allocation1 + $0x12] sm:$0xff]  ;;  %v14547_v27 = vld [vmem:[#allocation1 + $0x9] sm:$0xff]  ;;  %v9249_v30 = vor.u32 %v13059_v16, %v9248_v14  ;;  %6607 = vmatpush.bf16.msrb.mxu2 %v9521_v20 }
  0x6e   : > { %v14540_v22 = vld [vmem:[#allocation1] sm:$0xff]  ;;  %v9504_v25 = vld [vmem:[%s14415_s8 + $0x660] sm:$0xf]  ;;  %6560 = vmatmul.bf16.vlgmr.msra.gmra.mxu2 %v14538_v21  ;;  %6547 = vmatmul.bf16.vlgmr.msra.gmra.mxu1 %v14547_v27  ;;  %v9377_v31 = vor.u32 %v13091_v18, %v9376_v17  ;;  %v14576_v61 = vld [vmem:[#allocation1 + $0x36] sm:$0xff] }
  0x6f   : > { %v14542_v23 = vld [vmem:[#allocation1 + $0x1b] sm:$0xff]  ;;  %v9632_v28 = vld [vmem:[%s14415_s8 + $0x760] sm:$0xf]  ;;  %6534 = vmatmul.bf16.vlgmr.msra.gmra.mxu0 %v14540_v22  ;;  %6620 = vmatpush.bf16.msrb.mxu3 %v9649_v24  ;;  %v14579_v1 = vld [vmem:[#allocation1 + $0x24] sm:$0xff] }
  0x70   : > { %v13123_v26 = vld [vmem:[%s14415_s8 + $0x66c] sm:$0xf0]  ;;  %6573 = vmatmul.bf16.vlgmr.msra.gmra.mxu3 %v14542_v23  ;;  %v9232_v33 = vld [vmem:[%s14415_s8 + $0x440] sm:$0xf]  ;;  %6582 = vmatpush.bf16.msrb.mxu0 %v9249_v30 }
  0x71   : > { %v13155_v29 = vld [vmem:[%s14415_s8 + $0x76c] sm:$0xf0]  ;;  %v9505_v32 = vor.u32 %v13123_v26, %v9504_v25  ;;  %v9360_v35 = vld [vmem:[%s14415_s8 + $0x540] sm:$0xf]  ;;  %6595 = vmatpush.bf16.msrb.mxu1 %v9377_v31 }
  0x72   : > { %v13055_v34 = vld [vmem:[%s14415_s8 + $0x44c] sm:$0xf0]  ;;  %v9633_v36 = vor.u32 %v13155_v29, %v9632_v28  ;;  %v9488_v38 = vld [vmem:[%s14415_s8 + $0x640] sm:$0xf] }
  0x73   : > { %v13087_v37 = vld [vmem:[%s14415_s8 + $0x54c] sm:$0xf0]  ;;  %v9616_v40 = vld [vmem:[%s14415_s8 + $0x740] sm:$0xf]  ;;  %v9233_v42 = vor.u32 %v13055_v34, %v9232_v33  ;;  %6608 = vmatpush.bf16.msrb.mxu2 %v9505_v32 }
  0x74   : > { %v13119_v39 = vld [vmem:[%s14415_s8 + $0x64c] sm:$0xf0]  ;;  %v9216_v43 = vld [vmem:[%s14415_s8 + $0x420] sm:$0xf]  ;;  %v9361_v44 = vor.u32 %v13087_v37, %v9360_v35  ;;  %6621 = vmatpush.bf16.msrb.mxu3 %v9633_v36 }
  0x75   : > { %v13151_v41 = vld [vmem:[%s14415_s8 + $0x74c] sm:$0xf0]  ;;  %v9489_v45 = vor.u32 %v13119_v39, %v9488_v38  ;;  %v9344_v47 = vld [vmem:[%s14415_s8 + $0x520] sm:$0xf]  ;;  %6583 = vmatpush.bf16.msrb.mxu0 %v9233_v42 }
  0x76   : > { %v13051_v46 = vld [vmem:[%s14415_s8 + $0x42c] sm:$0xf0]  ;;  %v9617_v49 = vor.u32 %v13151_v41, %v9616_v40  ;;  %v9472_v50 = vld [vmem:[%s14415_s8 + $0x620] sm:$0xf]  ;;  %6596 = vmatpush.bf16.msrb.mxu1 %v9361_v44 }
  0x77   : > { %v13083_v48 = vld [vmem:[%s14415_s8 + $0x52c] sm:$0xf0]  ;;  %v9600_v52 = vld [vmem:[%s14415_s8 + $0x720] sm:$0xf]  ;;  %v9217_v56 = vor.u32 %v13051_v46, %v9216_v43  ;;  %6609 = vmatpush.bf16.msrb.mxu2 %v9489_v45 }
  0x78   : > { %v13115_v51 = vld [vmem:[%s14415_s8 + $0x62c] sm:$0xf0]  ;;  %v9200_v54 = vld [vmem:[%s14415_s8 + $0x400] sm:$0xf]  ;;  %v9345_v63 = vor.u32 %v13083_v48, %v9344_v47  ;;  %6622 = vmatpush.bf16.msrb.mxu3 %v9617_v49 }
  0x79   : > { %v13147_v53 = vld [vmem:[%s14415_s8 + $0x72c] sm:$0xf0]  ;;  %v9328_v57 = vld [vmem:[%s14415_s8 + $0x500] sm:$0xf]  ;;  %v9473_v0 = vor.u32 %v13115_v51, %v9472_v50  ;;  %6584 = vmatpush.bf16.msrb.mxu0 %v9217_v56 }
  0x7a   : > { %v13047_v55 = vld [vmem:[%s14415_s8 + $0x40c] sm:$0xf0]  ;;  %v9456_v59 = vld [vmem:[%s14415_s8 + $0x600] sm:$0xf]  ;;  %v9601_v4 = vor.u32 %v13147_v53, %v9600_v52  ;;  %6597 = vmatpush.bf16.msrb.mxu1 %v9345_v63 }
  0x7b   : > { %v13079_v58 = vld [vmem:[%s14415_s8 + $0x50c] sm:$0xf0]  ;;  %v14583_v3 = vld [vmem:[#allocation1 + $0x2d] sm:$0xff]  ;;  %v9201_v10 = vor.u32 %v13047_v55, %v9200_v54  ;;  %6610 = vmatpush.bf16.msrb.mxu2 %v9473_v0 }
  0x7c   : > { %v13111_v60 = vld [vmem:[%s14415_s8 + $0x60c] sm:$0xf0]  ;;  %v9584_v5 = vld [vmem:[%s14415_s8 + $0x700] sm:$0xf]  ;;  %v9329_v14 = vor.u32 %v13079_v58, %v9328_v57  ;;  %6623 = vmatpush.bf16.msrb.mxu3 %v9601_v4 }
  0x7d   : > { %v14581_v2 = vld [vmem:[#allocation1 + $0x3f] sm:$0xff]  ;;  %v9824_v7 = vld [vmem:[%s14415_s8 + $0x8e0] sm:$0xf]  ;;  %v9457_v15 = vor.u32 %v13111_v60, %v9456_v59  ;;  %6585 = vmatpush.bf16.msrb.mxu0 %v9201_v10 }
  0x7e   : > { %v13143_v6 = vld [vmem:[%s14415_s8 + $0x70c] sm:$0xf0]  ;;  %1345 = vst [vmem:[#allocation1] ss:$9 sm:$0xff] %v307_v62  ;;  %v9952_v9 = vld [vmem:[%s14415_s8 + $0x9e0] sm:$0xf]  ;;  %6598 = vmatpush.bf16.msrb.mxu1 %v9329_v14 }
  0x7f   : > { %v13203_v8 = vld [vmem:[%s14415_s8 + $0x8ec] sm:$0xf0]  ;;  %v10080_v12 = vld [vmem:[%s14415_s8 + $0xae0] sm:$0xf]  ;;  %v9585_v18 = vor.u32 %v13143_v6, %v9584_v5  ;;  %6611 = vmatpush.bf16.msrb.mxu2 %v9457_v15 }
  0x80   : > { %v13235_v11 = vld [vmem:[%s14415_s8 + $0x9ec] sm:$0xf0]  ;;  %v10208_v16 = vld [vmem:[%s14415_s8 + $0xbe0] sm:$0xf]  ;;  %v9825_v19 = vor.u32 %v13203_v8, %v9824_v7  ;;  %6586 = vmatmul.bf16.vlgmr.msrb.gmra.mxu0 %v14579_v1 }
  0x81   : > { %v13267_v13 = vld [vmem:[%s14415_s8 + $0xaec] sm:$0xf0]  ;;  %v9953_v20 = vor.u32 %v13235_v11, %v9952_v9  ;;  %v9808_v25 = vld [vmem:[%s14415_s8 + $0x8c0] sm:$0xf]  ;;  %6624 = vmatpush.bf16.msrb.mxu3 %v9585_v18  ;;  %6599 = vmatmul.bf16.vlgmr.msrb.gmra.mxu1 %v14583_v3 }
  0x82   : > { %v13299_v17 = vld [vmem:[%s14415_s8 + $0xbec] sm:$0xf0]  ;;  %v10081_v24 = vor.u32 %v13267_v13, %v10080_v12  ;;  %v9936_v28 = vld [vmem:[%s14415_s8 + $0x9c0] sm:$0xf]  ;;  %6630 = vmatpush.bf16.msra.mxu0 %v9825_v19  ;;  %6612 = vmatmul.bf16.vlgmr.msrb.gmra.mxu2 %v14576_v61 }
  0x83   : > { %v13199_v26 = vld [vmem:[%s14415_s8 + $0x8cc] sm:$0xf0]  ;;  %v10209_v29 = vor.u32 %v13299_v17, %v10208_v16  ;;  %v10064_v31 = vld [vmem:[%s14415_s8 + $0xac0] sm:$0xf]  ;;  %6643 = vmatpush.bf16.msra.mxu1 %v9953_v20 }
  0x84   : > { %v13231_v30 = vld [vmem:[%s14415_s8 + $0x9cc] sm:$0xf0]  ;;  %v10192_v33 = vld [vmem:[%s14415_s8 + $0xbc0] sm:$0xf]  ;;  %v9809_v35 = vor.u32 %v13199_v26, %v9808_v25  ;;  %6656 = vmatpush.bf16.msra.mxu2 %v10081_v24  ;;  %6625 = vmatmul.bf16.vlgmr.msrb.gmra.mxu3 %v14581_v2 }
  0x85   : > { %v13263_v32 = vld [vmem:[%s14415_s8 + $0xacc] sm:$0xf0]  ;;  %v9937_v36 = vor.u32 %v13231_v30, %v9936_v28  ;;  %v9792_v38 = vld [vmem:[%s14415_s8 + $0x8a0] sm:$0xf]  ;;  %6669 = vmatpush.bf16.msra.mxu3 %v10209_v29 }
  0x86   : > { %v13295_v34 = vld [vmem:[%s14415_s8 + $0xbcc] sm:$0xf0]  ;;  %v10065_v37 = vor.u32 %v13263_v32, %v10064_v31  ;;  %v9920_v40 = vld [vmem:[%s14415_s8 + $0x9a0] sm:$0xf]  ;;  %6631 = vmatpush.bf16.msra.mxu0 %v9809_v35 }
  0x87   : > { %v13195_v39 = vld [vmem:[%s14415_s8 + $0x8ac] sm:$0xf0]  ;;  %v10193_v41 = vor.u32 %v13295_v34, %v10192_v33  ;;  %v10048_v43 = vld [vmem:[%s14415_s8 + $0xaa0] sm:$0xf]  ;;  %6644 = vmatpush.bf16.msra.mxu1 %v9937_v36 }
  0x88   : > { %v13227_v42 = vld [vmem:[%s14415_s8 + $0x9ac] sm:$0xf0]  ;;  %v10176_v45 = vld [vmem:[%s14415_s8 + $0xba0] sm:$0xf]  ;;  %v9793_v47 = vor.u32 %v13195_v39, %v9792_v38  ;;  %6657 = vmatpush.bf16.msra.mxu2 %v10065_v37 }
  0x89   : > { %v13259_v44 = vld [vmem:[%s14415_s8 + $0xaac] sm:$0xf0]  ;;  %v9921_v48 = vor.u32 %v13227_v42, %v9920_v40  ;;  %v9776_v50 = vld [vmem:[%s14415_s8 + $0x880] sm:$0xf]  ;;  %6670 = vmatpush.bf16.msra.mxu3 %v10193_v41 }
  0x8a   : > { %v13291_v46 = vld [vmem:[%s14415_s8 + $0xbac] sm:$0xf0]  ;;  %v10049_v49 = vor.u32 %v13259_v44, %v10048_v43  ;;  %v9904_v52 = vld [vmem:[%s14415_s8 + $0x980] sm:$0xf]  ;;  %6632 = vmatpush.bf16.msra.mxu0 %v9793_v47 }
  0x8b   : > { %v13191_v51 = vld [vmem:[%s14415_s8 + $0x88c] sm:$0xf0]  ;;  %v10177_v53 = vor.u32 %v13291_v46, %v10176_v45  ;;  %v10032_v55 = vld [vmem:[%s14415_s8 + $0xa80] sm:$0xf]  ;;  %6645 = vmatpush.bf16.msra.mxu1 %v9921_v48 }
  0x8c   : > { %v13223_v54 = vld [vmem:[%s14415_s8 + $0x98c] sm:$0xf0]  ;;  %v10160_v57 = vld [vmem:[%s14415_s8 + $0xb80] sm:$0xf]  ;;  %v9777_v59 = vor.u32 %v13191_v51, %v9776_v50  ;;  %6658 = vmatpush.bf16.msra.mxu2 %v10049_v49 }
  0x8d   : > { %v13255_v56 = vld [vmem:[%s14415_s8 + $0xa8c] sm:$0xf0]  ;;  %v9905_v60 = vor.u32 %v13223_v54, %v9904_v52  ;;  %v9760_v63 = vld [vmem:[%s14415_s8 + $0x860] sm:$0xf]  ;;  %6671 = vmatpush.bf16.msra.mxu3 %v10177_v53 }
  0x8e   : > { %v13287_v58 = vld [vmem:[%s14415_s8 + $0xb8c] sm:$0xf0]  ;;  %v10033_v62 = vor.u32 %v13255_v56, %v10032_v55  ;;  %v9888_v4 = vld [vmem:[%s14415_s8 + $0x960] sm:$0xf]  ;;  %6633 = vmatpush.bf16.msra.mxu0 %v9777_v59 }
  0x8f   : > { %v13187_v0 = vld [vmem:[%s14415_s8 + $0x86c] sm:$0xf0]  ;;  %v10161_v5 = vor.u32 %v13287_v58, %v10160_v57  ;;  %v10016_v7 = vld [vmem:[%s14415_s8 + $0xa60] sm:$0xf]  ;;  %6646 = vmatpush.bf16.msra.mxu1 %v9905_v60 }
  0x90   : > { %v13219_v6 = vld [vmem:[%s14415_s8 + $0x96c] sm:$0xf0]  ;;  %v10144_v9 = vld [vmem:[%s14415_s8 + $0xb60] sm:$0xf]  ;;  %v9761_v11 = vor.u32 %v13187_v0, %v9760_v63  ;;  %6659 = vmatpush.bf16.msra.mxu2 %v10033_v62 }
  0x91   : > { %v13251_v8 = vld [vmem:[%s14415_s8 + $0xa6c] sm:$0xf0]  ;;  %v9889_v12 = vor.u32 %v13219_v6, %v9888_v4  ;;  %v9744_v14 = vld [vmem:[%s14415_s8 + $0x840] sm:$0xf]  ;;  %6672 = vmatpush.bf16.msra.mxu3 %v10161_v5 }
  0x92   : > { %v13283_v10 = vld [vmem:[%s14415_s8 + $0xb6c] sm:$0xf0]  ;;  %v10017_v13 = vor.u32 %v13251_v8, %v10016_v7  ;;  %v9872_v16 = vld [vmem:[%s14415_s8 + $0x940] sm:$0xf]  ;;  %6634 = vmatpush.bf16.msra.mxu0 %v9761_v11 }
  0x93   : > { %v13183_v15 = vld [vmem:[%s14415_s8 + $0x84c] sm:$0xf0]  ;;  %v10145_v17 = vor.u32 %v13283_v10, %v10144_v9  ;;  %v10000_v19 = vld [vmem:[%s14415_s8 + $0xa40] sm:$0xf]  ;;  %6647 = vmatpush.bf16.msra.mxu1 %v9889_v12 }
  0x94   : > { %v13215_v18 = vld [vmem:[%s14415_s8 + $0x94c] sm:$0xf0]  ;;  %v10128_v24 = vld [vmem:[%s14415_s8 + $0xb40] sm:$0xf]  ;;  %v9745_v26 = vor.u32 %v13183_v15, %v9744_v14  ;;  %6660 = vmatpush.bf16.msra.mxu2 %v10017_v13 }
  0x95   : > { %v13247_v20 = vld [vmem:[%s14415_s8 + $0xa4c] sm:$0xf0]  ;;  %v9873_v28 = vor.u32 %v13215_v18, %v9872_v16  ;;  %v9728_v30 = vld [vmem:[%s14415_s8 + $0x820] sm:$0xf]  ;;  %6673 = vmatpush.bf16.msra.mxu3 %v10145_v17 }
  0x96   : > { %v13279_v25 = vld [vmem:[%s14415_s8 + $0xb4c] sm:$0xf0]  ;;  %v10001_v29 = vor.u32 %v13247_v20, %v10000_v19  ;;  %v9856_v32 = vld [vmem:[%s14415_s8 + $0x920] sm:$0xf]  ;;  %6635 = vmatpush.bf16.msra.mxu0 %v9745_v26 }
  0x97   : > { %v13179_v31 = vld [vmem:[%s14415_s8 + $0x82c] sm:$0xf0]  ;;  %v10129_v33 = vor.u32 %v13279_v25, %v10128_v24  ;;  %v9984_v35 = vld [vmem:[%s14415_s8 + $0xa20] sm:$0xf]  ;;  %6648 = vmatpush.bf16.msra.mxu1 %v9873_v28 }
  0x98   : > { %v13211_v34 = vld [vmem:[%s14415_s8 + $0x92c] sm:$0xf0]  ;;  %v10112_v37 = vld [vmem:[%s14415_s8 + $0xb20] sm:$0xf]  ;;  %v9729_v39 = vor.u32 %v13179_v31, %v9728_v30  ;;  %6661 = vmatpush.bf16.msra.mxu2 %v10001_v29 }
  0x99   : > { %v13243_v36 = vld [vmem:[%s14415_s8 + $0xa2c] sm:$0xf0]  ;;  %v9712_v40 = vld [vmem:[%s14415_s8 + $0x800] sm:$0xf]  ;;  %v9857_v42 = vor.u32 %v13211_v34, %v9856_v32  ;;  %6674 = vmatpush.bf16.msra.mxu3 %v10129_v33 }
  0x9a   : > { %v13275_v38 = vld [vmem:[%s14415_s8 + $0xb2c] sm:$0xf0]  ;;  %v9985_v43 = vor.u32 %v13243_v36, %v9984_v35  ;;  %v9840_v44 = vld [vmem:[%s14415_s8 + $0x900] sm:$0xf]  ;;  %6636 = vmatpush.bf16.msra.mxu0 %v9729_v39 }
  0x9b   : > { %v13175_v41 = vld [vmem:[%s14415_s8 + $0x80c] sm:$0xf0]  ;;  %v9968_v46 = vld [vmem:[%s14415_s8 + $0xa00] sm:$0xf]  ;;  %v10113_v47 = vor.u32 %v13275_v38, %v10112_v37  ;;  %6649 = vmatpush.bf16.msra.mxu1 %v9857_v42 }
  0x9c   : > { %v13207_v45 = vld [vmem:[%s14415_s8 + $0x90c] sm:$0xf0]  ;;  %v10096_v49 = vld [vmem:[%s14415_s8 + $0xb00] sm:$0xf]  ;;  %v9713_v54 = vor.u32 %v13175_v41, %v9712_v40  ;;  %6662 = vmatpush.bf16.msra.mxu2 %v9985_v43 }
  0x9d   : > { %v13239_v48 = vld [vmem:[%s14415_s8 + $0xa0c] sm:$0xf0]  ;;  %v10336_v51 = vld [vmem:[%s14415_s8 + $0xce0] sm:$0xf]  ;;  %v9841_v58 = vor.u32 %v13207_v45, %v9840_v44  ;;  %6675 = vmatpush.bf16.msra.mxu3 %v10113_v47 }
  0x9e   : > { %v13271_v50 = vld [vmem:[%s14415_s8 + $0xb0c] sm:$0xf0]  ;;  %v10464_v53 = vld [vmem:[%s14415_s8 + $0xde0] sm:$0xf]  ;;  %v9969_v59 = vor.u32 %v13239_v48, %v9968_v46  ;;  %6637 = vmatpush.bf16.msra.mxu0 %v9713_v54 }
  0x9f   : > { %v13331_v52 = vld [vmem:[%s14415_s8 + $0xcec] sm:$0xf0]  ;;  %v10592_v56 = vld [vmem:[%s14415_s8 + $0xee0] sm:$0xf]  ;;  %v10097_v63 = vor.u32 %v13271_v50, %v10096_v49  ;;  %6650 = vmatpush.bf16.msra.mxu1 %v9841_v58 }
  0xa0   : > { %v13363_v55 = vld [vmem:[%s14415_s8 + $0xdec] sm:$0xf0]  ;;  %v10720_v60 = vld [vmem:[%s14415_s8 + $0xfe0] sm:$0xf]  ;;  %v10337_v0 = vor.u32 %v13331_v52, %v10336_v51  ;;  %6663 = vmatpush.bf16.msra.mxu2 %v9969_v59 }
  0xa1   : > { %v13395_v57 = vld [vmem:[%s14415_s8 + $0xeec] sm:$0xf0]  ;;  %v10465_v4 = vor.u32 %v13363_v55, %v10464_v53  ;;  %v10320_v6 = vld [vmem:[%s14415_s8 + $0xcc0] sm:$0xf]  ;;  %6676 = vmatpush.bf16.msra.mxu3 %v10097_v63 }
  0xa2   : > { %v13427_v62 = vld [vmem:[%s14415_s8 + $0xfec] sm:$0xf0]  ;;  %v10593_v5 = vor.u32 %v13395_v57, %v10592_v56  ;;  %v10448_v8 = vld [vmem:[%s14415_s8 + $0xdc0] sm:$0xf]  ;;  %6682 = vmatpush.bf16.msrb.mxu0 %v10337_v0 }
  0xa3   : > { %v13327_v7 = vld [vmem:[%s14415_s8 + $0xccc] sm:$0xf0]  ;;  %v10721_v9 = vor.u32 %v13427_v62, %v10720_v60  ;;  %v10576_v11 = vld [vmem:[%s14415_s8 + $0xec0] sm:$0xf]  ;;  %6695 = vmatpush.bf16.msrb.mxu1 %v10465_v4 }
  0xa4   : > { %v13359_v10 = vld [vmem:[%s14415_s8 + $0xdcc] sm:$0xf0]  ;;  %v10704_v14 = vld [vmem:[%s14415_s8 + $0xfc0] sm:$0xf]  ;;  %v10321_v19 = vor.u32 %v13327_v7, %v10320_v6  ;;  %6708 = vmatpush.bf16.msrb.mxu2 %v10593_v5 }
  0xa5   : > { %v13391_v12 = vld [vmem:[%s14415_s8 + $0xecc] sm:$0xf0]  ;;  %v14673_v16 = vld [vmem:[#allocation1 + $0x12] sm:$0xff]  ;;  %v14675_v17 = vld [vmem:[#allocation1 + $0x9] sm:$0xff]  ;;  %v10449_v20 = vor.u32 %v13359_v10, %v10448_v8  ;;  %6721 = vmatpush.bf16.msrb.mxu3 %v10721_v9 }
  0xa6   : > { %v14669_v13 = vld [vmem:[#allocation1] sm:$0xff]  ;;  %v10577_v24 = vor.u32 %v13391_v12, %v10576_v11  ;;  %v10304_v25 = vld [vmem:[%s14415_s8 + $0xca0] sm:$0xf]  ;;  %6664 = vmatmul.bf16.vlgmr.msra.gmra.mxu2 %v14673_v16  ;;  %6651 = vmatmul.bf16.vlgmr.msra.gmra.mxu1 %v14675_v17 }
  0xa7   : > { %v13423_v15 = vld [vmem:[%s14415_s8 + $0xfcc] sm:$0xf0]  ;;  %v10432_v28 = vld [vmem:[%s14415_s8 + $0xda0] sm:$0xf]  ;;  %6638 = vmatmul.bf16.vlgmr.msra.gmra.mxu0 %v14669_v13  ;;  %6696 = vmatpush.bf16.msrb.mxu1 %v10449_v20 }
  0xa8   : > { %v14677_v18 = vld [vmem:[#allocation1 + $0x1b] sm:$0xff]  ;;  %v10705_v29 = vor.u32 %v13423_v15, %v10704_v14  ;;  %v10560_v31 = vld [vmem:[%s14415_s8 + $0xea0] sm:$0xf]  ;;  %6683 = vmatpush.bf16.msrb.mxu0 %v10321_v19  ;;  %6709 = vmatpush.bf16.msrb.mxu2 %v10577_v24 }
  0xa9   : > { %v13323_v26 = vld [vmem:[%s14415_s8 + $0xcac] sm:$0xf0]  ;;  %v10688_v33 = vld [vmem:[%s14415_s8 + $0xfa0] sm:$0xf]  ;;  %6677 = vmatmul.bf16.vlgmr.msra.gmra.mxu3 %v14677_v18 }
  0xaa   : > { %v13355_v30 = vld [vmem:[%s14415_s8 + $0xdac] sm:$0xf0]  ;;  %v10305_v35 = vor.u32 %v13323_v26, %v10304_v25  ;;  %v10288_v38 = vld [vmem:[%s14415_s8 + $0xc80] sm:$0xf]  ;;  %6722 = vmatpush.bf16.msrb.mxu3 %v10705_v29 }
  0xab   : > { %v13387_v32 = vld [vmem:[%s14415_s8 + $0xeac] sm:$0xf0]  ;;  %v10433_v36 = vor.u32 %v13355_v30, %v10432_v28  ;;  %v10416_v40 = vld [vmem:[%s14415_s8 + $0xd80] sm:$0xf] }
  0xac   : > { %v13419_v34 = vld [vmem:[%s14415_s8 + $0xfac] sm:$0xf0]  ;;  %v10561_v37 = vor.u32 %v13387_v32, %v10560_v31  ;;  %v10544_v43 = vld [vmem:[%s14415_s8 + $0xe80] sm:$0xf]  ;;  %6684 = vmatpush.bf16.msrb.mxu0 %v10305_v35 }
  0xad   : > { %v13319_v39 = vld [vmem:[%s14415_s8 + $0xc8c] sm:$0xf0]  ;;  %v10689_v41 = vor.u32 %v13419_v34, %v10688_v33  ;;  %v10672_v45 = vld [vmem:[%s14415_s8 + $0xf80] sm:$0xf]  ;;  %6697 = vmatpush.bf16.msrb.mxu1 %v10433_v36 }
  0xae   : > { %v13351_v42 = vld [vmem:[%s14415_s8 + $0xd8c] sm:$0xf0]  ;;  %v10289_v47 = vor.u32 %v13319_v39, %v10288_v38  ;;  %6710 = vmatpush.bf16.msrb.mxu2 %v10561_v37  ;;  %v10272_v50 = vld [vmem:[%s14415_s8 + $0xc60] sm:$0xf] }
  0xaf   : > { %v13383_v44 = vld [vmem:[%s14415_s8 + $0xe8c] sm:$0xf0]  ;;  %v10417_v48 = vor.u32 %v13351_v42, %v10416_v40  ;;  %v10400_v52 = vld [vmem:[%s14415_s8 + $0xd60] sm:$0xf]  ;;  %6723 = vmatpush.bf16.msrb.mxu3 %v10689_v41 }
  0xb0   : > { %v13415_v46 = vld [vmem:[%s14415_s8 + $0xf8c] sm:$0xf0]  ;;  %v10545_v49 = vor.u32 %v13383_v44, %v10544_v43  ;;  %v10528_v55 = vld [vmem:[%s14415_s8 + $0xe60] sm:$0xf]  ;;  %6685 = vmatpush.bf16.msrb.mxu0 %v10289_v47  ;;  %v14735_v47 = vld [vmem:[#allocation1 + $0x24] sm:$0xff] }
  0xb1   : > { %v13315_v51 = vld [vmem:[%s14415_s8 + $0xc6c] sm:$0xf0]  ;;  %v10673_v53 = vor.u32 %v13415_v46, %v10672_v45  ;;  %v10656_v57 = vld [vmem:[%s14415_s8 + $0xf60] sm:$0xf]  ;;  %6698 = vmatpush.bf16.msrb.mxu1 %v10417_v48  ;;  %v14737_v48 = vld [vmem:[#allocation1 + $0x36] sm:$0xff] }
  0xb2   : > { %v13347_v54 = vld [vmem:[%s14415_s8 + $0xd6c] sm:$0xf0]  ;;  %v10273_v59 = vor.u32 %v13315_v51, %v10272_v50  ;;  %6711 = vmatpush.bf16.msrb.mxu2 %v10545_v49  ;;  %v10256_v63 = vld [vmem:[%s14415_s8 + $0xc40] sm:$0xf] }
  0xb3   : > { %v13379_v56 = vld [vmem:[%s14415_s8 + $0xe6c] sm:$0xf0]  ;;  %v10401_v60 = vor.u32 %v13347_v54, %v10400_v52  ;;  %v10384_v4 = vld [vmem:[%s14415_s8 + $0xd40] sm:$0xf]  ;;  %6724 = vmatpush.bf16.msrb.mxu3 %v10673_v53 }
  0xb4   : > { %v13411_v58 = vld [vmem:[%s14415_s8 + $0xf6c] sm:$0xf0]  ;;  %v10529_v62 = vor.u32 %v13379_v56, %v10528_v55  ;;  %v10512_v7 = vld [vmem:[%s14415_s8 + $0xe40] sm:$0xf]  ;;  %6686 = vmatpush.bf16.msrb.mxu0 %v10273_v59 }
  0xb5   : > { %v13311_v0 = vld [vmem:[%s14415_s8 + $0xc4c] sm:$0xf0]  ;;  %v10657_v5 = vor.u32 %v13411_v58, %v10656_v57  ;;  %v10640_v9 = vld [vmem:[%s14415_s8 + $0xf40] sm:$0xf]  ;;  %6699 = vmatpush.bf16.msrb.mxu1 %v10401_v60 }
  0xb6   : > { %v13343_v6 = vld [vmem:[%s14415_s8 + $0xd4c] sm:$0xf0]  ;;  %v10257_v11 = vor.u32 %v13311_v0, %v10256_v63  ;;  %v10240_v12 = vld [vmem:[%s14415_s8 + $0xc20] sm:$0xf]  ;;  %6712 = vmatpush.bf16.msrb.mxu2 %v10529_v62 }
  0xb7   : > { %v13375_v8 = vld [vmem:[%s14415_s8 + $0xe4c] sm:$0xf0]  ;;  %v10385_v14 = vor.u32 %v13343_v6, %v10384_v4  ;;  %v10368_v20 = vld [vmem:[%s14415_s8 + $0xd20] sm:$0xf]  ;;  %6725 = vmatpush.bf16.msrb.mxu3 %v10657_v5 }
  0xb8   : > { %v13407_v10 = vld [vmem:[%s14415_s8 + $0xf4c] sm:$0xf0]  ;;  %v10513_v15 = vor.u32 %v13375_v8, %v10512_v7  ;;  %v10496_v26 = vld [vmem:[%s14415_s8 + $0xe20] sm:$0xf]  ;;  %6687 = vmatpush.bf16.msrb.mxu0 %v10257_v11 }
  0xb9   : > { %v13307_v19 = vld [vmem:[%s14415_s8 + $0xc2c] sm:$0xf0]  ;;  %v10641_v25 = vor.u32 %v13407_v10, %v10640_v9  ;;  %v10624_v29 = vld [vmem:[%s14415_s8 + $0xf20] sm:$0xf]  ;;  %6700 = vmatpush.bf16.msrb.mxu1 %v10385_v14 }
  0xba   : > { %v13339_v24 = vld [vmem:[%s14415_s8 + $0xd2c] sm:$0xf0]  ;;  %v10224_v31 = vld [vmem:[%s14415_s8 + $0xc00] sm:$0xf]  ;;  %v10241_v33 = vor.u32 %v13307_v19, %v10240_v12  ;;  %6713 = vmatpush.bf16.msrb.mxu2 %v10513_v15 }
  0xbb   : > { %v13371_v28 = vld [vmem:[%s14415_s8 + $0xe2c] sm:$0xf0]  ;;  %v10352_v34 = vld [vmem:[%s14415_s8 + $0xd00] sm:$0xf]  ;;  %v10369_v38 = vor.u32 %v13339_v24, %v10368_v20  ;;  %6726 = vmatpush.bf16.msrb.mxu3 %v10641_v25 }
  0xbc   : > { %v13403_v30 = vld [vmem:[%s14415_s8 + $0xf2c] sm:$0xf0]  ;;  %v10480_v36 = vld [vmem:[%s14415_s8 + $0xe00] sm:$0xf]  ;;  %v10497_v39 = vor.u32 %v13371_v28, %v10496_v26  ;;  %6688 = vmatpush.bf16.msrb.mxu0 %v10241_v33 }
  0xbd   : > { %v13303_v32 = vld [vmem:[%s14415_s8 + $0xc0c] sm:$0xf0]  ;;  %v10608_v40 = vld [vmem:[%s14415_s8 + $0xf00] sm:$0xf]  ;;  %v10625_v44 = vor.u32 %v13403_v30, %v10624_v29  ;;  %6701 = vmatpush.bf16.msrb.mxu1 %v10369_v38 }
  0xbe   : > { %v13335_v35 = vld [vmem:[%s14415_s8 + $0xd0c] sm:$0xf0]  ;;  %v10848_v42 = vld [vmem:[%s14415_s8 + $0x10e0] sm:$0xf]  ;;  %v10225_v52 = vor.u32 %v13303_v32, %v10224_v31  ;;  %6714 = vmatpush.bf16.msrb.mxu2 %v10497_v39 }
  0xbf   : > { %v13367_v37 = vld [vmem:[%s14415_s8 + $0xe0c] sm:$0xf0]  ;;  %v10976_v45 = vld [vmem:[%s14415_s8 + $0x11e0] sm:$0xf]  ;;  %v10353_v55 = vor.u32 %v13335_v35, %v10352_v34  ;;  %6727 = vmatpush.bf16.msrb.mxu3 %v10625_v44 }
  0xc0   : > { %v13399_v41 = vld [vmem:[%s14415_s8 + $0xf0c] sm:$0xf0]  ;;  %v14739_v49 = vld [vmem:[#allocation1 + $0x2d] sm:$0xff]  ;;  %v10481_v56 = vor.u32 %v13367_v37, %v10480_v36  ;;  %6689 = vmatpush.bf16.msrb.mxu0 %v10225_v52 }
  0xc1   : > { %v13459_v43 = vld [vmem:[%s14415_s8 + $0x10ec] sm:$0xf0]  ;;  %v308_v51 = vld [vmem:[%s14433_s23 + $0x10] sm:$0xff]  ;;  %v10609_v59 = vor.u32 %v13399_v41, %v10608_v40  ;;  %6702 = vmatpush.bf16.msrb.mxu1 %v10353_v55 }
  0xc2   : > { %v13491_v46 = vld [vmem:[%s14415_s8 + $0x11ec] sm:$0xf0]  ;;  %v11104_v53 = vld [vmem:[%s14415_s8 + $0x12e0] sm:$0xf]  ;;  %v10849_v60 = vor.u32 %v13459_v43, %v10848_v42  ;;  %6715 = vmatpush.bf16.msrb.mxu2 %v10481_v56 }
  0xc3   : > { %v14741_v50 = vld [vmem:[#allocation1 + $0x3f] sm:$0xff]  ;;  %v11232_v57 = vld [vmem:[%s14415_s8 + $0x13e0] sm:$0xf]  ;;  %v10977_v62 = vor.u32 %v13491_v46, %v10976_v45  ;;  %6728 = vmatpush.bf16.msrb.mxu3 %v10609_v59  ;;  %6690 = vmatmul.bf16.vlgmr.msrb.gmra.mxu0 %v14735_v47 }
  0xc4   : > { %v13523_v54 = vld [vmem:[%s14415_s8 + $0x12ec] sm:$0xf0]  ;;  %1355 = vst [vmem:[#allocation1] ss:$9 sm:$0xff] %v308_v51  ;;  %v10832_v0 = vld [vmem:[%s14415_s8 + $0x10c0] sm:$0xf]  ;;  %6734 = vmatpush.bf16.msra.mxu0 %v10849_v60  ;;  %6703 = vmatmul.bf16.vlgmr.msrb.gmra.mxu1 %v14739_v49 }
  0xc5   : > { %v13555_v58 = vld [vmem:[%s14415_s8 + $0x13ec] sm:$0xf0]  ;;  %v11105_v63 = vor.u32 %v13523_v54, %v11104_v53  ;;  %v10960_v5 = vld [vmem:[%s14415_s8 + $0x11c0] sm:$0xf]  ;;  %6747 = vmatpush.bf16.msra.mxu1 %v10977_v62  ;;  %6716 = vmatmul.bf16.vlgmr.msrb.gmra.mxu2 %v14737_v48 }
  0xc6   : > { %v13455_v4 = vld [vmem:[%s14415_s8 + $0x10cc] sm:$0xf0]  ;;  %v11233_v6 = vor.u32 %v13555_v58, %v11232_v57  ;;  %v11088_v8 = vld [vmem:[%s14415_s8 + $0x12c0] sm:$0xf]  ;;  %6729 = vmatmul.bf16.vlgmr.msrb.gmra.mxu3 %v14741_v50 }
  0xc7   : > { %v13487_v7 = vld [vmem:[%s14415_s8 + $0x11cc] sm:$0xf0]  ;;  %v11216_v10 = vld [vmem:[%s14415_s8 + $0x13c0] sm:$0xf]  ;;  %v10833_v12 = vor.u32 %v13455_v4, %v10832_v0  ;;  %6760 = vmatpush.bf16.msra.mxu2 %v11105_v63 }
  0xc8   : > { %v13519_v9 = vld [vmem:[%s14415_s8 + $0x12cc] sm:$0xf0]  ;;  %v10961_v14 = vor.u32 %v13487_v7, %v10960_v5  ;;  %v10816_v19 = vld [vmem:[%s14415_s8 + $0x10a0] sm:$0xf]  ;;  %6773 = vmatpush.bf16.msra.mxu3 %v11233_v6 }
  0xc9   : > { %v13551_v11 = vld [vmem:[%s14415_s8 + $0x13cc] sm:$0xf0]  ;;  %v11089_v15 = vor.u32 %v13519_v9, %v11088_v8  ;;  %v10944_v24 = vld [vmem:[%s14415_s8 + $0x11a0] sm:$0xf]  ;;  %6735 = vmatpush.bf16.msra.mxu0 %v10833_v12 }
  0xca   : > { %v13451_v20 = vld [vmem:[%s14415_s8 + $0x10ac] sm:$0xf0]  ;;  %v11217_v25 = vor.u32 %v13551_v11, %v11216_v10  ;;  %v11072_v28 = vld [vmem:[%s14415_s8 + $0x12a0] sm:$0xf]  ;;  %6748 = vmatpush.bf16.msra.mxu1 %v10961_v14 }
  0xcb   : > { %v13483_v26 = vld [vmem:[%s14415_s8 + $0x11ac] sm:$0xf0]  ;;  %v11200_v30 = vld [vmem:[%s14415_s8 + $0x13a0] sm:$0xf]  ;;  %v10817_v32 = vor.u32 %v13451_v20, %v10816_v19  ;;  %6761 = vmatpush.bf16.msra.mxu2 %v11089_v15 }
  0xcc   : > { %v13515_v29 = vld [vmem:[%s14415_s8 + $0x12ac] sm:$0xf0]  ;;  %v10945_v33 = vor.u32 %v13483_v26, %v10944_v24  ;;  %v10800_v35 = vld [vmem:[%s14415_s8 + $0x1080] sm:$0xf]  ;;  %6774 = vmatpush.bf16.msra.mxu3 %v11217_v25 }
  0xcd   : > { %v13547_v31 = vld [vmem:[%s14415_s8 + $0x13ac] sm:$0xf0]  ;;  %v11073_v34 = vor.u32 %v13515_v29, %v11072_v28  ;;  %v10928_v37 = vld [vmem:[%s14415_s8 + $0x1180] sm:$0xf]  ;;  %6736 = vmatpush.bf16.msra.mxu0 %v10817_v32 }
  0xce   : > { %v13447_v36 = vld [vmem:[%s14415_s8 + $0x108c] sm:$0xf0]  ;;  %v11201_v38 = vor.u32 %v13547_v31, %v11200_v30  ;;  %v11056_v40 = vld [vmem:[%s14415_s8 + $0x1280] sm:$0xf]  ;;  %6749 = vmatpush.bf16.msra.mxu1 %v10945_v33 }
  0xcf   : > { %v13479_v39 = vld [vmem:[%s14415_s8 + $0x118c] sm:$0xf0]  ;;  %v11184_v42 = vld [vmem:[%s14415_s8 + $0x1380] sm:$0xf]  ;;  %v10801_v44 = vor.u32 %v13447_v36, %v10800_v35  ;;  %6762 = vmatpush.bf16.msra.mxu2 %v11073_v34 }
  0xd0   : > { %v13511_v41 = vld [vmem:[%s14415_s8 + $0x128c] sm:$0xf0]  ;;  %v10929_v45 = vor.u32 %v13479_v39, %v10928_v37  ;;  %v10784_v51 = vld [vmem:[%s14415_s8 + $0x1060] sm:$0xf]  ;;  %6775 = vmatpush.bf16.msra.mxu3 %v11201_v38 }
  0xd1   : > { %v13543_v43 = vld [vmem:[%s14415_s8 + $0x138c] sm:$0xf0]  ;;  %v11057_v46 = vor.u32 %v13511_v41, %v11056_v40  ;;  %v10912_v53 = vld [vmem:[%s14415_s8 + $0x1160] sm:$0xf]  ;;  %6737 = vmatpush.bf16.msra.mxu0 %v10801_v44 }
  0xd2   : > { %v13443_v52 = vld [vmem:[%s14415_s8 + $0x106c] sm:$0xf0]  ;;  %v11185_v54 = vor.u32 %v13543_v43, %v11184_v42  ;;  %v11040_v56 = vld [vmem:[%s14415_s8 + $0x1260] sm:$0xf]  ;;  %6750 = vmatpush.bf16.msra.mxu1 %v10929_v45 }
  0xd3   : > { %v13475_v55 = vld [vmem:[%s14415_s8 + $0x116c] sm:$0xf0]  ;;  %v11168_v58 = vld [vmem:[%s14415_s8 + $0x1360] sm:$0xf]  ;;  %v10785_v60 = vor.u32 %v13443_v52, %v10784_v51  ;;  %6763 = vmatpush.bf16.msra.mxu2 %v11057_v46 }
  0xd4   : > { %v13507_v57 = vld [vmem:[%s14415_s8 + $0x126c] sm:$0xf0]  ;;  %v10913_v62 = vor.u32 %v13475_v55, %v10912_v53  ;;  %v10768_v0 = vld [vmem:[%s14415_s8 + $0x1040] sm:$0xf]  ;;  %6776 = vmatpush.bf16.msra.mxu3 %v11185_v54 }
  0xd5   : > { %v13539_v59 = vld [vmem:[%s14415_s8 + $0x136c] sm:$0xf0]  ;;  %v11041_v63 = vor.u32 %v13507_v57, %v11040_v56  ;;  %v10896_v5 = vld [vmem:[%s14415_s8 + $0x1140] sm:$0xf]  ;;  %6738 = vmatpush.bf16.msra.mxu0 %v10785_v60 }
  0xd6   : > { %v13439_v4 = vld [vmem:[%s14415_s8 + $0x104c] sm:$0xf0]  ;;  %v11169_v6 = vor.u32 %v13539_v59, %v11168_v58  ;;  %v11024_v8 = vld [vmem:[%s14415_s8 + $0x1240] sm:$0xf]  ;;  %6751 = vmatpush.bf16.msra.mxu1 %v10913_v62 }
  0xd7   : > { %v13471_v7 = vld [vmem:[%s14415_s8 + $0x114c] sm:$0xf0]  ;;  %v11152_v10 = vld [vmem:[%s14415_s8 + $0x1340] sm:$0xf]  ;;  %v10769_v12 = vor.u32 %v13439_v4, %v10768_v0  ;;  %6764 = vmatpush.bf16.msra.mxu2 %v11041_v63 }
  0xd8   : > { %v13503_v9 = vld [vmem:[%s14415_s8 + $0x124c] sm:$0xf0]  ;;  %v10897_v14 = vor.u32 %v13471_v7, %v10896_v5  ;;  %v10752_v19 = vld [vmem:[%s14415_s8 + $0x1020] sm:$0xf]  ;;  %6777 = vmatpush.bf16.msra.mxu3 %v11169_v6 }
  0xd9   : > { %v13535_v11 = vld [vmem:[%s14415_s8 + $0x134c] sm:$0xf0]  ;;  %v11025_v15 = vor.u32 %v13503_v9, %v11024_v8  ;;  %v10880_v24 = vld [vmem:[%s14415_s8 + $0x1120] sm:$0xf]  ;;  %6739 = vmatpush.bf16.msra.mxu0 %v10769_v12 }
  0xda   : > { %v13435_v20 = vld [vmem:[%s14415_s8 + $0x102c] sm:$0xf0]  ;;  %v11153_v25 = vor.u32 %v13535_v11, %v11152_v10  ;;  %v11008_v28 = vld [vmem:[%s14415_s8 + $0x1220] sm:$0xf]  ;;  %6752 = vmatpush.bf16.msra.mxu1 %v10897_v14 }
  0xdb   : > { %v13467_v26 = vld [vmem:[%s14415_s8 + $0x112c] sm:$0xf0]  ;;  %v11136_v30 = vld [vmem:[%s14415_s8 + $0x1320] sm:$0xf]  ;;  %v10753_v32 = vor.u32 %v13435_v20, %v10752_v19  ;;  %6765 = vmatpush.bf16.msra.mxu2 %v11025_v15 }
  0xdc   : > { %v13499_v29 = vld [vmem:[%s14415_s8 + $0x122c] sm:$0xf0]  ;;  %v10736_v33 = vld [vmem:[%s14415_s8 + $0x1000] sm:$0xf]  ;;  %v10881_v35 = vor.u32 %v13467_v26, %v10880_v24  ;;  %6778 = vmatpush.bf16.msra.mxu3 %v11153_v25 }
  0xdd   : > { %v13531_v31 = vld [vmem:[%s14415_s8 + $0x132c] sm:$0xf0]  ;;  %v11009_v36 = vor.u32 %v13499_v29, %v11008_v28  ;;  %v10864_v37 = vld [vmem:[%s14415_s8 + $0x1100] sm:$0xf]  ;;  %6740 = vmatpush.bf16.msra.mxu0 %v10753_v32 }
  0xde   : > { %v13431_v34 = vld [vmem:[%s14415_s8 + $0x100c] sm:$0xf0]  ;;  %v10992_v39 = vld [vmem:[%s14415_s8 + $0x1200] sm:$0xf]  ;;  %v11137_v40 = vor.u32 %v13531_v31, %v11136_v30  ;;  %6753 = vmatpush.bf16.msra.mxu1 %v10881_v35 }
  0xdf   : > { %v13463_v38 = vld [vmem:[%s14415_s8 + $0x110c] sm:$0xf0]  ;;  %v11120_v42 = vld [vmem:[%s14415_s8 + $0x1300] sm:$0xf]  ;;  %v10737_v51 = vor.u32 %v13431_v34, %v10736_v33  ;;  %6766 = vmatpush.bf16.msra.mxu2 %v11009_v36 }
  0xe0   : > { %v13495_v41 = vld [vmem:[%s14415_s8 + $0x120c] sm:$0xf0]  ;;  %v11360_v44 = vld [vmem:[%s14415_s8 + $0x14e0] sm:$0xf]  ;;  %v10865_v55 = vor.u32 %v13463_v38, %v10864_v37  ;;  %6779 = vmatpush.bf16.msra.mxu3 %v11137_v40 }
  0xe1   : > { %v13527_v43 = vld [vmem:[%s14415_s8 + $0x130c] sm:$0xf0]  ;;  %v11488_v46 = vld [vmem:[%s14415_s8 + $0x15e0] sm:$0xf]  ;;  %v10993_v56 = vor.u32 %v13495_v41, %v10992_v39  ;;  %6741 = vmatpush.bf16.msra.mxu0 %v10737_v51 }
  0xe2   : > { %v13587_v45 = vld [vmem:[%s14415_s8 + $0x14ec] sm:$0xf0]  ;;  %v11616_v53 = vld [vmem:[%s14415_s8 + $0x16e0] sm:$0xf]  ;;  %v11121_v59 = vor.u32 %v13527_v43, %v11120_v42  ;;  %6754 = vmatpush.bf16.msra.mxu1 %v10865_v55 }
  0xe3   : > { %v13619_v52 = vld [vmem:[%s14415_s8 + $0x15ec] sm:$0xf0]  ;;  %v11744_v57 = vld [vmem:[%s14415_s8 + $0x17e0] sm:$0xf]  ;;  %v11361_v60 = vor.u32 %v13587_v45, %v11360_v44  ;;  %6767 = vmatpush.bf16.msra.mxu2 %v10993_v56 }
  0xe4   : > { %v13651_v54 = vld [vmem:[%s14415_s8 + $0x16ec] sm:$0xf0]  ;;  %v11489_v62 = vor.u32 %v13619_v52, %v11488_v46  ;;  %v11344_v0 = vld [vmem:[%s14415_s8 + $0x14c0] sm:$0xf]  ;;  %6780 = vmatpush.bf16.msra.mxu3 %v11121_v59 }
  0xe5   : > { %v13683_v58 = vld [vmem:[%s14415_s8 + $0x17ec] sm:$0xf0]  ;;  %v11617_v63 = vor.u32 %v13651_v54, %v11616_v53  ;;  %v11472_v5 = vld [vmem:[%s14415_s8 + $0x15c0] sm:$0xf]  ;;  %6786 = vmatpush.bf16.msrb.mxu0 %v11361_v60 }
  0xe6   : > { %v13583_v4 = vld [vmem:[%s14415_s8 + $0x14cc] sm:$0xf0]  ;;  %v11745_v6 = vor.u32 %v13683_v58, %v11744_v57  ;;  %v11600_v8 = vld [vmem:[%s14415_s8 + $0x16c0] sm:$0xf]  ;;  %6799 = vmatpush.bf16.msrb.mxu1 %v11489_v62 }
  0xe7   : > { %v13615_v7 = vld [vmem:[%s14415_s8 + $0x15cc] sm:$0xf0]  ;;  %v11728_v11 = vld [vmem:[%s14415_s8 + $0x17c0] sm:$0xf]  ;;  %v11345_v20 = vor.u32 %v13583_v4, %v11344_v0  ;;  %6812 = vmatpush.bf16.msrb.mxu2 %v11617_v63 }
  0xe8   : > { %v13647_v9 = vld [vmem:[%s14415_s8 + $0x16cc] sm:$0xf0]  ;;  %v14826_v14 = vld [vmem:[#allocation1 + $0x12] sm:$0xff]  ;;  %v14828_v15 = vld [vmem:[#allocation1 + $0x9] sm:$0xff]  ;;  %v11473_v24 = vor.u32 %v13615_v7, %v11472_v5  ;;  %6825 = vmatpush.bf16.msrb.mxu3 %v11745_v6 }
  0xe9   : > { %v14822_v10 = vld [vmem:[#allocation1] sm:$0xff]  ;;  %v11601_v25 = vor.u32 %v13647_v9, %v11600_v8  ;;  %v11328_v26 = vld [vmem:[%s14415_s8 + $0x14a0] sm:$0xf]  ;;  %6768 = vmatmul.bf16.vlgmr.msra.gmra.mxu2 %v14826_v14  ;;  %6755 = vmatmul.bf16.vlgmr.msra.gmra.mxu1 %v14828_v15 }
  0xea   : > { %v13679_v12 = vld [vmem:[%s14415_s8 + $0x17cc] sm:$0xf0]  ;;  %v11456_v29 = vld [vmem:[%s14415_s8 + $0x15a0] sm:$0xf]  ;;  %6742 = vmatmul.bf16.vlgmr.msra.gmra.mxu0 %v14822_v10  ;;  %6800 = vmatpush.bf16.msrb.mxu1 %v11473_v24 }
  0xeb   : > { %v14830_v19 = vld [vmem:[#allocation1 + $0x1b] sm:$0xff]  ;;  %v11729_v30 = vor.u32 %v13679_v12, %v11728_v11  ;;  %v11584_v32 = vld [vmem:[%s14415_s8 + $0x16a0] sm:$0xf]  ;;  %6787 = vmatpush.bf16.msrb.mxu0 %v11345_v20  ;;  %6813 = vmatpush.bf16.msrb.mxu2 %v11601_v25 }
  0xec   : > { %v13579_v28 = vld [vmem:[%s14415_s8 + $0x14ac] sm:$0xf0]  ;;  %v11712_v34 = vld [vmem:[%s14415_s8 + $0x17a0] sm:$0xf]  ;;  %6781 = vmatmul.bf16.vlgmr.msra.gmra.mxu3 %v14830_v19 }
  0xed   : > { %v13611_v31 = vld [vmem:[%s14415_s8 + $0x15ac] sm:$0xf0]  ;;  %v11329_v36 = vor.u32 %v13579_v28, %v11328_v26  ;;  %v11312_v39 = vld [vmem:[%s14415_s8 + $0x1480] sm:$0xf]  ;;  %6826 = vmatpush.bf16.msrb.mxu3 %v11729_v30  ;;  %v6535_v30 = vpop.f32.mrf.mxu0 }
  0xee   : > { %v13643_v33 = vld [vmem:[%s14415_s8 + $0x16ac] sm:$0xf0]  ;;  %v11457_v37 = vor.u32 %v13611_v31, %v11456_v29  ;;  %v11440_v41 = vld [vmem:[%s14415_s8 + $0x1580] sm:$0xf] }
  0xef   : > { %v13675_v35 = vld [vmem:[%s14415_s8 + $0x17ac] sm:$0xf0]  ;;  %v11585_v38 = vor.u32 %v13643_v33, %v11584_v32  ;;  %v11568_v44 = vld [vmem:[%s14415_s8 + $0x1680] sm:$0xf]  ;;  %6788 = vmatpush.bf16.msrb.mxu0 %v11329_v36  ;;  %v6548_v36 = vpop.f32.mrf.mxu1 }
  0xf0   : > { %v13575_v40 = vld [vmem:[%s14415_s8 + $0x148c] sm:$0xf0]  ;;  %v11713_v42 = vor.u32 %v13675_v35, %v11712_v34  ;;  %v11696_v46 = vld [vmem:[%s14415_s8 + $0x1780] sm:$0xf]  ;;  %6801 = vmatpush.bf16.msrb.mxu1 %v11457_v37 }
  0xf1   : > { %v13607_v43 = vld [vmem:[%s14415_s8 + $0x158c] sm:$0xf0]  ;;  %v11313_v52 = vor.u32 %v13575_v40, %v11312_v39  ;;  %6814 = vmatpush.bf16.msrb.mxu2 %v11585_v38  ;;  %v11296_v55 = vld [vmem:[%s14415_s8 + $0x1460] sm:$0xf] }
  0xf2   : > { %v13639_v45 = vld [vmem:[%s14415_s8 + $0x168c] sm:$0xf0]  ;;  %v11441_v53 = vor.u32 %v13607_v43, %v11440_v41  ;;  %v11424_v57 = vld [vmem:[%s14415_s8 + $0x1560] sm:$0xf]  ;;  %6827 = vmatpush.bf16.msrb.mxu3 %v11713_v42  ;;  %v6549_v41 = vadd.f32 %v6548_v36, %v6535_v30 }
  0xf3   : > { %v13671_v51 = vld [vmem:[%s14415_s8 + $0x178c] sm:$0xf0]  ;;  %v11569_v54 = vor.u32 %v13639_v45, %v11568_v44  ;;  %v11552_v60 = vld [vmem:[%s14415_s8 + $0x1660] sm:$0xf]  ;;  %6789 = vmatpush.bf16.msrb.mxu0 %v11313_v52 }
  0xf4   : > { %v13571_v56 = vld [vmem:[%s14415_s8 + $0x146c] sm:$0xf0]  ;;  %v11697_v58 = vor.u32 %v13671_v51, %v11696_v46  ;;  %v11680_v63 = vld [vmem:[%s14415_s8 + $0x1760] sm:$0xf]  ;;  %6802 = vmatpush.bf16.msrb.mxu1 %v11441_v53 }
  0xf5   : > { %v13603_v59 = vld [vmem:[%s14415_s8 + $0x156c] sm:$0xf0]  ;;  %v11297_v4 = vor.u32 %v13571_v56, %v11296_v55  ;;  %6815 = vmatpush.bf16.msrb.mxu2 %v11569_v54  ;;  %v11280_v7 = vld [vmem:[%s14415_s8 + $0x1440] sm:$0xf] }
  0xf6   : > { %v13635_v62 = vld [vmem:[%s14415_s8 + $0x166c] sm:$0xf0]  ;;  %v11425_v5 = vor.u32 %v13603_v59, %v11424_v57  ;;  %v11408_v9 = vld [vmem:[%s14415_s8 + $0x1540] sm:$0xf]  ;;  %6828 = vmatpush.bf16.msrb.mxu3 %v11697_v58 }
  0xf7   : > { %v13667_v0 = vld [vmem:[%s14415_s8 + $0x176c] sm:$0xf0]  ;;  %v11553_v6 = vor.u32 %v13635_v62, %v11552_v60  ;;  %v11536_v20 = vld [vmem:[%s14415_s8 + $0x1640] sm:$0xf]  ;;  %6790 = vmatpush.bf16.msrb.mxu0 %v11297_v4  ;;  %v6561_v60 = vpop.f32.mrf.mxu2  ;;  %v14888_v4 = vld [vmem:[#allocation1 + $0x24] sm:$0xff] }
  0xf8   : > { %v13567_v8 = vld [vmem:[%s14415_s8 + $0x144c] sm:$0xf0]  ;;  %v11681_v11 = vor.u32 %v13667_v0, %v11680_v63  ;;  %v11664_v25 = vld [vmem:[%s14415_s8 + $0x1740] sm:$0xf]  ;;  %6803 = vmatpush.bf16.msrb.mxu1 %v11425_v5  ;;  %v14890_v5 = vld [vmem:[#allocation1 + $0x36] sm:$0xff] }
  0xf9   : > { %v13599_v12 = vld [vmem:[%s14415_s8 + $0x154c] sm:$0xf0]  ;;  %v11281_v28 = vor.u32 %v13567_v8, %v11280_v7  ;;  %v11264_v29 = vld [vmem:[%s14415_s8 + $0x1420] sm:$0xf]  ;;  %6816 = vmatpush.bf16.msrb.mxu2 %v11553_v6  ;;  %v6562_v6 = vadd.f32 %v6561_v60, %v6549_v41  ;;  %v6574_v7 = vpop.f32.mrf.mxu3 }
  0xfa   : > { %v13631_v24 = vld [vmem:[%s14415_s8 + $0x164c] sm:$0xf0]  ;;  %v11409_v31 = vor.u32 %v13599_v12, %v11408_v9  ;;  %v11392_v34 = vld [vmem:[%s14415_s8 + $0x1520] sm:$0xf]  ;;  %6829 = vmatpush.bf16.msrb.mxu3 %v11681_v11  ;;  %v309_v11 = vld [vmem:[%s14433_s23 + $0x18] sm:$0xff] }
  0xfb   : > { %v13663_v26 = vld [vmem:[%s14415_s8 + $0x174c] sm:$0xf0]  ;;  %v11537_v32 = vor.u32 %v13631_v24, %v11536_v20  ;;  %v11520_v38 = vld [vmem:[%s14415_s8 + $0x1620] sm:$0xf]  ;;  %6791 = vmatpush.bf16.msrb.mxu0 %v11281_v28 }
  0xfc   : > { %v13563_v33 = vld [vmem:[%s14415_s8 + $0x142c] sm:$0xf0]  ;;  %v11665_v37 = vor.u32 %v13663_v26, %v11664_v25  ;;  %v11648_v40 = vld [vmem:[%s14415_s8 + $0x1720] sm:$0xf]  ;;  %6804 = vmatpush.bf16.msrb.mxu1 %v11409_v31  ;;  %v14899_v25 = vadd.f32 %v6574_v7, %v6562_v6  ;;  %v6537_v26 = vpop.f32.mrf.mxu0 }
  0xfd   : > { %v13595_v35 = vld [vmem:[%s14415_s8 + $0x152c] sm:$0xf0]  ;;  %v11248_v43 = vld [vmem:[%s14415_s8 + $0x1400] sm:$0xf]  ;;  %v11265_v45 = vor.u32 %v13563_v33, %v11264_v29  ;;  %6817 = vmatpush.bf16.msrb.mxu2 %v11537_v32  ;;  %v6550_v32 = vpop.f32.mrf.mxu1 }
  0xfe   : > { %v13627_v39 = vld [vmem:[%s14415_s8 + $0x162c] sm:$0xf0]  ;;  %v11376_v46 = vld [vmem:[%s14415_s8 + $0x1500] sm:$0xf]  ;;  %v11393_v54 = vor.u32 %v13595_v35, %v11392_v34  ;;  %6830 = vmatpush.bf16.msrb.mxu3 %v11665_v37 }
  0xff   : > { %v13659_v42 = vld [vmem:[%s14415_s8 + $0x172c] sm:$0xf0]  ;;  %v11504_v52 = vld [vmem:[%s14415_s8 + $0x1600] sm:$0xf]  ;;  %v11521_v55 = vor.u32 %v13627_v39, %v11520_v38  ;;  %6792 = vmatpush.bf16.msrb.mxu0 %v11265_v45 }
 0x100   : > { %v13559_v44 = vld [vmem:[%s14415_s8 + $0x140c] sm:$0xf0]  ;;  %v11632_v56 = vld [vmem:[%s14415_s8 + $0x1700] sm:$0xf]  ;;  %v11649_v62 = vor.u32 %v13659_v42, %v11648_v40  ;;  %6805 = vmatpush.bf16.msrb.mxu1 %v11393_v54 }
 0x101   : > { %v13591_v51 = vld [vmem:[%s14415_s8 + $0x150c] sm:$0xf0]  ;;  %v11872_v58 = vld [vmem:[%s14415_s8 + $0x18e0] sm:$0xf]  ;;  %v11249_v12 = vor.u32 %v13559_v44, %v11248_v43  ;;  %6818 = vmatpush.bf16.msrb.mxu2 %v11521_v55 }
 0x102   : > { %v13623_v53 = vld [vmem:[%s14415_s8 + $0x160c] sm:$0xf0]  ;;  %v12000_v63 = vld [vmem:[%s14415_s8 + $0x19e0] sm:$0xf]  ;;  %v11377_v28 = vor.u32 %v13591_v51, %v11376_v46  ;;  %6831 = vmatpush.bf16.msrb.mxu3 %v11649_v62  ;;  %v6563_v46 = vpop.f32.mrf.mxu2 }
 0x103   : > { %v13655_v57 = vld [vmem:[%s14415_s8 + $0x170c] sm:$0xf0]  ;;  %v14892_v8 = vld [vmem:[#allocation1 + $0x2d] sm:$0xff]  ;;  %v11505_v29 = vor.u32 %v13623_v53, %v11504_v52  ;;  %6793 = vmatpush.bf16.msrb.mxu0 %v11249_v12  ;;  %v6576_v52 = vpop.f32.mrf.mxu3 }
 0x104   : > { %v13715_v59 = vld [vmem:[%s14415_s8 + $0x18ec] sm:$0xf0]  ;;  %v12128_v20 = vld [vmem:[%s14415_s8 + $0x1ae0] sm:$0xf]  ;;  %v11633_v33 = vor.u32 %v13655_v57, %v11632_v56  ;;  %6806 = vmatpush.bf16.msrb.mxu1 %v11377_v28 }
 0x105   : > { %v13747_v0 = vld [vmem:[%s14415_s8 + $0x19ec] sm:$0xf0]  ;;  %v12256_v30 = vld [vmem:[%s14415_s8 + $0x1be0] sm:$0xf]  ;;  %v11873_v34 = vor.u32 %v13715_v59, %v11872_v58  ;;  %6819 = vmatpush.bf16.msrb.mxu2 %v11505_v29 }
 0x106   : > { %v14894_v9 = vld [vmem:[#allocation1 + $0x3f] sm:$0xff]  ;;  %v12001_v35 = vor.u32 %v13747_v0, %v12000_v63  ;;  %v11856_v37 = vld [vmem:[%s14415_s8 + $0x18c0] sm:$0xf]  ;;  %6832 = vmatpush.bf16.msrb.mxu3 %v11633_v33  ;;  %6794 = vmatmul.bf16.vlgmr.msrb.gmra.mxu0 %v14888_v4 }
 0x107   : > { %v13779_v24 = vld [vmem:[%s14415_s8 + $0x1aec] sm:$0xf0]  ;;  %1365 = vst [vmem:[#allocation1] ss:$9 sm:$0xff] %v309_v11  ;;  %v11984_v39 = vld [vmem:[%s14415_s8 + $0x19c0] sm:$0xf]  ;;  %6838 = vmatpush.bf16.msra.mxu0 %v11873_v34  ;;  %6807 = vmatmul.bf16.vlgmr.msrb.gmra.mxu1 %v14892_v8  ;;  %v6587_v34 = vpop.f32.mrf.mxu0 }
 0x108   : > { %v13811_v31 = vld [vmem:[%s14415_s8 + $0x1bec] sm:$0xf0]  ;;  %v12129_v36 = vor.u32 %v13779_v24, %v12128_v20  ;;  %v12112_v42 = vld [vmem:[%s14415_s8 + $0x1ac0] sm:$0xf]  ;;  %6851 = vmatpush.bf16.msra.mxu1 %v12001_v35  ;;  %6820 = vmatmul.bf16.vlgmr.msrb.gmra.mxu2 %v14890_v5 }
 0x109   : > { %v13711_v38 = vld [vmem:[%s14415_s8 + $0x18cc] sm:$0xf0]  ;;  %v12257_v40 = vor.u32 %v13811_v31, %v12256_v30  ;;  %v12240_v44 = vld [vmem:[%s14415_s8 + $0x1bc0] sm:$0xf]  ;;  %6833 = vmatmul.bf16.vlgmr.msrb.gmra.mxu3 %v14894_v9 }
 0x10a   : > { %v13743_v41 = vld [vmem:[%s14415_s8 + $0x19cc] sm:$0xf0]  ;;  %v11857_v51 = vor.u32 %v13711_v38, %v11856_v37  ;;  %6864 = vmatpush.bf16.msra.mxu2 %v12129_v36  ;;  %v11840_v55 = vld [vmem:[%s14415_s8 + $0x18a0] sm:$0xf] }
 0x10b   : > { %v13775_v43 = vld [vmem:[%s14415_s8 + $0x1acc] sm:$0xf0]  ;;  %v11985_v53 = vor.u32 %v13743_v41, %v11984_v39  ;;  %v11968_v57 = vld [vmem:[%s14415_s8 + $0x19a0] sm:$0xf]  ;;  %6877 = vmatpush.bf16.msra.mxu3 %v12257_v40  ;;  %v6588_v40 = vadd.f32 %v6587_v34, %v14899_v25  ;;  %v6600_v41 = vpop.f32.mrf.mxu1 }
 0x10c   : > { %v13807_v45 = vld [vmem:[%s14415_s8 + $0x1bcc] sm:$0xf0]  ;;  %v12113_v54 = vor.u32 %v13775_v43, %v12112_v42  ;;  %v12096_v60 = vld [vmem:[%s14415_s8 + $0x1aa0] sm:$0xf]  ;;  %6839 = vmatpush.bf16.msra.mxu0 %v11857_v51 }
 0x10d   : > { %v13707_v56 = vld [vmem:[%s14415_s8 + $0x18ac] sm:$0xf0]  ;;  %v12241_v58 = vor.u32 %v13807_v45, %v12240_v44  ;;  %v12224_v63 = vld [vmem:[%s14415_s8 + $0x1ba0] sm:$0xf]  ;;  %6852 = vmatpush.bf16.msra.mxu1 %v11985_v53  ;;  %v6601_v52 = vadd.f32 %v6600_v41, %v6588_v40 }
 0x10e   : > { %v13739_v59 = vld [vmem:[%s14415_s8 + $0x19ac] sm:$0xf0]  ;;  %v11841_v6 = vor.u32 %v13707_v56, %v11840_v55  ;;  %6865 = vmatpush.bf16.msra.mxu2 %v12113_v54  ;;  %v11824_v12 = vld [vmem:[%s14415_s8 + $0x1880] sm:$0xf] }
 0x10f   : > { %v13771_v62 = vld [vmem:[%s14415_s8 + $0x1aac] sm:$0xf0]  ;;  %v11969_v7 = vor.u32 %v13739_v59, %v11968_v57  ;;  %v11952_v24 = vld [vmem:[%s14415_s8 + $0x1980] sm:$0xf]  ;;  %6878 = vmatpush.bf16.msra.mxu3 %v12241_v58  ;;  %v6613_v58 = vpop.f32.mrf.mxu2 }
 0x110   : > { %v13803_v0 = vld [vmem:[%s14415_s8 + $0x1bac] sm:$0xf0]  ;;  %v12097_v11 = vor.u32 %v13771_v62, %v12096_v60  ;;  %v12080_v29 = vld [vmem:[%s14415_s8 + $0x1a80] sm:$0xf]  ;;  %6840 = vmatpush.bf16.msra.mxu0 %v11841_v6  ;;  %v6626_v6 = vpop.f32.mrf.mxu3 }
 0x111   : > { %v13703_v20 = vld [vmem:[%s14415_s8 + $0x188c] sm:$0xf0]  ;;  %v12225_v26 = vor.u32 %v13803_v0, %v12224_v63  ;;  %v12208_v31 = vld [vmem:[%s14415_s8 + $0x1b80] sm:$0xf]  ;;  %6853 = vmatpush.bf16.msra.mxu1 %v11969_v7  ;;  %v6614_v0 = vadd.f32 %v6613_v58, %v6601_v52 }
 0x112   : > { %v13735_v28 = vld [vmem:[%s14415_s8 + $0x198c] sm:$0xf0]  ;;  %v11825_v33 = vor.u32 %v13703_v20, %v11824_v12  ;;  %6866 = vmatpush.bf16.msra.mxu2 %v12097_v11  ;;  %v11808_v37 = vld [vmem:[%s14415_s8 + $0x1860] sm:$0xf] }
 0x113   : > { %v13767_v30 = vld [vmem:[%s14415_s8 + $0x1a8c] sm:$0xf0]  ;;  %v11953_v35 = vor.u32 %v13735_v28, %v11952_v24  ;;  %v11936_v39 = vld [vmem:[%s14415_s8 + $0x1960] sm:$0xf]  ;;  %6879 = vmatpush.bf16.msra.mxu3 %v12225_v26  ;;  %v14948_v20 = vadd.f32 %v6626_v6, %v6614_v0  ;;  %v6589_v24 = vpop.f32.mrf.mxu0 }
 0x114   : > { %v13799_v32 = vld [vmem:[%s14415_s8 + $0x1b8c] sm:$0xf0]  ;;  %v12081_v36 = vor.u32 %v13767_v30, %v12080_v29  ;;  %v12064_v44 = vld [vmem:[%s14415_s8 + $0x1a60] sm:$0xf]  ;;  %6841 = vmatpush.bf16.msra.mxu0 %v11825_v33 }
 0x115   : > { %v13699_v38 = vld [vmem:[%s14415_s8 + $0x186c] sm:$0xf0]  ;;  %v12209_v42 = vor.u32 %v13799_v32, %v12208_v31  ;;  %v12192_v46 = vld [vmem:[%s14415_s8 + $0x1b60] sm:$0xf]  ;;  %6854 = vmatpush.bf16.msra.mxu1 %v11953_v35  ;;  %v6602_v32 = vpop.f32.mrf.mxu1 }
 0x116   : > { %v13731_v43 = vld [vmem:[%s14415_s8 + $0x196c] sm:$0xf0]  ;;  %v11809_v53 = vor.u32 %v13699_v38, %v11808_v37  ;;  %6867 = vmatpush.bf16.msra.mxu2 %v12081_v36  ;;  %v11792_v55 = vld [vmem:[%s14415_s8 + $0x1840] sm:$0xf] }
 0x117   : > { %v13763_v45 = vld [vmem:[%s14415_s8 + $0x1a6c] sm:$0xf0]  ;;  %v11937_v25 = vor.u32 %v13731_v43, %v11936_v39  ;;  %v11920_v57 = vld [vmem:[%s14415_s8 + $0x1940] sm:$0xf]  ;;  %6880 = vmatpush.bf16.msra.mxu3 %v12209_v42 }
 0x118   : > { %v13795_v51 = vld [vmem:[%s14415_s8 + $0x1b6c] sm:$0xf0]  ;;  %v12065_v54 = vor.u32 %v13763_v45, %v12064_v44  ;;  %v12048_v62 = vld [vmem:[%s14415_s8 + $0x1a40] sm:$0xf]  ;;  %6842 = vmatpush.bf16.msra.mxu0 %v11809_v53 }
 0x119   : > { %v13695_v56 = vld [vmem:[%s14415_s8 + $0x184c] sm:$0xf0]  ;;  %v12193_v59 = vor.u32 %v13795_v51, %v12192_v46  ;;  %v12176_v7 = vld [vmem:[%s14415_s8 + $0x1b40] sm:$0xf]  ;;  %6855 = vmatpush.bf16.msra.mxu1 %v11937_v25  ;;  %v6615_v51 = vpop.f32.mrf.mxu2 }
 0x11a   : > { %v13727_v60 = vld [vmem:[%s14415_s8 + $0x194c] sm:$0xf0]  ;;  %v11793_v12 = vor.u32 %v13695_v56, %v11792_v55  ;;  %6868 = vmatpush.bf16.msra.mxu2 %v12065_v54  ;;  %v11776_v29 = vld [vmem:[%s14415_s8 + $0x1820] sm:$0xf]  ;;  %v6628_v55 = vpop.f32.mrf.mxu3 }
 0x11b   : > { %v13759_v63 = vld [vmem:[%s14415_s8 + $0x1a4c] sm:$0xf0]  ;;  %v11921_v26 = vor.u32 %v13727_v60, %v11920_v57  ;;  %v11904_v31 = vld [vmem:[%s14415_s8 + $0x1920] sm:$0xf]  ;;  %6881 = vmatpush.bf16.msra.mxu3 %v12193_v59 }
 0x11c   : > { %v13791_v11 = vld [vmem:[%s14415_s8 + $0x1b4c] sm:$0xf0]  ;;  %v12049_v28 = vor.u32 %v13759_v63, %v12048_v62  ;;  %v12032_v35 = vld [vmem:[%s14415_s8 + $0x1a20] sm:$0xf]  ;;  %6843 = vmatpush.bf16.msra.mxu0 %v11793_v12 }
 0x11d   : > { %v13691_v30 = vld [vmem:[%s14415_s8 + $0x182c] sm:$0xf0]  ;;  %v12177_v33 = vor.u32 %v13791_v11, %v12176_v7  ;;  %v12160_v37 = vld [vmem:[%s14415_s8 + $0x1b20] sm:$0xf]  ;;  %6856 = vmatpush.bf16.msra.mxu1 %v11921_v26 }
 0x11e   : > { %v13723_v34 = vld [vmem:[%s14415_s8 + $0x192c] sm:$0xf0]  ;;  %v11777_v39 = vor.u32 %v13691_v30, %v11776_v29  ;;  %v11760_v40 = vld [vmem:[%s14415_s8 + $0x1800] sm:$0xf]  ;;  %6869 = vmatpush.bf16.msra.mxu2 %v12049_v28 }
 0x11f   : > { %v13755_v36 = vld [vmem:[%s14415_s8 + $0x1a2c] sm:$0xf0]  ;;  %v11905_v42 = vor.u32 %v13723_v34, %v11904_v31  ;;  %v11888_v44 = vld [vmem:[%s14415_s8 + $0x1900] sm:$0xf]  ;;  %6882 = vmatpush.bf16.msra.mxu3 %v12177_v33 }
 0x120   : > { %v13787_v38 = vld [vmem:[%s14415_s8 + $0x1b2c] sm:$0xf0]  ;;  %v12033_v43 = vor.u32 %v13755_v36, %v12032_v35  ;;  %v12016_v46 = vld [vmem:[%s14415_s8 + $0x1a00] sm:$0xf]  ;;  %6844 = vmatpush.bf16.msra.mxu0 %v11777_v39 }
 0x121   : > { %v13687_v41 = vld [vmem:[%s14415_s8 + $0x180c] sm:$0xf0]  ;;  %v12161_v52 = vor.u32 %v13787_v38, %v12160_v37  ;;  %v12144_v25 = vld [vmem:[%s14415_s8 + $0x1b00] sm:$0xf]  ;;  %6857 = vmatpush.bf16.msra.mxu1 %v11905_v42 }
 0x122   : > { %v13719_v45 = vld [vmem:[%s14415_s8 + $0x190c] sm:$0xf0]  ;;  %v12384_v56 = vld [vmem:[%s14415_s8 + $0x1ce0] sm:$0xf]  ;;  %v11761_v59 = vor.u32 %v13687_v41, %v11760_v40  ;;  %6870 = vmatpush.bf16.msra.mxu2 %v12033_v43 }
 0x123   : > { %v13751_v53 = vld [vmem:[%s14415_s8 + $0x1a0c] sm:$0xf0]  ;;  %v12512_v58 = vld [vmem:[%s14415_s8 + $0x1de0] sm:$0xf]  ;;  %v11889_v0 = vor.u32 %v13719_v45, %v11888_v44  ;;  %6883 = vmatpush.bf16.msra.mxu3 %v12161_v52 }
 0x124   : > { %v13783_v54 = vld [vmem:[%s14415_s8 + $0x1b0c] sm:$0xf0]  ;;  %v12640_v62 = vld [vmem:[%s14415_s8 + $0x1ee0] sm:$0xf]  ;;  %v12017_v6 = vor.u32 %v13751_v53, %v12016_v46  ;;  %6845 = vmatpush.bf16.msra.mxu0 %v11761_v59 }
 0x125   : > { %v13843_v57 = vld [vmem:[%s14415_s8 + $0x1cec] sm:$0xf0]  ;;  %v12768_v7 = vld [vmem:[%s14415_s8 + $0x1fe0] sm:$0xf]  ;;  %v12145_v12 = vor.u32 %v13783_v54, %v12144_v25  ;;  %6858 = vmatpush.bf16.msra.mxu1 %v11889_v0 }
 0x126   : > { %v13875_v60 = vld [vmem:[%s14415_s8 + $0x1dec] sm:$0xf0]  ;;  %v12385_v24 = vor.u32 %v13843_v57, %v12384_v56  ;;  %v12368_v29 = vld [vmem:[%s14415_s8 + $0x1cc0] sm:$0xf]  ;;  %6871 = vmatpush.bf16.msra.mxu2 %v12017_v6 }
 0x127   : > { %v13907_v63 = vld [vmem:[%s14415_s8 + $0x1eec] sm:$0xf0]  ;;  %v12513_v26 = vor.u32 %v13875_v60, %v12512_v58  ;;  %v12496_v31 = vld [vmem:[%s14415_s8 + $0x1dc0] sm:$0xf]  ;;  %6884 = vmatpush.bf16.msra.mxu3 %v12145_v12  ;;  %v6639_v12 = vpop.f32.mrf.mxu0 }
 0x128   : > { %v13939_v11 = vld [vmem:[%s14415_s8 + $0x1fec] sm:$0xf0]  ;;  %v12641_v28 = vor.u32 %v13907_v63, %v12640_v62  ;;  %v12624_v34 = vld [vmem:[%s14415_s8 + $0x1ec0] sm:$0xf]  ;;  %6890 = vmatpush.bf16.msrb.mxu0 %v12385_v24 }
 0x129   : > { %v13839_v30 = vld [vmem:[%s14415_s8 + $0x1ccc] sm:$0xf0]  ;;  %v12769_v32 = vor.u32 %v13939_v11, %v12768_v7  ;;  %v12752_v37 = vld [vmem:[%s14415_s8 + $0x1fc0] sm:$0xf]  ;;  %6903 = vmatpush.bf16.msrb.mxu1 %v12513_v26 }
 0x12a   : > { %v13871_v33 = vld [vmem:[%s14415_s8 + $0x1dcc] sm:$0xf0]  ;;  %v1368_v39 = vld [vmem:[#allocation1 + $0x12] sm:$0xff]  ;;  %v1367_v40 = vld [vmem:[#allocation1 + $0x9] sm:$0xff]  ;;  %v12369_v42 = vor.u32 %v13839_v30, %v12368_v29  ;;  %6916 = vmatpush.bf16.msrb.mxu2 %v12641_v28  ;;  %v6640_v28 = vadd.f32 %v6639_v12, %v14948_v20  ;;  %v6652_v30 = vpop.f32.mrf.mxu1 }
 0x12b   : > { %v13903_v35 = vld [vmem:[%s14415_s8 + $0x1ecc] sm:$0xf0]  ;;  %v12497_v43 = vor.u32 %v13871_v33, %v12496_v31  ;;  %v12352_v45 = vld [vmem:[%s14415_s8 + $0x1ca0] sm:$0xf]  ;;  %6929 = vmatpush.bf16.msrb.mxu3 %v12769_v32  ;;  %6872 = vmatmul.bf16.vlgmr.msra.gmra.mxu2 %v1368_v39 }
 0x12c   : > { %v1366_v36 = vld [vmem:[#allocation1] sm:$0xff]  ;;  %v12625_v44 = vor.u32 %v13903_v35, %v12624_v34  ;;  %v12480_v51 = vld [vmem:[%s14415_s8 + $0x1da0] sm:$0xf]  ;;  %6859 = vmatmul.bf16.vlgmr.msra.gmra.mxu1 %v1367_v40  ;;  %6891 = vmatpush.bf16.msrb.mxu0 %v12369_v42 }
 0x12d   : > { %v13935_v38 = vld [vmem:[%s14415_s8 + $0x1fcc] sm:$0xf0]  ;;  %6846 = vmatmul.bf16.vlgmr.msra.gmra.mxu0 %v1366_v36  ;;  %v12608_v25 = vld [vmem:[%s14415_s8 + $0x1ea0] sm:$0xf]  ;;  %6904 = vmatpush.bf16.msrb.mxu1 %v12497_v43 }
 0x12e   : > { %v1369_v41 = vld [vmem:[#allocation1 + $0x1b] sm:$0xff]  ;;  %v12753_v52 = vor.u32 %v13935_v38, %v12752_v37  ;;  %v12736_v55 = vld [vmem:[%s14415_s8 + $0x1fa0] sm:$0xf]  ;;  %6917 = vmatpush.bf16.msrb.mxu2 %v12625_v44  ;;  %v6653_v37 = vadd.f32 %v6652_v30, %v6640_v28 }
 0x12f   : > { %v13835_v46 = vld [vmem:[%s14415_s8 + $0x1cac] sm:$0xf0]  ;;  %6885 = vmatmul.bf16.vlgmr.msra.gmra.mxu3 %v1369_v41  ;;  %v12336_v60 = vld [vmem:[%s14415_s8 + $0x1c80] sm:$0xf] }
 0x130   : > { %v13867_v53 = vld [vmem:[%s14415_s8 + $0x1dac] sm:$0xf0]  ;;  %v12353_v57 = vor.u32 %v13835_v46, %v12352_v45  ;;  %v12464_v63 = vld [vmem:[%s14415_s8 + $0x1d80] sm:$0xf]  ;;  %6930 = vmatpush.bf16.msrb.mxu3 %v12753_v52 }
 0x131   : > { %v13899_v54 = vld [vmem:[%s14415_s8 + $0x1eac] sm:$0xf0]  ;;  %v12481_v58 = vor.u32 %v13867_v53, %v12480_v51  ;;  %v12592_v7 = vld [vmem:[%s14415_s8 + $0x1e80] sm:$0xf]  ;;  %v6665_v53 = vpop.f32.mrf.mxu2 }
 0x132   : > { %v13931_v56 = vld [vmem:[%s14415_s8 + $0x1fac] sm:$0xf0]  ;;  %v12609_v59 = vor.u32 %v13899_v54, %v12608_v25  ;;  %v12720_v24 = vld [vmem:[%s14415_s8 + $0x1f80] sm:$0xf]  ;;  %6892 = vmatpush.bf16.msrb.mxu0 %v12353_v57  ;;  %v6678_v57 = vpop.f32.mrf.mxu3 }
 0x133   : > { %v13831_v62 = vld [vmem:[%s14415_s8 + $0x1c8c] sm:$0xf0]  ;;  %v12737_v0 = vor.u32 %v13931_v56, %v12736_v55  ;;  %6905 = vmatpush.bf16.msrb.mxu1 %v12481_v58  ;;  %v12320_v33 = vld [vmem:[%s14415_s8 + $0x1c60] sm:$0xf]  ;;  %v6666_v56 = vadd.f32 %v6665_v53, %v6653_v37 }
 0x134   : > { %v13863_v6 = vld [vmem:[%s14415_s8 + $0x1d8c] sm:$0xf0]  ;;  %v12337_v29 = vor.u32 %v13831_v62, %v12336_v60  ;;  %6918 = vmatpush.bf16.msrb.mxu2 %v12609_v59  ;;  %v12448_v35 = vld [vmem:[%s14415_s8 + $0x1d60] sm:$0xf]  ;;  %v6641_v60 = vpop.f32.mrf.mxu0 }
 0x135   : > { %v13895_v11 = vld [vmem:[%s14415_s8 + $0x1e8c] sm:$0xf0]  ;;  %v12465_v31 = vor.u32 %v13863_v6, %v12464_v63  ;;  %6931 = vmatpush.bf16.msrb.mxu3 %v12737_v0  ;;  %v12576_v39 = vld [vmem:[%s14415_s8 + $0x1e60] sm:$0xf]  ;;  %v6654_v63 = vpop.f32.mrf.mxu1  ;;  %v15015_v0 = vadd.f32 %v6678_v57, %v6666_v56 }
 0x136   : > { %v13927_v26 = vld [vmem:[%s14415_s8 + $0x1f8c] sm:$0xf0]  ;;  %v12593_v32 = vor.u32 %v13895_v11, %v12592_v7  ;;  %v12704_v40 = vld [vmem:[%s14415_s8 + $0x1f60] sm:$0xf]  ;;  %6893 = vmatpush.bf16.msrb.mxu0 %v12337_v29 }
 0x137   : > { %v13827_v34 = vld [vmem:[%s14415_s8 + $0x1c6c] sm:$0xf0]  ;;  %v12721_v36 = vor.u32 %v13927_v26, %v12720_v24  ;;  %6906 = vmatpush.bf16.msrb.mxu1 %v12465_v31  ;;  %v12304_v45 = vld [vmem:[%s14415_s8 + $0x1c40] sm:$0xf] }
 0x138   : > { %v13859_v38 = vld [vmem:[%s14415_s8 + $0x1d6c] sm:$0xf0]  ;;  %v12321_v42 = vor.u32 %v13827_v34, %v12320_v33  ;;  %6919 = vmatpush.bf16.msrb.mxu2 %v12593_v32  ;;  %v12432_v51 = vld [vmem:[%s14415_s8 + $0x1d40] sm:$0xf] }
 0x139   : > { %v13891_v20 = vld [vmem:[%s14415_s8 + $0x1e6c] sm:$0xf0]  ;;  %v12449_v43 = vor.u32 %v13859_v38, %v12448_v35  ;;  %6932 = vmatpush.bf16.msrb.mxu3 %v12721_v36  ;;  %v12560_v54 = vld [vmem:[%s14415_s8 + $0x1e40] sm:$0xf] }
 0x13a   : > { %v13923_v41 = vld [vmem:[%s14415_s8 + $0x1f6c] sm:$0xf0]  ;;  %v12577_v44 = vor.u32 %v13891_v20, %v12576_v39  ;;  %v12688_v58 = vld [vmem:[%s14415_s8 + $0x1f40] sm:$0xf]  ;;  %6894 = vmatpush.bf16.msrb.mxu0 %v12321_v42 }
 0x13b   : > { %v13823_v46 = vld [vmem:[%s14415_s8 + $0x1c4c] sm:$0xf0]  ;;  %v12705_v52 = vor.u32 %v13923_v41, %v12704_v40  ;;  %6907 = vmatpush.bf16.msrb.mxu1 %v12449_v43  ;;  %v12288_v11 = vld [vmem:[%s14415_s8 + $0x1c20] sm:$0xf] }
 0x13c   : > { %v13855_v25 = vld [vmem:[%s14415_s8 + $0x1d4c] sm:$0xf0]  ;;  %v12305_v62 = vor.u32 %v13823_v46, %v12304_v45  ;;  %6920 = vmatpush.bf16.msrb.mxu2 %v12577_v44  ;;  %v12416_v24 = vld [vmem:[%s14415_s8 + $0x1d20] sm:$0xf]  ;;  %v6667_v44 = vpop.f32.mrf.mxu2  ;;  %v12945_v45 = vld [vmem:[%s14415_s8 + $0xe4] sm:$0xf] }
 0x13d   : > { %v13887_v55 = vld [vmem:[%s14415_s8 + $0x1e4c] sm:$0xf0]  ;;  %v12433_v6 = vor.u32 %v13855_v25, %v12432_v51  ;;  %6933 = vmatpush.bf16.msrb.mxu3 %v12705_v52  ;;  %v12544_v29 = vld [vmem:[%s14415_s8 + $0x1e20] sm:$0xf]  ;;  %v8802_v46 = vld [vmem:[%s14415_s8 + $0xf0] sm:$0xf0]  ;;  %v6680_v52 = vpop.f32.mrf.mxu3 }
 0x13e   : > { %v13919_v59 = vld [vmem:[%s14415_s8 + $0x1f4c] sm:$0xf0]  ;;  %v12561_v7 = vor.u32 %v13887_v55, %v12560_v54  ;;  %v12672_v31 = vld [vmem:[%s14415_s8 + $0x1f20] sm:$0xf]  ;;  %6895 = vmatpush.bf16.msrb.mxu0 %v12305_v62  ;;  %v12977_v51 = vld [vmem:[%s14415_s8 + $0x1e4] sm:$0xf]  ;;  %v8805_v62 = vor.u32 %v12945_v45, %v8802_v46 }
 0x13f   : > { %v13819_v12 = vld [vmem:[%s14415_s8 + $0x1c2c] sm:$0xf0]  ;;  %v12689_v26 = vor.u32 %v13919_v59, %v12688_v58  ;;  %v12272_v34 = vld [vmem:[%s14415_s8 + $0x1c00] sm:$0xf]  ;;  %6908 = vmatpush.bf16.msrb.mxu1 %v12433_v6  ;;  %v8930_v25 = vld [vmem:[%s14415_s8 + $0x1f0] sm:$0xf0] }
 0x140   : > { %v13851_v28 = vld [vmem:[%s14415_s8 + $0x1d2c] sm:$0xf0]  ;;  %v12289_v33 = vor.u32 %v13819_v12, %v12288_v11  ;;  %6921 = vmatpush.bf16.msrb.mxu2 %v12561_v7  ;;  %v12400_v38 = vld [vmem:[%s14415_s8 + $0x1d00] sm:$0xf]  ;;  %v13009_v54 = vld [vmem:[%s14415_s8 + $0x2e4] sm:$0xf]  ;;  %v8933_v63 = vor.u32 %v12977_v51, %v8930_v25 }
 0x141   : > { %v13883_v30 = vld [vmem:[%s14415_s8 + $0x1e2c] sm:$0xf0]  ;;  %v12417_v36 = vor.u32 %v13851_v28, %v12416_v24  ;;  %v12528_v20 = vld [vmem:[%s14415_s8 + $0x1e00] sm:$0xf]  ;;  %6934 = vmatpush.bf16.msrb.mxu3 %v12689_v26  ;;  %v9058_v55 = vld [vmem:[%s14415_s8 + $0x2f0] sm:$0xf0] }
 0x142   : > { %v13915_v32 = vld [vmem:[%s14415_s8 + $0x1f2c] sm:$0xf0]  ;;  %v12545_v37 = vor.u32 %v13883_v30, %v12544_v29  ;;  %v12656_v42 = vld [vmem:[%s14415_s8 + $0x1f00] sm:$0xf]  ;;  %6896 = vmatpush.bf16.msrb.mxu0 %v12289_v33  ;;  %v13041_v58 = vld [vmem:[%s14415_s8 + $0x3e4] sm:$0xf]  ;;  %v9061_v6 = vor.u32 %v13009_v54, %v9058_v55 }
 0x143   : > { %v13815_v35 = vld [vmem:[%s14415_s8 + $0x1c0c] sm:$0xf0]  ;;  %v12673_v40 = vor.u32 %v13915_v32, %v12672_v31  ;;  %6909 = vmatpush.bf16.msrb.mxu1 %v12417_v36  ;;  %v9186_v59 = vld [vmem:[%s14415_s8 + $0x3f0] sm:$0xf0]  ;;  %v12941_v7 = vld [vmem:[%s14415_s8 + $0xc4] sm:$0xf] }
 0x144   : > { %v13847_v39 = vld [vmem:[%s14415_s8 + $0x1d0c] sm:$0xf0]  ;;  %v12273_v53 = vor.u32 %v13815_v35, %v12272_v34  ;;  %6922 = vmatpush.bf16.msrb.mxu2 %v12545_v37  ;;  %v8786_v11 = vld [vmem:[%s14415_s8 + $0xd0] sm:$0xf0]  ;;  %v12973_v12 = vld [vmem:[%s14415_s8 + $0x1c4] sm:$0xf]  ;;  %v9189_v24 = vor.u32 %v13041_v58, %v9186_v59 }
 0x145   : > { %v13879_v41 = vld [vmem:[%s14415_s8 + $0x1e0c] sm:$0xf0]  ;;  %v12401_v56 = vor.u32 %v13847_v39, %v12400_v38  ;;  %6935 = vmatpush.bf16.msrb.mxu3 %v12673_v40  ;;  %v8914_v26 = vld [vmem:[%s14415_s8 + $0x1d0] sm:$0xf0]  ;;  %v13005_v28 = vld [vmem:[%s14415_s8 + $0x2c4] sm:$0xf]  ;;  %v8789_v36 = vor.u32 %v12941_v7, %v8786_v11  ;;  %v6704_v11 = vpop.f32.mrf.mxu1 }
 0x146   : > { %v13911_v43 = vld [vmem:[%s14415_s8 + $0x1f0c] sm:$0xf0]  ;;  %v12529_v57 = vor.u32 %v13879_v41, %v12528_v20  ;;  %6897 = vmatpush.bf16.msrb.mxu0 %v12273_v53  ;;  %v9042_v29 = vld [vmem:[%s14415_s8 + $0x2d0] sm:$0xf0]  ;;  %v13037_v31 = vld [vmem:[%s14415_s8 + $0x3c4] sm:$0xf]  ;;  %v8917_v37 = vor.u32 %v12973_v12, %v8914_v26 }
 0x147   : > { %v12657_v60 = vor.u32 %v13911_v43, %v12656_v42  ;;  %6910 = vmatpush.bf16.msrb.mxu1 %v12401_v56  ;;  %v1370_v30 = vld [vmem:[#allocation1 + $0x24] sm:$0xff]  ;;  %v1372_v33 = vld [vmem:[#allocation1 + $0x36] sm:$0xff]  ;;  %v1371_v34 = vld [vmem:[#allocation1 + $0x2d] sm:$0xff]  ;;  %v9045_v38 = vor.u32 %v13005_v28, %v9042_v29 }
 0x148   : > { %6923 = vmatpush.bf16.msrb.mxu2 %v12529_v57  ;;  %v9170_v32 = vld [vmem:[%s14415_s8 + $0x3d0] sm:$0xf0]  ;;  %v12937_v39 = vld [vmem:[%s14415_s8 + $0xa4] sm:$0xf] }
 0x149   : > { %6936 = vmatpush.bf16.msrb.mxu3 %v12657_v60  ;;  %v1373_v35 = vld [vmem:[#allocation1 + $0x3f] sm:$0xff]  ;;  %v12969_v40 = vld [vmem:[%s14415_s8 + $0x1a4] sm:$0xf]  ;;  %6898 = vmatmul.bf16.vlgmr.msrb.gmra.mxu0 %v1370_v30  ;;  %v9173_v41 = vor.u32 %v13037_v31, %v9170_v32  ;;  %v6691_v60 = vpop.f32.mrf.mxu0 }
 0x14a   : > { %6942 = vmatpush.bf16.msra.mxu0 %v8805_v62  ;;  %v8770_v20 = vld [vmem:[%s14415_s8 + $0xb0] sm:$0xf0]  ;;  %v13001_v43 = vld [vmem:[%s14415_s8 + $0x2a4] sm:$0xf]  ;;  %6911 = vmatmul.bf16.vlgmr.msrb.gmra.mxu1 %v1371_v34 }
 0x14b   : > { %6955 = vmatpush.bf16.msra.mxu1 %v8933_v63  ;;  %v8898_v42 = vld [vmem:[%s14415_s8 + $0x1b0] sm:$0xf0]  ;;  %6924 = vmatmul.bf16.vlgmr.msrb.gmra.mxu2 %v1372_v33  ;;  %v13033_v45 = vld [vmem:[%s14415_s8 + $0x3a4] sm:$0xf]  ;;  %v8773_v51 = vor.u32 %v12937_v39, %v8770_v20 }
 0x14c   : > { %6968 = vmatpush.bf16.msra.mxu2 %v9061_v6  ;;  %v9026_v44 = vld [vmem:[%s14415_s8 + $0x2b0] sm:$0xf0]  ;;  %6937 = vmatmul.bf16.vlgmr.msrb.gmra.mxu3 %v1373_v35  ;;  %v8901_v52 = vor.u32 %v12969_v40, %v8898_v42  ;;  %v12933_v25 = vld [vmem:[%s14415_s8 + $0x84] sm:$0xf]  ;;  %v6692_v6 = vadd.f32 %v6691_v60, %v15015_v0  ;;  %v6717_v42 = vpop.f32.mrf.mxu2 }
 0x14d   : > { %6981 = vmatpush.bf16.msra.mxu3 %v9189_v24  ;;  %v9154_v46 = vld [vmem:[%s14415_s8 + $0x3b0] sm:$0xf0]  ;;  %v9029_v53 = vor.u32 %v13001_v43, %v9026_v44  ;;  %v12965_v55 = vld [vmem:[%s14415_s8 + $0x184] sm:$0xf] }
 0x14e   : > { %6943 = vmatpush.bf16.msra.mxu0 %v8789_v36  ;;  %v8754_v54 = vld [vmem:[%s14415_s8 + $0x90] sm:$0xf0]  ;;  %v9157_v56 = vor.u32 %v13033_v45, %v9154_v46  ;;  %v12997_v58 = vld [vmem:[%s14415_s8 + $0x284] sm:$0xf]  ;;  %v6705_v31 = vadd.f32 %v6704_v11, %v6692_v6 }
 0x14f   : > { %6956 = vmatpush.bf16.msra.mxu1 %v8917_v37  ;;  %v8882_v57 = vld [vmem:[%s14415_s8 + $0x190] sm:$0xf0]  ;;  %v13029_v62 = vld [vmem:[%s14415_s8 + $0x384] sm:$0xf]  ;;  %v8757_v7 = vor.u32 %v12933_v25, %v8754_v54 }
 0x150   : > { %6969 = vmatpush.bf16.msra.mxu2 %v9045_v38  ;;  %v9010_v59 = vld [vmem:[%s14415_s8 + $0x290] sm:$0xf0]  ;;  %v8885_v12 = vor.u32 %v12965_v55, %v8882_v57  ;;  %v12929_v26 = vld [vmem:[%s14415_s8 + $0x64] sm:$0xf]  ;;  %v6718_v46 = vadd.f32 %v6717_v42, %v6705_v31  ;;  %v6706_v55 = vpop.f32.mrf.mxu1 }
 0x151   : > { %6982 = vmatpush.bf16.msra.mxu3 %v9173_v41  ;;  %v9138_v63 = vld [vmem:[%s14415_s8 + $0x390] sm:$0xf0]  ;;  %v9013_v24 = vor.u32 %v12997_v58, %v9010_v59  ;;  %v12961_v29 = vld [vmem:[%s14415_s8 + $0x164] sm:$0xf]  ;;  %v6693_v25 = vpop.f32.mrf.mxu0 }
 0x152   : > { %6944 = vmatpush.bf16.msra.mxu0 %v8773_v51  ;;  %v8738_v28 = vld [vmem:[%s14415_s8 + $0x70] sm:$0xf0]  ;;  %v9141_v30 = vor.u32 %v13029_v62, %v9138_v63  ;;  %v12993_v33 = vld [vmem:[%s14415_s8 + $0x264] sm:$0xf]  ;;  %v6730_v51 = vpop.f32.mrf.mxu3 }
 0x153   : > { %6957 = vmatpush.bf16.msra.mxu1 %v8901_v52  ;;  %v8866_v32 = vld [vmem:[%s14415_s8 + $0x170] sm:$0xf0]  ;;  %v13025_v34 = vld [vmem:[%s14415_s8 + $0x364] sm:$0xf]  ;;  %v8741_v36 = vor.u32 %v12929_v26, %v8738_v28 }
 0x154   : > { %6970 = vmatpush.bf16.msra.mxu2 %v9029_v53  ;;  %v8994_v0 = vld [vmem:[%s14415_s8 + $0x270] sm:$0xf0]  ;;  %v8869_v37 = vor.u32 %v12961_v29, %v8866_v32  ;;  %v12925_v39 = vld [vmem:[%s14415_s8 + $0x44] sm:$0xf] }
 0x155   : > { %6983 = vmatpush.bf16.msra.mxu3 %v9157_v56  ;;  %v9122_v35 = vld [vmem:[%s14415_s8 + $0x370] sm:$0xf0]  ;;  %v8997_v38 = vor.u32 %v12993_v33, %v8994_v0  ;;  %v12957_v40 = vld [vmem:[%s14415_s8 + $0x144] sm:$0xf]  ;;  %v15082_v56 = vadd.f32 %v6730_v51, %v6718_v46 }
 0x156   : > { %6945 = vmatpush.bf16.msra.mxu0 %v8757_v7  ;;  %v8722_v20 = vld [vmem:[%s14415_s8 + $0x50] sm:$0xf0]  ;;  %v9125_v41 = vor.u32 %v13025_v34, %v9122_v35  ;;  %v12989_v44 = vld [vmem:[%s14415_s8 + $0x244] sm:$0xf] }
 0x157   : > { %6958 = vmatpush.bf16.msra.mxu1 %v8885_v12  ;;  %v8850_v43 = vld [vmem:[%s14415_s8 + $0x150] sm:$0xf0]  ;;  %v13021_v52 = vld [vmem:[%s14415_s8 + $0x344] sm:$0xf]  ;;  %v8725_v54 = vor.u32 %v12925_v39, %v8722_v20 }
 0x158   : > { %6971 = vmatpush.bf16.msra.mxu2 %v9013_v24  ;;  %v8978_v45 = vld [vmem:[%s14415_s8 + $0x250] sm:$0xf0]  ;;  %v8853_v57 = vor.u32 %v12957_v40, %v8850_v43  ;;  %v12921_v59 = vld [vmem:[%s14415_s8 + $0x24] sm:$0xf] }
 0x159   : > { %6984 = vmatpush.bf16.msra.mxu3 %v9141_v30  ;;  %v9106_v53 = vld [vmem:[%s14415_s8 + $0x350] sm:$0xf0]  ;;  %v8981_v58 = vor.u32 %v12989_v44, %v8978_v45  ;;  %v12953_v62 = vld [vmem:[%s14415_s8 + $0x124] sm:$0xf] }
 0x15a   : > { %6946 = vmatpush.bf16.msra.mxu0 %v8741_v36  ;;  %v8706_v60 = vld [vmem:[%s14415_s8 + $0x30] sm:$0xf0]  ;;  %v9109_v63 = vor.u32 %v13021_v52, %v9106_v53  ;;  %v12985_v7 = vld [vmem:[%s14415_s8 + $0x224] sm:$0xf] }
 0x15b   : > { %6959 = vmatpush.bf16.msra.mxu1 %v8869_v37  ;;  %v8834_v6 = vld [vmem:[%s14415_s8 + $0x130] sm:$0xf0]  ;;  %v13017_v12 = vld [vmem:[%s14415_s8 + $0x324] sm:$0xf]  ;;  %v8709_v26 = vor.u32 %v12921_v59, %v8706_v60 }
 0x15c   : > { %6972 = vmatpush.bf16.msra.mxu2 %v8997_v38  ;;  %v8962_v11 = vld [vmem:[%s14415_s8 + $0x230] sm:$0xf0]  ;;  %v12917_v28 = vld [vmem:[%s14415_s8 + $0x4] sm:$0xf]  ;;  %v8837_v30 = vor.u32 %v12953_v62, %v8834_v6  ;;  %v6719_v38 = vpop.f32.mrf.mxu2 }
 0x15d   : > { %6985 = vmatpush.bf16.msra.mxu3 %v9125_v41  ;;  %v9090_v24 = vld [vmem:[%s14415_s8 + $0x330] sm:$0xf0]  ;;  %v8965_v31 = vor.u32 %v12985_v7, %v8962_v11  ;;  %v12949_v32 = vld [vmem:[%s14415_s8 + $0x104] sm:$0xf]  ;;  %v6732_v41 = vpop.f32.mrf.mxu3 }
 0x15e   : > { %6947 = vmatpush.bf16.msra.mxu0 %v8725_v54  ;;  %v8690_v29 = vld [vmem:[%s14415_s8 + $0x10] sm:$0xf0]  ;;  %v12981_v0 = vld [vmem:[%s14415_s8 + $0x204] sm:$0xf]  ;;  %v9093_v34 = vor.u32 %v13017_v12, %v9090_v24 }
 0x15f   : > { %6960 = vmatpush.bf16.msra.mxu1 %v8853_v57  ;;  %v8818_v33 = vld [vmem:[%s14415_s8 + $0x110] sm:$0xf0]  ;;  %v13013_v36 = vld [vmem:[%s14415_s8 + $0x304] sm:$0xf]  ;;  %v8693_v42 = vor.u32 %v12917_v28, %v8690_v29 }
 0x160   : > { %6973 = vmatpush.bf16.msra.mxu2 %v8981_v58  ;;  %v8946_v35 = vld [vmem:[%s14415_s8 + $0x210] sm:$0xf0]  ;;  %v13073_v39 = vld [vmem:[%s14415_s8 + $0x4e4] sm:$0xf]  ;;  %v8821_v46 = vor.u32 %v12949_v32, %v8818_v33 }
 0x161   : > { %6986 = vmatpush.bf16.msra.mxu3 %v9109_v63  ;;  %v9074_v37 = vld [vmem:[%s14415_s8 + $0x310] sm:$0xf0]  ;;  %v13105_v40 = vld [vmem:[%s14415_s8 + $0x5e4] sm:$0xf]  ;;  %v8949_v51 = vor.u32 %v12981_v0, %v8946_v35 }
 0x162   : > { %v9314_v20 = vld [vmem:[%s14415_s8 + $0x4f0] sm:$0xf0]  ;;  %6948 = vmatpush.bf16.msra.mxu0 %v8709_v26  ;;  %v13137_v44 = vld [vmem:[%s14415_s8 + $0x6e4] sm:$0xf]  ;;  %v9077_v25 = vor.u32 %v13013_v36, %v9074_v37 }
 0x163   : > { %v9442_v43 = vld [vmem:[%s14415_s8 + $0x5f0] sm:$0xf0]  ;;  %6961 = vmatpush.bf16.msra.mxu1 %v8837_v30  ;;  %v13169_v52 = vld [vmem:[%s14415_s8 + $0x7e4] sm:$0xf]  ;;  %v9317_v54 = vor.u32 %v13073_v39, %v9314_v20 }
 0x164   : > { %v9570_v45 = vld [vmem:[%s14415_s8 + $0x6f0] sm:$0xf0]  ;;  %6974 = vmatpush.bf16.msra.mxu2 %v8965_v31  ;;  %v9445_v55 = vor.u32 %v13105_v40, %v9442_v43  ;;  %v13069_v58 = vld [vmem:[%s14415_s8 + $0x4c4] sm:$0xf] }
 0x165   : > { %v9698_v53 = vld [vmem:[%s14415_s8 + $0x7f0] sm:$0xf0]  ;;  %6987 = vmatpush.bf16.msra.mxu3 %v9093_v34  ;;  %v9573_v57 = vor.u32 %v13137_v44, %v9570_v45  ;;  %v13101_v60 = vld [vmem:[%s14415_s8 + $0x5c4] sm:$0xf] }
 0x166   : > { %v9298_v59 = vld [vmem:[%s14415_s8 + $0x4d0] sm:$0xf0]  ;;  %6949 = vmatpush.bf16.msra.mxu0 %v8693_v42  ;;  %v9701_v62 = vor.u32 %v13169_v52, %v9698_v53  ;;  %v13133_v6 = vld [vmem:[%s14415_s8 + $0x6c4] sm:$0xf] }
 0x167   : > { %v9426_v63 = vld [vmem:[%s14415_s8 + $0x5d0] sm:$0xf0]  ;;  %6962 = vmatpush.bf16.msra.mxu1 %v8821_v46  ;;  %v13165_v11 = vld [vmem:[%s14415_s8 + $0x7c4] sm:$0xf]  ;;  %v9301_v24 = vor.u32 %v13069_v58, %v9298_v59  ;;  %v6743_v46 = vpop.f32.mrf.mxu0 }
 0x168   : > { %v9554_v7 = vld [vmem:[%s14415_s8 + $0x6d0] sm:$0xf0]  ;;  %6975 = vmatpush.bf16.msra.mxu2 %v8949_v51  ;;  %v9429_v26 = vor.u32 %v13101_v60, %v9426_v63  ;;  %v13065_v29 = vld [vmem:[%s14415_s8 + $0x4a4] sm:$0xf]  ;;  %v6744_v53 = vadd.f32 %v6743_v46, %v15082_v56 }
 0x169   : > { %v9682_v12 = vld [vmem:[%s14415_s8 + $0x7d0] sm:$0xf0]  ;;  %6988 = vmatpush.bf16.msra.mxu3 %v9077_v25  ;;  %v9557_v28 = vor.u32 %v13133_v6, %v9554_v7  ;;  %v13097_v31 = vld [vmem:[%s14415_s8 + $0x5a4] sm:$0xf]  ;;  %6950 = vmatmul.bf16.vlgmr.msra.gmra.mxu0 %v14540_v22 }
 0x16a   : > { %6994 = vmatpush.bf16.msrb.mxu0 %v9317_v54  ;;  %v9282_v30 = vld [vmem:[%s14415_s8 + $0x4b0] sm:$0xf0]  ;;  %v9685_v32 = vor.u32 %v13165_v11, %v9682_v12  ;;  %v13129_v0 = vld [vmem:[%s14415_s8 + $0x6a4] sm:$0xf]  ;;  %6963 = vmatmul.bf16.vlgmr.msra.gmra.mxu1 %v14547_v27  ;;  %v6756_v54 = vpop.f32.mrf.mxu1 }
 0x16b   : > { %7007 = vmatpush.bf16.msrb.mxu1 %v9445_v55  ;;  %v9410_v33 = vld [vmem:[%s14415_s8 + $0x5b0] sm:$0xf0]  ;;  %6976 = vmatmul.bf16.vlgmr.msra.gmra.mxu2 %v14538_v21  ;;  %v13161_v35 = vld [vmem:[%s14415_s8 + $0x7a4] sm:$0xf]  ;;  %v9285_v37 = vor.u32 %v13065_v29, %v9282_v30  ;;  %v6757_v63 = vadd.f32 %v6756_v54, %v6744_v53 }
 0x16c   : > { %7020 = vmatpush.bf16.msrb.mxu2 %v9573_v57  ;;  %v9538_v34 = vld [vmem:[%s14415_s8 + $0x6b0] sm:$0xf0]  ;;  %6989 = vmatmul.bf16.vlgmr.msra.gmra.mxu3 %v14542_v23  ;;  %v9413_v38 = vor.u32 %v13097_v31, %v9410_v33  ;;  %v13061_v20 = vld [vmem:[%s14415_s8 + $0x484] sm:$0xf]  ;;  %v6769_v33 = vpop.f32.mrf.mxu2 }
 0x16d   : > { %7033 = vmatpush.bf16.msrb.mxu3 %v9701_v62  ;;  %v9666_v36 = vld [vmem:[%s14415_s8 + $0x7b0] sm:$0xf0]  ;;  %v9541_v39 = vor.u32 %v13129_v0, %v9538_v34  ;;  %v13093_v41 = vld [vmem:[%s14415_s8 + $0x584] sm:$0xf] }
 0x16e   : > { %6995 = vmatpush.bf16.msrb.mxu0 %v9301_v24  ;;  %v9266_v40 = vld [vmem:[%s14415_s8 + $0x490] sm:$0xf0]  ;;  %v9669_v42 = vor.u32 %v13161_v35, %v9666_v36  ;;  %v13125_v44 = vld [vmem:[%s14415_s8 + $0x684] sm:$0xf]  ;;  %v6770_v36 = vadd.f32 %v6769_v33, %v6757_v63 }
 0x16f   : > { %7008 = vmatpush.bf16.msrb.mxu1 %v9429_v26  ;;  %v9394_v43 = vld [vmem:[%s14415_s8 + $0x590] sm:$0xf0]  ;;  %v13157_v51 = vld [vmem:[%s14415_s8 + $0x784] sm:$0xf]  ;;  %v9269_v25 = vor.u32 %v13061_v20, %v9266_v40  ;;  %v6745_v20 = vpop.f32.mrf.mxu0 }
 0x170   : > { %7021 = vmatpush.bf16.msrb.mxu2 %v9557_v28  ;;  %v9522_v45 = vld [vmem:[%s14415_s8 + $0x690] sm:$0xf0]  ;;  %v9397_v55 = vor.u32 %v13093_v41, %v9394_v43  ;;  %v13057_v58 = vld [vmem:[%s14415_s8 + $0x464] sm:$0xf] }
 0x171   : > { %7034 = vmatpush.bf16.msrb.mxu3 %v9685_v32  ;;  %v9650_v52 = vld [vmem:[%s14415_s8 + $0x790] sm:$0xf0]  ;;  %v9525_v57 = vor.u32 %v13125_v44, %v9522_v45  ;;  %v13089_v60 = vld [vmem:[%s14415_s8 + $0x564] sm:$0xf] }
 0x172   : > { %6996 = vmatpush.bf16.msrb.mxu0 %v9285_v37  ;;  %v9250_v59 = vld [vmem:[%s14415_s8 + $0x470] sm:$0xf0]  ;;  %v9653_v62 = vor.u32 %v13157_v51, %v9650_v52  ;;  %v13121_v7 = vld [vmem:[%s14415_s8 + $0x664] sm:$0xf]  ;;  %v6782_v37 = vpop.f32.mrf.mxu3  ;;  %v6758_v41 = vpop.f32.mrf.mxu1 }
 0x173   : > { %7009 = vmatpush.bf16.msrb.mxu1 %v9413_v38  ;;  %v9378_v6 = vld [vmem:[%s14415_s8 + $0x570] sm:$0xf0]  ;;  %v13153_v11 = vld [vmem:[%s14415_s8 + $0x764] sm:$0xf]  ;;  %v9253_v24 = vor.u32 %v13057_v58, %v9250_v59 }
 0x174   : > { %7022 = vmatpush.bf16.msrb.mxu2 %v9541_v39  ;;  %v9506_v56 = vld [vmem:[%s14415_s8 + $0x670] sm:$0xf0]  ;;  %v9381_v26 = vor.u32 %v13089_v60, %v9378_v6  ;;  %v13053_v29 = vld [vmem:[%s14415_s8 + $0x444] sm:$0xf] }
 0x175   : > { %7035 = vmatpush.bf16.msrb.mxu3 %v9669_v42  ;;  %v9634_v12 = vld [vmem:[%s14415_s8 + $0x770] sm:$0xf0]  ;;  %v9509_v28 = vor.u32 %v13121_v7, %v9506_v56  ;;  %v13085_v31 = vld [vmem:[%s14415_s8 + $0x544] sm:$0xf]  ;;  %v15153_v42 = vadd.f32 %v6782_v37, %v6770_v36 }
 0x176   : > { %6997 = vmatpush.bf16.msrb.mxu0 %v9269_v25  ;;  %v9234_v30 = vld [vmem:[%s14415_s8 + $0x450] sm:$0xf0]  ;;  %v9637_v32 = vor.u32 %v13153_v11, %v9634_v12  ;;  %v13117_v34 = vld [vmem:[%s14415_s8 + $0x644] sm:$0xf] }
 0x177   : > { %7010 = vmatpush.bf16.msrb.mxu1 %v9397_v55  ;;  %v9362_v0 = vld [vmem:[%s14415_s8 + $0x550] sm:$0xf0]  ;;  %v13149_v38 = vld [vmem:[%s14415_s8 + $0x744] sm:$0xf]  ;;  %v9237_v40 = vor.u32 %v13053_v29, %v9234_v30 }
 0x178   : > { %7023 = vmatpush.bf16.msrb.mxu2 %v9525_v57  ;;  %v9490_v35 = vld [vmem:[%s14415_s8 + $0x650] sm:$0xf0]  ;;  %v9365_v43 = vor.u32 %v13085_v31, %v9362_v0  ;;  %v13049_v45 = vld [vmem:[%s14415_s8 + $0x424] sm:$0xf] }
 0x179   : > { %7036 = vmatpush.bf16.msrb.mxu3 %v9653_v62  ;;  %v9618_v39 = vld [vmem:[%s14415_s8 + $0x750] sm:$0xf0]  ;;  %v9493_v44 = vor.u32 %v13117_v34, %v9490_v35  ;;  %v13081_v51 = vld [vmem:[%s14415_s8 + $0x524] sm:$0xf] }
 0x17a   : > { %6998 = vmatpush.bf16.msrb.mxu0 %v9253_v24  ;;  %v9218_v46 = vld [vmem:[%s14415_s8 + $0x430] sm:$0xf0]  ;;  %v9621_v52 = vor.u32 %v13149_v38, %v9618_v39  ;;  %v13113_v25 = vld [vmem:[%s14415_s8 + $0x624] sm:$0xf] }
 0x17b   : > { %7011 = vmatpush.bf16.msrb.mxu1 %v9381_v26  ;;  %v9346_v53 = vld [vmem:[%s14415_s8 + $0x530] sm:$0xf0]  ;;  %v13145_v55 = vld [vmem:[%s14415_s8 + $0x724] sm:$0xf]  ;;  %v9221_v58 = vor.u32 %v13049_v45, %v9218_v46 }
 0x17c   : > { %7024 = vmatpush.bf16.msrb.mxu2 %v9509_v28  ;;  %v9474_v54 = vld [vmem:[%s14415_s8 + $0x630] sm:$0xf0]  ;;  %v13045_v59 = vld [vmem:[%s14415_s8 + $0x404] sm:$0xf]  ;;  %v9349_v62 = vor.u32 %v13081_v51, %v9346_v53  ;;  %v6771_v28 = vpop.f32.mrf.mxu2 }
 0x17d   : > { %7037 = vmatpush.bf16.msrb.mxu3 %v9637_v32  ;;  %v9602_v57 = vld [vmem:[%s14415_s8 + $0x730] sm:$0xf0]  ;;  %v9477_v63 = vor.u32 %v13113_v25, %v9474_v54  ;;  %v13077_v6 = vld [vmem:[%s14415_s8 + $0x504] sm:$0xf]  ;;  %v6784_v32 = vpop.f32.mrf.mxu3 }
 0x17e   : > { %6999 = vmatpush.bf16.msrb.mxu0 %v9237_v40  ;;  %v9202_v60 = vld [vmem:[%s14415_s8 + $0x410] sm:$0xf0]  ;;  %v13109_v56 = vld [vmem:[%s14415_s8 + $0x604] sm:$0xf]  ;;  %v9605_v11 = vor.u32 %v13145_v55, %v9602_v57 }
 0x17f   : > { %7012 = vmatpush.bf16.msrb.mxu1 %v9365_v43  ;;  %v9330_v7 = vld [vmem:[%s14415_s8 + $0x510] sm:$0xf0]  ;;  %v13141_v24 = vld [vmem:[%s14415_s8 + $0x704] sm:$0xf]  ;;  %v9205_v33 = vor.u32 %v13045_v59, %v9202_v60 }
 0x180   : > { %7025 = vmatpush.bf16.msrb.mxu2 %v9493_v44  ;;  %v9458_v12 = vld [vmem:[%s14415_s8 + $0x610] sm:$0xf0]  ;;  %v13201_v29 = vld [vmem:[%s14415_s8 + $0x8e4] sm:$0xf]  ;;  %v9333_v36 = vor.u32 %v13077_v6, %v9330_v7 }
 0x181   : > { %7038 = vmatpush.bf16.msrb.mxu3 %v9621_v52  ;;  %v9586_v26 = vld [vmem:[%s14415_s8 + $0x710] sm:$0xf0]  ;;  %v13233_v31 = vld [vmem:[%s14415_s8 + $0x9e4] sm:$0xf]  ;;  %v9461_v37 = vor.u32 %v13109_v56, %v9458_v12 }
 0x182   : > { %v9826_v30 = vld [vmem:[%s14415_s8 + $0x8f0] sm:$0xf0]  ;;  %7000 = vmatpush.bf16.msrb.mxu0 %v9221_v58  ;;  %v13265_v34 = vld [vmem:[%s14415_s8 + $0xae4] sm:$0xf]  ;;  %v9589_v20 = vor.u32 %v13141_v24, %v9586_v26 }
 0x183   : > { %v9954_v0 = vld [vmem:[%s14415_s8 + $0x9f0] sm:$0xf0]  ;;  %7013 = vmatpush.bf16.msrb.mxu1 %v9349_v62  ;;  %v13297_v38 = vld [vmem:[%s14415_s8 + $0xbe4] sm:$0xf]  ;;  %v9829_v40 = vor.u32 %v13201_v29, %v9826_v30 }
 0x184   : > { %v10082_v35 = vld [vmem:[%s14415_s8 + $0xaf0] sm:$0xf0]  ;;  %7026 = vmatpush.bf16.msrb.mxu2 %v9477_v63  ;;  %v9957_v41 = vor.u32 %v13233_v31, %v9954_v0  ;;  %v13197_v44 = vld [vmem:[%s14415_s8 + $0x8c4] sm:$0xf] }
 0x185   : > { %v10210_v39 = vld [vmem:[%s14415_s8 + $0xbf0] sm:$0xf0]  ;;  %7039 = vmatpush.bf16.msrb.mxu3 %v9605_v11  ;;  %v10085_v43 = vor.u32 %v13265_v34, %v10082_v35  ;;  %v13229_v46 = vld [vmem:[%s14415_s8 + $0x9c4] sm:$0xf] }
 0x186   : > { %v9810_v45 = vld [vmem:[%s14415_s8 + $0x8d0] sm:$0xf0]  ;;  %7001 = vmatpush.bf16.msrb.mxu0 %v9205_v33  ;;  %v10213_v51 = vor.u32 %v13297_v38, %v10210_v39  ;;  %v13261_v53 = vld [vmem:[%s14415_s8 + $0xac4] sm:$0xf] }
 0x187   : > { %v9938_v52 = vld [vmem:[%s14415_s8 + $0x9d0] sm:$0xf0]  ;;  %7014 = vmatpush.bf16.msrb.mxu1 %v9333_v36  ;;  %v13293_v54 = vld [vmem:[%s14415_s8 + $0xbc4] sm:$0xf]  ;;  %v9813_v57 = vor.u32 %v13197_v44, %v9810_v45  ;;  %v6795_v36 = vpop.f32.mrf.mxu0 }
 0x188   : > { %v10066_v25 = vld [vmem:[%s14415_s8 + $0xad0] sm:$0xf0]  ;;  %7027 = vmatpush.bf16.msrb.mxu2 %v9461_v37  ;;  %v9941_v58 = vor.u32 %v13229_v46, %v9938_v52  ;;  %v13193_v60 = vld [vmem:[%s14415_s8 + $0x8a4] sm:$0xf]  ;;  %v6796_v39 = vadd.f32 %v6795_v36, %v15153_v42 }
 0x189   : > { %v10194_v55 = vld [vmem:[%s14415_s8 + $0xbd0] sm:$0xf0]  ;;  %7040 = vmatpush.bf16.msrb.mxu3 %v9589_v20  ;;  %v10069_v59 = vor.u32 %v13261_v53, %v10066_v25  ;;  %v13225_v63 = vld [vmem:[%s14415_s8 + $0x9a4] sm:$0xf]  ;;  %7002 = vmatmul.bf16.vlgmr.msrb.gmra.mxu0 %v14579_v1 }
 0x18a   : > { %7046 = vmatpush.bf16.msra.mxu0 %v9829_v40  ;;  %v9794_v62 = vld [vmem:[%s14415_s8 + $0x8b0] sm:$0xf0]  ;;  %v10197_v6 = vor.u32 %v13293_v54, %v10194_v55  ;;  %v13257_v56 = vld [vmem:[%s14415_s8 + $0xaa4] sm:$0xf]  ;;  %7015 = vmatmul.bf16.vlgmr.msrb.gmra.mxu1 %v14583_v3  ;;  %v6808_v40 = vpop.f32.mrf.mxu1 }
 0x18b   : > { %7059 = vmatpush.bf16.msra.mxu1 %v9957_v41  ;;  %7028 = vmatmul.bf16.vlgmr.msrb.gmra.mxu2 %v14576_v61  ;;  %v9922_v7 = vld [vmem:[%s14415_s8 + $0x9b0] sm:$0xf0]  ;;  %v13289_v12 = vld [vmem:[%s14415_s8 + $0xba4] sm:$0xf]  ;;  %v9797_v26 = vor.u32 %v13193_v60, %v9794_v62  ;;  %v6809_v52 = vadd.f32 %v6808_v40, %v6796_v39 }
 0x18c   : > { %7072 = vmatpush.bf16.msra.mxu2 %v10085_v43  ;;  %v10050_v11 = vld [vmem:[%s14415_s8 + $0xab0] sm:$0xf0]  ;;  %7041 = vmatmul.bf16.vlgmr.msrb.gmra.mxu3 %v14581_v2  ;;  %v9925_v28 = vor.u32 %v13225_v63, %v9922_v7  ;;  %v13189_v30 = vld [vmem:[%s14415_s8 + $0x884] sm:$0xf]  ;;  %v6821_v7 = vpop.f32.mrf.mxu2 }
 0x18d   : > { %7085 = vmatpush.bf16.msra.mxu3 %v10213_v51  ;;  %v10178_v24 = vld [vmem:[%s14415_s8 + $0xbb0] sm:$0xf0]  ;;  %v10053_v29 = vor.u32 %v13257_v56, %v10050_v11  ;;  %v13221_v32 = vld [vmem:[%s14415_s8 + $0x984] sm:$0xf] }
 0x18e   : > { %7047 = vmatpush.bf16.msra.mxu0 %v9813_v57  ;;  %v9778_v31 = vld [vmem:[%s14415_s8 + $0x890] sm:$0xf0]  ;;  %v10181_v33 = vor.u32 %v13289_v12, %v10178_v24  ;;  %v13253_v34 = vld [vmem:[%s14415_s8 + $0xa84] sm:$0xf]  ;;  %v6822_v24 = vadd.f32 %v6821_v7, %v6809_v52 }
 0x18f   : > { %7060 = vmatpush.bf16.msra.mxu1 %v9941_v58  ;;  %v9906_v0 = vld [vmem:[%s14415_s8 + $0x990] sm:$0xf0]  ;;  %v13285_v37 = vld [vmem:[%s14415_s8 + $0xb84] sm:$0xf]  ;;  %v9781_v20 = vor.u32 %v13189_v30, %v9778_v31  ;;  %v6797_v30 = vpop.f32.mrf.mxu0 }
 0x190   : > { %7073 = vmatpush.bf16.msra.mxu2 %v10069_v59  ;;  %v10034_v35 = vld [vmem:[%s14415_s8 + $0xa90] sm:$0xf0]  ;;  %v9909_v41 = vor.u32 %v13221_v32, %v9906_v0  ;;  %v13185_v44 = vld [vmem:[%s14415_s8 + $0x864] sm:$0xf] }
 0x191   : > { %7086 = vmatpush.bf16.msra.mxu3 %v10197_v6  ;;  %v10162_v38 = vld [vmem:[%s14415_s8 + $0xb90] sm:$0xf0]  ;;  %v10037_v43 = vor.u32 %v13253_v34, %v10034_v35  ;;  %v13217_v46 = vld [vmem:[%s14415_s8 + $0x964] sm:$0xf] }
 0x192   : > { %7048 = vmatpush.bf16.msra.mxu0 %v9797_v26  ;;  %v9762_v45 = vld [vmem:[%s14415_s8 + $0x870] sm:$0xf0]  ;;  %v10165_v51 = vor.u32 %v13285_v37, %v10162_v38  ;;  %v13249_v25 = vld [vmem:[%s14415_s8 + $0xa64] sm:$0xf]  ;;  %v6834_v26 = vpop.f32.mrf.mxu3  ;;  %v6810_v32 = vpop.f32.mrf.mxu1 }
 0x193   : > { %7061 = vmatpush.bf16.msra.mxu1 %v9925_v28  ;;  %v9890_v53 = vld [vmem:[%s14415_s8 + $0x970] sm:$0xf0]  ;;  %v13281_v54 = vld [vmem:[%s14415_s8 + $0xb64] sm:$0xf]  ;;  %v9765_v57 = vor.u32 %v13185_v44, %v9762_v45 }
 0x194   : > { %7074 = vmatpush.bf16.msra.mxu2 %v10053_v29  ;;  %v10018_v42 = vld [vmem:[%s14415_s8 + $0xa70] sm:$0xf0]  ;;  %v9893_v58 = vor.u32 %v13217_v46, %v9890_v53  ;;  %v13181_v60 = vld [vmem:[%s14415_s8 + $0x844] sm:$0xf] }
 0x195   : > { %7087 = vmatpush.bf16.msra.mxu3 %v10181_v33  ;;  %v10146_v55 = vld [vmem:[%s14415_s8 + $0xb70] sm:$0xf0]  ;;  %v10021_v59 = vor.u32 %v13249_v25, %v10018_v42  ;;  %v13213_v63 = vld [vmem:[%s14415_s8 + $0x944] sm:$0xf]  ;;  %v15224_v33 = vadd.f32 %v6834_v26, %v6822_v24 }
 0x196   : > { %7049 = vmatpush.bf16.msra.mxu0 %v9781_v20  ;;  %v9746_v62 = vld [vmem:[%s14415_s8 + $0x850] sm:$0xf0]  ;;  %v10149_v6 = vor.u32 %v13281_v54, %v10146_v55  ;;  %v13245_v11 = vld [vmem:[%s14415_s8 + $0xa44] sm:$0xf] }
 0x197   : > { %7062 = vmatpush.bf16.msra.mxu1 %v9909_v41  ;;  %v9874_v56 = vld [vmem:[%s14415_s8 + $0x950] sm:$0xf0]  ;;  %v13277_v28 = vld [vmem:[%s14415_s8 + $0xb44] sm:$0xf]  ;;  %v9749_v31 = vor.u32 %v13181_v60, %v9746_v62 }
 0x198   : > { %7075 = vmatpush.bf16.msra.mxu2 %v10037_v43  ;;  %v10002_v12 = vld [vmem:[%s14415_s8 + $0xa50] sm:$0xf0]  ;;  %v9877_v0 = vor.u32 %v13213_v63, %v9874_v56  ;;  %v13177_v35 = vld [vmem:[%s14415_s8 + $0x824] sm:$0xf] }
 0x199   : > { %7088 = vmatpush.bf16.msra.mxu3 %v10165_v51  ;;  %v10130_v29 = vld [vmem:[%s14415_s8 + $0xb50] sm:$0xf0]  ;;  %v10005_v34 = vor.u32 %v13245_v11, %v10002_v12  ;;  %v13209_v37 = vld [vmem:[%s14415_s8 + $0x924] sm:$0xf] }
 0x19a   : > { %7050 = vmatpush.bf16.msra.mxu0 %v9765_v57  ;;  %v9730_v36 = vld [vmem:[%s14415_s8 + $0x830] sm:$0xf0]  ;;  %v10133_v38 = vor.u32 %v13277_v28, %v10130_v29  ;;  %v13241_v20 = vld [vmem:[%s14415_s8 + $0xa24] sm:$0xf] }
 0x19b   : > { %7063 = vmatpush.bf16.msra.mxu1 %v9893_v58  ;;  %v9858_v39 = vld [vmem:[%s14415_s8 + $0x930] sm:$0xf0]  ;;  %v13273_v41 = vld [vmem:[%s14415_s8 + $0xb24] sm:$0xf]  ;;  %v9733_v44 = vor.u32 %v13177_v35, %v9730_v36 }
 0x19c   : > { %7076 = vmatpush.bf16.msra.mxu2 %v10021_v59  ;;  %v9986_v40 = vld [vmem:[%s14415_s8 + $0xa30] sm:$0xf0]  ;;  %v13173_v45 = vld [vmem:[%s14415_s8 + $0x804] sm:$0xf]  ;;  %v9861_v51 = vor.u32 %v13209_v37, %v9858_v39  ;;  %v6823_v59 = vpop.f32.mrf.mxu2 }
 0x19d   : > { %7089 = vmatpush.bf16.msra.mxu3 %v10149_v6  ;;  %v10114_v43 = vld [vmem:[%s14415_s8 + $0xb30] sm:$0xf0]  ;;  %v9989_v52 = vor.u32 %v13241_v20, %v9986_v40  ;;  %v13205_v53 = vld [vmem:[%s14415_s8 + $0x904] sm:$0xf]  ;;  %v6836_v6 = vpop.f32.mrf.mxu3 }
 0x19e   : > { %7051 = vmatpush.bf16.msra.mxu0 %v9749_v31  ;;  %v9714_v46 = vld [vmem:[%s14415_s8 + $0x810] sm:$0xf0]  ;;  %v13237_v42 = vld [vmem:[%s14415_s8 + $0xa04] sm:$0xf]  ;;  %v10117_v54 = vor.u32 %v13273_v41, %v10114_v43 }
 0x19f   : > { %7064 = vmatpush.bf16.msra.mxu1 %v9877_v0  ;;  %v9842_v25 = vld [vmem:[%s14415_s8 + $0x910] sm:$0xf0]  ;;  %v13269_v57 = vld [vmem:[%s14415_s8 + $0xb04] sm:$0xf]  ;;  %v9717_v7 = vor.u32 %v13173_v45, %v9714_v46 }
 0x1a0   : > { %7077 = vmatpush.bf16.msra.mxu2 %v10005_v34  ;;  %v9970_v55 = vld [vmem:[%s14415_s8 + $0xa10] sm:$0xf0]  ;;  %v13329_v60 = vld [vmem:[%s14415_s8 + $0xce4] sm:$0xf]  ;;  %v9845_v24 = vor.u32 %v13205_v53, %v9842_v25 }
 0x1a1   : > { %7090 = vmatpush.bf16.msra.mxu3 %v10133_v38  ;;  %v10098_v58 = vld [vmem:[%s14415_s8 + $0xb10] sm:$0xf0]  ;;  %v13361_v63 = vld [vmem:[%s14415_s8 + $0xde4] sm:$0xf]  ;;  %v9973_v26 = vor.u32 %v13237_v42, %v9970_v55 }
 0x1a2   : > { %v10338_v62 = vld [vmem:[%s14415_s8 + $0xcf0] sm:$0xf0]  ;;  %7052 = vmatpush.bf16.msra.mxu0 %v9733_v44  ;;  %v13393_v11 = vld [vmem:[%s14415_s8 + $0xee4] sm:$0xf]  ;;  %v10101_v30 = vor.u32 %v13269_v57, %v10098_v58 }
 0x1a3   : > { %v10466_v56 = vld [vmem:[%s14415_s8 + $0xdf0] sm:$0xf0]  ;;  %7065 = vmatpush.bf16.msra.mxu1 %v9861_v51  ;;  %v13425_v28 = vld [vmem:[%s14415_s8 + $0xfe4] sm:$0xf]  ;;  %v10341_v31 = vor.u32 %v13329_v60, %v10338_v62 }
 0x1a4   : > { %v10594_v12 = vld [vmem:[%s14415_s8 + $0xef0] sm:$0xf0]  ;;  %7078 = vmatpush.bf16.msra.mxu2 %v9989_v52  ;;  %v10469_v32 = vor.u32 %v13361_v63, %v10466_v56  ;;  %v13325_v34 = vld [vmem:[%s14415_s8 + $0xcc4] sm:$0xf] }
 0x1a5   : > { %v10722_v29 = vld [vmem:[%s14415_s8 + $0xff0] sm:$0xf0]  ;;  %7091 = vmatpush.bf16.msra.mxu3 %v10117_v54  ;;  %v10597_v0 = vor.u32 %v13393_v11, %v10594_v12  ;;  %v13357_v36 = vld [vmem:[%s14415_s8 + $0xdc4] sm:$0xf] }
 0x1a6   : > { %v10322_v35 = vld [vmem:[%s14415_s8 + $0xcd0] sm:$0xf0]  ;;  %7053 = vmatpush.bf16.msra.mxu0 %v9717_v7  ;;  %v10725_v37 = vor.u32 %v13425_v28, %v10722_v29  ;;  %v13389_v39 = vld [vmem:[%s14415_s8 + $0xec4] sm:$0xf] }
 0x1a7   : > { %v10450_v38 = vld [vmem:[%s14415_s8 + $0xdd0] sm:$0xf0]  ;;  %7066 = vmatpush.bf16.msra.mxu1 %v9845_v24  ;;  %v13421_v40 = vld [vmem:[%s14415_s8 + $0xfc4] sm:$0xf]  ;;  %v10325_v43 = vor.u32 %v13325_v34, %v10322_v35 }
 0x1a8   : > { %v10578_v20 = vld [vmem:[%s14415_s8 + $0xed0] sm:$0xf0]  ;;  %7079 = vmatpush.bf16.msra.mxu2 %v9973_v26  ;;  %v10453_v44 = vor.u32 %v13357_v36, %v10450_v38  ;;  %v13321_v46 = vld [vmem:[%s14415_s8 + $0xca4] sm:$0xf] }
 0x1a9   : > { %v10706_v41 = vld [vmem:[%s14415_s8 + $0xfd0] sm:$0xf0]  ;;  %7092 = vmatpush.bf16.msra.mxu3 %v10101_v30  ;;  %v10581_v45 = vor.u32 %v13389_v39, %v10578_v20  ;;  %v13353_v52 = vld [vmem:[%s14415_s8 + $0xda4] sm:$0xf]  ;;  %7054 = vmatmul.bf16.vlgmr.msra.gmra.mxu0 %v14669_v13 }
 0x1aa   : > { %7098 = vmatpush.bf16.msrb.mxu0 %v10341_v31  ;;  %v10306_v51 = vld [vmem:[%s14415_s8 + $0xcb0] sm:$0xf0]  ;;  %v10709_v53 = vor.u32 %v13421_v40, %v10706_v41  ;;  %v13385_v42 = vld [vmem:[%s14415_s8 + $0xea4] sm:$0xf]  ;;  %7067 = vmatmul.bf16.vlgmr.msra.gmra.mxu1 %v14675_v17  ;;  %v6847_v24 = vpop.f32.mrf.mxu0  ;;  %v6860_v31 = vpop.f32.mrf.mxu1 }
 0x1ab   : > { %7111 = vmatpush.bf16.msrb.mxu1 %v10469_v32  ;;  %v10434_v25 = vld [vmem:[%s14415_s8 + $0xdb0] sm:$0xf0]  ;;  %7080 = vmatmul.bf16.vlgmr.msra.gmra.mxu2 %v14673_v16  ;;  %v13417_v55 = vld [vmem:[%s14415_s8 + $0xfa4] sm:$0xf]  ;;  %v10309_v58 = vor.u32 %v13321_v46, %v10306_v51  ;;  %v6848_v29 = vadd.f32 %v6847_v24, %v15224_v33 }
 0x1ac   : > { %7124 = vmatpush.bf16.msrb.mxu2 %v10597_v0  ;;  %v10562_v54 = vld [vmem:[%s14415_s8 + $0xeb0] sm:$0xf0]  ;;  %7093 = vmatmul.bf16.vlgmr.msra.gmra.mxu3 %v14677_v18  ;;  %v10437_v59 = vor.u32 %v13353_v52, %v10434_v25  ;;  %v13317_v62 = vld [vmem:[%s14415_s8 + $0xc84] sm:$0xf] }
 0x1ad   : > { %7137 = vmatpush.bf16.msrb.mxu3 %v10725_v37  ;;  %v10690_v57 = vld [vmem:[%s14415_s8 + $0xfb0] sm:$0xf0]  ;;  %v10565_v60 = vor.u32 %v13385_v42, %v10562_v54  ;;  %v13349_v6 = vld [vmem:[%s14415_s8 + $0xd84] sm:$0xf]  ;;  %v6861_v38 = vadd.f32 %v6860_v31, %v6848_v29 }
 0x1ae   : > { %7099 = vmatpush.bf16.msrb.mxu0 %v10325_v43  ;;  %v10290_v63 = vld [vmem:[%s14415_s8 + $0xc90] sm:$0xf0]  ;;  %v10693_v7 = vor.u32 %v13417_v55, %v10690_v57  ;;  %v13381_v11 = vld [vmem:[%s14415_s8 + $0xe84] sm:$0xf]  ;;  %v6873_v25 = vpop.f32.mrf.mxu2 }
 0x1af   : > { %7112 = vmatpush.bf16.msrb.mxu1 %v10453_v44  ;;  %v10418_v56 = vld [vmem:[%s14415_s8 + $0xd90] sm:$0xf0]  ;;  %v13413_v26 = vld [vmem:[%s14415_s8 + $0xf84] sm:$0xf]  ;;  %v10293_v30 = vor.u32 %v13317_v62, %v10290_v63  ;;  %v6874_v57 = vadd.f32 %v6873_v25, %v6861_v38 }
 0x1b0   : > { %7125 = vmatpush.bf16.msrb.mxu2 %v10581_v45  ;;  %v10546_v12 = vld [vmem:[%s14415_s8 + $0xe90] sm:$0xf0]  ;;  %v10421_v32 = vor.u32 %v13349_v6, %v10418_v56  ;;  %v13313_v34 = vld [vmem:[%s14415_s8 + $0xc64] sm:$0xf] }
 0x1b1   : > { %7138 = vmatpush.bf16.msrb.mxu3 %v10709_v53  ;;  %v10674_v28 = vld [vmem:[%s14415_s8 + $0xf90] sm:$0xf0]  ;;  %v10549_v0 = vor.u32 %v13381_v11, %v10546_v12  ;;  %v13345_v36 = vld [vmem:[%s14415_s8 + $0xd64] sm:$0xf] }
 0x1b2   : > { %7100 = vmatpush.bf16.msrb.mxu0 %v10309_v58  ;;  %v10274_v35 = vld [vmem:[%s14415_s8 + $0xc70] sm:$0xf0]  ;;  %v10677_v37 = vor.u32 %v13413_v26, %v10674_v28  ;;  %v13377_v20 = vld [vmem:[%s14415_s8 + $0xe64] sm:$0xf]  ;;  %v6886_v58 = vpop.f32.mrf.mxu3  ;;  %v6849_v62 = vpop.f32.mrf.mxu0 }
 0x1b3   : > { %7113 = vmatpush.bf16.msrb.mxu1 %v10437_v59  ;;  %v10402_v39 = vld [vmem:[%s14415_s8 + $0xd70] sm:$0xf0]  ;;  %v13409_v40 = vld [vmem:[%s14415_s8 + $0xf64] sm:$0xf]  ;;  %v10277_v43 = vor.u32 %v13313_v34, %v10274_v35  ;;  %v6862_v6 = vpop.f32.mrf.mxu1 }
 0x1b4   : > { %7126 = vmatpush.bf16.msrb.mxu2 %v10565_v60  ;;  %v10530_v33 = vld [vmem:[%s14415_s8 + $0xe70] sm:$0xf0]  ;;  %v10405_v44 = vor.u32 %v13345_v36, %v10402_v39  ;;  %v13309_v46 = vld [vmem:[%s14415_s8 + $0xc44] sm:$0xf] }
 0x1b5   : > { %7139 = vmatpush.bf16.msrb.mxu3 %v10693_v7  ;;  %v10658_v41 = vld [vmem:[%s14415_s8 + $0xf70] sm:$0xf0]  ;;  %v10533_v45 = vor.u32 %v13377_v20, %v10530_v33  ;;  %v13341_v52 = vld [vmem:[%s14415_s8 + $0xd44] sm:$0xf]  ;;  %v15295_v7 = vadd.f32 %v6886_v58, %v6874_v57 }
 0x1b6   : > { %7101 = vmatpush.bf16.msrb.mxu0 %v10293_v30  ;;  %v10258_v51 = vld [vmem:[%s14415_s8 + $0xc50] sm:$0xf0]  ;;  %v10661_v53 = vor.u32 %v13409_v40, %v10658_v41  ;;  %v13373_v54 = vld [vmem:[%s14415_s8 + $0xe44] sm:$0xf] }
 0x1b7   : > { %7114 = vmatpush.bf16.msrb.mxu1 %v10421_v32  ;;  %v10386_v42 = vld [vmem:[%s14415_s8 + $0xd50] sm:$0xf0]  ;;  %v13405_v59 = vld [vmem:[%s14415_s8 + $0xf44] sm:$0xf]  ;;  %v10261_v63 = vor.u32 %v13309_v46, %v10258_v51 }
 0x1b8   : > { %7127 = vmatpush.bf16.msrb.mxu2 %v10549_v0  ;;  %v10514_v55 = vld [vmem:[%s14415_s8 + $0xe50] sm:$0xf0]  ;;  %v10389_v56 = vor.u32 %v13341_v52, %v10386_v42  ;;  %v13305_v12 = vld [vmem:[%s14415_s8 + $0xc24] sm:$0xf] }
 0x1b9   : > { %7140 = vmatpush.bf16.msrb.mxu3 %v10677_v37  ;;  %v10642_v60 = vld [vmem:[%s14415_s8 + $0xf50] sm:$0xf0]  ;;  %v10517_v11 = vor.u32 %v13373_v54, %v10514_v55  ;;  %v13337_v26 = vld [vmem:[%s14415_s8 + $0xd24] sm:$0xf] }
 0x1ba   : > { %7102 = vmatpush.bf16.msrb.mxu0 %v10277_v43  ;;  %v10242_v24 = vld [vmem:[%s14415_s8 + $0xc30] sm:$0xf0]  ;;  %v10645_v28 = vor.u32 %v13405_v59, %v10642_v60  ;;  %v13369_v30 = vld [vmem:[%s14415_s8 + $0xe24] sm:$0xf] }
 0x1bb   : > { %7115 = vmatpush.bf16.msrb.mxu1 %v10405_v44  ;;  %v10370_v29 = vld [vmem:[%s14415_s8 + $0xd30] sm:$0xf0]  ;;  %v13401_v32 = vld [vmem:[%s14415_s8 + $0xf24] sm:$0xf]  ;;  %v10245_v34 = vor.u32 %v13305_v12, %v10242_v24 }
 0x1bc   : > { %7128 = vmatpush.bf16.msrb.mxu2 %v10533_v45  ;;  %v10498_v31 = vld [vmem:[%s14415_s8 + $0xe30] sm:$0xf0]  ;;  %v13301_v35 = vld [vmem:[%s14415_s8 + $0xc04] sm:$0xf]  ;;  %v10373_v37 = vor.u32 %v13337_v26, %v10370_v29  ;;  %v6875_v45 = vpop.f32.mrf.mxu2 }
 0x1bd   : > { %7141 = vmatpush.bf16.msrb.mxu3 %v10661_v53  ;;  %v10626_v0 = vld [vmem:[%s14415_s8 + $0xf30] sm:$0xf0]  ;;  %v10501_v38 = vor.u32 %v13369_v30, %v10498_v31  ;;  %v13333_v39 = vld [vmem:[%s14415_s8 + $0xd04] sm:$0xf]  ;;  %v6888_v53 = vpop.f32.mrf.mxu3 }
 0x1be   : > { %7103 = vmatpush.bf16.msrb.mxu0 %v10261_v63  ;;  %v10226_v36 = vld [vmem:[%s14415_s8 + $0xc10] sm:$0xf0]  ;;  %v13365_v33 = vld [vmem:[%s14415_s8 + $0xe04] sm:$0xf]  ;;  %v10629_v40 = vor.u32 %v13401_v32, %v10626_v0 }
 0x1bf   : > { %7116 = vmatpush.bf16.msrb.mxu1 %v10389_v56  ;;  %v10354_v20 = vld [vmem:[%s14415_s8 + $0xd10] sm:$0xf0]  ;;  %v13397_v43 = vld [vmem:[%s14415_s8 + $0xf04] sm:$0xf]  ;;  %v10229_v25 = vor.u32 %v13301_v35, %v10226_v36 }
 0x1c0   : > { %7129 = vmatpush.bf16.msrb.mxu2 %v10517_v11  ;;  %v10482_v41 = vld [vmem:[%s14415_s8 + $0xe10] sm:$0xf0]  ;;  %v13457_v46 = vld [vmem:[%s14415_s8 + $0x10e4] sm:$0xf]  ;;  %v10357_v57 = vor.u32 %v13333_v39, %v10354_v20 }
 0x1c1   : > { %7142 = vmatpush.bf16.msrb.mxu3 %v10645_v28  ;;  %v10610_v44 = vld [vmem:[%s14415_s8 + $0xf10] sm:$0xf0]  ;;  %v13489_v52 = vld [vmem:[%s14415_s8 + $0x11e4] sm:$0xf]  ;;  %v10485_v58 = vor.u32 %v13365_v33, %v10482_v41 }
 0x1c2   : > { %v10850_v51 = vld [vmem:[%s14415_s8 + $0x10f0] sm:$0xf0]  ;;  %7104 = vmatpush.bf16.msrb.mxu0 %v10245_v34  ;;  %v13521_v54 = vld [vmem:[%s14415_s8 + $0x12e4] sm:$0xf]  ;;  %v10613_v62 = vor.u32 %v13397_v43, %v10610_v44 }
 0x1c3   : > { %v10978_v42 = vld [vmem:[%s14415_s8 + $0x11f0] sm:$0xf0]  ;;  %7117 = vmatpush.bf16.msrb.mxu1 %v10373_v37  ;;  %v13553_v59 = vld [vmem:[%s14415_s8 + $0x13e4] sm:$0xf]  ;;  %v10853_v63 = vor.u32 %v13457_v46, %v10850_v51 }
 0x1c4   : > { %v11106_v55 = vld [vmem:[%s14415_s8 + $0x12f0] sm:$0xf0]  ;;  %7130 = vmatpush.bf16.msrb.mxu2 %v10501_v38  ;;  %v10981_v6 = vor.u32 %v13489_v52, %v10978_v42  ;;  %v13453_v11 = vld [vmem:[%s14415_s8 + $0x10c4] sm:$0xf] }
 0x1c5   : > { %v11234_v60 = vld [vmem:[%s14415_s8 + $0x13f0] sm:$0xf0]  ;;  %7143 = vmatpush.bf16.msrb.mxu3 %v10629_v40  ;;  %v11109_v56 = vor.u32 %v13521_v54, %v11106_v55  ;;  %v13485_v24 = vld [vmem:[%s14415_s8 + $0x11c4] sm:$0xf] }
 0x1c6   : > { %v10834_v12 = vld [vmem:[%s14415_s8 + $0x10d0] sm:$0xf0]  ;;  %7105 = vmatpush.bf16.msrb.mxu0 %v10229_v25  ;;  %v11237_v26 = vor.u32 %v13553_v59, %v11234_v60  ;;  %v13517_v29 = vld [vmem:[%s14415_s8 + $0x12c4] sm:$0xf] }
 0x1c7   : > { %v10962_v28 = vld [vmem:[%s14415_s8 + $0x11d0] sm:$0xf0]  ;;  %7118 = vmatpush.bf16.msrb.mxu1 %v10357_v57  ;;  %v13549_v31 = vld [vmem:[%s14415_s8 + $0x13c4] sm:$0xf]  ;;  %v10837_v0 = vor.u32 %v13453_v11, %v10834_v12  ;;  %v6899_v57 = vpop.f32.mrf.mxu0 }
 0x1c8   : > { %v11090_v30 = vld [vmem:[%s14415_s8 + $0x12d0] sm:$0xf0]  ;;  %7131 = vmatpush.bf16.msrb.mxu2 %v10485_v58  ;;  %v10965_v34 = vor.u32 %v13485_v24, %v10962_v28  ;;  %v13449_v36 = vld [vmem:[%s14415_s8 + $0x10a4] sm:$0xf]  ;;  %v6900_v60 = vadd.f32 %v6899_v57, %v15295_v7 }
 0x1c9   : > { %v11218_v32 = vld [vmem:[%s14415_s8 + $0x13d0] sm:$0xf0]  ;;  %7144 = vmatpush.bf16.msrb.mxu3 %v10613_v62  ;;  %v11093_v35 = vor.u32 %v13517_v29, %v11090_v30  ;;  %v13481_v38 = vld [vmem:[%s14415_s8 + $0x11a4] sm:$0xf]  ;;  %7106 = vmatmul.bf16.vlgmr.msrb.gmra.mxu0 %v14735_v47 }
 0x1ca   : > { %7150 = vmatpush.bf16.msra.mxu0 %v10853_v63  ;;  %v10818_v37 = vld [vmem:[%s14415_s8 + $0x10b0] sm:$0xf0]  ;;  %v11221_v39 = vor.u32 %v13549_v31, %v11218_v32  ;;  %v13513_v33 = vld [vmem:[%s14415_s8 + $0x12a4] sm:$0xf]  ;;  %7119 = vmatmul.bf16.vlgmr.msrb.gmra.mxu1 %v14739_v49  ;;  %v6912_v63 = vpop.f32.mrf.mxu1 }
 0x1cb   : > { %7163 = vmatpush.bf16.msra.mxu1 %v10981_v6  ;;  %v10946_v20 = vld [vmem:[%s14415_s8 + $0x11b0] sm:$0xf0]  ;;  %7132 = vmatmul.bf16.vlgmr.msrb.gmra.mxu2 %v14737_v48  ;;  %v13545_v41 = vld [vmem:[%s14415_s8 + $0x13a4] sm:$0xf]  ;;  %v10821_v44 = vor.u32 %v13449_v36, %v10818_v37  ;;  %v6913_v28 = vadd.f32 %v6912_v63, %v6900_v60 }
 0x1cc   : > { %7176 = vmatpush.bf16.msra.mxu2 %v11109_v56  ;;  %v11074_v40 = vld [vmem:[%s14415_s8 + $0x12b0] sm:$0xf0]  ;;  %7145 = vmatmul.bf16.vlgmr.msrb.gmra.mxu3 %v14741_v50  ;;  %v10949_v45 = vor.u32 %v13481_v38, %v10946_v20  ;;  %v13445_v51 = vld [vmem:[%s14415_s8 + $0x1084] sm:$0xf] }
 0x1cd   : > { %7189 = vmatpush.bf16.msra.mxu3 %v11237_v26  ;;  %v11202_v43 = vld [vmem:[%s14415_s8 + $0x13b0] sm:$0xf0]  ;;  %v11077_v46 = vor.u32 %v13513_v33, %v11074_v40  ;;  %v13477_v53 = vld [vmem:[%s14415_s8 + $0x1184] sm:$0xf] }
 0x1ce   : > { %7151 = vmatpush.bf16.msra.mxu0 %v10837_v0  ;;  %v10802_v52 = vld [vmem:[%s14415_s8 + $0x1090] sm:$0xf0]  ;;  %v11205_v25 = vor.u32 %v13545_v41, %v11202_v43  ;;  %v13509_v54 = vld [vmem:[%s14415_s8 + $0x1284] sm:$0xf]  ;;  %v6925_v20 = vpop.f32.mrf.mxu2 }
 0x1cf   : > { %7164 = vmatpush.bf16.msra.mxu1 %v10965_v34  ;;  %v10930_v42 = vld [vmem:[%s14415_s8 + $0x1190] sm:$0xf0]  ;;  %v13541_v58 = vld [vmem:[%s14415_s8 + $0x1384] sm:$0xf]  ;;  %v10805_v62 = vor.u32 %v13445_v51, %v10802_v52  ;;  %v6926_v43 = vadd.f32 %v6925_v20, %v6913_v28  ;;  %v6901_v51 = vpop.f32.mrf.mxu0 }
 0x1d0   : > { %7177 = vmatpush.bf16.msra.mxu2 %v11093_v35  ;;  %v11058_v55 = vld [vmem:[%s14415_s8 + $0x1290] sm:$0xf0]  ;;  %v10933_v6 = vor.u32 %v13477_v53, %v10930_v42  ;;  %v13441_v11 = vld [vmem:[%s14415_s8 + $0x1064] sm:$0xf] }
 0x1d1   : > { %7190 = vmatpush.bf16.msra.mxu3 %v11221_v39  ;;  %v11186_v59 = vld [vmem:[%s14415_s8 + $0x1390] sm:$0xf0]  ;;  %v11061_v56 = vor.u32 %v13509_v54, %v11058_v55  ;;  %v13473_v24 = vld [vmem:[%s14415_s8 + $0x1164] sm:$0xf] }
 0x1d2   : > { %7152 = vmatpush.bf16.msra.mxu0 %v10821_v44  ;;  %v10786_v12 = vld [vmem:[%s14415_s8 + $0x1070] sm:$0xf0]  ;;  %v11189_v26 = vor.u32 %v13541_v58, %v11186_v59  ;;  %v13505_v30 = vld [vmem:[%s14415_s8 + $0x1264] sm:$0xf]  ;;  %v6938_v44 = vpop.f32.mrf.mxu3  ;;  %v6914_v53 = vpop.f32.mrf.mxu1 }
 0x1d3   : > { %7165 = vmatpush.bf16.msra.mxu1 %v10949_v45  ;;  %v10914_v29 = vld [vmem:[%s14415_s8 + $0x1170] sm:$0xf0]  ;;  %v13537_v31 = vld [vmem:[%s14415_s8 + $0x1364] sm:$0xf]  ;;  %v10789_v0 = vor.u32 %v13441_v11, %v10786_v12 }
 0x1d4   : > { %7178 = vmatpush.bf16.msra.mxu2 %v11077_v46  ;;  %v11042_v7 = vld [vmem:[%s14415_s8 + $0x1270] sm:$0xf0]  ;;  %v10917_v34 = vor.u32 %v13473_v24, %v10914_v29  ;;  %v13437_v36 = vld [vmem:[%s14415_s8 + $0x1044] sm:$0xf] }
 0x1d5   : > { %7191 = vmatpush.bf16.msra.mxu3 %v11205_v25  ;;  %v11170_v32 = vld [vmem:[%s14415_s8 + $0x1370] sm:$0xf0]  ;;  %v11045_v35 = vor.u32 %v13505_v30, %v11042_v7  ;;  %v13469_v38 = vld [vmem:[%s14415_s8 + $0x1144] sm:$0xf]  ;;  %v15366_v25 = vadd.f32 %v6938_v44, %v6926_v43 }
 0x1d6   : > { %7153 = vmatpush.bf16.msra.mxu0 %v10805_v62  ;;  %v10770_v37 = vld [vmem:[%s14415_s8 + $0x1050] sm:$0xf0]  ;;  %v11173_v39 = vor.u32 %v13537_v31, %v11170_v32  ;;  %v13501_v40 = vld [vmem:[%s14415_s8 + $0x1244] sm:$0xf] }
 0x1d7   : > { %7166 = vmatpush.bf16.msra.mxu1 %v10933_v6  ;;  %v10898_v33 = vld [vmem:[%s14415_s8 + $0x1150] sm:$0xf0]  ;;  %v13533_v45 = vld [vmem:[%s14415_s8 + $0x1344] sm:$0xf]  ;;  %v10773_v52 = vor.u32 %v13437_v36, %v10770_v37 }
 0x1d8   : > { %7179 = vmatpush.bf16.msra.mxu2 %v11061_v56  ;;  %v11026_v41 = vld [vmem:[%s14415_s8 + $0x1250] sm:$0xf0]  ;;  %v10901_v42 = vor.u32 %v13469_v38, %v10898_v33  ;;  %v13433_v55 = vld [vmem:[%s14415_s8 + $0x1024] sm:$0xf] }
 0x1d9   : > { %7192 = vmatpush.bf16.msra.mxu3 %v11189_v26  ;;  %v11154_v46 = vld [vmem:[%s14415_s8 + $0x1350] sm:$0xf0]  ;;  %v11029_v54 = vor.u32 %v13501_v40, %v11026_v41  ;;  %v13465_v58 = vld [vmem:[%s14415_s8 + $0x1124] sm:$0xf] }
 0x1da   : > { %7154 = vmatpush.bf16.msra.mxu0 %v10789_v0  ;;  %v10754_v57 = vld [vmem:[%s14415_s8 + $0x1030] sm:$0xf0]  ;;  %v11157_v59 = vor.u32 %v13533_v45, %v11154_v46  ;;  %v13497_v62 = vld [vmem:[%s14415_s8 + $0x1224] sm:$0xf] }
 0x1db   : > { %7167 = vmatpush.bf16.msra.mxu1 %v10917_v34  ;;  %v10882_v60 = vld [vmem:[%s14415_s8 + $0x1130] sm:$0xf0]  ;;  %v13529_v6 = vld [vmem:[%s14415_s8 + $0x1324] sm:$0xf]  ;;  %v10757_v11 = vor.u32 %v13433_v55, %v10754_v57 }
 0x1dc   : > { %7180 = vmatpush.bf16.msra.mxu2 %v11045_v35  ;;  %v11010_v63 = vld [vmem:[%s14415_s8 + $0x1230] sm:$0xf0]  ;;  %v13429_v12 = vld [vmem:[%s14415_s8 + $0x1004] sm:$0xf]  ;;  %v10885_v26 = vor.u32 %v13465_v58, %v10882_v60  ;;  %v6927_v35 = vpop.f32.mrf.mxu2 }
 0x1dd   : > { %7193 = vmatpush.bf16.msra.mxu3 %v11173_v39  ;;  %v11138_v56 = vld [vmem:[%s14415_s8 + $0x1330] sm:$0xf0]  ;;  %v11013_v28 = vor.u32 %v13497_v62, %v11010_v63  ;;  %v13461_v29 = vld [vmem:[%s14415_s8 + $0x1104] sm:$0xf]  ;;  %v6940_v39 = vpop.f32.mrf.mxu3 }
 0x1de   : > { %7155 = vmatpush.bf16.msra.mxu0 %v10773_v52  ;;  %v10738_v24 = vld [vmem:[%s14415_s8 + $0x1010] sm:$0xf0]  ;;  %v13493_v7 = vld [vmem:[%s14415_s8 + $0x1204] sm:$0xf]  ;;  %v11141_v31 = vor.u32 %v13529_v6, %v11138_v56 }
 0x1df   : > { %7168 = vmatpush.bf16.msra.mxu1 %v10901_v42  ;;  %v10866_v30 = vld [vmem:[%s14415_s8 + $0x1110] sm:$0xf0]  ;;  %v13525_v0 = vld [vmem:[%s14415_s8 + $0x1304] sm:$0xf]  ;;  %v10741_v20 = vor.u32 %v13429_v12, %v10738_v24 }
 0x1e0   : > { %7181 = vmatpush.bf16.msra.mxu2 %v11029_v54  ;;  %v10994_v32 = vld [vmem:[%s14415_s8 + $0x1210] sm:$0xf0]  ;;  %v13585_v36 = vld [vmem:[%s14415_s8 + $0x14e4] sm:$0xf]  ;;  %v10869_v43 = vor.u32 %v13461_v29, %v10866_v30 }
 0x1e1   : > { %7194 = vmatpush.bf16.msra.mxu3 %v11157_v59  ;;  %v11122_v34 = vld [vmem:[%s14415_s8 + $0x1310] sm:$0xf0]  ;;  %v13617_v38 = vld [vmem:[%s14415_s8 + $0x15e4] sm:$0xf]  ;;  %v10997_v44 = vor.u32 %v13493_v7, %v10994_v32 }
 0x1e2   : > { %v11362_v37 = vld [vmem:[%s14415_s8 + $0x14f0] sm:$0xf0]  ;;  %7156 = vmatpush.bf16.msra.mxu0 %v10757_v11  ;;  %v13649_v40 = vld [vmem:[%s14415_s8 + $0x16e4] sm:$0xf]  ;;  %v11125_v51 = vor.u32 %v13525_v0, %v11122_v34 }
 0x1e3   : > { %v11490_v33 = vld [vmem:[%s14415_s8 + $0x15f0] sm:$0xf0]  ;;  %7169 = vmatpush.bf16.msra.mxu1 %v10885_v26  ;;  %v13681_v45 = vld [vmem:[%s14415_s8 + $0x17e4] sm:$0xf]  ;;  %v11365_v52 = vor.u32 %v13585_v36, %v11362_v37 }
 0x1e4   : > { %v11618_v41 = vld [vmem:[%s14415_s8 + $0x16f0] sm:$0xf0]  ;;  %7182 = vmatpush.bf16.msra.mxu2 %v11013_v28  ;;  %v11493_v53 = vor.u32 %v13617_v38, %v11490_v33  ;;  %v13581_v54 = vld [vmem:[%s14415_s8 + $0x14c4] sm:$0xf] }
 0x1e5   : > { %v11746_v46 = vld [vmem:[%s14415_s8 + $0x17f0] sm:$0xf0]  ;;  %7195 = vmatpush.bf16.msra.mxu3 %v11141_v31  ;;  %v11621_v42 = vor.u32 %v13649_v40, %v11618_v41  ;;  %v13613_v57 = vld [vmem:[%s14415_s8 + $0x15c4] sm:$0xf] }
 0x1e6   : > { %v11346_v55 = vld [vmem:[%s14415_s8 + $0x14d0] sm:$0xf0]  ;;  %7157 = vmatpush.bf16.msra.mxu0 %v10741_v20  ;;  %v11749_v58 = vor.u32 %v13681_v45, %v11746_v46  ;;  %v13645_v60 = vld [vmem:[%s14415_s8 + $0x16c4] sm:$0xf]  ;;  %v6951_v46 = vpop.f32.mrf.mxu0 }
 0x1e7   : > { %v11474_v59 = vld [vmem:[%s14415_s8 + $0x15d0] sm:$0xf0]  ;;  %7170 = vmatpush.bf16.msra.mxu1 %v10869_v43  ;;  %v13677_v63 = vld [vmem:[%s14415_s8 + $0x17c4] sm:$0xf]  ;;  %v11349_v56 = vor.u32 %v13581_v54, %v11346_v55  ;;  %v6964_v55 = vpop.f32.mrf.mxu1 }
 0x1e8   : > { %v11602_v62 = vld [vmem:[%s14415_s8 + $0x16d0] sm:$0xf0]  ;;  %7183 = vmatpush.bf16.msra.mxu2 %v10997_v44  ;;  %v11477_v11 = vor.u32 %v13613_v57, %v11474_v59  ;;  %v13577_v24 = vld [vmem:[%s14415_s8 + $0x14a4] sm:$0xf] }
 0x1e9   : > { %v11730_v6 = vld [vmem:[%s14415_s8 + $0x17d0] sm:$0xf0]  ;;  %7196 = vmatpush.bf16.msra.mxu3 %v11125_v51  ;;  %v11605_v12 = vor.u32 %v13645_v60, %v11602_v62  ;;  %v13609_v28 = vld [vmem:[%s14415_s8 + $0x15a4] sm:$0xf]  ;;  %7158 = vmatmul.bf16.vlgmr.msra.gmra.mxu0 %v14822_v10  ;;  %v6965_v62 = vadd.f32 %v6964_v55, %v6951_v46 }
 0x1ea   : > { %7202 = vmatpush.bf16.msrb.mxu0 %v11365_v52  ;;  %v11330_v26 = vld [vmem:[%s14415_s8 + $0x14b0] sm:$0xf0]  ;;  %v11733_v29 = vor.u32 %v13677_v63, %v11730_v6  ;;  %v13641_v7 = vld [vmem:[%s14415_s8 + $0x16a4] sm:$0xf]  ;;  %7171 = vmatmul.bf16.vlgmr.msra.gmra.mxu1 %v14828_v15 }
 0x1eb   : > { %7215 = vmatpush.bf16.msrb.mxu1 %v11493_v53  ;;  %v11458_v30 = vld [vmem:[%s14415_s8 + $0x15b0] sm:$0xf0]  ;;  %7184 = vmatmul.bf16.vlgmr.msra.gmra.mxu2 %v14826_v14  ;;  %v13673_v32 = vld [vmem:[%s14415_s8 + $0x17a4] sm:$0xf]  ;;  %v11333_v34 = vor.u32 %v13577_v24, %v11330_v26 }
 0x1ec   : > { %7228 = vmatpush.bf16.msrb.mxu2 %v11621_v42  ;;  %v11586_v31 = vld [vmem:[%s14415_s8 + $0x16b0] sm:$0xf0]  ;;  %7197 = vmatmul.bf16.vlgmr.msra.gmra.mxu3 %v14830_v19  ;;  %v11461_v35 = vor.u32 %v13609_v28, %v11458_v30  ;;  %v13573_v37 = vld [vmem:[%s14415_s8 + $0x1484] sm:$0xf] }
 0x1ed   : > { %7241 = vmatpush.bf16.msrb.mxu3 %v11749_v58  ;;  %v11714_v0 = vld [vmem:[%s14415_s8 + $0x17b0] sm:$0xf0]  ;;  %v11589_v36 = vor.u32 %v13641_v7, %v11586_v31  ;;  %v13605_v39 = vld [vmem:[%s14415_s8 + $0x1584] sm:$0xf] }
 0x1ee   : > { %7203 = vmatpush.bf16.msrb.mxu0 %v11349_v56  ;;  %v11314_v38 = vld [vmem:[%s14415_s8 + $0x1490] sm:$0xf0]  ;;  %v11717_v20 = vor.u32 %v13673_v32, %v11714_v0  ;;  %v13637_v40 = vld [vmem:[%s14415_s8 + $0x1684] sm:$0xf] }
 0x1ef   : > { %7216 = vmatpush.bf16.msrb.mxu1 %v11477_v11  ;;  %v11442_v33 = vld [vmem:[%s14415_s8 + $0x1590] sm:$0xf0]  ;;  %v13669_v43 = vld [vmem:[%s14415_s8 + $0x1784] sm:$0xf]  ;;  %v11317_v45 = vor.u32 %v13573_v37, %v11314_v38 }
 0x1f0   : > { %7229 = vmatpush.bf16.msrb.mxu2 %v11605_v12  ;;  %v11570_v41 = vld [vmem:[%s14415_s8 + $0x1690] sm:$0xf0]  ;;  %v11445_v51 = vor.u32 %v13605_v39, %v11442_v33  ;;  %v13569_v53 = vld [vmem:[%s14415_s8 + $0x1464] sm:$0xf]  ;;  %v6953_v39 = vpop.f32.mrf.mxu0 }
 0x1f1   : > { %7242 = vmatpush.bf16.msrb.mxu3 %v11733_v29  ;;  %v11698_v44 = vld [vmem:[%s14415_s8 + $0x1790] sm:$0xf0]  ;;  %v11573_v52 = vor.u32 %v13637_v40, %v11570_v41  ;;  %v13601_v54 = vld [vmem:[%s14415_s8 + $0x1564] sm:$0xf]  ;;  %v6977_v29 = vpop.f32.mrf.mxu2 }
 0x1f2   : > { %7204 = vmatpush.bf16.msrb.mxu0 %v11333_v34  ;;  %v11298_v42 = vld [vmem:[%s14415_s8 + $0x1470] sm:$0xf0]  ;;  %v11701_v57 = vor.u32 %v13669_v43, %v11698_v44  ;;  %v13633_v59 = vld [vmem:[%s14415_s8 + $0x1664] sm:$0xf]  ;;  %v6978_v0 = vadd.f32 %v6977_v29, %v6965_v62  ;;  %v6990_v34 = vpop.f32.mrf.mxu3  ;;  %v6966_v44 = vpop.f32.mrf.mxu1 }
 0x1f3   : > { %7217 = vmatpush.bf16.msrb.mxu1 %v11461_v35  ;;  %v11426_v58 = vld [vmem:[%s14415_s8 + $0x1570] sm:$0xf0]  ;;  %v13665_v63 = vld [vmem:[%s14415_s8 + $0x1764] sm:$0xf]  ;;  %v11301_v56 = vor.u32 %v13569_v53, %v11298_v42 }
 0x1f4   : > { %7230 = vmatpush.bf16.msrb.mxu2 %v11589_v36  ;;  %v11554_v60 = vld [vmem:[%s14415_s8 + $0x1670] sm:$0xf0]  ;;  %v11429_v11 = vor.u32 %v13601_v54, %v11426_v58  ;;  %v13565_v24 = vld [vmem:[%s14415_s8 + $0x1444] sm:$0xf]  ;;  %v15436_v38 = vadd.f32 %v6990_v34, %v6978_v0 }
 0x1f5   : > { %7243 = vmatpush.bf16.msrb.mxu3 %v11717_v20  ;;  %v11682_v6 = vld [vmem:[%s14415_s8 + $0x1770] sm:$0xf0]  ;;  %v11557_v12 = vor.u32 %v13633_v59, %v11554_v60  ;;  %v13597_v28 = vld [vmem:[%s14415_s8 + $0x1544] sm:$0xf] }
 0x1f6   : > { %7205 = vmatpush.bf16.msrb.mxu0 %v11317_v45  ;;  %v11282_v26 = vld [vmem:[%s14415_s8 + $0x1450] sm:$0xf0]  ;;  %v11685_v30 = vor.u32 %v13665_v63, %v11682_v6  ;;  %v13629_v31 = vld [vmem:[%s14415_s8 + $0x1644] sm:$0xf] }
 0x1f7   : > { %7218 = vmatpush.bf16.msrb.mxu1 %v11445_v51  ;;  %v11410_v7 = vld [vmem:[%s14415_s8 + $0x1550] sm:$0xf0]  ;;  %v13661_v35 = vld [vmem:[%s14415_s8 + $0x1744] sm:$0xf]  ;;  %v11285_v37 = vor.u32 %v13565_v24, %v11282_v26 }
 0x1f8   : > { %7231 = vmatpush.bf16.msrb.mxu2 %v11573_v52  ;;  %v11538_v32 = vld [vmem:[%s14415_s8 + $0x1650] sm:$0xf0]  ;;  %v11413_v20 = vor.u32 %v13597_v28, %v11410_v7  ;;  %v13561_v40 = vld [vmem:[%s14415_s8 + $0x1424] sm:$0xf] }
 0x1f9   : > { %7244 = vmatpush.bf16.msrb.mxu3 %v11701_v57  ;;  %v11666_v36 = vld [vmem:[%s14415_s8 + $0x1750] sm:$0xf0]  ;;  %v11541_v33 = vor.u32 %v13629_v31, %v11538_v32  ;;  %v13593_v43 = vld [vmem:[%s14415_s8 + $0x1524] sm:$0xf]  ;;  %v6979_v6 = vpop.f32.mrf.mxu2 }
 0x1fa   : > { %7206 = vmatpush.bf16.msrb.mxu0 %v11301_v56  ;;  %v11266_v41 = vld [vmem:[%s14415_s8 + $0x1430] sm:$0xf0]  ;;  %v11669_v45 = vor.u32 %v13661_v35, %v11666_v36  ;;  %v13625_v51 = vld [vmem:[%s14415_s8 + $0x1624] sm:$0xf]  ;;  %v6992_v26 = vpop.f32.mrf.mxu3 }
 0x1fb   : > { %7219 = vmatpush.bf16.msrb.mxu1 %v11429_v11  ;;  %v11394_v46 = vld [vmem:[%s14415_s8 + $0x1530] sm:$0xf0]  ;;  %v13657_v53 = vld [vmem:[%s14415_s8 + $0x1724] sm:$0xf]  ;;  %v11269_v54 = vor.u32 %v13561_v40, %v11266_v41 }
 0x1fc   : > { %7232 = vmatpush.bf16.msrb.mxu2 %v11557_v12  ;;  %v11522_v52 = vld [vmem:[%s14415_s8 + $0x1630] sm:$0xf0]  ;;  %v13557_v55 = vld [vmem:[%s14415_s8 + $0x1404] sm:$0xf]  ;;  %v11397_v58 = vor.u32 %v13593_v43, %v11394_v46 }
 0x1fd   : > { %7245 = vmatpush.bf16.msrb.mxu3 %v11685_v30  ;;  %v11650_v42 = vld [vmem:[%s14415_s8 + $0x1730] sm:$0xf0]  ;;  %v11525_v59 = vor.u32 %v13625_v51, %v11522_v52  ;;  %v13589_v60 = vld [vmem:[%s14415_s8 + $0x1504] sm:$0xf] }
 0x1fe   : > { %7207 = vmatpush.bf16.msrb.mxu0 %v11285_v37  ;;  %v11250_v57 = vld [vmem:[%s14415_s8 + $0x1410] sm:$0xf0]  ;;  %v13621_v63 = vld [vmem:[%s14415_s8 + $0x1604] sm:$0xf]  ;;  %v11653_v56 = vor.u32 %v13657_v53, %v11650_v42 }
 0x1ff   : > { %7220 = vmatpush.bf16.msrb.mxu1 %v11413_v20  ;;  %v11378_v62 = vld [vmem:[%s14415_s8 + $0x1510] sm:$0xf0]  ;;  %v13653_v12 = vld [vmem:[%s14415_s8 + $0x1704] sm:$0xf]  ;;  %v11253_v7 = vor.u32 %v13557_v55, %v11250_v57 }
 0x200   : > { %7233 = vmatpush.bf16.msrb.mxu2 %v11541_v33  ;;  %v11506_v11 = vld [vmem:[%s14415_s8 + $0x1610] sm:$0xf0]  ;;  %v13713_v28 = vld [vmem:[%s14415_s8 + $0x18e4] sm:$0xf]  ;;  %v11381_v34 = vor.u32 %v13589_v60, %v11378_v62 }
 0x201   : > { %7246 = vmatpush.bf16.msrb.mxu3 %v11669_v45  ;;  %v11634_v24 = vld [vmem:[%s14415_s8 + $0x1710] sm:$0xf0]  ;;  %v13745_v30 = vld [vmem:[%s14415_s8 + $0x19e4] sm:$0xf]  ;;  %v11509_v35 = vor.u32 %v13621_v63, %v11506_v11 }
 0x202   : > { %v11874_v29 = vld [vmem:[%s14415_s8 + $0x18f0] sm:$0xf0]  ;;  %7208 = vmatpush.bf16.msrb.mxu0 %v11269_v54  ;;  %v13777_v32 = vld [vmem:[%s14415_s8 + $0x1ae4] sm:$0xf]  ;;  %v11637_v39 = vor.u32 %v13653_v12, %v11634_v24 }
 0x203   : > { %v12002_v31 = vld [vmem:[%s14415_s8 + $0x19f0] sm:$0xf0]  ;;  %7221 = vmatpush.bf16.msrb.mxu1 %v11397_v58  ;;  %v13809_v36 = vld [vmem:[%s14415_s8 + $0x1be4] sm:$0xf]  ;;  %v11877_v20 = vor.u32 %v13713_v28, %v11874_v29 }
 0x204   : > { %v12130_v0 = vld [vmem:[%s14415_s8 + $0x1af0] sm:$0xf0]  ;;  %7234 = vmatpush.bf16.msrb.mxu2 %v11525_v59  ;;  %v12005_v33 = vor.u32 %v13745_v30, %v12002_v31  ;;  %v13709_v41 = vld [vmem:[%s14415_s8 + $0x18c4] sm:$0xf] }
 0x205   : > { %v12258_v37 = vld [vmem:[%s14415_s8 + $0x1bf0] sm:$0xf0]  ;;  %7247 = vmatpush.bf16.msrb.mxu3 %v11653_v56  ;;  %v12133_v40 = vor.u32 %v13777_v32, %v12130_v0  ;;  %v13741_v44 = vld [vmem:[%s14415_s8 + $0x19c4] sm:$0xf] }
 0x206   : > { %v11858_v43 = vld [vmem:[%s14415_s8 + $0x18d0] sm:$0xf0]  ;;  %7209 = vmatpush.bf16.msrb.mxu0 %v11253_v7  ;;  %v12261_v45 = vor.u32 %v13809_v36, %v12258_v37  ;;  %v13773_v51 = vld [vmem:[%s14415_s8 + $0x1ac4] sm:$0xf] }
 0x207   : > { %v11986_v46 = vld [vmem:[%s14415_s8 + $0x19d0] sm:$0xf0]  ;;  %7222 = vmatpush.bf16.msrb.mxu1 %v11381_v34  ;;  %v13805_v53 = vld [vmem:[%s14415_s8 + $0x1bc4] sm:$0xf]  ;;  %v11861_v54 = vor.u32 %v13709_v41, %v11858_v43 }
 0x208   : > { %v12114_v52 = vld [vmem:[%s14415_s8 + $0x1ad0] sm:$0xf0]  ;;  %7235 = vmatpush.bf16.msrb.mxu2 %v11509_v35  ;;  %v11989_v55 = vor.u32 %v13741_v44, %v11986_v46  ;;  %v13705_v58 = vld [vmem:[%s14415_s8 + $0x18a4] sm:$0xf] }
 0x209   : > { %v12242_v42 = vld [vmem:[%s14415_s8 + $0x1bd0] sm:$0xf0]  ;;  %7248 = vmatpush.bf16.msrb.mxu3 %v11637_v39  ;;  %v12117_v57 = vor.u32 %v13773_v51, %v12114_v52  ;;  %v13737_v60 = vld [vmem:[%s14415_s8 + $0x19a4] sm:$0xf]  ;;  %7210 = vmatmul.bf16.vlgmr.msrb.gmra.mxu0 %v14888_v4  ;;  %v7003_v39 = vpop.f32.mrf.mxu0 }
 0x20a   : > { %7254 = vmatpush.bf16.msra.mxu0 %v11877_v20  ;;  %v11842_v59 = vld [vmem:[%s14415_s8 + $0x18b0] sm:$0xf0]  ;;  %v12245_v62 = vor.u32 %v13805_v53, %v12242_v42  ;;  %v13769_v6 = vld [vmem:[%s14415_s8 + $0x1aa4] sm:$0xf]  ;;  %7223 = vmatmul.bf16.vlgmr.msrb.gmra.mxu1 %v14892_v8  ;;  %v7004_v44 = vadd.f32 %v7003_v39, %v15436_v38 }
 0x20b   : > { %7267 = vmatpush.bf16.msra.mxu1 %v12005_v33  ;;  %v11970_v63 = vld [vmem:[%s14415_s8 + $0x19b0] sm:$0xf0]  ;;  %7236 = vmatmul.bf16.vlgmr.msrb.gmra.mxu2 %v14890_v5  ;;  %v13801_v11 = vld [vmem:[%s14415_s8 + $0x1ba4] sm:$0xf]  ;;  %v11845_v24 = vor.u32 %v13705_v58, %v11842_v59 }
 0x20c   : > { %7280 = vmatpush.bf16.msra.mxu2 %v12133_v40  ;;  %v12098_v56 = vld [vmem:[%s14415_s8 + $0x1ab0] sm:$0xf0]  ;;  %7249 = vmatmul.bf16.vlgmr.msrb.gmra.mxu3 %v14894_v9  ;;  %v11973_v26 = vor.u32 %v13737_v60, %v11970_v63  ;;  %v13701_v29 = vld [vmem:[%s14415_s8 + $0x1884] sm:$0xf] }
 0x20d   : > { %7293 = vmatpush.bf16.msra.mxu3 %v12261_v45  ;;  %v12226_v12 = vld [vmem:[%s14415_s8 + $0x1bb0] sm:$0xf0]  ;;  %v12101_v28 = vor.u32 %v13769_v6, %v12098_v56  ;;  %v13733_v7 = vld [vmem:[%s14415_s8 + $0x1984] sm:$0xf]  ;;  %v7016_v45 = vpop.f32.mrf.mxu1 }
 0x20e   : > { %7255 = vmatpush.bf16.msra.mxu0 %v11861_v54  ;;  %v11826_v30 = vld [vmem:[%s14415_s8 + $0x1890] sm:$0xf0]  ;;  %v12229_v31 = vor.u32 %v13801_v11, %v12226_v12  ;;  %v13765_v0 = vld [vmem:[%s14415_s8 + $0x1a84] sm:$0xf]  ;;  %v7029_v63 = vpop.f32.mrf.mxu2 }
 0x20f   : > { %7268 = vmatpush.bf16.msra.mxu1 %v11989_v55  ;;  %v11954_v32 = vld [vmem:[%s14415_s8 + $0x1990] sm:$0xf0]  ;;  %v13797_v35 = vld [vmem:[%s14415_s8 + $0x1b84] sm:$0xf]  ;;  %v11829_v37 = vor.u32 %v13701_v29, %v11826_v30  ;;  %v7017_v55 = vadd.f32 %v7016_v45, %v7004_v44 }
 0x210   : > { %7281 = vmatpush.bf16.msra.mxu2 %v12117_v57  ;;  %v12082_v34 = vld [vmem:[%s14415_s8 + $0x1a90] sm:$0xf0]  ;;  %v11957_v20 = vor.u32 %v13733_v7, %v11954_v32  ;;  %v13697_v40 = vld [vmem:[%s14415_s8 + $0x1864] sm:$0xf] }
 0x211   : > { %7294 = vmatpush.bf16.msra.mxu3 %v12245_v62  ;;  %v12210_v36 = vld [vmem:[%s14415_s8 + $0x1b90] sm:$0xf0]  ;;  %v12085_v33 = vor.u32 %v13765_v0, %v12082_v34  ;;  %v13729_v43 = vld [vmem:[%s14415_s8 + $0x1964] sm:$0xf] }
 0x212   : > { %7256 = vmatpush.bf16.msra.mxu0 %v11845_v24  ;;  %v11810_v41 = vld [vmem:[%s14415_s8 + $0x1870] sm:$0xf0]  ;;  %v12213_v46 = vor.u32 %v13797_v35, %v12210_v36  ;;  %v13761_v52 = vld [vmem:[%s14415_s8 + $0x1a64] sm:$0xf]  ;;  %v7030_v24 = vadd.f32 %v7029_v63, %v7017_v55 }
 0x213   : > { %7269 = vmatpush.bf16.msra.mxu1 %v11973_v26  ;;  %v11938_v51 = vld [vmem:[%s14415_s8 + $0x1970] sm:$0xf0]  ;;  %v13793_v42 = vld [vmem:[%s14415_s8 + $0x1b64] sm:$0xf]  ;;  %v11813_v57 = vor.u32 %v13697_v40, %v11810_v41  ;;  %v7042_v26 = vpop.f32.mrf.mxu3 }
 0x214   : > { %7282 = vmatpush.bf16.msra.mxu2 %v12101_v28  ;;  %v12066_v53 = vld [vmem:[%s14415_s8 + $0x1a70] sm:$0xf0]  ;;  %v11941_v38 = vor.u32 %v13729_v43, %v11938_v51  ;;  %v13693_v59 = vld [vmem:[%s14415_s8 + $0x1844] sm:$0xf]  ;;  %v15507_v7 = vadd.f32 %v7042_v26, %v7030_v24 }
 0x215   : > { %7295 = vmatpush.bf16.msra.mxu3 %v12229_v31  ;;  %v12194_v54 = vld [vmem:[%s14415_s8 + $0x1b70] sm:$0xf0]  ;;  %v12069_v58 = vor.u32 %v13761_v52, %v12066_v53  ;;  %v13725_v62 = vld [vmem:[%s14415_s8 + $0x1944] sm:$0xf]  ;;  %v7005_v31 = vpop.f32.mrf.mxu0 }
 0x216   : > { %7257 = vmatpush.bf16.msra.mxu0 %v11829_v37  ;;  %v11794_v60 = vld [vmem:[%s14415_s8 + $0x1850] sm:$0xf0]  ;;  %v12197_v6 = vor.u32 %v13793_v42, %v12194_v54  ;;  %v13757_v11 = vld [vmem:[%s14415_s8 + $0x1a44] sm:$0xf]  ;;  %v7018_v37 = vpop.f32.mrf.mxu1  ;;  %v7031_v55 = vpop.f32.mrf.mxu2 }
 0x217   : > { %7270 = vmatpush.bf16.msra.mxu1 %v11957_v20  ;;  %v11922_v56 = vld [vmem:[%s14415_s8 + $0x1950] sm:$0xf0]  ;;  %v13789_v28 = vld [vmem:[%s14415_s8 + $0x1b44] sm:$0xf]  ;;  %v11797_v30 = vor.u32 %v13693_v59, %v11794_v60 }
 0x218   : > { %7283 = vmatpush.bf16.msra.mxu2 %v12085_v33  ;;  %v12050_v12 = vld [vmem:[%s14415_s8 + $0x1a50] sm:$0xf0]  ;;  %v11925_v32 = vor.u32 %v13725_v62, %v11922_v56  ;;  %v13689_v34 = vld [vmem:[%s14415_s8 + $0x1824] sm:$0xf] }
 0x219   : > { %7296 = vmatpush.bf16.msra.mxu3 %v12213_v46  ;;  %v12178_v29 = vld [vmem:[%s14415_s8 + $0x1b50] sm:$0xf0]  ;;  %v12053_v0 = vor.u32 %v13757_v11, %v12050_v12  ;;  %v13721_v36 = vld [vmem:[%s14415_s8 + $0x1924] sm:$0xf] }
 0x21a   : > { %7258 = vmatpush.bf16.msra.mxu0 %v11813_v57  ;;  %v11778_v35 = vld [vmem:[%s14415_s8 + $0x1830] sm:$0xf0]  ;;  %v12181_v39 = vor.u32 %v13789_v28, %v12178_v29  ;;  %v13753_v33 = vld [vmem:[%s14415_s8 + $0x1a24] sm:$0xf] }
 0x21b   : > { %7271 = vmatpush.bf16.msra.mxu1 %v11941_v38  ;;  %v11906_v20 = vld [vmem:[%s14415_s8 + $0x1930] sm:$0xf0]  ;;  %v13785_v41 = vld [vmem:[%s14415_s8 + $0x1b24] sm:$0xf]  ;;  %v11781_v44 = vor.u32 %v13689_v34, %v11778_v35  ;;  %v7044_v60 = vpop.f32.mrf.mxu3 }
 0x21c   : > { %7284 = vmatpush.bf16.msra.mxu2 %v12069_v58  ;;  %v12034_v40 = vld [vmem:[%s14415_s8 + $0x1a30] sm:$0xf0]  ;;  %v13685_v45 = vld [vmem:[%s14415_s8 + $0x1804] sm:$0xf]  ;;  %v11909_v51 = vor.u32 %v13721_v36, %v11906_v20 }
 0x21d   : > { %7297 = vmatpush.bf16.msra.mxu3 %v12197_v6  ;;  %v12162_v43 = vld [vmem:[%s14415_s8 + $0x1b30] sm:$0xf0]  ;;  %v12037_v52 = vor.u32 %v13753_v33, %v12034_v40  ;;  %v13717_v53 = vld [vmem:[%s14415_s8 + $0x1904] sm:$0xf] }
 0x21e   : > { %7259 = vmatpush.bf16.msra.mxu0 %v11797_v30  ;;  %v11762_v46 = vld [vmem:[%s14415_s8 + $0x1810] sm:$0xf0]  ;;  %v13749_v54 = vld [vmem:[%s14415_s8 + $0x1a04] sm:$0xf]  ;;  %v12165_v57 = vor.u32 %v13785_v41, %v12162_v43 }
 0x21f   : > { %7272 = vmatpush.bf16.msra.mxu1 %v11925_v32  ;;  %v11890_v42 = vld [vmem:[%s14415_s8 + $0x1910] sm:$0xf0]  ;;  %v13781_v58 = vld [vmem:[%s14415_s8 + $0x1b04] sm:$0xf]  ;;  %v11765_v56 = vor.u32 %v13685_v45, %v11762_v46 }
 0x220   : > { %7285 = vmatpush.bf16.msra.mxu2 %v12053_v0  ;;  %v12018_v38 = vld [vmem:[%s14415_s8 + $0x1a10] sm:$0xf0]  ;;  %v13841_v62 = vld [vmem:[%s14415_s8 + $0x1ce4] sm:$0xf]  ;;  %v11893_v26 = vor.u32 %v13717_v53, %v11890_v42 }
 0x221   : > { %7298 = vmatpush.bf16.msra.mxu3 %v12181_v39  ;;  %v12146_v59 = vld [vmem:[%s14415_s8 + $0x1b10] sm:$0xf0]  ;;  %v13873_v6 = vld [vmem:[%s14415_s8 + $0x1de4] sm:$0xf]  ;;  %v12021_v28 = vor.u32 %v13749_v54, %v12018_v38 }
 0x222   : > { %v12386_v63 = vld [vmem:[%s14415_s8 + $0x1cf0] sm:$0xf0]  ;;  %7260 = vmatpush.bf16.msra.mxu0 %v11781_v44  ;;  %v13905_v12 = vld [vmem:[%s14415_s8 + $0x1ee4] sm:$0xf]  ;;  %v12149_v31 = vor.u32 %v13781_v58, %v12146_v59  ;;  %v14059_v59 = vld [vmem:[#allocation1 + $0x9] sm:$0xff] }
 0x223   : > { %v12514_v11 = vld [vmem:[%s14415_s8 + $0x1df0] sm:$0xf0]  ;;  %7273 = vmatpush.bf16.msra.mxu1 %v11909_v51  ;;  %v13937_v29 = vld [vmem:[%s14415_s8 + $0x1fe4] sm:$0xf]  ;;  %v12389_v32 = vor.u32 %v13841_v62, %v12386_v63  ;;  %v14060_v63 = vld [vmem:[#allocation1 + $0x1b] sm:$0xff] }
 0x224   : > { %v12642_v24 = vld [vmem:[%s14415_s8 + $0x1ef0] sm:$0xf0]  ;;  %7286 = vmatpush.bf16.msra.mxu2 %v12037_v52  ;;  %v12517_v0 = vor.u32 %v13873_v6, %v12514_v11  ;;  %v13837_v35 = vld [vmem:[%s14415_s8 + $0x1cc4] sm:$0xf] }
 0x225   : > { %v12770_v30 = vld [vmem:[%s14415_s8 + $0x1ff0] sm:$0xf0]  ;;  %7299 = vmatpush.bf16.msra.mxu3 %v12165_v57  ;;  %v12645_v34 = vor.u32 %v13905_v12, %v12642_v24  ;;  %v13869_v37 = vld [vmem:[%s14415_s8 + $0x1dc4] sm:$0xf] }
 0x226   : > { %v12370_v36 = vld [vmem:[%s14415_s8 + $0x1cd0] sm:$0xf0]  ;;  %7261 = vmatpush.bf16.msra.mxu0 %v11765_v56  ;;  %v12773_v39 = vor.u32 %v13937_v29, %v12770_v30  ;;  %v13901_v33 = vld [vmem:[%s14415_s8 + $0x1ec4] sm:$0xf] }
 0x227   : > { %v12498_v20 = vld [vmem:[%s14415_s8 + $0x1dd0] sm:$0xf0]  ;;  %7274 = vmatpush.bf16.msra.mxu1 %v11893_v26  ;;  %v13933_v41 = vld [vmem:[%s14415_s8 + $0x1fc4] sm:$0xf]  ;;  %v12373_v44 = vor.u32 %v13837_v35, %v12370_v36 }
 0x228   : > { %v12626_v40 = vld [vmem:[%s14415_s8 + $0x1ed0] sm:$0xf0]  ;;  %7287 = vmatpush.bf16.msra.mxu2 %v12021_v28  ;;  %v12501_v45 = vor.u32 %v13869_v37, %v12498_v20  ;;  %v13833_v51 = vld [vmem:[%s14415_s8 + $0x1ca4] sm:$0xf]  ;;  %v7068_v37 = vpop.f32.mrf.mxu1 }
 0x229   : > { %v12754_v43 = vld [vmem:[%s14415_s8 + $0x1fd0] sm:$0xf0]  ;;  %7300 = vmatpush.bf16.msra.mxu3 %v12149_v31  ;;  %v12629_v46 = vor.u32 %v13901_v33, %v12626_v40  ;;  %v13865_v53 = vld [vmem:[%s14415_s8 + $0x1da4] sm:$0xf] }
 0x22a   : > { %7306 = vmatpush.bf16.msrb.mxu0 %v12389_v32  ;;  %v12354_v52 = vld [vmem:[%s14415_s8 + $0x1cb0] sm:$0xf0]  ;;  %v12757_v54 = vor.u32 %v13933_v41, %v12754_v43  ;;  %v13897_v57 = vld [vmem:[%s14415_s8 + $0x1ea4] sm:$0xf]  ;;  %7275 = vmatmul.bf16.vlgmr.msra.gmra.mxu1 %v14059_v59  ;;  %v7055_v32 = vpop.f32.mrf.mxu0 }
 0x22b   : > { %7319 = vmatpush.bf16.msrb.mxu1 %v12517_v0  ;;  %v14057_v42 = vld [vmem:[#allocation1] sm:$0xff]  ;;  %v14058_v58 = vld [vmem:[#allocation1 + $0x12] sm:$0xff]  ;;  %v12357_v6 = vor.u32 %v13833_v51, %v12354_v52  ;;  %v7056_v35 = vadd.f32 %v7055_v32, %v15507_v7 }
 0x22c   : > { %7332 = vmatpush.bf16.msrb.mxu2 %v12645_v34  ;;  %7262 = vmatmul.bf16.vlgmr.msra.gmra.mxu0 %v14057_v42  ;;  %v12482_v55 = vld [vmem:[%s14415_s8 + $0x1db0] sm:$0xf0]  ;;  %v13929_v60 = vld [vmem:[%s14415_s8 + $0x1fa4] sm:$0xf] }
 0x22d   : > { %7345 = vmatpush.bf16.msrb.mxu3 %v12773_v39  ;;  %v12610_v38 = vld [vmem:[%s14415_s8 + $0x1eb0] sm:$0xf0]  ;;  %7288 = vmatmul.bf16.vlgmr.msra.gmra.mxu2 %v14058_v58  ;;  %v12485_v56 = vor.u32 %v13865_v53, %v12482_v55  ;;  %v13829_v12 = vld [vmem:[%s14415_s8 + $0x1c84] sm:$0xf] }
 0x22e   : > { %v12738_v62 = vld [vmem:[%s14415_s8 + $0x1fb0] sm:$0xf0]  ;;  %7301 = vmatmul.bf16.vlgmr.msra.gmra.mxu3 %v14060_v63  ;;  %7307 = vmatpush.bf16.msrb.mxu0 %v12373_v44  ;;  %v12613_v11 = vor.u32 %v13897_v57, %v12610_v38  ;;  %v13861_v26 = vld [vmem:[%s14415_s8 + $0x1d84] sm:$0xf]  ;;  %v7069_v44 = vadd.f32 %v7068_v37, %v7056_v35  ;;  %v7081_v59 = vpop.f32.mrf.mxu2 }
 0x22f   : > { %7320 = vmatpush.bf16.msrb.mxu1 %v12501_v45  ;;  %v12338_v24 = vld [vmem:[%s14415_s8 + $0x1c90] sm:$0xf0]  ;;  %v12741_v28 = vor.u32 %v13929_v60, %v12738_v62  ;;  %v13893_v30 = vld [vmem:[%s14415_s8 + $0x1e84] sm:$0xf] }
 0x230   : > { %7333 = vmatpush.bf16.msrb.mxu2 %v12629_v46  ;;  %v12466_v29 = vld [vmem:[%s14415_s8 + $0x1d90] sm:$0xf0]  ;;  %v13925_v0 = vld [vmem:[%s14415_s8 + $0x1f84] sm:$0xf]  ;;  %v12341_v36 = vor.u32 %v13829_v12, %v12338_v24 }
 0x231   : > { %7346 = vmatpush.bf16.msrb.mxu3 %v12757_v54  ;;  %v12594_v31 = vld [vmem:[%s14415_s8 + $0x1e90] sm:$0xf0]  ;;  %v12469_v39 = vor.u32 %v13861_v26, %v12466_v29  ;;  %v13825_v33 = vld [vmem:[%s14415_s8 + $0x1c64] sm:$0xf] }
 0x232   : > { %v12722_v34 = vld [vmem:[%s14415_s8 + $0x1f90] sm:$0xf0]  ;;  %7308 = vmatpush.bf16.msrb.mxu0 %v12357_v6  ;;  %v12597_v20 = vor.u32 %v13893_v30, %v12594_v31  ;;  %v13857_v41 = vld [vmem:[%s14415_s8 + $0x1d64] sm:$0xf]  ;;  %v7082_v6 = vadd.f32 %v7081_v59, %v7069_v44  ;;  %v7057_v24 = vpop.f32.mrf.mxu0 }
 0x233   : > { %7321 = vmatpush.bf16.msrb.mxu1 %v12485_v56  ;;  %v12322_v40 = vld [vmem:[%s14415_s8 + $0x1c70] sm:$0xf0]  ;;  %v12725_v43 = vor.u32 %v13925_v0, %v12722_v34  ;;  %v13889_v46 = vld [vmem:[%s14415_s8 + $0x1e64] sm:$0xf]  ;;  %v7094_v56 = vpop.f32.mrf.mxu3  ;;  %v13044_v24 = vld [vmem:[%s14415_s8 + $0x3f4] sm:$0xf0] }
 0x234   : > { %7334 = vmatpush.bf16.msrb.mxu2 %v12613_v11  ;;  %v12450_v45 = vld [vmem:[%s14415_s8 + $0x1d70] sm:$0xf0]  ;;  %v13921_v51 = vld [vmem:[%s14415_s8 + $0x1f64] sm:$0xf]  ;;  %v12325_v53 = vor.u32 %v13825_v33, %v12322_v40  ;;  %v15574_v29 = vadd.f32 %v7094_v56, %v7082_v6  ;;  %v13012_v6 = vld [vmem:[%s14415_s8 + $0x2f4] sm:$0xf0] }
 0x235   : > { %7347 = vmatpush.bf16.msrb.mxu3 %v12741_v28  ;;  %v12578_v7 = vld [vmem:[%s14415_s8 + $0x1e70] sm:$0xf0]  ;;  %v12453_v42 = vor.u32 %v13857_v41, %v12450_v45  ;;  %v13821_v55 = vld [vmem:[%s14415_s8 + $0x1c44] sm:$0xf]  ;;  %v7070_v28 = vpop.f32.mrf.mxu1 }
 0x236   : > { %v12706_v52 = vld [vmem:[%s14415_s8 + $0x1f70] sm:$0xf0]  ;;  %7309 = vmatpush.bf16.msrb.mxu0 %v12341_v36  ;;  %v12581_v54 = vor.u32 %v13889_v46, %v12578_v7  ;;  %v13853_v38 = vld [vmem:[%s14415_s8 + $0x1d44] sm:$0xf] }
 0x237   : > { %7322 = vmatpush.bf16.msrb.mxu1 %v12469_v39  ;;  %v12306_v57 = vld [vmem:[%s14415_s8 + $0x1c50] sm:$0xf0]  ;;  %v12709_v58 = vor.u32 %v13921_v51, %v12706_v52  ;;  %v13885_v62 = vld [vmem:[%s14415_s8 + $0x1e44] sm:$0xf] }
 0x238   : > { %7335 = vmatpush.bf16.msrb.mxu2 %v12597_v20  ;;  %v12434_v60 = vld [vmem:[%s14415_s8 + $0x1d50] sm:$0xf0]  ;;  %v13917_v11 = vld [vmem:[%s14415_s8 + $0x1f44] sm:$0xf]  ;;  %v12309_v26 = vor.u32 %v13821_v55, %v12306_v57  ;;  %v7083_v55 = vpop.f32.mrf.mxu2  ;;  %v8808_v57 = vld [vmem:[%s14415_s8 + $0xe8] sm:$0xf] }
 0x239   : > { %7348 = vmatpush.bf16.msrb.mxu3 %v12725_v43  ;;  %v12562_v63 = vld [vmem:[%s14415_s8 + $0x1e50] sm:$0xf0]  ;;  %v12437_v30 = vor.u32 %v13853_v38, %v12434_v60  ;;  %v13817_v32 = vld [vmem:[%s14415_s8 + $0x1c24] sm:$0xf]  ;;  %v12948_v38 = vld [vmem:[%s14415_s8 + $0xf4] sm:$0xf0] }
 0x23a   : > { %v12690_v12 = vld [vmem:[%s14415_s8 + $0x1f50] sm:$0xf0]  ;;  %7310 = vmatpush.bf16.msrb.mxu0 %v12325_v53  ;;  %v12565_v31 = vor.u32 %v13885_v62, %v12562_v63  ;;  %v13849_v34 = vld [vmem:[%s14415_s8 + $0x1d24] sm:$0xf]  ;;  %v12980_v62 = vld [vmem:[%s14415_s8 + $0x1f4] sm:$0xf0]  ;;  %v8809_v28 = vor.u32 %v12948_v38, %v8808_v57 }
 0x23b   : > { %7323 = vmatpush.bf16.msrb.mxu1 %v12453_v42  ;;  %v12290_v0 = vld [vmem:[%s14415_s8 + $0x1c30] sm:$0xf0]  ;;  %v12693_v35 = vor.u32 %v13917_v11, %v12690_v12  ;;  %v13881_v37 = vld [vmem:[%s14415_s8 + $0x1e24] sm:$0xf]  ;;  %v7096_v59 = vpop.f32.mrf.mxu3  ;;  %v9064_v63 = vld [vmem:[%s14415_s8 + $0x2e8] sm:$0xf] }
 0x23c   : > { %7336 = vmatpush.bf16.msrb.mxu2 %v12581_v54  ;;  %v12418_v36 = vld [vmem:[%s14415_s8 + $0x1d30] sm:$0xf0]  ;;  %v13913_v20 = vld [vmem:[%s14415_s8 + $0x1f24] sm:$0xf]  ;;  %v12293_v40 = vor.u32 %v13817_v32, %v12290_v0  ;;  %v9192_v12 = vld [vmem:[%s14415_s8 + $0x3e8] sm:$0xf] }
 0x23d   : > { %7349 = vmatpush.bf16.msrb.mxu3 %v12709_v58  ;;  %v12546_v39 = vld [vmem:[%s14415_s8 + $0x1e30] sm:$0xf0]  ;;  %v13813_v41 = vld [vmem:[%s14415_s8 + $0x1c04] sm:$0xf]  ;;  %v12421_v44 = vor.u32 %v13849_v34, %v12418_v36  ;;  %v8936_v58 = vld [vmem:[%s14415_s8 + $0x1e8] sm:$0xf] }
 0x23e   : > { %v12674_v33 = vld [vmem:[%s14415_s8 + $0x1f30] sm:$0xf0]  ;;  %7311 = vmatpush.bf16.msrb.mxu0 %v12309_v26  ;;  %v12549_v45 = vor.u32 %v13881_v37, %v12546_v39  ;;  %v13845_v46 = vld [vmem:[%s14415_s8 + $0x1d04] sm:$0xf]  ;;  %v8792_v32 = vld [vmem:[%s14415_s8 + $0xc8] sm:$0xf] }
 0x23f   : > { %v12274_v43 = vld [vmem:[%s14415_s8 + $0x1c10] sm:$0xf0]  ;;  %7324 = vmatpush.bf16.msrb.mxu1 %v12437_v30  ;;  %v13877_v51 = vld [vmem:[%s14415_s8 + $0x1e04] sm:$0xf]  ;;  %v12677_v52 = vor.u32 %v13913_v20, %v12674_v33  ;;  %v8937_v30 = vor.u32 %v12980_v62, %v8936_v58  ;;  %v12944_v0 = vld [vmem:[%s14415_s8 + $0xd4] sm:$0xf0] }
 0x240   : > { %7337 = vmatpush.bf16.msrb.mxu2 %v12565_v31  ;;  %v12402_v7 = vld [vmem:[%s14415_s8 + $0x1d10] sm:$0xf0]  ;;  %v13909_v42 = vld [vmem:[%s14415_s8 + $0x1f04] sm:$0xf]  ;;  %v12277_v60 = vor.u32 %v13813_v41, %v12274_v43  ;;  %v9065_v31 = vor.u32 %v13012_v6, %v9064_v63  ;;  %v8920_v34 = vld [vmem:[%s14415_s8 + $0x1c8] sm:$0xf] }
 0x241   : > { %7350 = vmatpush.bf16.msrb.mxu3 %v12693_v35  ;;  %v12530_v53 = vld [vmem:[%s14415_s8 + $0x1e10] sm:$0xf0]  ;;  %v12405_v56 = vor.u32 %v13845_v46, %v12402_v7  ;;  %v9193_v35 = vor.u32 %v13044_v24, %v9192_v12  ;;  %v12976_v36 = vld [vmem:[%s14415_s8 + $0x1d4] sm:$0xf0]  ;;  %v9048_v37 = vld [vmem:[%s14415_s8 + $0x2c8] sm:$0xf] }
 0x242   : > { %v12658_v54 = vld [vmem:[%s14415_s8 + $0x1f10] sm:$0xf0]  ;;  %7312 = vmatpush.bf16.msrb.mxu0 %v12293_v40  ;;  %v12533_v11 = vor.u32 %v13877_v51, %v12530_v53  ;;  %v13008_v39 = vld [vmem:[%s14415_s8 + $0x2d4] sm:$0xf0]  ;;  %v9176_v20 = vld [vmem:[%s14415_s8 + $0x3c8] sm:$0xf]  ;;  %v8793_v40 = vor.u32 %v12944_v0, %v8792_v32  ;;  %v8921_v41 = vor.u32 %v12976_v36, %v8920_v34 }
 0x243   : > { %7325 = vmatpush.bf16.msrb.mxu1 %v12421_v44  ;;  %v12661_v26 = vor.u32 %v13909_v42, %v12658_v54  ;;  %v13040_v33 = vld [vmem:[%s14415_s8 + $0x3d4] sm:$0xf0]  ;;  %v9049_v43 = vor.u32 %v13008_v39, %v9048_v37  ;;  %v8776_v44 = vld [vmem:[%s14415_s8 + $0xa8] sm:$0xf]  ;;  %v14063_v55 = vld [vmem:[#allocation1 + $0x2d] sm:$0xff] }
 0x244   : > { %7338 = vmatpush.bf16.msrb.mxu2 %v12549_v45  ;;  %v12940_v45 = vld [vmem:[%s14415_s8 + $0xb4] sm:$0xf0]  ;;  %v8904_v46 = vld [vmem:[%s14415_s8 + $0x1a8] sm:$0xf]  ;;  %v9177_v51 = vor.u32 %v13040_v33, %v9176_v20  ;;  %v14064_v58 = vld [vmem:[#allocation1 + $0x3f] sm:$0xff] }
 0x245   : > { %7351 = vmatpush.bf16.msrb.mxu3 %v12677_v52  ;;  %v14061_v7 = vld [vmem:[#allocation1 + $0x24] sm:$0xff]  ;;  %v9032_v53 = vld [vmem:[%s14415_s8 + $0x2a8] sm:$0xf]  ;;  %v8777_v59 = vor.u32 %v12940_v45, %v8776_v44 }
 0x246   : > { %7313 = vmatpush.bf16.msrb.mxu0 %v12277_v60  ;;  %v12972_v52 = vld [vmem:[%s14415_s8 + $0x1b4] sm:$0xf0]  ;;  %v14062_v54 = vld [vmem:[#allocation1 + $0x36] sm:$0xff] }
 0x247   : > { %7326 = vmatpush.bf16.msrb.mxu1 %v12405_v56  ;;  %v13004_v42 = vld [vmem:[%s14415_s8 + $0x2b4] sm:$0xf0]  ;;  %v9160_v57 = vld [vmem:[%s14415_s8 + $0x3a8] sm:$0xf]  ;;  %v8905_v60 = vor.u32 %v12972_v52, %v8904_v46  ;;  %v7120_v34 = vpop.f32.mrf.mxu1 }
 0x248   : > { %7339 = vmatpush.bf16.msrb.mxu2 %v12533_v11  ;;  %v13036_v38 = vld [vmem:[%s14415_s8 + $0x3b4] sm:$0xf0]  ;;  %v9033_v62 = vor.u32 %v13004_v42, %v9032_v53  ;;  %v8760_v63 = vld [vmem:[%s14415_s8 + $0x88] sm:$0xf] }
 0x249   : > { %7352 = vmatpush.bf16.msrb.mxu3 %v12661_v26  ;;  %7314 = vmatmul.bf16.vlgmr.msrb.gmra.mxu0 %v14061_v7  ;;  %v12936_v6 = vld [vmem:[%s14415_s8 + $0x94] sm:$0xf0]  ;;  %v8888_v56 = vld [vmem:[%s14415_s8 + $0x188] sm:$0xf]  ;;  %v9161_v11 = vor.u32 %v13036_v38, %v9160_v57 }
 0x24a   : > { %7358 = vmatpush.bf16.msra.mxu0 %v8809_v28  ;;  %7327 = vmatmul.bf16.vlgmr.msrb.gmra.mxu1 %v14063_v55  ;;  %v12968_v12 = vld [vmem:[%s14415_s8 + $0x194] sm:$0xf0]  ;;  %v9016_v24 = vld [vmem:[%s14415_s8 + $0x288] sm:$0xf]  ;;  %v7107_v28 = vpop.f32.mrf.mxu0  ;;  %v8761_v0 = vor.u32 %v12936_v6, %v8760_v63 }
 0x24b   : > { %7371 = vmatpush.bf16.msra.mxu1 %v8937_v30  ;;  %7340 = vmatmul.bf16.vlgmr.msrb.gmra.mxu2 %v14062_v54  ;;  %v13000_v26 = vld [vmem:[%s14415_s8 + $0x294] sm:$0xf0]  ;;  %v9144_v30 = vld [vmem:[%s14415_s8 + $0x388] sm:$0xf]  ;;  %v7108_v32 = vadd.f32 %v7107_v28, %v15574_v29 }
 0x24c   : > { %7384 = vmatpush.bf16.msra.mxu2 %v9065_v31  ;;  %7353 = vmatmul.bf16.vlgmr.msrb.gmra.mxu3 %v14064_v58  ;;  %v13032_v31 = vld [vmem:[%s14415_s8 + $0x394] sm:$0xf0]  ;;  %v9017_v36 = vor.u32 %v13000_v26, %v9016_v24  ;;  %v8744_v37 = vld [vmem:[%s14415_s8 + $0x68] sm:$0xf] }
 0x24d   : > { %7397 = vmatpush.bf16.msra.mxu3 %v9193_v35  ;;  %v8889_v35 = vor.u32 %v12968_v12, %v8888_v56  ;;  %v12932_v39 = vld [vmem:[%s14415_s8 + $0x74] sm:$0xf0]  ;;  %v8872_v20 = vld [vmem:[%s14415_s8 + $0x168] sm:$0xf]  ;;  %v9145_v33 = vor.u32 %v13032_v31, %v9144_v30 }
 0x24e   : > { %7359 = vmatpush.bf16.msra.mxu0 %v8793_v40  ;;  %v7121_v40 = vadd.f32 %v7120_v34, %v7108_v32  ;;  %v12996_v29 = vld [vmem:[%s14415_s8 + $0x274] sm:$0xf0]  ;;  %v9128_v44 = vld [vmem:[%s14415_s8 + $0x368] sm:$0xf]  ;;  %v8745_v46 = vor.u32 %v12932_v39, %v8744_v37  ;;  %v7133_v55 = vpop.f32.mrf.mxu2 }
 0x24f   : > { %7372 = vmatpush.bf16.msra.mxu1 %v8921_v41  ;;  %v12964_v41 = vld [vmem:[%s14415_s8 + $0x174] sm:$0xf0]  ;;  %v8728_v52 = vld [vmem:[%s14415_s8 + $0x48] sm:$0xf] }
 0x250   : > { %7385 = vmatpush.bf16.msra.mxu2 %v9049_v43  ;;  %v9000_v43 = vld [vmem:[%s14415_s8 + $0x268] sm:$0xf]  ;;  %v13028_v45 = vld [vmem:[%s14415_s8 + $0x374] sm:$0xf0]  ;;  %v8873_v7 = vor.u32 %v12964_v41, %v8872_v20 }
 0x251   : > { %7398 = vmatpush.bf16.msra.mxu3 %v9177_v51  ;;  %v9001_v51 = vor.u32 %v12996_v29, %v9000_v43  ;;  %v12928_v53 = vld [vmem:[%s14415_s8 + $0x54] sm:$0xf0]  ;;  %v8856_v42 = vld [vmem:[%s14415_s8 + $0x148] sm:$0xf]  ;;  %v9129_v54 = vor.u32 %v13028_v45, %v9128_v44 }
 0x252   : > { %7360 = vmatpush.bf16.msra.mxu0 %v8777_v59  ;;  %v12960_v57 = vld [vmem:[%s14415_s8 + $0x154] sm:$0xf0]  ;;  %v8984_v38 = vld [vmem:[%s14415_s8 + $0x248] sm:$0xf]  ;;  %v7134_v59 = vadd.f32 %v7133_v55, %v7121_v40  ;;  %v7109_v6 = vpop.f32.mrf.mxu0  ;;  %v8729_v56 = vor.u32 %v12928_v53, %v8728_v52 }
 0x253   : > { %7373 = vmatpush.bf16.msra.mxu1 %v8905_v60  ;;  %v12992_v58 = vld [vmem:[%s14415_s8 + $0x254] sm:$0xf0]  ;;  %v7146_v60 = vpop.f32.mrf.mxu3  ;;  %v8857_v24 = vor.u32 %v12960_v57, %v8856_v42  ;;  %v8712_v28 = vld [vmem:[%s14415_s8 + $0x28] sm:$0xf] }
 0x254   : > { %7386 = vmatpush.bf16.msra.mxu2 %v9033_v62  ;;  %v9112_v62 = vld [vmem:[%s14415_s8 + $0x348] sm:$0xf]  ;;  %v13024_v63 = vld [vmem:[%s14415_s8 + $0x354] sm:$0xf0]  ;;  %v15641_v12 = vadd.f32 %v7146_v60, %v7134_v59  ;;  %v8985_v26 = vor.u32 %v12992_v58, %v8984_v38 }
 0x255   : > { %7399 = vmatpush.bf16.msra.mxu3 %v9161_v11  ;;  %v7122_v11 = vpop.f32.mrf.mxu1  ;;  %v12924_v30 = vld [vmem:[%s14415_s8 + $0x34] sm:$0xf0]  ;;  %v8840_v31 = vld [vmem:[%s14415_s8 + $0x128] sm:$0xf]  ;;  %v9113_v32 = vor.u32 %v13024_v63, %v9112_v62 }
 0x256   : > { %7361 = vmatpush.bf16.msra.mxu0 %v8761_v0  ;;  %v12956_v0 = vld [vmem:[%s14415_s8 + $0x134] sm:$0xf0]  ;;  %v8968_v34 = vld [vmem:[%s14415_s8 + $0x228] sm:$0xf]  ;;  %v8713_v39 = vor.u32 %v12924_v30, %v8712_v28  ;;  %v7135_v52 = vpop.f32.mrf.mxu2 }
 0x257   : > { %7374 = vmatpush.bf16.msra.mxu1 %v8889_v35  ;;  %v12988_v35 = vld [vmem:[%s14415_s8 + $0x234] sm:$0xf0]  ;;  %v8696_v20 = vld [vmem:[%s14415_s8 + $0x8] sm:$0xf]  ;;  %v8841_v40 = vor.u32 %v12956_v0, %v8840_v31 }
 0x258   : > { %7387 = vmatpush.bf16.msra.mxu2 %v9017_v36  ;;  %v9096_v36 = vld [vmem:[%s14415_s8 + $0x328] sm:$0xf]  ;;  %v13020_v37 = vld [vmem:[%s14415_s8 + $0x334] sm:$0xf0]  ;;  %v8969_v41 = vor.u32 %v12988_v35, %v8968_v34 }
 0x259   : > { %7400 = vmatpush.bf16.msra.mxu3 %v9145_v33  ;;  %v12920_v33 = vld [vmem:[%s14415_s8 + $0x14] sm:$0xf0]  ;;  %v8824_v43 = vld [vmem:[%s14415_s8 + $0x108] sm:$0xf]  ;;  %v9097_v45 = vor.u32 %v13020_v37, %v9096_v36 }
 0x25a   : > { %7362 = vmatpush.bf16.msra.mxu0 %v8745_v46  ;;  %v12952_v29 = vld [vmem:[%s14415_s8 + $0x114] sm:$0xf0]  ;;  %v8952_v44 = vld [vmem:[%s14415_s8 + $0x208] sm:$0xf]  ;;  %v8697_v57 = vor.u32 %v12920_v33, %v8696_v20 }
 0x25b   : > { %7375 = vmatpush.bf16.msra.mxu1 %v8873_v7  ;;  %v12984_v46 = vld [vmem:[%s14415_s8 + $0x214] sm:$0xf0]  ;;  %v9080_v7 = vld [vmem:[%s14415_s8 + $0x308] sm:$0xf]  ;;  %v7148_v55 = vpop.f32.mrf.mxu3  ;;  %v8825_v60 = vor.u32 %v12952_v29, %v8824_v43 }
 0x25c   : > { %7388 = vmatpush.bf16.msra.mxu2 %v9001_v51  ;;  %v13016_v51 = vld [vmem:[%s14415_s8 + $0x314] sm:$0xf0]  ;;  %v9320_v53 = vld [vmem:[%s14415_s8 + $0x4e8] sm:$0xf]  ;;  %v8953_v62 = vor.u32 %v12984_v46, %v8952_v44 }
 0x25d   : > { %7401 = vmatpush.bf16.msra.mxu3 %v9129_v54  ;;  %v13076_v42 = vld [vmem:[%s14415_s8 + $0x4f4] sm:$0xf0]  ;;  %v9448_v54 = vld [vmem:[%s14415_s8 + $0x5e8] sm:$0xf] }
 0x25e   : > { %7363 = vmatpush.bf16.msra.mxu0 %v8729_v56  ;;  %v13108_v38 = vld [vmem:[%s14415_s8 + $0x5f4] sm:$0xf0]  ;;  %v9576_v58 = vld [vmem:[%s14415_s8 + $0x6e8] sm:$0xf]  ;;  %v9081_v56 = vor.u32 %v13016_v51, %v9080_v7  ;;  %v9321_v11 = vor.u32 %v13076_v42, %v9320_v53 }
 0x25f   : > { %7376 = vmatpush.bf16.msra.mxu1 %v8857_v24  ;;  %v13140_v59 = vld [vmem:[%s14415_s8 + $0x6f4] sm:$0xf0]  ;;  %v9704_v63 = vld [vmem:[%s14415_s8 + $0x7e8] sm:$0xf]  ;;  %v9449_v24 = vor.u32 %v13108_v38, %v9448_v54 }
 0x260   : > { %7389 = vmatpush.bf16.msra.mxu2 %v8985_v26  ;;  %v13172_v6 = vld [vmem:[%s14415_s8 + $0x7f4] sm:$0xf0]  ;;  %v9577_v26 = vor.u32 %v13140_v59, %v9576_v58  ;;  %v9304_v28 = vld [vmem:[%s14415_s8 + $0x4c8] sm:$0xf] }
 0x261   : > { %7402 = vmatpush.bf16.msra.mxu3 %v9113_v32  ;;  %v13072_v30 = vld [vmem:[%s14415_s8 + $0x4d4] sm:$0xf0]  ;;  %v9432_v31 = vld [vmem:[%s14415_s8 + $0x5c8] sm:$0xf]  ;;  %v9705_v32 = vor.u32 %v13172_v6, %v9704_v63 }
 0x262   : > { %7364 = vmatpush.bf16.msra.mxu0 %v8713_v39  ;;  %v13104_v0 = vld [vmem:[%s14415_s8 + $0x5d4] sm:$0xf0]  ;;  %v9560_v34 = vld [vmem:[%s14415_s8 + $0x6c8] sm:$0xf]  ;;  %v9305_v39 = vor.u32 %v13072_v30, %v9304_v28 }
 0x263   : > { %7377 = vmatpush.bf16.msra.mxu1 %v8841_v40  ;;  %v13136_v35 = vld [vmem:[%s14415_s8 + $0x6d4] sm:$0xf0]  ;;  %v9688_v36 = vld [vmem:[%s14415_s8 + $0x7c8] sm:$0xf]  ;;  %v9433_v20 = vor.u32 %v13104_v0, %v9432_v31 }
 0x264   : > { %7390 = vmatpush.bf16.msra.mxu2 %v8969_v41  ;;  %v13168_v37 = vld [vmem:[%s14415_s8 + $0x7d4] sm:$0xf0]  ;;  %v9561_v33 = vor.u32 %v13136_v35, %v9560_v34  ;;  %v9288_v40 = vld [vmem:[%s14415_s8 + $0x4a8] sm:$0xf] }
 0x265   : > { %7403 = vmatpush.bf16.msra.mxu3 %v9097_v45  ;;  %v13068_v41 = vld [vmem:[%s14415_s8 + $0x4b4] sm:$0xf0]  ;;  %v9416_v43 = vld [vmem:[%s14415_s8 + $0x5a8] sm:$0xf]  ;;  %v9689_v29 = vor.u32 %v13168_v37, %v9688_v36 }
 0x266   : > { %7365 = vmatpush.bf16.msra.mxu0 %v8697_v57  ;;  %v13100_v44 = vld [vmem:[%s14415_s8 + $0x5b4] sm:$0xf0]  ;;  %v9544_v45 = vld [vmem:[%s14415_s8 + $0x6a8] sm:$0xf]  ;;  %v9289_v52 = vor.u32 %v13068_v41, %v9288_v40 }
 0x267   : > { %7378 = vmatpush.bf16.msra.mxu1 %v8825_v60  ;;  %v13132_v46 = vld [vmem:[%s14415_s8 + $0x6b4] sm:$0xf0]  ;;  %v9672_v7 = vld [vmem:[%s14415_s8 + $0x7a8] sm:$0xf]  ;;  %v9417_v53 = vor.u32 %v13100_v44, %v9416_v43 }
 0x268   : > { %7391 = vmatpush.bf16.msra.mxu2 %v8953_v62  ;;  %v13164_v51 = vld [vmem:[%s14415_s8 + $0x7b4] sm:$0xf0]  ;;  %v9545_v42 = vor.u32 %v13132_v46, %v9544_v45  ;;  %v9272_v54 = vld [vmem:[%s14415_s8 + $0x488] sm:$0xf]  ;;  %v7159_v62 = vpop.f32.mrf.mxu0 }
 0x269   : > { %7404 = vmatpush.bf16.msra.mxu3 %v9081_v56  ;;  %7366 = vmatmul.bf16.vlgmr.msra.gmra.mxu0 %v14540_v22  ;;  %v13064_v55 = vld [vmem:[%s14415_s8 + $0x494] sm:$0xf0]  ;;  %v9400_v57 = vld [vmem:[%s14415_s8 + $0x588] sm:$0xf]  ;;  %v9673_v38 = vor.u32 %v13164_v51, %v9672_v7  ;;  %v7160_v56 = vadd.f32 %v7159_v62, %v15641_v12 }
 0x26a   : > { %7410 = vmatpush.bf16.msrb.mxu0 %v9321_v11  ;;  %7379 = vmatmul.bf16.vlgmr.msra.gmra.mxu1 %v14547_v27  ;;  %v13096_v58 = vld [vmem:[%s14415_s8 + $0x594] sm:$0xf0]  ;;  %v9528_v59 = vld [vmem:[%s14415_s8 + $0x688] sm:$0xf]  ;;  %v9273_v11 = vor.u32 %v13064_v55, %v9272_v54 }
 0x26b   : > { %7423 = vmatpush.bf16.msrb.mxu1 %v9449_v24  ;;  %7392 = vmatmul.bf16.vlgmr.msra.gmra.mxu2 %v14538_v21  ;;  %v13128_v60 = vld [vmem:[%s14415_s8 + $0x694] sm:$0xf0]  ;;  %v9656_v63 = vld [vmem:[%s14415_s8 + $0x788] sm:$0xf]  ;;  %v7172_v24 = vpop.f32.mrf.mxu1 }
 0x26c   : > { %7436 = vmatpush.bf16.msrb.mxu2 %v9577_v26  ;;  %7405 = vmatmul.bf16.vlgmr.msra.gmra.mxu3 %v14542_v23  ;;  %v13160_v6 = vld [vmem:[%s14415_s8 + $0x794] sm:$0xf0]  ;;  %v9401_v26 = vor.u32 %v13096_v58, %v9400_v57  ;;  %v9529_v28 = vor.u32 %v13128_v60, %v9528_v59  ;;  %v9256_v30 = vld [vmem:[%s14415_s8 + $0x468] sm:$0xf]  ;;  %v7173_v34 = vadd.f32 %v7172_v24, %v7160_v56 }
 0x26d   : > { %7449 = vmatpush.bf16.msrb.mxu3 %v9705_v32  ;;  %v13060_v31 = vld [vmem:[%s14415_s8 + $0x474] sm:$0xf0]  ;;  %v9384_v32 = vld [vmem:[%s14415_s8 + $0x568] sm:$0xf]  ;;  %v9657_v0 = vor.u32 %v13160_v6, %v9656_v63 }
 0x26e   : > { %7411 = vmatpush.bf16.msrb.mxu0 %v9305_v39  ;;  %v13092_v35 = vld [vmem:[%s14415_s8 + $0x574] sm:$0xf0]  ;;  %v9512_v36 = vld [vmem:[%s14415_s8 + $0x668] sm:$0xf]  ;;  %v7185_v45 = vpop.f32.mrf.mxu2 }
 0x26f   : > { %7424 = vmatpush.bf16.msrb.mxu1 %v9433_v20  ;;  %v13124_v12 = vld [vmem:[%s14415_s8 + $0x674] sm:$0xf0]  ;;  %v9640_v37 = vld [vmem:[%s14415_s8 + $0x768] sm:$0xf]  ;;  %v9257_v20 = vor.u32 %v13060_v31, %v9256_v30 }
 0x270   : > { %7437 = vmatpush.bf16.msrb.mxu2 %v9561_v33  ;;  %v13156_v39 = vld [vmem:[%s14415_s8 + $0x774] sm:$0xf0]  ;;  %v9385_v33 = vor.u32 %v13092_v35, %v9384_v32  ;;  %v9513_v40 = vor.u32 %v13124_v12, %v9512_v36  ;;  %v9240_v41 = vld [vmem:[%s14415_s8 + $0x448] sm:$0xf]  ;;  %v7161_v55 = vpop.f32.mrf.mxu0 }
 0x271   : > { %7450 = vmatpush.bf16.msrb.mxu3 %v9689_v29  ;;  %v13056_v43 = vld [vmem:[%s14415_s8 + $0x454] sm:$0xf0]  ;;  %v9368_v29 = vld [vmem:[%s14415_s8 + $0x548] sm:$0xf]  ;;  %v9641_v44 = vor.u32 %v13156_v39, %v9640_v37 }
 0x272   : > { %7412 = vmatpush.bf16.msrb.mxu0 %v9289_v52  ;;  %v13088_v46 = vld [vmem:[%s14415_s8 + $0x554] sm:$0xf0]  ;;  %v9496_v7 = vld [vmem:[%s14415_s8 + $0x648] sm:$0xf]  ;;  %v7186_v52 = vadd.f32 %v7185_v45, %v7173_v34  ;;  %v9241_v57 = vor.u32 %v13056_v43, %v9240_v41 }
 0x273   : > { %7425 = vmatpush.bf16.msrb.mxu1 %v9417_v53  ;;  %v13120_v51 = vld [vmem:[%s14415_s8 + $0x654] sm:$0xf0]  ;;  %v7198_v53 = vpop.f32.mrf.mxu3  ;;  %v9369_v59 = vor.u32 %v13088_v46, %v9368_v29  ;;  %v9224_v62 = vld [vmem:[%s14415_s8 + $0x428] sm:$0xf] }
 0x274   : > { %7438 = vmatpush.bf16.msrb.mxu2 %v9545_v42  ;;  %v9624_v42 = vld [vmem:[%s14415_s8 + $0x748] sm:$0xf]  ;;  %v13152_v54 = vld [vmem:[%s14415_s8 + $0x754] sm:$0xf0]  ;;  %v15712_v58 = vadd.f32 %v7198_v53, %v7186_v52  ;;  %v9497_v60 = vor.u32 %v13120_v51, %v9496_v7 }
 0x275   : > { %7451 = vmatpush.bf16.msrb.mxu3 %v9673_v38  ;;  %v7174_v38 = vpop.f32.mrf.mxu1  ;;  %v13052_v63 = vld [vmem:[%s14415_s8 + $0x434] sm:$0xf0]  ;;  %v9352_v6 = vld [vmem:[%s14415_s8 + $0x528] sm:$0xf]  ;;  %v9625_v56 = vor.u32 %v13152_v54, %v9624_v42 }
 0x276   : > { %7413 = vmatpush.bf16.msrb.mxu0 %v9273_v11  ;;  %v13084_v11 = vld [vmem:[%s14415_s8 + $0x534] sm:$0xf0]  ;;  %v9480_v24 = vld [vmem:[%s14415_s8 + $0x628] sm:$0xf]  ;;  %v9225_v31 = vor.u32 %v13052_v63, %v9224_v62  ;;  %v7187_v41 = vpop.f32.mrf.mxu2 }
 0x277   : > { %7426 = vmatpush.bf16.msrb.mxu1 %v9401_v26  ;;  %v13116_v26 = vld [vmem:[%s14415_s8 + $0x634] sm:$0xf0]  ;;  %v9208_v32 = vld [vmem:[%s14415_s8 + $0x408] sm:$0xf]  ;;  %v9353_v34 = vor.u32 %v13084_v11, %v9352_v6 }
 0x278   : > { %7439 = vmatpush.bf16.msrb.mxu2 %v9529_v28  ;;  %v9608_v28 = vld [vmem:[%s14415_s8 + $0x728] sm:$0xf]  ;;  %v13148_v30 = vld [vmem:[%s14415_s8 + $0x734] sm:$0xf0]  ;;  %v9481_v35 = vor.u32 %v13116_v26, %v9480_v24 }
 0x279   : > { %7452 = vmatpush.bf16.msrb.mxu3 %v9657_v0  ;;  %v13048_v0 = vld [vmem:[%s14415_s8 + $0x414] sm:$0xf0]  ;;  %v9336_v36 = vld [vmem:[%s14415_s8 + $0x508] sm:$0xf]  ;;  %v9609_v39 = vor.u32 %v13148_v30, %v9608_v28 }
 0x27a   : > { %7414 = vmatpush.bf16.msrb.mxu0 %v9257_v20  ;;  %v13080_v12 = vld [vmem:[%s14415_s8 + $0x514] sm:$0xf0]  ;;  %v9464_v37 = vld [vmem:[%s14415_s8 + $0x608] sm:$0xf]  ;;  %v9209_v46 = vor.u32 %v13048_v0, %v9208_v32 }
 0x27b   : > { %7427 = vmatpush.bf16.msrb.mxu1 %v9385_v33  ;;  %v13112_v20 = vld [vmem:[%s14415_s8 + $0x614] sm:$0xf0]  ;;  %v9592_v33 = vld [vmem:[%s14415_s8 + $0x708] sm:$0xf]  ;;  %v7200_v45 = vpop.f32.mrf.mxu3  ;;  %v9337_v53 = vor.u32 %v13080_v12, %v9336_v36 }
 0x27c   : > { %7440 = vmatpush.bf16.msrb.mxu2 %v9513_v40  ;;  %v13144_v40 = vld [vmem:[%s14415_s8 + $0x714] sm:$0xf0]  ;;  %v9832_v43 = vld [vmem:[%s14415_s8 + $0x8e8] sm:$0xf]  ;;  %v9465_v42 = vor.u32 %v13112_v20, %v9464_v37 }
 0x27d   : > { %7453 = vmatpush.bf16.msrb.mxu3 %v9641_v44  ;;  %v13204_v29 = vld [vmem:[%s14415_s8 + $0x8f4] sm:$0xf0]  ;;  %v9960_v44 = vld [vmem:[%s14415_s8 + $0x9e8] sm:$0xf] }
 0x27e   : > { %7415 = vmatpush.bf16.msrb.mxu0 %v9241_v57  ;;  %v13236_v7 = vld [vmem:[%s14415_s8 + $0x9f4] sm:$0xf0]  ;;  %v10088_v51 = vld [vmem:[%s14415_s8 + $0xae8] sm:$0xf]  ;;  %v9593_v57 = vor.u32 %v13144_v40, %v9592_v33  ;;  %v9833_v38 = vor.u32 %v13204_v29, %v9832_v43 }
 0x27f   : > { %7428 = vmatpush.bf16.msrb.mxu1 %v9369_v59  ;;  %v13268_v52 = vld [vmem:[%s14415_s8 + $0xaf4] sm:$0xf0]  ;;  %v10216_v54 = vld [vmem:[%s14415_s8 + $0xbe8] sm:$0xf]  ;;  %v9961_v59 = vor.u32 %v13236_v7, %v9960_v44 }
 0x280   : > { %7441 = vmatpush.bf16.msrb.mxu2 %v9497_v60  ;;  %v13300_v55 = vld [vmem:[%s14415_s8 + $0xbf4] sm:$0xf0]  ;;  %v10089_v60 = vor.u32 %v13268_v52, %v10088_v51  ;;  %v9816_v62 = vld [vmem:[%s14415_s8 + $0x8c8] sm:$0xf] }
 0x281   : > { %7454 = vmatpush.bf16.msrb.mxu3 %v9625_v56  ;;  %v13200_v63 = vld [vmem:[%s14415_s8 + $0x8d4] sm:$0xf0]  ;;  %v9944_v6 = vld [vmem:[%s14415_s8 + $0x9c8] sm:$0xf]  ;;  %v10217_v56 = vor.u32 %v13300_v55, %v10216_v54 }
 0x282   : > { %7416 = vmatpush.bf16.msrb.mxu0 %v9225_v31  ;;  %v13232_v11 = vld [vmem:[%s14415_s8 + $0x9d4] sm:$0xf0]  ;;  %v10072_v24 = vld [vmem:[%s14415_s8 + $0xac8] sm:$0xf]  ;;  %v9817_v31 = vor.u32 %v13200_v63, %v9816_v62 }
 0x283   : > { %7429 = vmatpush.bf16.msrb.mxu1 %v9353_v34  ;;  %v13264_v26 = vld [vmem:[%s14415_s8 + $0xad4] sm:$0xf0]  ;;  %v10200_v28 = vld [vmem:[%s14415_s8 + $0xbc8] sm:$0xf]  ;;  %v9945_v32 = vor.u32 %v13232_v11, %v9944_v6 }
 0x284   : > { %7442 = vmatpush.bf16.msrb.mxu2 %v9481_v35  ;;  %v13296_v30 = vld [vmem:[%s14415_s8 + $0xbd4] sm:$0xf0]  ;;  %v10073_v0 = vor.u32 %v13264_v26, %v10072_v24  ;;  %v9800_v34 = vld [vmem:[%s14415_s8 + $0x8a8] sm:$0xf] }
 0x285   : > { %7455 = vmatpush.bf16.msrb.mxu3 %v9609_v39  ;;  %v13196_v35 = vld [vmem:[%s14415_s8 + $0x8b4] sm:$0xf0]  ;;  %v9928_v36 = vld [vmem:[%s14415_s8 + $0x9a8] sm:$0xf]  ;;  %v10201_v12 = vor.u32 %v13296_v30, %v10200_v28 }
 0x286   : > { %7417 = vmatpush.bf16.msrb.mxu0 %v9209_v46  ;;  %v13228_v37 = vld [vmem:[%s14415_s8 + $0x9b4] sm:$0xf0]  ;;  %v10056_v39 = vld [vmem:[%s14415_s8 + $0xaa8] sm:$0xf]  ;;  %v9801_v41 = vor.u32 %v13196_v35, %v9800_v34 }
 0x287   : > { %7430 = vmatpush.bf16.msrb.mxu1 %v9337_v53  ;;  %v13260_v20 = vld [vmem:[%s14415_s8 + $0xab4] sm:$0xf0]  ;;  %v10184_v33 = vld [vmem:[%s14415_s8 + $0xba8] sm:$0xf]  ;;  %v9929_v43 = vor.u32 %v13228_v37, %v9928_v36 }
 0x288   : > { %7443 = vmatpush.bf16.msrb.mxu2 %v9465_v42  ;;  %v13292_v40 = vld [vmem:[%s14415_s8 + $0xbb4] sm:$0xf0]  ;;  %v10057_v29 = vor.u32 %v13260_v20, %v10056_v39  ;;  %v9784_v44 = vld [vmem:[%s14415_s8 + $0x888] sm:$0xf]  ;;  %v7211_v42 = vpop.f32.mrf.mxu0 }
 0x289   : > { %7456 = vmatpush.bf16.msrb.mxu3 %v9593_v57  ;;  %7418 = vmatmul.bf16.vlgmr.msrb.gmra.mxu0 %v14579_v1  ;;  %v13192_v45 = vld [vmem:[%s14415_s8 + $0x894] sm:$0xf0]  ;;  %v9912_v46 = vld [vmem:[%s14415_s8 + $0x988] sm:$0xf]  ;;  %v10185_v7 = vor.u32 %v13292_v40, %v10184_v33  ;;  %v7212_v57 = vadd.f32 %v7211_v42, %v15712_v58 }
 0x28a   : > { %7462 = vmatpush.bf16.msra.mxu0 %v9833_v38  ;;  %7431 = vmatmul.bf16.vlgmr.msrb.gmra.mxu1 %v14583_v3  ;;  %v13224_v51 = vld [vmem:[%s14415_s8 + $0x994] sm:$0xf0]  ;;  %v10040_v52 = vld [vmem:[%s14415_s8 + $0xa88] sm:$0xf]  ;;  %v9785_v38 = vor.u32 %v13192_v45, %v9784_v44 }
 0x28b   : > { %7475 = vmatpush.bf16.msra.mxu1 %v9961_v59  ;;  %7444 = vmatmul.bf16.vlgmr.msrb.gmra.mxu2 %v14576_v61  ;;  %v13256_v53 = vld [vmem:[%s14415_s8 + $0xa94] sm:$0xf0]  ;;  %v10168_v54 = vld [vmem:[%s14415_s8 + $0xb88] sm:$0xf]  ;;  %v7224_v59 = vpop.f32.mrf.mxu1 }
 0x28c   : > { %7488 = vmatpush.bf16.msra.mxu2 %v10089_v60  ;;  %7457 = vmatmul.bf16.vlgmr.msrb.gmra.mxu3 %v14581_v2  ;;  %v13288_v55 = vld [vmem:[%s14415_s8 + $0xb94] sm:$0xf0]  ;;  %v9913_v60 = vor.u32 %v13224_v51, %v9912_v46  ;;  %v10041_v62 = vor.u32 %v13256_v53, %v10040_v52  ;;  %v9768_v63 = vld [vmem:[%s14415_s8 + $0x868] sm:$0xf]  ;;  %v7225_v24 = vadd.f32 %v7224_v59, %v7212_v57 }
 0x28d   : > { %7501 = vmatpush.bf16.msra.mxu3 %v10217_v56  ;;  %v13188_v6 = vld [vmem:[%s14415_s8 + $0x874] sm:$0xf0]  ;;  %v9896_v56 = vld [vmem:[%s14415_s8 + $0x968] sm:$0xf]  ;;  %v10169_v11 = vor.u32 %v13288_v55, %v10168_v54 }
 0x28e   : > { %7463 = vmatpush.bf16.msra.mxu0 %v9817_v31  ;;  %v13220_v26 = vld [vmem:[%s14415_s8 + $0x974] sm:$0xf0]  ;;  %v10024_v28 = vld [vmem:[%s14415_s8 + $0xa68] sm:$0xf]  ;;  %v7237_v39 = vpop.f32.mrf.mxu2 }
 0x28f   : > { %7476 = vmatpush.bf16.msra.mxu1 %v9945_v32  ;;  %v13252_v58 = vld [vmem:[%s14415_s8 + $0xa74] sm:$0xf0]  ;;  %v10152_v30 = vld [vmem:[%s14415_s8 + $0xb68] sm:$0xf]  ;;  %v9769_v32 = vor.u32 %v13188_v6, %v9768_v63 }
 0x290   : > { %7489 = vmatpush.bf16.msra.mxu2 %v10073_v0  ;;  %v13284_v31 = vld [vmem:[%s14415_s8 + $0xb74] sm:$0xf0]  ;;  %v9897_v0 = vor.u32 %v13220_v26, %v9896_v56  ;;  %v10025_v34 = vor.u32 %v13252_v58, %v10024_v28  ;;  %v9752_v35 = vld [vmem:[%s14415_s8 + $0x848] sm:$0xf]  ;;  %v7213_v45 = vpop.f32.mrf.mxu0 }
 0x291   : > { %7502 = vmatpush.bf16.msra.mxu3 %v10201_v12  ;;  %v13184_v36 = vld [vmem:[%s14415_s8 + $0x854] sm:$0xf0]  ;;  %v9880_v12 = vld [vmem:[%s14415_s8 + $0x948] sm:$0xf]  ;;  %v10153_v37 = vor.u32 %v13284_v31, %v10152_v30 }
 0x292   : > { %7464 = vmatpush.bf16.msra.mxu0 %v9801_v41  ;;  %v13216_v20 = vld [vmem:[%s14415_s8 + $0x954] sm:$0xf0]  ;;  %v10008_v33 = vld [vmem:[%s14415_s8 + $0xa48] sm:$0xf]  ;;  %v7238_v41 = vadd.f32 %v7237_v39, %v7225_v24  ;;  %v9753_v46 = vor.u32 %v13184_v36, %v9752_v35 }
 0x293   : > { %7477 = vmatpush.bf16.msra.mxu1 %v9929_v43  ;;  %v13248_v40 = vld [vmem:[%s14415_s8 + $0xa54] sm:$0xf0]  ;;  %v7250_v43 = vpop.f32.mrf.mxu3  ;;  %v9881_v52 = vor.u32 %v13216_v20, %v9880_v12  ;;  %v9736_v42 = vld [vmem:[%s14415_s8 + $0x828] sm:$0xf] }
 0x294   : > { %7490 = vmatpush.bf16.msra.mxu2 %v10057_v29  ;;  %v10136_v29 = vld [vmem:[%s14415_s8 + $0xb48] sm:$0xf]  ;;  %v13280_v44 = vld [vmem:[%s14415_s8 + $0xb54] sm:$0xf0]  ;;  %v15783_v51 = vadd.f32 %v7250_v43, %v7238_v41  ;;  %v10009_v53 = vor.u32 %v13248_v40, %v10008_v33 }
 0x295   : > { %7503 = vmatpush.bf16.msra.mxu3 %v10185_v7  ;;  %v7226_v7 = vpop.f32.mrf.mxu1  ;;  %v13180_v54 = vld [vmem:[%s14415_s8 + $0x834] sm:$0xf0]  ;;  %v9864_v55 = vld [vmem:[%s14415_s8 + $0x928] sm:$0xf]  ;;  %v10137_v57 = vor.u32 %v13280_v44, %v10136_v29 }
 0x296   : > { %7465 = vmatpush.bf16.msra.mxu0 %v9785_v38  ;;  %v13212_v38 = vld [vmem:[%s14415_s8 + $0x934] sm:$0xf0]  ;;  %v9992_v59 = vld [vmem:[%s14415_s8 + $0xa28] sm:$0xf]  ;;  %v9737_v6 = vor.u32 %v13180_v54, %v9736_v42  ;;  %v7239_v35 = vpop.f32.mrf.mxu2 }
 0x297   : > { %7478 = vmatpush.bf16.msra.mxu1 %v9913_v60  ;;  %v13244_v60 = vld [vmem:[%s14415_s8 + $0xa34] sm:$0xf0]  ;;  %v9720_v56 = vld [vmem:[%s14415_s8 + $0x808] sm:$0xf]  ;;  %v9865_v24 = vor.u32 %v13212_v38, %v9864_v55 }
 0x298   : > { %7491 = vmatpush.bf16.msra.mxu2 %v10041_v62  ;;  %v10120_v62 = vld [vmem:[%s14415_s8 + $0xb28] sm:$0xf]  ;;  %v13276_v63 = vld [vmem:[%s14415_s8 + $0xb34] sm:$0xf0]  ;;  %v9993_v26 = vor.u32 %v13244_v60, %v9992_v59 }
 0x299   : > { %7504 = vmatpush.bf16.msra.mxu3 %v10169_v11  ;;  %v13176_v11 = vld [vmem:[%s14415_s8 + $0x814] sm:$0xf0]  ;;  %v9848_v28 = vld [vmem:[%s14415_s8 + $0x908] sm:$0xf]  ;;  %v10121_v31 = vor.u32 %v13276_v63, %v10120_v62 }
 0x29a   : > { %7466 = vmatpush.bf16.msra.mxu0 %v9769_v32  ;;  %v13208_v58 = vld [vmem:[%s14415_s8 + $0x914] sm:$0xf0]  ;;  %v9976_v30 = vld [vmem:[%s14415_s8 + $0xa08] sm:$0xf]  ;;  %v9721_v20 = vor.u32 %v13176_v11, %v9720_v56 }
 0x29b   : > { %7479 = vmatpush.bf16.msra.mxu1 %v9897_v0  ;;  %v13240_v32 = vld [vmem:[%s14415_s8 + $0xa14] sm:$0xf0]  ;;  %v10104_v0 = vld [vmem:[%s14415_s8 + $0xb08] sm:$0xf]  ;;  %v7252_v39 = vpop.f32.mrf.mxu3  ;;  %v9849_v43 = vor.u32 %v13208_v58, %v9848_v28 }
 0x29c   : > { %7492 = vmatpush.bf16.msra.mxu2 %v10025_v34  ;;  %v13272_v34 = vld [vmem:[%s14415_s8 + $0xb14] sm:$0xf0]  ;;  %v10344_v36 = vld [vmem:[%s14415_s8 + $0xce8] sm:$0xf]  ;;  %v9977_v29 = vor.u32 %v13240_v32, %v9976_v30 }
 0x29d   : > { %7505 = vmatpush.bf16.msra.mxu3 %v10153_v37  ;;  %v13332_v12 = vld [vmem:[%s14415_s8 + $0xcf4] sm:$0xf0]  ;;  %v10472_v37 = vld [vmem:[%s14415_s8 + $0xde8] sm:$0xf] }
 0x29e   : > { %7467 = vmatpush.bf16.msra.mxu0 %v9753_v46  ;;  %v13364_v33 = vld [vmem:[%s14415_s8 + $0xdf4] sm:$0xf0]  ;;  %v10600_v40 = vld [vmem:[%s14415_s8 + $0xee8] sm:$0xf]  ;;  %v10105_v46 = vor.u32 %v13272_v34, %v10104_v0  ;;  %v10345_v7 = vor.u32 %v13332_v12, %v10344_v36 }
 0x29f   : > { %7480 = vmatpush.bf16.msra.mxu1 %v9881_v52  ;;  %v13396_v41 = vld [vmem:[%s14415_s8 + $0xef4] sm:$0xf0]  ;;  %v10728_v44 = vld [vmem:[%s14415_s8 + $0xfe8] sm:$0xf]  ;;  %v10473_v52 = vor.u32 %v13364_v33, %v10472_v37 }
 0x2a0   : > { %7493 = vmatpush.bf16.msra.mxu2 %v10009_v53  ;;  %v13428_v45 = vld [vmem:[%s14415_s8 + $0xff4] sm:$0xf0]  ;;  %v10601_v53 = vor.u32 %v13396_v41, %v10600_v40  ;;  %v10328_v42 = vld [vmem:[%s14415_s8 + $0xcc8] sm:$0xf] }
 0x2a1   : > { %7506 = vmatpush.bf16.msra.mxu3 %v10137_v57  ;;  %v13328_v54 = vld [vmem:[%s14415_s8 + $0xcd4] sm:$0xf0]  ;;  %v10456_v55 = vld [vmem:[%s14415_s8 + $0xdc8] sm:$0xf]  ;;  %v10729_v57 = vor.u32 %v13428_v45, %v10728_v44 }
 0x2a2   : > { %7468 = vmatpush.bf16.msra.mxu0 %v9737_v6  ;;  %v13360_v38 = vld [vmem:[%s14415_s8 + $0xdd4] sm:$0xf0]  ;;  %v10584_v59 = vld [vmem:[%s14415_s8 + $0xec8] sm:$0xf]  ;;  %v10329_v6 = vor.u32 %v13328_v54, %v10328_v42 }
 0x2a3   : > { %7481 = vmatpush.bf16.msra.mxu1 %v9865_v24  ;;  %v13392_v60 = vld [vmem:[%s14415_s8 + $0xed4] sm:$0xf0]  ;;  %v10712_v62 = vld [vmem:[%s14415_s8 + $0xfc8] sm:$0xf]  ;;  %v10457_v56 = vor.u32 %v13360_v38, %v10456_v55 }
 0x2a4   : > { %7494 = vmatpush.bf16.msra.mxu2 %v9993_v26  ;;  %v13424_v63 = vld [vmem:[%s14415_s8 + $0xfd4] sm:$0xf0]  ;;  %v10585_v11 = vor.u32 %v13392_v60, %v10584_v59  ;;  %v10312_v24 = vld [vmem:[%s14415_s8 + $0xca8] sm:$0xf] }
 0x2a5   : > { %7507 = vmatpush.bf16.msra.mxu3 %v10121_v31  ;;  %v13324_v26 = vld [vmem:[%s14415_s8 + $0xcb4] sm:$0xf0]  ;;  %v10440_v28 = vld [vmem:[%s14415_s8 + $0xda8] sm:$0xf]  ;;  %v10713_v58 = vor.u32 %v13424_v63, %v10712_v62 }
 0x2a6   : > { %7469 = vmatpush.bf16.msra.mxu0 %v9721_v20  ;;  %v13356_v30 = vld [vmem:[%s14415_s8 + $0xdb4] sm:$0xf0]  ;;  %v10568_v31 = vld [vmem:[%s14415_s8 + $0xea8] sm:$0xf]  ;;  %v10313_v35 = vor.u32 %v13324_v26, %v10312_v24 }
 0x2a7   : > { %7482 = vmatpush.bf16.msra.mxu1 %v9849_v43  ;;  %v13388_v32 = vld [vmem:[%s14415_s8 + $0xeb4] sm:$0xf0]  ;;  %v10696_v0 = vld [vmem:[%s14415_s8 + $0xfa8] sm:$0xf]  ;;  %v10441_v36 = vor.u32 %v13356_v30, %v10440_v28 }
 0x2a8   : > { %7495 = vmatpush.bf16.msra.mxu2 %v9977_v29  ;;  %v13420_v34 = vld [vmem:[%s14415_s8 + $0xfb4] sm:$0xf0]  ;;  %v10569_v12 = vor.u32 %v13388_v32, %v10568_v31  ;;  %v10296_v37 = vld [vmem:[%s14415_s8 + $0xc88] sm:$0xf] }
 0x2a9   : > { %7508 = vmatpush.bf16.msra.mxu3 %v10105_v46  ;;  %7470 = vmatmul.bf16.vlgmr.msra.gmra.mxu0 %v14669_v13  ;;  %v13320_v39 = vld [vmem:[%s14415_s8 + $0xc94] sm:$0xf0]  ;;  %v10424_v20 = vld [vmem:[%s14415_s8 + $0xd88] sm:$0xf]  ;;  %v10697_v33 = vor.u32 %v13420_v34, %v10696_v0  ;;  %v7263_v29 = vpop.f32.mrf.mxu0 }
 0x2aa   : > { %7514 = vmatpush.bf16.msrb.mxu0 %v10345_v7  ;;  %7483 = vmatmul.bf16.vlgmr.msra.gmra.mxu1 %v14675_v17  ;;  %v13352_v40 = vld [vmem:[%s14415_s8 + $0xd94] sm:$0xf0]  ;;  %v10552_v41 = vld [vmem:[%s14415_s8 + $0xe88] sm:$0xf]  ;;  %v7264_v46 = vadd.f32 %v7263_v29, %v15783_v51  ;;  %v10297_v7 = vor.u32 %v13320_v39, %v10296_v37 }
 0x2ab   : > { %7527 = vmatpush.bf16.msrb.mxu1 %v10473_v52  ;;  %7496 = vmatmul.bf16.vlgmr.msra.gmra.mxu2 %v14673_v16  ;;  %v13384_v43 = vld [vmem:[%s14415_s8 + $0xe94] sm:$0xf0]  ;;  %v10680_v44 = vld [vmem:[%s14415_s8 + $0xf88] sm:$0xf]  ;;  %v7276_v52 = vpop.f32.mrf.mxu1 }
 0x2ac   : > { %7540 = vmatpush.bf16.msrb.mxu2 %v10601_v53  ;;  %7509 = vmatmul.bf16.vlgmr.msra.gmra.mxu3 %v14677_v18  ;;  %v13416_v45 = vld [vmem:[%s14415_s8 + $0xf94] sm:$0xf0]  ;;  %v10425_v53 = vor.u32 %v13352_v40, %v10424_v20  ;;  %v10553_v42 = vor.u32 %v13384_v43, %v10552_v41  ;;  %v10280_v54 = vld [vmem:[%s14415_s8 + $0xc68] sm:$0xf]  ;;  %v7277_v59 = vadd.f32 %v7276_v52, %v7264_v46 }
 0x2ad   : > { %7553 = vmatpush.bf16.msrb.mxu3 %v10729_v57  ;;  %v13316_v55 = vld [vmem:[%s14415_s8 + $0xc74] sm:$0xf0]  ;;  %v10408_v57 = vld [vmem:[%s14415_s8 + $0xd68] sm:$0xf]  ;;  %v10681_v38 = vor.u32 %v13416_v45, %v10680_v44 }
 0x2ae   : > { %7515 = vmatpush.bf16.msrb.mxu0 %v10329_v6  ;;  %v13348_v60 = vld [vmem:[%s14415_s8 + $0xd74] sm:$0xf0]  ;;  %v10536_v62 = vld [vmem:[%s14415_s8 + $0xe68] sm:$0xf] }
 0x2af   : > { %7528 = vmatpush.bf16.msrb.mxu1 %v10457_v56  ;;  %v13380_v51 = vld [vmem:[%s14415_s8 + $0xe74] sm:$0xf0]  ;;  %v10664_v63 = vld [vmem:[%s14415_s8 + $0xf68] sm:$0xf]  ;;  %v10281_v56 = vor.u32 %v13316_v55, %v10280_v54 }
 0x2b0   : > { %7541 = vmatpush.bf16.msrb.mxu2 %v10585_v11  ;;  %v13412_v6 = vld [vmem:[%s14415_s8 + $0xf74] sm:$0xf0]  ;;  %v10409_v11 = vor.u32 %v13348_v60, %v10408_v57  ;;  %v10537_v24 = vor.u32 %v13380_v51, %v10536_v62  ;;  %v10264_v26 = vld [vmem:[%s14415_s8 + $0xc48] sm:$0xf]  ;;  %v7289_v31 = vpop.f32.mrf.mxu2 }
 0x2b1   : > { %7554 = vmatpush.bf16.msrb.mxu3 %v10713_v58  ;;  %v13312_v28 = vld [vmem:[%s14415_s8 + $0xc54] sm:$0xf0]  ;;  %v10392_v58 = vld [vmem:[%s14415_s8 + $0xd48] sm:$0xf]  ;;  %v10665_v30 = vor.u32 %v13412_v6, %v10664_v63  ;;  %v7265_v39 = vpop.f32.mrf.mxu0 }
 0x2b2   : > { %7516 = vmatpush.bf16.msrb.mxu0 %v10313_v35  ;;  %v13344_v32 = vld [vmem:[%s14415_s8 + $0xd54] sm:$0xf0]  ;;  %v10520_v0 = vld [vmem:[%s14415_s8 + $0xe48] sm:$0xf]  ;;  %v7290_v35 = vadd.f32 %v7289_v31, %v7277_v59  ;;  %v10265_v20 = vor.u32 %v13312_v28, %v10264_v26 }
 0x2b3   : > { %7529 = vmatpush.bf16.msrb.mxu1 %v10441_v36  ;;  %v13376_v34 = vld [vmem:[%s14415_s8 + $0xe54] sm:$0xf0]  ;;  %v7302_v36 = vpop.f32.mrf.mxu3  ;;  %v10393_v41 = vor.u32 %v13344_v32, %v10392_v58  ;;  %v10248_v29 = vld [vmem:[%s14415_s8 + $0xc28] sm:$0xf] }
 0x2b4   : > { %7542 = vmatpush.bf16.msrb.mxu2 %v10569_v12  ;;  %v10648_v12 = vld [vmem:[%s14415_s8 + $0xf48] sm:$0xf]  ;;  %v13408_v37 = vld [vmem:[%s14415_s8 + $0xf54] sm:$0xf0]  ;;  %v15854_v40 = vadd.f32 %v7302_v36, %v7290_v35  ;;  %v10521_v43 = vor.u32 %v13376_v34, %v10520_v0 }
 0x2b5   : > { %7555 = vmatpush.bf16.msrb.mxu3 %v10697_v33  ;;  %v7278_v33 = vpop.f32.mrf.mxu1  ;;  %v13308_v44 = vld [vmem:[%s14415_s8 + $0xc34] sm:$0xf0]  ;;  %v10376_v45 = vld [vmem:[%s14415_s8 + $0xd28] sm:$0xf]  ;;  %v10649_v46 = vor.u32 %v13408_v37, %v10648_v12 }
 0x2b6   : > { %7517 = vmatpush.bf16.msrb.mxu0 %v10297_v7  ;;  %v13340_v7 = vld [vmem:[%s14415_s8 + $0xd34] sm:$0xf0]  ;;  %v10504_v52 = vld [vmem:[%s14415_s8 + $0xe28] sm:$0xf]  ;;  %v10249_v55 = vor.u32 %v13308_v44, %v10248_v29 }
 0x2b7   : > { %7530 = vmatpush.bf16.msrb.mxu1 %v10425_v53  ;;  %v13372_v53 = vld [vmem:[%s14415_s8 + $0xe34] sm:$0xf0]  ;;  %v10232_v57 = vld [vmem:[%s14415_s8 + $0xc08] sm:$0xf]  ;;  %v10377_v59 = vor.u32 %v13340_v7, %v10376_v45 }
 0x2b8   : > { %7543 = vmatpush.bf16.msrb.mxu2 %v10553_v42  ;;  %v10632_v42 = vld [vmem:[%s14415_s8 + $0xf28] sm:$0xf]  ;;  %v13404_v54 = vld [vmem:[%s14415_s8 + $0xf34] sm:$0xf0]  ;;  %v10505_v60 = vor.u32 %v13372_v53, %v10504_v52  ;;  %v7291_v26 = vpop.f32.mrf.mxu2 }
 0x2b9   : > { %7556 = vmatpush.bf16.msrb.mxu3 %v10681_v38  ;;  %v13304_v38 = vld [vmem:[%s14415_s8 + $0xc14] sm:$0xf0]  ;;  %v10360_v62 = vld [vmem:[%s14415_s8 + $0xd08] sm:$0xf]  ;;  %v10633_v6 = vor.u32 %v13404_v54, %v10632_v42 }
 0x2ba   : > { %7518 = vmatpush.bf16.msrb.mxu0 %v10281_v56  ;;  %v13336_v51 = vld [vmem:[%s14415_s8 + $0xd14] sm:$0xf0]  ;;  %v10488_v63 = vld [vmem:[%s14415_s8 + $0xe08] sm:$0xf]  ;;  %v10233_v32 = vor.u32 %v13304_v38, %v10232_v57 }
 0x2bb   : > { %7531 = vmatpush.bf16.msrb.mxu1 %v10409_v11  ;;  %v13368_v56 = vld [vmem:[%s14415_s8 + $0xe14] sm:$0xf0]  ;;  %v10616_v11 = vld [vmem:[%s14415_s8 + $0xf08] sm:$0xf]  ;;  %v7304_v31 = vpop.f32.mrf.mxu3  ;;  %v10361_v36 = vor.u32 %v13336_v51, %v10360_v62 }
 0x2bc   : > { %7544 = vmatpush.bf16.msrb.mxu2 %v10537_v24  ;;  %v13400_v24 = vld [vmem:[%s14415_s8 + $0xf14] sm:$0xf0]  ;;  %v10856_v28 = vld [vmem:[%s14415_s8 + $0x10e8] sm:$0xf]  ;;  %v10489_v12 = vor.u32 %v13368_v56, %v10488_v63 }
 0x2bd   : > { %7557 = vmatpush.bf16.msrb.mxu3 %v10665_v30  ;;  %v13460_v58 = vld [vmem:[%s14415_s8 + $0x10f4] sm:$0xf0]  ;;  %v10984_v30 = vld [vmem:[%s14415_s8 + $0x11e8] sm:$0xf] }
 0x2be   : > { %7519 = vmatpush.bf16.msrb.mxu0 %v10265_v20  ;;  %v13492_v0 = vld [vmem:[%s14415_s8 + $0x11f4] sm:$0xf0]  ;;  %v11112_v34 = vld [vmem:[%s14415_s8 + $0x12e8] sm:$0xf]  ;;  %v10617_v20 = vor.u32 %v13400_v24, %v10616_v11  ;;  %v10857_v33 = vor.u32 %v13460_v58, %v10856_v28 }
 0x2bf   : > { %7532 = vmatpush.bf16.msrb.mxu1 %v10393_v41  ;;  %v13524_v35 = vld [vmem:[%s14415_s8 + $0x12f4] sm:$0xf0]  ;;  %v11240_v37 = vld [vmem:[%s14415_s8 + $0x13e8] sm:$0xf]  ;;  %v10985_v41 = vor.u32 %v13492_v0, %v10984_v30 }
 0x2c0   : > { %7545 = vmatpush.bf16.msrb.mxu2 %v10521_v43  ;;  %v13556_v39 = vld [vmem:[%s14415_s8 + $0x13f4] sm:$0xf0]  ;;  %v11113_v43 = vor.u32 %v13524_v35, %v11112_v34  ;;  %v10840_v29 = vld [vmem:[%s14415_s8 + $0x10c8] sm:$0xf] }
 0x2c1   : > { %7558 = vmatpush.bf16.msrb.mxu3 %v10649_v46  ;;  %v13456_v44 = vld [vmem:[%s14415_s8 + $0x10d4] sm:$0xf0]  ;;  %v10968_v45 = vld [vmem:[%s14415_s8 + $0x11c8] sm:$0xf]  ;;  %v11241_v46 = vor.u32 %v13556_v39, %v11240_v37 }
 0x2c2   : > { %7520 = vmatpush.bf16.msrb.mxu0 %v10249_v55  ;;  %v13488_v7 = vld [vmem:[%s14415_s8 + $0x11d4] sm:$0xf0]  ;;  %v11096_v52 = vld [vmem:[%s14415_s8 + $0x12c8] sm:$0xf]  ;;  %v10841_v55 = vor.u32 %v13456_v44, %v10840_v29 }
 0x2c3   : > { %7533 = vmatpush.bf16.msrb.mxu1 %v10377_v59  ;;  %v13520_v53 = vld [vmem:[%s14415_s8 + $0x12d4] sm:$0xf0]  ;;  %v11224_v42 = vld [vmem:[%s14415_s8 + $0x13c8] sm:$0xf]  ;;  %v10969_v57 = vor.u32 %v13488_v7, %v10968_v45 }
 0x2c4   : > { %7546 = vmatpush.bf16.msrb.mxu2 %v10505_v60  ;;  %v13552_v54 = vld [vmem:[%s14415_s8 + $0x13d4] sm:$0xf0]  ;;  %v11097_v38 = vor.u32 %v13520_v53, %v11096_v52  ;;  %v10824_v59 = vld [vmem:[%s14415_s8 + $0x10a8] sm:$0xf] }
 0x2c5   : > { %7559 = vmatpush.bf16.msrb.mxu3 %v10633_v6  ;;  %v13452_v60 = vld [vmem:[%s14415_s8 + $0x10b4] sm:$0xf0]  ;;  %v10952_v62 = vld [vmem:[%s14415_s8 + $0x11a8] sm:$0xf]  ;;  %v11225_v51 = vor.u32 %v13552_v54, %v11224_v42 }
 0x2c6   : > { %7521 = vmatpush.bf16.msrb.mxu0 %v10233_v32  ;;  %v13484_v63 = vld [vmem:[%s14415_s8 + $0x11b4] sm:$0xf0]  ;;  %v11080_v6 = vld [vmem:[%s14415_s8 + $0x12a8] sm:$0xf]  ;;  %v10825_v26 = vor.u32 %v13452_v60, %v10824_v59 }
 0x2c7   : > { %7534 = vmatpush.bf16.msrb.mxu1 %v10361_v36  ;;  %v13516_v56 = vld [vmem:[%s14415_s8 + $0x12b4] sm:$0xf0]  ;;  %v11208_v11 = vld [vmem:[%s14415_s8 + $0x13a8] sm:$0xf]  ;;  %v10953_v28 = vor.u32 %v13484_v63, %v10952_v62 }
 0x2c8   : > { %7547 = vmatpush.bf16.msrb.mxu2 %v10489_v12  ;;  %v13548_v24 = vld [vmem:[%s14415_s8 + $0x13b4] sm:$0xf0]  ;;  %v11081_v58 = vor.u32 %v13516_v56, %v11080_v6  ;;  %v10808_v30 = vld [vmem:[%s14415_s8 + $0x1088] sm:$0xf]  ;;  %v7315_v12 = vpop.f32.mrf.mxu0 }
 0x2c9   : > { %7560 = vmatpush.bf16.msrb.mxu3 %v10617_v20  ;;  %7522 = vmatmul.bf16.vlgmr.msrb.gmra.mxu0 %v14735_v47  ;;  %v13448_v31 = vld [vmem:[%s14415_s8 + $0x1094] sm:$0xf0]  ;;  %v10936_v32 = vld [vmem:[%s14415_s8 + $0x1188] sm:$0xf]  ;;  %v11209_v0 = vor.u32 %v13548_v24, %v11208_v11  ;;  %v7316_v20 = vadd.f32 %v7315_v12, %v15854_v40 }
 0x2ca   : > { %7566 = vmatpush.bf16.msra.mxu0 %v10857_v33  ;;  %7535 = vmatmul.bf16.vlgmr.msrb.gmra.mxu1 %v14739_v49  ;;  %v13480_v34 = vld [vmem:[%s14415_s8 + $0x1194] sm:$0xf0]  ;;  %v11064_v35 = vld [vmem:[%s14415_s8 + $0x1288] sm:$0xf]  ;;  %v10809_v33 = vor.u32 %v13448_v31, %v10808_v30 }
 0x2cb   : > { %7579 = vmatpush.bf16.msra.mxu1 %v10985_v41  ;;  %7548 = vmatmul.bf16.vlgmr.msrb.gmra.mxu2 %v14737_v48  ;;  %v13512_v36 = vld [vmem:[%s14415_s8 + $0x1294] sm:$0xf0]  ;;  %v11192_v37 = vld [vmem:[%s14415_s8 + $0x1388] sm:$0xf]  ;;  %v7328_v41 = vpop.f32.mrf.mxu1 }
 0x2cc   : > { %7592 = vmatpush.bf16.msra.mxu2 %v11113_v43  ;;  %7561 = vmatmul.bf16.vlgmr.msrb.gmra.mxu3 %v14741_v50  ;;  %v13544_v39 = vld [vmem:[%s14415_s8 + $0x1394] sm:$0xf0]  ;;  %v10937_v43 = vor.u32 %v13480_v34, %v10936_v32  ;;  %v11065_v29 = vor.u32 %v13512_v36, %v11064_v35  ;;  %v10792_v44 = vld [vmem:[%s14415_s8 + $0x1068] sm:$0xf]  ;;  %v7329_v52 = vadd.f32 %v7328_v41, %v7316_v20 }
 0x2cd   : > { %7605 = vmatpush.bf16.msra.mxu3 %v11241_v46  ;;  %v13444_v45 = vld [vmem:[%s14415_s8 + $0x1074] sm:$0xf0]  ;;  %v10920_v46 = vld [vmem:[%s14415_s8 + $0x1168] sm:$0xf]  ;;  %v11193_v7 = vor.u32 %v13544_v39, %v11192_v37 }
 0x2ce   : > { %7567 = vmatpush.bf16.msra.mxu0 %v10841_v55  ;;  %v13476_v53 = vld [vmem:[%s14415_s8 + $0x1174] sm:$0xf0]  ;;  %v11048_v42 = vld [vmem:[%s14415_s8 + $0x1268] sm:$0xf]  ;;  %v7341_v6 = vpop.f32.mrf.mxu2 }
 0x2cf   : > { %7580 = vmatpush.bf16.msra.mxu1 %v10969_v57  ;;  %v13508_v40 = vld [vmem:[%s14415_s8 + $0x1274] sm:$0xf0]  ;;  %v11176_v54 = vld [vmem:[%s14415_s8 + $0x1368] sm:$0xf]  ;;  %v10793_v57 = vor.u32 %v13444_v45, %v10792_v44 }
 0x2d0   : > { %7593 = vmatpush.bf16.msra.mxu2 %v11097_v38  ;;  %v13540_v55 = vld [vmem:[%s14415_s8 + $0x1374] sm:$0xf0]  ;;  %v10921_v38 = vor.u32 %v13476_v53, %v10920_v46  ;;  %v11049_v59 = vor.u32 %v13508_v40, %v11048_v42  ;;  %v10776_v60 = vld [vmem:[%s14415_s8 + $0x1048] sm:$0xf]  ;;  %v7317_v31 = vpop.f32.mrf.mxu0 }
 0x2d1   : > { %7606 = vmatpush.bf16.msra.mxu3 %v11225_v51  ;;  %v13440_v62 = vld [vmem:[%s14415_s8 + $0x1054] sm:$0xf0]  ;;  %v10904_v51 = vld [vmem:[%s14415_s8 + $0x1148] sm:$0xf]  ;;  %v11177_v63 = vor.u32 %v13540_v55, %v11176_v54 }
 0x2d2   : > { %7568 = vmatpush.bf16.msra.mxu0 %v10825_v26  ;;  %v13472_v56 = vld [vmem:[%s14415_s8 + $0x1154] sm:$0xf0]  ;;  %v11032_v11 = vld [vmem:[%s14415_s8 + $0x1248] sm:$0xf]  ;;  %v7342_v26 = vadd.f32 %v7341_v6, %v7329_v52  ;;  %v10777_v32 = vor.u32 %v13440_v62, %v10776_v60 }
 0x2d3   : > { %7581 = vmatpush.bf16.msra.mxu1 %v10953_v28  ;;  %v13504_v24 = vld [vmem:[%s14415_s8 + $0x1254] sm:$0xf0]  ;;  %v7354_v28 = vpop.f32.mrf.mxu3  ;;  %v10905_v35 = vor.u32 %v13472_v56, %v10904_v51  ;;  %v10760_v12 = vld [vmem:[%s14415_s8 + $0x1028] sm:$0xf] }
 0x2d4   : > { %7594 = vmatpush.bf16.msra.mxu2 %v11081_v58  ;;  %v11160_v58 = vld [vmem:[%s14415_s8 + $0x1348] sm:$0xf]  ;;  %v13536_v30 = vld [vmem:[%s14415_s8 + $0x1354] sm:$0xf0]  ;;  %v7355_v34 = vadd.f32 %v7354_v28, %v7342_v26  ;;  %v11033_v36 = vor.u32 %v13504_v24, %v11032_v11 }
 0x2d5   : > { %7607 = vmatpush.bf16.msra.mxu3 %v11209_v0  ;;  %v7330_v0 = vpop.f32.mrf.mxu1  ;;  %v13436_v37 = vld [vmem:[%s14415_s8 + $0x1034] sm:$0xf0]  ;;  %v10888_v39 = vld [vmem:[%s14415_s8 + $0x1128] sm:$0xf]  ;;  %v11161_v20 = vor.u32 %v13536_v30, %v11160_v58 }
 0x2d6   : > { %7569 = vmatpush.bf16.msra.mxu0 %v10809_v33  ;;  %v13468_v33 = vld [vmem:[%s14415_s8 + $0x1134] sm:$0xf0]  ;;  %v11016_v41 = vld [vmem:[%s14415_s8 + $0x1228] sm:$0xf]  ;;  %v10761_v46 = vor.u32 %v13436_v37, %v10760_v12 }
 0x2d7   : > { %7582 = vmatpush.bf16.msra.mxu1 %v10937_v43  ;;  %v13500_v43 = vld [vmem:[%s14415_s8 + $0x1234] sm:$0xf0]  ;;  %v11144_v44 = vld [vmem:[%s14415_s8 + $0x1328] sm:$0xf]  ;;  %v10889_v42 = vor.u32 %v13468_v33, %v10888_v39 }
 0x2d8   : > { %7595 = vmatpush.bf16.msra.mxu2 %v11065_v29  ;;  %v8194_v29 = vrot.slane %v7355_v34, 6  ;;  %v13532_v45 = vld [vmem:[%s14415_s8 + $0x1334] sm:$0xf0]  ;;  %v11017_v40 = vor.u32 %v13500_v43, %v11016_v41  ;;  %v10872_v54 = vld [vmem:[%s14415_s8 + $0x1108] sm:$0xf] }
 0x2d9   : > { %7608 = vmatpush.bf16.msra.mxu3 %v11193_v7  ;;  %v10744_v7 = vld [vmem:[%s14415_s8 + $0x1008] sm:$0xf]  ;;  %v13432_v52 = vld [vmem:[%s14415_s8 + $0x1014] sm:$0xf0] }
 0x2da   : > { %7570 = vmatpush.bf16.msra.mxu0 %v10793_v57  ;;  %v15937_v53 = vsel %vm8197_vm0, %v15366_v25, %v8194_v29  ;;  %v13464_v55 = vld [vmem:[%s14415_s8 + $0x1114] sm:$0xf0]  ;;  %v11000_v57 = vld [vmem:[%s14415_s8 + $0x1208] sm:$0xf]  ;;  %v7343_v25 = vpop.f32.mrf.mxu2  ;;  %v10745_v11 = vor.u32 %v13432_v52, %v10744_v7 }
 0x2db   : > { %7583 = vmatpush.bf16.msra.mxu1 %v10921_v38  ;;  %v11145_v38 = vor.u32 %v13532_v45, %v11144_v44  ;;  %v11128_v60 = vld [vmem:[%s14415_s8 + $0x1308] sm:$0xf]  ;;  %v13528_v62 = vld [vmem:[%s14415_s8 + $0x1314] sm:$0xf0]  ;;  %v7356_v56 = vpop.f32.mrf.mxu3  ;;  %v10873_v58 = vor.u32 %v13464_v55, %v10872_v54 }
 0x2dc   : > { %7596 = vmatpush.bf16.msra.mxu2 %v11049_v59  ;;  %v13496_v59 = vld [vmem:[%s14415_s8 + $0x1214] sm:$0xf0]  ;;  %v11368_v51 = vld [vmem:[%s14415_s8 + $0x14e8] sm:$0xf]  ;;  %v11129_v0 = vor.u32 %v13528_v62, %v11128_v60 }
 0x2dd   : > { %7609 = vmatpush.bf16.msra.mxu3 %v11177_v63  ;;  %v13588_v63 = vld [vmem:[%s14415_s8 + $0x14f4] sm:$0xf0]  ;;  %v11496_v6 = vld [vmem:[%s14415_s8 + $0x15e8] sm:$0xf]  ;;  %v11001_v30 = vor.u32 %v13496_v59, %v11000_v57 }
 0x2de   : > { %7571 = vmatpush.bf16.msra.mxu0 %v10777_v32  ;;  %v13620_v24 = vld [vmem:[%s14415_s8 + $0x15f4] sm:$0xf0]  ;;  %v11624_v26 = vld [vmem:[%s14415_s8 + $0x16e8] sm:$0xf]  ;;  %v11369_v34 = vor.u32 %v13588_v63, %v11368_v51 }
 0x2df   : > { %7584 = vmatpush.bf16.msra.mxu1 %v10905_v35  ;;  %v13652_v28 = vld [vmem:[%s14415_s8 + $0x16f4] sm:$0xf0]  ;;  %v11752_v31 = vld [vmem:[%s14415_s8 + $0x17e8] sm:$0xf]  ;;  %v11497_v35 = vor.u32 %v13620_v24, %v11496_v6 }
 0x2e0   : > { %7597 = vmatpush.bf16.msra.mxu2 %v11033_v36  ;;  %v13684_v32 = vld [vmem:[%s14415_s8 + $0x17f4] sm:$0xf0]  ;;  %v11625_v36 = vor.u32 %v13652_v28, %v11624_v26  ;;  %v11352_v12 = vld [vmem:[%s14415_s8 + $0x14c8] sm:$0xf] }
 0x2e1   : > { %7610 = vmatpush.bf16.msra.mxu3 %v11161_v20  ;;  %v13584_v37 = vld [vmem:[%s14415_s8 + $0x14d4] sm:$0xf0]  ;;  %v11480_v39 = vld [vmem:[%s14415_s8 + $0x15c8] sm:$0xf]  ;;  %v11753_v20 = vor.u32 %v13684_v32, %v11752_v31 }
 0x2e2   : > { %7572 = vmatpush.bf16.msra.mxu0 %v10761_v46  ;;  %v13616_v33 = vld [vmem:[%s14415_s8 + $0x15d4] sm:$0xf0]  ;;  %v11608_v41 = vld [vmem:[%s14415_s8 + $0x16c8] sm:$0xf]  ;;  %v11353_v45 = vor.u32 %v13584_v37, %v11352_v12 }
 0x2e3   : > { %7585 = vmatpush.bf16.msra.mxu1 %v10889_v42  ;;  %v13648_v43 = vld [vmem:[%s14415_s8 + $0x16d4] sm:$0xf0]  ;;  %v11736_v29 = vld [vmem:[%s14415_s8 + $0x17c8] sm:$0xf]  ;;  %v11481_v46 = vor.u32 %v13616_v33, %v11480_v39 }
 0x2e4   : > { %7598 = vmatpush.bf16.msra.mxu2 %v11017_v40  ;;  %v13680_v44 = vld [vmem:[%s14415_s8 + $0x17d4] sm:$0xf0]  ;;  %v11609_v7 = vor.u32 %v13648_v43, %v11608_v41  ;;  %v11336_v52 = vld [vmem:[%s14415_s8 + $0x14a8] sm:$0xf] }
 0x2e5   : > { %7611 = vmatpush.bf16.msra.mxu3 %v11145_v38  ;;  %v13580_v42 = vld [vmem:[%s14415_s8 + $0x14b4] sm:$0xf0]  ;;  %v11464_v40 = vld [vmem:[%s14415_s8 + $0x15a8] sm:$0xf]  ;;  %v11737_v54 = vor.u32 %v13680_v44, %v11736_v29 }
 0x2e6   : > { %7573 = vmatpush.bf16.msra.mxu0 %v10745_v11  ;;  %v13612_v55 = vld [vmem:[%s14415_s8 + $0x15b4] sm:$0xf0]  ;;  %v11592_v57 = vld [vmem:[%s14415_s8 + $0x16a8] sm:$0xf]  ;;  %v11337_v62 = vor.u32 %v13580_v42, %v11336_v52  ;;  %v7367_v32 = vpop.f32.mrf.mxu0 }
 0x2e7   : > { %7586 = vmatpush.bf16.msra.mxu1 %v10873_v58  ;;  %v13644_v38 = vld [vmem:[%s14415_s8 + $0x16b4] sm:$0xf0]  ;;  %v11720_v59 = vld [vmem:[%s14415_s8 + $0x17a8] sm:$0xf]  ;;  %v11465_v25 = vor.u32 %v13612_v55, %v11464_v40  ;;  %v7380_v37 = vpop.f32.mrf.mxu1 }
 0x2e8   : > { %7599 = vmatpush.bf16.msra.mxu2 %v11001_v30  ;;  %v13676_v60 = vld [vmem:[%s14415_s8 + $0x17b4] sm:$0xf0]  ;;  %v11593_v51 = vor.u32 %v13644_v38, %v11592_v57  ;;  %v11320_v63 = vld [vmem:[%s14415_s8 + $0x1488] sm:$0xf]  ;;  %v7381_v43 = vadd.f32 %v7380_v37, %v7367_v32 }
 0x2e9   : > { %7612 = vmatpush.bf16.msra.mxu3 %v11129_v0  ;;  %7574 = vmatmul.bf16.vlgmr.msra.gmra.mxu0 %v14822_v10  ;;  %v13576_v6 = vld [vmem:[%s14415_s8 + $0x1494] sm:$0xf0]  ;;  %v11448_v56 = vld [vmem:[%s14415_s8 + $0x1588] sm:$0xf]  ;;  %v11721_v11 = vor.u32 %v13676_v60, %v11720_v59 }
 0x2ea   : > { %7618 = vmatpush.bf16.msrb.mxu0 %v11369_v34  ;;  %7587 = vmatmul.bf16.vlgmr.msra.gmra.mxu1 %v14828_v15  ;;  %v13608_v24 = vld [vmem:[%s14415_s8 + $0x1594] sm:$0xf0]  ;;  %v11576_v26 = vld [vmem:[%s14415_s8 + $0x1688] sm:$0xf]  ;;  %v11321_v31 = vor.u32 %v13576_v6, %v11320_v63 }
 0x2eb   : > { %7631 = vmatpush.bf16.msrb.mxu1 %v11497_v35  ;;  %7600 = vmatmul.bf16.vlgmr.msra.gmra.mxu2 %v14826_v14  ;;  %v13640_v28 = vld [vmem:[%s14415_s8 + $0x1694] sm:$0xf0]  ;;  %v11704_v58 = vld [vmem:[%s14415_s8 + $0x1788] sm:$0xf]  ;;  %v11449_v0 = vor.u32 %v13608_v24, %v11448_v56 }
 0x2ec   : > { %7644 = vmatpush.bf16.msrb.mxu2 %v11625_v36  ;;  %7613 = vmatmul.bf16.vlgmr.msra.gmra.mxu3 %v14830_v19  ;;  %v13672_v30 = vld [vmem:[%s14415_s8 + $0x1794] sm:$0xf0]  ;;  %v11577_v34 = vor.u32 %v13640_v28, %v11576_v26  ;;  %v11304_v35 = vld [vmem:[%s14415_s8 + $0x1468] sm:$0xf] }
 0x2ed   : > { %7657 = vmatpush.bf16.msrb.mxu3 %v11753_v20  ;;  %v13572_v36 = vld [vmem:[%s14415_s8 + $0x1474] sm:$0xf0]  ;;  %v11432_v12 = vld [vmem:[%s14415_s8 + $0x1568] sm:$0xf]  ;;  %v11705_v39 = vor.u32 %v13672_v30, %v11704_v58 }
 0x2ee   : > { %7619 = vmatpush.bf16.msrb.mxu0 %v11353_v45  ;;  %v13604_v20 = vld [vmem:[%s14415_s8 + $0x1574] sm:$0xf0]  ;;  %v11560_v33 = vld [vmem:[%s14415_s8 + $0x1668] sm:$0xf]  ;;  %v11305_v45 = vor.u32 %v13572_v36, %v11304_v35  ;;  %v7369_v56 = vpop.f32.mrf.mxu0 }
 0x2ef   : > { %7632 = vmatpush.bf16.msrb.mxu1 %v11481_v46  ;;  %v13636_v41 = vld [vmem:[%s14415_s8 + $0x1674] sm:$0xf0]  ;;  %v11688_v29 = vld [vmem:[%s14415_s8 + $0x1768] sm:$0xf]  ;;  %v11433_v46 = vor.u32 %v13604_v20, %v11432_v12  ;;  %v7382_v30 = vpop.f32.mrf.mxu1 }
 0x2f0   : > { %7645 = vmatpush.bf16.msrb.mxu2 %v11609_v7  ;;  %v13668_v44 = vld [vmem:[%s14415_s8 + $0x1774] sm:$0xf0]  ;;  %v11561_v7 = vor.u32 %v13636_v41, %v11560_v33  ;;  %v11288_v52 = vld [vmem:[%s14415_s8 + $0x1448] sm:$0xf] }
 0x2f1   : > { %7658 = vmatpush.bf16.msrb.mxu3 %v11737_v54  ;;  %v13568_v42 = vld [vmem:[%s14415_s8 + $0x1454] sm:$0xf0]  ;;  %v11416_v40 = vld [vmem:[%s14415_s8 + $0x1548] sm:$0xf]  ;;  %v7393_v54 = vpop.f32.mrf.mxu2  ;;  %v11689_v55 = vor.u32 %v13668_v44, %v11688_v29 }
 0x2f2   : > { %7620 = vmatpush.bf16.msrb.mxu0 %v11337_v62  ;;  %v13600_v57 = vld [vmem:[%s14415_s8 + $0x1554] sm:$0xf0]  ;;  %v11544_v38 = vld [vmem:[%s14415_s8 + $0x1648] sm:$0xf]  ;;  %v7394_v60 = vadd.f32 %v7393_v54, %v7381_v43  ;;  %v7406_v62 = vpop.f32.mrf.mxu3  ;;  %v11289_v63 = vor.u32 %v13568_v42, %v11288_v52 }
 0x2f3   : > { %7633 = vmatpush.bf16.msrb.mxu1 %v11465_v25  ;;  %v13632_v59 = vld [vmem:[%s14415_s8 + $0x1654] sm:$0xf0]  ;;  %v11672_v25 = vld [vmem:[%s14415_s8 + $0x1748] sm:$0xf] }
 0x2f4   : > { %7646 = vmatpush.bf16.msrb.mxu2 %v11593_v51  ;;  %v13664_v51 = vld [vmem:[%s14415_s8 + $0x1754] sm:$0xf0]  ;;  %v15997_v6 = vadd.f32 %v7406_v62, %v7394_v60  ;;  %v11545_v24 = vor.u32 %v13632_v59, %v11544_v38  ;;  %v11272_v26 = vld [vmem:[%s14415_s8 + $0x1428] sm:$0xf] }
 0x2f5   : > { %7659 = vmatpush.bf16.msrb.mxu3 %v11721_v11  ;;  %v11417_v11 = vor.u32 %v13600_v57, %v11416_v40  ;;  %v13564_v28 = vld [vmem:[%s14415_s8 + $0x1434] sm:$0xf0]  ;;  %v11400_v58 = vld [vmem:[%s14415_s8 + $0x1528] sm:$0xf] }
 0x2f6   : > { %7621 = vmatpush.bf16.msrb.mxu0 %v11321_v31  ;;  %v11673_v31 = vor.u32 %v13664_v51, %v11672_v25  ;;  %v13596_v32 = vld [vmem:[%s14415_s8 + $0x1534] sm:$0xf0]  ;;  %v11656_v35 = vld [vmem:[%s14415_s8 + $0x1728] sm:$0xf]  ;;  %v11273_v12 = vor.u32 %v13564_v28, %v11272_v26 }
 0x2f7   : > { %7634 = vmatpush.bf16.msrb.mxu1 %v11449_v0  ;;  %v11528_v0 = vld [vmem:[%s14415_s8 + $0x1628] sm:$0xf]  ;;  %v13660_v36 = vld [vmem:[%s14415_s8 + $0x1734] sm:$0xf0]  ;;  %v11401_v20 = vor.u32 %v13596_v32, %v11400_v58 }
 0x2f8   : > { %7647 = vmatpush.bf16.msrb.mxu2 %v11577_v34  ;;  %v13628_v34 = vld [vmem:[%s14415_s8 + $0x1634] sm:$0xf0]  ;;  %v11256_v37 = vld [vmem:[%s14415_s8 + $0x1408] sm:$0xf] }
 0x2f9   : > { %7660 = vmatpush.bf16.msrb.mxu3 %v11705_v39  ;;  %v13560_v39 = vld [vmem:[%s14415_s8 + $0x1414] sm:$0xf0]  ;;  %v11529_v33 = vor.u32 %v13628_v34, %v11528_v0  ;;  %v11384_v41 = vld [vmem:[%s14415_s8 + $0x1508] sm:$0xf]  ;;  %v7395_v44 = vpop.f32.mrf.mxu2 }
 0x2fa   : > { %7622 = vmatpush.bf16.msrb.mxu0 %v11305_v45  ;;  %v13592_v43 = vld [vmem:[%s14415_s8 + $0x1514] sm:$0xf0]  ;;  %v11512_v29 = vld [vmem:[%s14415_s8 + $0x1608] sm:$0xf]  ;;  %v11657_v45 = vor.u32 %v13660_v36, %v11656_v35  ;;  %v7408_v42 = vpop.f32.mrf.mxu3  ;;  %v11257_v57 = vor.u32 %v13560_v39, %v11256_v37 }
 0x2fb   : > { %7635 = vmatpush.bf16.msrb.mxu1 %v11433_v46  ;;  %v13624_v46 = vld [vmem:[%s14415_s8 + $0x1614] sm:$0xf0]  ;;  %v11880_v40 = vld [vmem:[%s14415_s8 + $0x18e8] sm:$0xf]  ;;  %v11385_v62 = vor.u32 %v13592_v43, %v11384_v41 }
 0x2fc   : > { %7648 = vmatpush.bf16.msrb.mxu2 %v11561_v7  ;;  %v11640_v7 = vld [vmem:[%s14415_s8 + $0x1708] sm:$0xf]  ;;  %v13656_v52 = vld [vmem:[%s14415_s8 + $0x1714] sm:$0xf0]  ;;  %v11513_v25 = vor.u32 %v13624_v46, %v11512_v29 }
 0x2fd   : > { %7661 = vmatpush.bf16.msrb.mxu3 %v11689_v55  ;;  %v13716_v54 = vld [vmem:[%s14415_s8 + $0x18f4] sm:$0xf0]  ;;  %v12008_v55 = vld [vmem:[%s14415_s8 + $0x19e8] sm:$0xf]  ;;  %v11641_v56 = vor.u32 %v13656_v52, %v11640_v7 }
 0x2fe   : > { %7623 = vmatpush.bf16.msrb.mxu0 %v11289_v63  ;;  %v13748_v38 = vld [vmem:[%s14415_s8 + $0x19f4] sm:$0xf0]  ;;  %v12136_v59 = vld [vmem:[%s14415_s8 + $0x1ae8] sm:$0xf] }
 0x2ff   : > { %7636 = vmatpush.bf16.msrb.mxu1 %v11417_v11  ;;  %v13780_v60 = vld [vmem:[%s14415_s8 + $0x1af4] sm:$0xf0]  ;;  %v12264_v51 = vld [vmem:[%s14415_s8 + $0x1be8] sm:$0xf]  ;;  %v11881_v11 = vor.u32 %v13716_v54, %v11880_v40 }
 0x300   : > { %7649 = vmatpush.bf16.msrb.mxu2 %v11545_v24  ;;  %v13812_v63 = vld [vmem:[%s14415_s8 + $0x1bf4] sm:$0xf0]  ;;  %v12009_v24 = vor.u32 %v13748_v38, %v12008_v55  ;;  %v12137_v26 = vor.u32 %v13780_v60, %v12136_v59  ;;  %v11864_v28 = vld [vmem:[%s14415_s8 + $0x18c8] sm:$0xf] }
 0x301   : > { %7662 = vmatpush.bf16.msrb.mxu3 %v11673_v31  ;;  %v13712_v58 = vld [vmem:[%s14415_s8 + $0x18d4] sm:$0xf0]  ;;  %v11992_v30 = vld [vmem:[%s14415_s8 + $0x19c8] sm:$0xf]  ;;  %v12265_v31 = vor.u32 %v13812_v63, %v12264_v51 }
 0x302   : > { %7624 = vmatpush.bf16.msrb.mxu0 %v11273_v12  ;;  %v13744_v32 = vld [vmem:[%s14415_s8 + $0x19d4] sm:$0xf0]  ;;  %v12120_v0 = vld [vmem:[%s14415_s8 + $0x1ac8] sm:$0xf]  ;;  %v11865_v12 = vor.u32 %v13712_v58, %v11864_v28 }
 0x303   : > { %7637 = vmatpush.bf16.msrb.mxu1 %v11401_v20  ;;  %v13776_v34 = vld [vmem:[%s14415_s8 + $0x1ad4] sm:$0xf0]  ;;  %v12248_v35 = vld [vmem:[%s14415_s8 + $0x1bc8] sm:$0xf]  ;;  %v11993_v37 = vor.u32 %v13744_v32, %v11992_v30 }
 0x304   : > { %7650 = vmatpush.bf16.msrb.mxu2 %v11529_v33  ;;  %v13808_v36 = vld [vmem:[%s14415_s8 + $0x1bd4] sm:$0xf0]  ;;  %v12121_v39 = vor.u32 %v13776_v34, %v12120_v0  ;;  %v11848_v20 = vld [vmem:[%s14415_s8 + $0x18a8] sm:$0xf] }
 0x305   : > { %7663 = vmatpush.bf16.msrb.mxu3 %v11657_v45  ;;  %v13708_v33 = vld [vmem:[%s14415_s8 + $0x18b4] sm:$0xf0]  ;;  %v11976_v41 = vld [vmem:[%s14415_s8 + $0x19a8] sm:$0xf]  ;;  %v12249_v43 = vor.u32 %v13808_v36, %v12248_v35 }
 0x306   : > { %7625 = vmatpush.bf16.msrb.mxu0 %v11257_v57  ;;  %v13740_v29 = vld [vmem:[%s14415_s8 + $0x19b4] sm:$0xf0]  ;;  %v12104_v44 = vld [vmem:[%s14415_s8 + $0x1aa8] sm:$0xf]  ;;  %v11849_v52 = vor.u32 %v13708_v33, %v11848_v20 }
 0x307   : > { %7638 = vmatpush.bf16.msrb.mxu1 %v11385_v62  ;;  %v13772_v45 = vld [vmem:[%s14415_s8 + $0x1ab4] sm:$0xf0]  ;;  %v12232_v46 = vld [vmem:[%s14415_s8 + $0x1ba8] sm:$0xf]  ;;  %v11977_v42 = vor.u32 %v13740_v29, %v11976_v41 }
 0x308   : > { %7651 = vmatpush.bf16.msrb.mxu2 %v11513_v25  ;;  %v13804_v7 = vld [vmem:[%s14415_s8 + $0x1bb4] sm:$0xf0]  ;;  %v12105_v40 = vor.u32 %v13772_v45, %v12104_v44  ;;  %v11832_v54 = vld [vmem:[%s14415_s8 + $0x1888] sm:$0xf] }
 0x309   : > { %7664 = vmatpush.bf16.msrb.mxu3 %v11641_v56  ;;  %7626 = vmatmul.bf16.vlgmr.msrb.gmra.mxu0 %v14888_v4  ;;  %v13704_v55 = vld [vmem:[%s14415_s8 + $0x1894] sm:$0xf0]  ;;  %v11960_v57 = vld [vmem:[%s14415_s8 + $0x1988] sm:$0xf]  ;;  %v12233_v38 = vor.u32 %v13804_v7, %v12232_v46  ;;  %v7419_v56 = vpop.f32.mrf.mxu0 }
 0x30a   : > { %7670 = vmatpush.bf16.msra.mxu0 %v11881_v11  ;;  %7639 = vmatmul.bf16.vlgmr.msrb.gmra.mxu1 %v14892_v8  ;;  %v13736_v59 = vld [vmem:[%s14415_s8 + $0x1994] sm:$0xf0]  ;;  %v12088_v60 = vld [vmem:[%s14415_s8 + $0x1a88] sm:$0xf]  ;;  %v11833_v63 = vor.u32 %v13704_v55, %v11832_v54  ;;  %v7420_v30 = vadd.f32 %v7419_v56, %v15997_v6 }
 0x30b   : > { %7683 = vmatpush.bf16.msra.mxu1 %v12009_v24  ;;  %7652 = vmatmul.bf16.vlgmr.msrb.gmra.mxu2 %v14890_v5  ;;  %v13768_v62 = vld [vmem:[%s14415_s8 + $0x1a94] sm:$0xf0]  ;;  %v12216_v25 = vld [vmem:[%s14415_s8 + $0x1b88] sm:$0xf]  ;;  %v11961_v11 = vor.u32 %v13736_v59, %v11960_v57 }
 0x30c   : > { %7696 = vmatpush.bf16.msra.mxu2 %v12137_v26  ;;  %7665 = vmatmul.bf16.vlgmr.msrb.gmra.mxu3 %v14894_v9  ;;  %v13800_v51 = vld [vmem:[%s14415_s8 + $0x1b94] sm:$0xf0]  ;;  %v12089_v24 = vor.u32 %v13768_v62, %v12088_v60  ;;  %v11816_v26 = vld [vmem:[%s14415_s8 + $0x1868] sm:$0xf] }
 0x30d   : > { %7709 = vmatpush.bf16.msra.mxu3 %v12265_v31  ;;  %v13700_v28 = vld [vmem:[%s14415_s8 + $0x1874] sm:$0xf0]  ;;  %v11944_v58 = vld [vmem:[%s14415_s8 + $0x1968] sm:$0xf]  ;;  %v7432_v31 = vpop.f32.mrf.mxu1  ;;  %v12217_v32 = vor.u32 %v13800_v51, %v12216_v25 }
 0x30e   : > { %7671 = vmatpush.bf16.msra.mxu0 %v11865_v12  ;;  %v13732_v0 = vld [vmem:[%s14415_s8 + $0x1974] sm:$0xf0]  ;;  %v12072_v34 = vld [vmem:[%s14415_s8 + $0x1a68] sm:$0xf]  ;;  %v7445_v29 = vpop.f32.mrf.mxu2 }
 0x30f   : > { %7684 = vmatpush.bf16.msra.mxu1 %v11993_v37  ;;  %v13764_v35 = vld [vmem:[%s14415_s8 + $0x1a74] sm:$0xf0]  ;;  %v12200_v36 = vld [vmem:[%s14415_s8 + $0x1b68] sm:$0xf]  ;;  %v7433_v37 = vadd.f32 %v7432_v31, %v7420_v30  ;;  %v11945_v6 = vor.u32 %v13732_v0, %v11944_v58 }
 0x310   : > { %7697 = vmatpush.bf16.msra.mxu2 %v12121_v39  ;;  %v13796_v12 = vld [vmem:[%s14415_s8 + $0x1b74] sm:$0xf0]  ;;  %v11817_v39 = vor.u32 %v13700_v28, %v11816_v26  ;;  %v12073_v20 = vor.u32 %v13764_v35, %v12072_v34  ;;  %v11800_v33 = vld [vmem:[%s14415_s8 + $0x1848] sm:$0xf] }
 0x311   : > { %7710 = vmatpush.bf16.msra.mxu3 %v12249_v43  ;;  %v13696_v41 = vld [vmem:[%s14415_s8 + $0x1854] sm:$0xf0]  ;;  %v11928_v43 = vld [vmem:[%s14415_s8 + $0x1948] sm:$0xf]  ;;  %v12201_v44 = vor.u32 %v13796_v12, %v12200_v36 }
 0x312   : > { %7672 = vmatpush.bf16.msra.mxu0 %v11849_v52  ;;  %v13728_v45 = vld [vmem:[%s14415_s8 + $0x1954] sm:$0xf0]  ;;  %v12056_v46 = vld [vmem:[%s14415_s8 + $0x1a48] sm:$0xf]  ;;  %v7446_v52 = vadd.f32 %v7445_v29, %v7433_v37  ;;  %v11801_v55 = vor.u32 %v13696_v41, %v11800_v33 }
 0x313   : > { %7685 = vmatpush.bf16.msra.mxu1 %v11977_v42  ;;  %v13760_v7 = vld [vmem:[%s14415_s8 + $0x1a54] sm:$0xf0]  ;;  %v7458_v42 = vpop.f32.mrf.mxu3  ;;  %v11929_v59 = vor.u32 %v13728_v45, %v11928_v43  ;;  %v11784_v62 = vld [vmem:[%s14415_s8 + $0x1828] sm:$0xf] }
 0x314   : > { %7698 = vmatpush.bf16.msra.mxu2 %v12105_v40  ;;  %v12184_v40 = vld [vmem:[%s14415_s8 + $0x1b48] sm:$0xf]  ;;  %v13792_v54 = vld [vmem:[%s14415_s8 + $0x1b54] sm:$0xf0]  ;;  %v16068_v57 = vadd.f32 %v7458_v42, %v7446_v52  ;;  %v12057_v60 = vor.u32 %v13760_v7, %v12056_v46 }
 0x315   : > { %7711 = vmatpush.bf16.msra.mxu3 %v12233_v38  ;;  %v7421_v38 = vpop.f32.mrf.mxu0  ;;  %v13692_v25 = vld [vmem:[%s14415_s8 + $0x1834] sm:$0xf0]  ;;  %v11912_v51 = vld [vmem:[%s14415_s8 + $0x1928] sm:$0xf]  ;;  %v12185_v56 = vor.u32 %v13792_v54, %v12184_v40 }
 0x316   : > { %7673 = vmatpush.bf16.msra.mxu0 %v11833_v63  ;;  %v7434_v63 = vpop.f32.mrf.mxu1  ;;  %v13756_v26 = vld [vmem:[%s14415_s8 + $0x1a34] sm:$0xf0]  ;;  %v12168_v28 = vld [vmem:[%s14415_s8 + $0x1b28] sm:$0xf]  ;;  %v11785_v30 = vor.u32 %v13692_v25, %v11784_v62  ;;  %v7447_v37 = vpop.f32.mrf.mxu2 }
 0x317   : > { %7686 = vmatpush.bf16.msra.mxu1 %v11961_v11  ;;  %v13724_v11 = vld [vmem:[%s14415_s8 + $0x1934] sm:$0xf0]  ;;  %v11768_v31 = vld [vmem:[%s14415_s8 + $0x1808] sm:$0xf] }
 0x318   : > { %7699 = vmatpush.bf16.msra.mxu2 %v12089_v24  ;;  %v12040_v24 = vld [vmem:[%s14415_s8 + $0x1a28] sm:$0xf]  ;;  %v13788_v58 = vld [vmem:[%s14415_s8 + $0x1b34] sm:$0xf0]  ;;  %v11913_v0 = vor.u32 %v13724_v11, %v11912_v51 }
 0x319   : > { %7712 = vmatpush.bf16.msra.mxu3 %v12217_v32  ;;  %v13688_v32 = vld [vmem:[%s14415_s8 + $0x1814] sm:$0xf0]  ;;  %v12041_v34 = vor.u32 %v13756_v26, %v12040_v24  ;;  %v11896_v35 = vld [vmem:[%s14415_s8 + $0x1908] sm:$0xf] }
 0x31a   : > { %7674 = vmatpush.bf16.msra.mxu0 %v11817_v39  ;;  %v13720_v36 = vld [vmem:[%s14415_s8 + $0x1914] sm:$0xf0]  ;;  %v12024_v12 = vld [vmem:[%s14415_s8 + $0x1a08] sm:$0xf]  ;;  %v12169_v39 = vor.u32 %v13788_v58, %v12168_v28  ;;  %v11769_v45 = vor.u32 %v13688_v32, %v11768_v31 }
 0x31b   : > { %7687 = vmatpush.bf16.msra.mxu1 %v11945_v6  ;;  %v13752_v6 = vld [vmem:[%s14415_s8 + $0x1a14] sm:$0xf0]  ;;  %v7460_v41 = vpop.f32.mrf.mxu3  ;;  %v12392_v43 = vld [vmem:[%s14415_s8 + $0x1ce8] sm:$0xf]  ;;  %v11897_v42 = vor.u32 %v13720_v36, %v11896_v35  ;;  %v14065_v36 = vld [vmem:[#allocation1] sm:$0xff] }
 0x31c   : > { %7700 = vmatpush.bf16.msra.mxu2 %v12073_v20  ;;  %v12152_v20 = vld [vmem:[%s14415_s8 + $0x1b08] sm:$0xf]  ;;  %v13784_v33 = vld [vmem:[%s14415_s8 + $0x1b14] sm:$0xf0]  ;;  %v12025_v40 = vor.u32 %v13752_v6, %v12024_v12 }
 0x31d   : > { %7713 = vmatpush.bf16.msra.mxu3 %v12201_v44  ;;  %v13844_v29 = vld [vmem:[%s14415_s8 + $0x1cf4] sm:$0xf0]  ;;  %v12520_v44 = vld [vmem:[%s14415_s8 + $0x1de8] sm:$0xf]  ;;  %v12153_v38 = vor.u32 %v13784_v33, %v12152_v20 }
 0x31e   : > { %7675 = vmatpush.bf16.msra.mxu0 %v11801_v55  ;;  %v13876_v46 = vld [vmem:[%s14415_s8 + $0x1df4] sm:$0xf0]  ;;  %v12648_v7 = vld [vmem:[%s14415_s8 + $0x1ee8] sm:$0xf] }
 0x31f   : > { %7688 = vmatpush.bf16.msra.mxu1 %v11929_v59  ;;  %v13908_v52 = vld [vmem:[%s14415_s8 + $0x1ef4] sm:$0xf0]  ;;  %v12776_v54 = vld [vmem:[%s14415_s8 + $0x1fe8] sm:$0xf]  ;;  %v12393_v59 = vor.u32 %v13844_v29, %v12392_v43 }
 0x320   : > { %7701 = vmatpush.bf16.msra.mxu2 %v12057_v60  ;;  %v13940_v55 = vld [vmem:[%s14415_s8 + $0x1ff4] sm:$0xf0]  ;;  %v12521_v60 = vor.u32 %v13876_v46, %v12520_v44  ;;  %v12649_v62 = vor.u32 %v13908_v52, %v12648_v7  ;;  %v12376_v25 = vld [vmem:[%s14415_s8 + $0x1cc8] sm:$0xf] }
 0x321   : > { %7714 = vmatpush.bf16.msra.mxu3 %v12185_v56  ;;  %v13840_v51 = vld [vmem:[%s14415_s8 + $0x1cd4] sm:$0xf0]  ;;  %v12504_v63 = vld [vmem:[%s14415_s8 + $0x1dc8] sm:$0xf]  ;;  %v12777_v56 = vor.u32 %v13940_v55, %v12776_v54 }
 0x322   : > { %7676 = vmatpush.bf16.msra.mxu0 %v11785_v30  ;;  %v13872_v11 = vld [vmem:[%s14415_s8 + $0x1dd4] sm:$0xf0]  ;;  %v12632_v24 = vld [vmem:[%s14415_s8 + $0x1ec8] sm:$0xf]  ;;  %v12377_v30 = vor.u32 %v13840_v51, %v12376_v25 }
 0x323   : > { %7689 = vmatpush.bf16.msra.mxu1 %v11913_v0  ;;  %v13904_v26 = vld [vmem:[%s14415_s8 + $0x1ed4] sm:$0xf0]  ;;  %v12760_v28 = vld [vmem:[%s14415_s8 + $0x1fc8] sm:$0xf]  ;;  %v12505_v31 = vor.u32 %v13872_v11, %v12504_v63 }
 0x324   : > { %7702 = vmatpush.bf16.msra.mxu2 %v12041_v34  ;;  %v13936_v58 = vld [vmem:[%s14415_s8 + $0x1fd4] sm:$0xf0]  ;;  %v12633_v32 = vor.u32 %v13904_v26, %v12632_v24  ;;  %v12360_v0 = vld [vmem:[%s14415_s8 + $0x1ca8] sm:$0xf] }
 0x325   : > { %7715 = vmatpush.bf16.msra.mxu3 %v12169_v39  ;;  %v13836_v34 = vld [vmem:[%s14415_s8 + $0x1cb4] sm:$0xf0]  ;;  %v12488_v35 = vld [vmem:[%s14415_s8 + $0x1da8] sm:$0xf]  ;;  %v12761_v12 = vor.u32 %v13936_v58, %v12760_v28 }
 0x326   : > { %7677 = vmatpush.bf16.msra.mxu0 %v11769_v45  ;;  %v13868_v37 = vld [vmem:[%s14415_s8 + $0x1db4] sm:$0xf0]  ;;  %v12616_v39 = vld [vmem:[%s14415_s8 + $0x1ea8] sm:$0xf]  ;;  %v12361_v44 = vor.u32 %v13836_v34, %v12360_v0 }
 0x327   : > { %7690 = vmatpush.bf16.msra.mxu1 %v11897_v42  ;;  %v13900_v6 = vld [vmem:[%s14415_s8 + $0x1eb4] sm:$0xf0]  ;;  %v14066_v20 = vld [vmem:[#allocation1 + $0x12] sm:$0xff]  ;;  %v14068_v29 = vld [vmem:[#allocation1 + $0x1b] sm:$0xff]  ;;  %v12489_v45 = vor.u32 %v13868_v37, %v12488_v35  ;;  %v7484_v63 = vpop.f32.mrf.mxu1 }
 0x328   : > { %7703 = vmatpush.bf16.msra.mxu2 %v12025_v40  ;;  %v14067_v33 = vld [vmem:[#allocation1 + $0x9] sm:$0xff]  ;;  %v12744_v41 = vld [vmem:[%s14415_s8 + $0x1fa8] sm:$0xf]  ;;  %v12617_v46 = vor.u32 %v13900_v6, %v12616_v39 }
 0x329   : > { %7716 = vmatpush.bf16.msra.mxu3 %v12153_v38  ;;  %7678 = vmatmul.bf16.vlgmr.msra.gmra.mxu0 %v14065_v36  ;;  %v13932_v43 = vld [vmem:[%s14415_s8 + $0x1fb4] sm:$0xf0]  ;;  %v12344_v7 = vld [vmem:[%s14415_s8 + $0x1c88] sm:$0xf] }
 0x32a   : > { %7722 = vmatpush.bf16.msrb.mxu0 %v12393_v59  ;;  %7691 = vmatmul.bf16.vlgmr.msra.gmra.mxu1 %v14067_v33  ;;  %v13832_v52 = vld [vmem:[%s14415_s8 + $0x1c94] sm:$0xf0]  ;;  %v12472_v42 = vld [vmem:[%s14415_s8 + $0x1d88] sm:$0xf]  ;;  %v12745_v40 = vor.u32 %v13932_v43, %v12744_v41  ;;  %v7471_v59 = vpop.f32.mrf.mxu0 }
 0x32b   : > { %7735 = vmatpush.bf16.msrb.mxu1 %v12521_v60  ;;  %7704 = vmatmul.bf16.vlgmr.msra.gmra.mxu2 %v14066_v20  ;;  %v13864_v54 = vld [vmem:[%s14415_s8 + $0x1d94] sm:$0xf0]  ;;  %v12600_v55 = vld [vmem:[%s14415_s8 + $0x1e88] sm:$0xf]  ;;  %v7472_v25 = vadd.f32 %v7471_v59, %v16068_v57  ;;  %v12345_v51 = vor.u32 %v13832_v52, %v12344_v7 }
 0x32c   : > { %7748 = vmatpush.bf16.msrb.mxu2 %v12649_v62  ;;  %7717 = vmatmul.bf16.vlgmr.msra.gmra.mxu3 %v14068_v29  ;;  %v13896_v38 = vld [vmem:[%s14415_s8 + $0x1e94] sm:$0xf0]  ;;  %v12728_v60 = vld [vmem:[%s14415_s8 + $0x1f88] sm:$0xf] }
 0x32d   : > { %7761 = vmatpush.bf16.msrb.mxu3 %v12777_v56  ;;  %v13928_v62 = vld [vmem:[%s14415_s8 + $0x1f94] sm:$0xf0]  ;;  %v12473_v56 = vor.u32 %v13864_v54, %v12472_v42  ;;  %v12601_v11 = vor.u32 %v13896_v38, %v12600_v55  ;;  %v12328_v24 = vld [vmem:[%s14415_s8 + $0x1c68] sm:$0xf] }
 0x32e   : > { %7723 = vmatpush.bf16.msrb.mxu0 %v12377_v30  ;;  %v13828_v26 = vld [vmem:[%s14415_s8 + $0x1c74] sm:$0xf0]  ;;  %v12456_v28 = vld [vmem:[%s14415_s8 + $0x1d68] sm:$0xf]  ;;  %v12729_v58 = vor.u32 %v13928_v62, %v12728_v60  ;;  %v7485_v30 = vadd.f32 %v7484_v63, %v7472_v25  ;;  %v7497_v33 = vpop.f32.mrf.mxu2 }
 0x32f   : > { %7736 = vmatpush.bf16.msrb.mxu1 %v12505_v31  ;;  %v13860_v31 = vld [vmem:[%s14415_s8 + $0x1d74] sm:$0xf0]  ;;  %v12712_v0 = vld [vmem:[%s14415_s8 + $0x1f68] sm:$0xf]  ;;  %v12329_v35 = vor.u32 %v13828_v26, %v12328_v24 }
 0x330   : > { %7749 = vmatpush.bf16.msrb.mxu2 %v12633_v32  ;;  %v12584_v32 = vld [vmem:[%s14415_s8 + $0x1e68] sm:$0xf]  ;;  %v13892_v57 = vld [vmem:[%s14415_s8 + $0x1e74] sm:$0xf0]  ;;  %v12457_v36 = vor.u32 %v13860_v31, %v12456_v28 }
 0x331   : > { %7762 = vmatpush.bf16.msrb.mxu3 %v12761_v12  ;;  %v13924_v34 = vld [vmem:[%s14415_s8 + $0x1f74] sm:$0xf0]  ;;  %v12585_v12 = vor.u32 %v13892_v57, %v12584_v32  ;;  %v12312_v37 = vld [vmem:[%s14415_s8 + $0x1c48] sm:$0xf] }
 0x332   : > { %7724 = vmatpush.bf16.msrb.mxu0 %v12361_v44  ;;  %v13824_v39 = vld [vmem:[%s14415_s8 + $0x1c54] sm:$0xf0]  ;;  %v12440_v6 = vld [vmem:[%s14415_s8 + $0x1d48] sm:$0xf]  ;;  %v12713_v20 = vor.u32 %v13924_v34, %v12712_v0  ;;  %v7498_v44 = vadd.f32 %v7497_v33, %v7485_v30  ;;  %v7473_v52 = vpop.f32.mrf.mxu0 }
 0x333   : > { %7737 = vmatpush.bf16.msrb.mxu1 %v12489_v45  ;;  %v13856_v41 = vld [vmem:[%s14415_s8 + $0x1d54] sm:$0xf0]  ;;  %v12568_v43 = vld [vmem:[%s14415_s8 + $0x1e48] sm:$0xf]  ;;  %v7510_v45 = vpop.f32.mrf.mxu3  ;;  %v12313_v42 = vor.u32 %v13824_v39, %v12312_v37  ;;  %v12946_v39 = vld [vmem:[%s14415_s8 + $0xec] sm:$0xf] }
 0x334   : > { %7750 = vmatpush.bf16.msrb.mxu2 %v12617_v46  ;;  %v13888_v29 = vld [vmem:[%s14415_s8 + $0x1e54] sm:$0xf0]  ;;  %v12696_v46 = vld [vmem:[%s14415_s8 + $0x1f48] sm:$0xf]  ;;  %v16135_v54 = vadd.f32 %v7510_v45, %v7498_v44  ;;  %v12441_v55 = vor.u32 %v13856_v41, %v12440_v6  ;;  %v8810_v6 = vld [vmem:[%s14415_s8 + $0xf8] sm:$0xf0] }
 0x335   : > { %7763 = vmatpush.bf16.msrb.mxu3 %v12745_v40  ;;  %v13920_v7 = vld [vmem:[%s14415_s8 + $0x1f54] sm:$0xf0]  ;;  %v7486_v40 = vpop.f32.mrf.mxu1  ;;  %v12569_v38 = vor.u32 %v13888_v29, %v12568_v43  ;;  %v12296_v59 = vld [vmem:[%s14415_s8 + $0x1c28] sm:$0xf]  ;;  %v8938_v43 = vld [vmem:[%s14415_s8 + $0x1f8] sm:$0xf0] }
 0x336   : > { %7725 = vmatpush.bf16.msrb.mxu0 %v12345_v51  ;;  %v13820_v60 = vld [vmem:[%s14415_s8 + $0x1c34] sm:$0xf0]  ;;  %v12424_v62 = vld [vmem:[%s14415_s8 + $0x1d28] sm:$0xf]  ;;  %v12697_v25 = vor.u32 %v13920_v7, %v12696_v46  ;;  %v7499_v37 = vpop.f32.mrf.mxu2  ;;  %v13010_v29 = vld [vmem:[%s14415_s8 + $0x2ec] sm:$0xf]  ;;  %v8813_v40 = vor.u32 %v12946_v39, %v8810_v6 }
 0x337   : > { %7738 = vmatpush.bf16.msrb.mxu1 %v12473_v56  ;;  %v13852_v51 = vld [vmem:[%s14415_s8 + $0x1d34] sm:$0xf0]  ;;  %v12552_v63 = vld [vmem:[%s14415_s8 + $0x1e28] sm:$0xf]  ;;  %v12297_v26 = vor.u32 %v13820_v60, %v12296_v59  ;;  %v9066_v44 = vld [vmem:[%s14415_s8 + $0x2f8] sm:$0xf0] }
 0x338   : > { %7751 = vmatpush.bf16.msrb.mxu2 %v12601_v11  ;;  %v13884_v56 = vld [vmem:[%s14415_s8 + $0x1e34] sm:$0xf0]  ;;  %v12680_v11 = vld [vmem:[%s14415_s8 + $0x1f28] sm:$0xf]  ;;  %v12425_v30 = vor.u32 %v13852_v51, %v12424_v62  ;;  %v13042_v7 = vld [vmem:[%s14415_s8 + $0x3ec] sm:$0xf] }
 0x339   : > { %7764 = vmatpush.bf16.msrb.mxu3 %v12729_v58  ;;  %v13916_v24 = vld [vmem:[%s14415_s8 + $0x1f34] sm:$0xf0]  ;;  %v12280_v28 = vld [vmem:[%s14415_s8 + $0x1c08] sm:$0xf]  ;;  %v12553_v31 = vor.u32 %v13884_v56, %v12552_v63  ;;  %v9194_v52 = vld [vmem:[%s14415_s8 + $0x3f8] sm:$0xf0] }
 0x33a   : > { %7726 = vmatpush.bf16.msrb.mxu0 %v12329_v35  ;;  %v13816_v58 = vld [vmem:[%s14415_s8 + $0x1c14] sm:$0xf0]  ;;  %v12408_v32 = vld [vmem:[%s14415_s8 + $0x1d08] sm:$0xf]  ;;  %v12681_v34 = vor.u32 %v13916_v24, %v12680_v11  ;;  %v12942_v59 = vld [vmem:[%s14415_s8 + $0xcc] sm:$0xf] }
 0x33b   : > { %7739 = vmatpush.bf16.msrb.mxu1 %v12457_v36  ;;  %v13848_v57 = vld [vmem:[%s14415_s8 + $0x1d14] sm:$0xf0]  ;;  %v12536_v0 = vld [vmem:[%s14415_s8 + $0x1e08] sm:$0xf]  ;;  %v7512_v33 = vpop.f32.mrf.mxu3  ;;  %v12281_v41 = vor.u32 %v13816_v58, %v12280_v28  ;;  %v8794_v60 = vld [vmem:[%s14415_s8 + $0xd8] sm:$0xf0] }
 0x33c   : > { %7752 = vmatpush.bf16.msrb.mxu2 %v12585_v12  ;;  %v13880_v35 = vld [vmem:[%s14415_s8 + $0x1e14] sm:$0xf0]  ;;  %v12664_v36 = vld [vmem:[%s14415_s8 + $0x1f08] sm:$0xf]  ;;  %v12409_v45 = vor.u32 %v13848_v57, %v12408_v32  ;;  %v12974_v62 = vld [vmem:[%s14415_s8 + $0x1cc] sm:$0xf] }
 0x33d   : > { %7765 = vmatpush.bf16.msrb.mxu3 %v12713_v20  ;;  %v13912_v12 = vld [vmem:[%s14415_s8 + $0x1f14] sm:$0xf0]  ;;  %v12978_v20 = vld [vmem:[%s14415_s8 + $0x1ec] sm:$0xf]  ;;  %v12537_v46 = vor.u32 %v13880_v35, %v12536_v0  ;;  %v8922_v51 = vld [vmem:[%s14415_s8 + $0x1d8] sm:$0xf0] }
 0x33e   : > { %7727 = vmatpush.bf16.msrb.mxu0 %v12313_v42  ;;  %v12665_v42 = vor.u32 %v13912_v12, %v12664_v36  ;;  %v13006_v63 = vld [vmem:[%s14415_s8 + $0x2cc] sm:$0xf]  ;;  %v9050_v56 = vld [vmem:[%s14415_s8 + $0x2d8] sm:$0xf0]  ;;  %v8925_v28 = vor.u32 %v12974_v62, %v8922_v51  ;;  %v14069_v57 = vld [vmem:[#allocation1 + $0x24] sm:$0xff] }
 0x33f   : > { %7740 = vmatpush.bf16.msrb.mxu1 %v12441_v55  ;;  %v8941_v55 = vor.u32 %v12978_v20, %v8938_v43  ;;  %v13038_v11 = vld [vmem:[%s14415_s8 + $0x3cc] sm:$0xf]  ;;  %v9178_v24 = vld [vmem:[%s14415_s8 + $0x3d8] sm:$0xf0]  ;;  %v9053_v58 = vor.u32 %v13006_v63, %v9050_v56 }
 0x340   : > { %7753 = vmatpush.bf16.msrb.mxu2 %v12569_v38  ;;  %v9069_v38 = vor.u32 %v13010_v29, %v9066_v44  ;;  %v12970_v32 = vld [vmem:[%s14415_s8 + $0x1ac] sm:$0xf]  ;;  %v9181_v0 = vor.u32 %v13038_v11, %v9178_v24  ;;  %v9034_v36 = vld [vmem:[%s14415_s8 + $0x2b8] sm:$0xf0] }
 0x341   : > { %7766 = vmatpush.bf16.msrb.mxu3 %v12697_v25  ;;  %v9197_v25 = vor.u32 %v13042_v7, %v9194_v52  ;;  %v13002_v35 = vld [vmem:[%s14415_s8 + $0x2ac] sm:$0xf]  ;;  %v14071_v37 = vld [vmem:[#allocation1 + $0x2d] sm:$0xff] }
 0x342   : > { %7728 = vmatpush.bf16.msrb.mxu0 %v12297_v26  ;;  %v8797_v26 = vor.u32 %v12942_v59, %v8794_v60  ;;  %v14070_v12 = vld [vmem:[#allocation1 + $0x36] sm:$0xff]  ;;  %v9162_v6 = vld [vmem:[%s14415_s8 + $0x3b8] sm:$0xf0]  ;;  %v14072_v20 = vld [vmem:[#allocation1 + $0x3f] sm:$0xff]  ;;  %v9037_v43 = vor.u32 %v13002_v35, %v9034_v36 }
 0x343   : > { %7741 = vmatpush.bf16.msrb.mxu1 %v12425_v30  ;;  %v12938_v30 = vld [vmem:[%s14415_s8 + $0xac] sm:$0xf]  ;;  %v8762_v44 = vld [vmem:[%s14415_s8 + $0x98] sm:$0xf0] }
 0x344   : > { %7754 = vmatpush.bf16.msrb.mxu2 %v12553_v31  ;;  %v8778_v31 = vld [vmem:[%s14415_s8 + $0xb8] sm:$0xf0]  ;;  %v13034_v39 = vld [vmem:[%s14415_s8 + $0x3ac] sm:$0xf] }
 0x345   : > { %7767 = vmatpush.bf16.msrb.mxu3 %v12681_v34  ;;  %v8906_v34 = vld [vmem:[%s14415_s8 + $0x1b8] sm:$0xf0]  ;;  %v8781_v33 = vor.u32 %v12938_v30, %v8778_v31  ;;  %v12934_v29 = vld [vmem:[%s14415_s8 + $0x8c] sm:$0xf] }
 0x346   : > { %7729 = vmatpush.bf16.msrb.mxu0 %v12281_v41  ;;  %v8909_v41 = vor.u32 %v12970_v32, %v8906_v34  ;;  %v8890_v7 = vld [vmem:[%s14415_s8 + $0x198] sm:$0xf0]  ;;  %v12998_v52 = vld [vmem:[%s14415_s8 + $0x28c] sm:$0xf]  ;;  %v8765_v60 = vor.u32 %v12934_v29, %v8762_v44 }
 0x347   : > { %7742 = vmatpush.bf16.msrb.mxu1 %v12409_v45  ;;  %v12966_v45 = vld [vmem:[%s14415_s8 + $0x18c] sm:$0xf]  ;;  %v7536_v62 = vpop.f32.mrf.mxu1  ;;  %v8746_v56 = vld [vmem:[%s14415_s8 + $0x78] sm:$0xf0] }
 0x348   : > { %7755 = vmatpush.bf16.msrb.mxu2 %v12537_v46  ;;  %v9165_v46 = vor.u32 %v13034_v39, %v9162_v6  ;;  %v12930_v63 = vld [vmem:[%s14415_s8 + $0x6c] sm:$0xf]  ;;  %v9130_v31 = vld [vmem:[%s14415_s8 + $0x378] sm:$0xf0] }
 0x349   : > { %7768 = vmatpush.bf16.msrb.mxu3 %v12665_v42  ;;  %7730 = vmatmul.bf16.vlgmr.msrb.gmra.mxu0 %v14069_v57  ;;  %v9018_v42 = vld [vmem:[%s14415_s8 + $0x298] sm:$0xf0]  ;;  %v12962_v11 = vld [vmem:[%s14415_s8 + $0x16c] sm:$0xf]  ;;  %v8749_v32 = vor.u32 %v12930_v63, %v8746_v56 }
 0x34a   : > { %7774 = vmatpush.bf16.msra.mxu0 %v8813_v40  ;;  %7743 = vmatmul.bf16.vlgmr.msrb.gmra.mxu1 %v14071_v37  ;;  %v7523_v40 = vpop.f32.mrf.mxu0  ;;  %v9021_v51 = vor.u32 %v12998_v52, %v9018_v42  ;;  %v13026_v30 = vld [vmem:[%s14415_s8 + $0x36c] sm:$0xf]  ;;  %v8730_v35 = vld [vmem:[%s14415_s8 + $0x58] sm:$0xf0] }
 0x34b   : > { %7787 = vmatpush.bf16.msra.mxu1 %v8941_v55  ;;  %7756 = vmatmul.bf16.vlgmr.msrb.gmra.mxu2 %v14070_v12  ;;  %v13030_v55 = vld [vmem:[%s14415_s8 + $0x38c] sm:$0xf]  ;;  %v7524_v59 = vadd.f32 %v7523_v40, %v16135_v54  ;;  %v9002_v54 = vld [vmem:[%s14415_s8 + $0x278] sm:$0xf0]  ;;  %v9133_v12 = vor.u32 %v13026_v30, %v9130_v31 }
 0x34c   : > { %7800 = vmatpush.bf16.msra.mxu2 %v9069_v38  ;;  %7769 = vmatmul.bf16.vlgmr.msrb.gmra.mxu3 %v14072_v20  ;;  %v9146_v38 = vld [vmem:[%s14415_s8 + $0x398] sm:$0xf0]  ;;  %v12926_v34 = vld [vmem:[%s14415_s8 + $0x4c] sm:$0xf] }
 0x34d   : > { %7813 = vmatpush.bf16.msra.mxu3 %v9197_v25  ;;  %v8893_v25 = vor.u32 %v12966_v45, %v8890_v7  ;;  %v9149_v24 = vor.u32 %v13030_v55, %v9146_v38  ;;  %v12958_v36 = vld [vmem:[%s14415_s8 + $0x14c] sm:$0xf]  ;;  %v8858_v39 = vld [vmem:[%s14415_s8 + $0x158] sm:$0xf0]  ;;  %v8733_v45 = vor.u32 %v12926_v34, %v8730_v35 }
 0x34e   : > { %7775 = vmatpush.bf16.msra.mxu0 %v8797_v26  ;;  %v7537_v26 = vadd.f32 %v7536_v62, %v7524_v59  ;;  %v7549_v37 = vpop.f32.mrf.mxu2  ;;  %v12990_v6 = vld [vmem:[%s14415_s8 + $0x24c] sm:$0xf]  ;;  %v8986_v20 = vld [vmem:[%s14415_s8 + $0x258] sm:$0xf0]  ;;  %v8861_v52 = vor.u32 %v12958_v36, %v8858_v39 }
 0x34f   : > { %7788 = vmatpush.bf16.msra.mxu1 %v8925_v28  ;;  %v8874_v28 = vld [vmem:[%s14415_s8 + $0x178] sm:$0xf0]  ;;  %v8989_v42 = vor.u32 %v12990_v6, %v8986_v20  ;;  %v12922_v40 = vld [vmem:[%s14415_s8 + $0x2c] sm:$0xf] }
 0x350   : > { %7801 = vmatpush.bf16.msra.mxu2 %v9053_v58  ;;  %v12994_v58 = vld [vmem:[%s14415_s8 + $0x26c] sm:$0xf]  ;;  %v8877_v57 = vor.u32 %v12962_v11, %v8874_v28  ;;  %v9114_v29 = vld [vmem:[%s14415_s8 + $0x358] sm:$0xf0] }
 0x351   : > { %7814 = vmatpush.bf16.msra.mxu3 %v9181_v0  ;;  %v9005_v0 = vor.u32 %v12994_v58, %v9002_v54  ;;  %v8714_v55 = vld [vmem:[%s14415_s8 + $0x38] sm:$0xf0]  ;;  %v12954_v38 = vld [vmem:[%s14415_s8 + $0x12c] sm:$0xf] }
 0x352   : > { %7776 = vmatpush.bf16.msra.mxu0 %v8781_v33  ;;  %v7550_v33 = vadd.f32 %v7549_v37, %v7537_v26  ;;  %v7525_v44 = vpop.f32.mrf.mxu0  ;;  %v12986_v62 = vld [vmem:[%s14415_s8 + $0x22c] sm:$0xf]  ;;  %v9098_v63 = vld [vmem:[%s14415_s8 + $0x338] sm:$0xf0]  ;;  %v8717_v56 = vor.u32 %v12922_v40, %v8714_v55 }
 0x353   : > { %7789 = vmatpush.bf16.msra.mxu1 %v8909_v41  ;;  %v7562_v41 = vpop.f32.mrf.mxu3  ;;  %v12918_v11 = vld [vmem:[%s14415_s8 + $0xc] sm:$0xf]  ;;  %v8826_v54 = vld [vmem:[%s14415_s8 + $0x118] sm:$0xf0] }
 0x354   : > { %7802 = vmatpush.bf16.msra.mxu2 %v9037_v43  ;;  %v13022_v43 = vld [vmem:[%s14415_s8 + $0x34c] sm:$0xf]  ;;  %v16202_v7 = vadd.f32 %v7562_v41, %v7550_v33  ;;  %v9322_v36 = vld [vmem:[%s14415_s8 + $0x4f8] sm:$0xf0] }
 0x355   : > { %7815 = vmatpush.bf16.msra.mxu3 %v9165_v46  ;;  %v7538_v46 = vpop.f32.mrf.mxu1  ;;  %v9117_v59 = vor.u32 %v13022_v43, %v9114_v29  ;;  %v12950_v58 = vld [vmem:[%s14415_s8 + $0x10c] sm:$0xf]  ;;  %v9450_v6 = vld [vmem:[%s14415_s8 + $0x5f8] sm:$0xf0] }
 0x356   : > { %7777 = vmatpush.bf16.msra.mxu0 %v8765_v60  ;;  %v8842_v60 = vld [vmem:[%s14415_s8 + $0x138] sm:$0xf0]  ;;  %v12982_v30 = vld [vmem:[%s14415_s8 + $0x20c] sm:$0xf]  ;;  %v7551_v34 = vpop.f32.mrf.mxu2  ;;  %v8829_v41 = vor.u32 %v12950_v58, %v8826_v54 }
 0x357   : > { %7790 = vmatpush.bf16.msra.mxu1 %v8893_v25  ;;  %v8970_v25 = vld [vmem:[%s14415_s8 + $0x238] sm:$0xf0]  ;;  %v8845_v26 = vor.u32 %v12954_v38, %v8842_v60  ;;  %v13074_v35 = vld [vmem:[%s14415_s8 + $0x4ec] sm:$0xf] }
 0x358   : > { %7803 = vmatpush.bf16.msra.mxu2 %v9021_v51  ;;  %v13018_v51 = vld [vmem:[%s14415_s8 + $0x32c] sm:$0xf]  ;;  %v8973_v28 = vor.u32 %v12986_v62, %v8970_v25  ;;  %v9578_v33 = vld [vmem:[%s14415_s8 + $0x6f8] sm:$0xf0]  ;;  %v9325_v46 = vor.u32 %v13074_v35, %v9322_v36 }
 0x359   : > { %7816 = vmatpush.bf16.msra.mxu3 %v9149_v24  ;;  %v8698_v24 = vld [vmem:[%s14415_s8 + $0x18] sm:$0xf0]  ;;  %v9101_v31 = vor.u32 %v13018_v51, %v9098_v63  ;;  %v13138_v20 = vld [vmem:[%s14415_s8 + $0x6ec] sm:$0xf] }
 0x35a   : > { %7778 = vmatpush.bf16.msra.mxu0 %v8749_v32  ;;  %v8954_v32 = vld [vmem:[%s14415_s8 + $0x218] sm:$0xf0]  ;;  %v8701_v39 = vor.u32 %v12918_v11, %v8698_v24  ;;  %v13170_v29 = vld [vmem:[%s14415_s8 + $0x7ec] sm:$0xf] }
 0x35b   : > { %7791 = vmatpush.bf16.msra.mxu1 %v8877_v57  ;;  %v13014_v57 = vld [vmem:[%s14415_s8 + $0x30c] sm:$0xf]  ;;  %v7564_v37 = vpop.f32.mrf.mxu3  ;;  %v8957_v43 = vor.u32 %v12982_v30, %v8954_v32  ;;  %v9706_v44 = vld [vmem:[%s14415_s8 + $0x7f8] sm:$0xf0] }
 0x35c   : > { %7804 = vmatpush.bf16.msra.mxu2 %v9005_v0  ;;  %v9082_v0 = vld [vmem:[%s14415_s8 + $0x318] sm:$0xf0]  ;;  %v13070_v40 = vld [vmem:[%s14415_s8 + $0x4cc] sm:$0xf] }
 0x35d   : > { %7817 = vmatpush.bf16.msra.mxu3 %v9133_v12  ;;  %v13106_v12 = vld [vmem:[%s14415_s8 + $0x5ec] sm:$0xf]  ;;  %v9306_v55 = vld [vmem:[%s14415_s8 + $0x4d8] sm:$0xf0] }
 0x35e   : > { %7779 = vmatpush.bf16.msra.mxu0 %v8733_v45  ;;  %v9085_v45 = vor.u32 %v13014_v57, %v9082_v0  ;;  %v13102_v38 = vld [vmem:[%s14415_s8 + $0x5cc] sm:$0xf]  ;;  %v9434_v60 = vld [vmem:[%s14415_s8 + $0x5d8] sm:$0xf0] }
 0x35f   : > { %7792 = vmatpush.bf16.msra.mxu1 %v8861_v52  ;;  %v9453_v52 = vor.u32 %v13106_v12, %v9450_v6  ;;  %v13134_v62 = vld [vmem:[%s14415_s8 + $0x6cc] sm:$0xf]  ;;  %v9562_v25 = vld [vmem:[%s14415_s8 + $0x6d8] sm:$0xf0]  ;;  %v9437_v11 = vor.u32 %v13102_v38, %v9434_v60 }
 0x360   : > { %7805 = vmatpush.bf16.msra.mxu2 %v8989_v42  ;;  %v9581_v42 = vor.u32 %v13138_v20, %v9578_v33  ;;  %v13166_v51 = vld [vmem:[%s14415_s8 + $0x7cc] sm:$0xf]  ;;  %v9690_v63 = vld [vmem:[%s14415_s8 + $0x7d8] sm:$0xf0]  ;;  %v9565_v24 = vor.u32 %v13134_v62, %v9562_v25 }
 0x361   : > { %7818 = vmatpush.bf16.msra.mxu3 %v9117_v59  ;;  %v9709_v59 = vor.u32 %v13170_v29, %v9706_v44  ;;  %v13098_v58 = vld [vmem:[%s14415_s8 + $0x5ac] sm:$0xf]  ;;  %v9693_v54 = vor.u32 %v13166_v51, %v9690_v63  ;;  %v9418_v30 = vld [vmem:[%s14415_s8 + $0x5b8] sm:$0xf0] }
 0x362   : > { %7780 = vmatpush.bf16.msra.mxu0 %v8717_v56  ;;  %v9309_v56 = vor.u32 %v13070_v40, %v9306_v55  ;;  %v9546_v32 = vld [vmem:[%s14415_s8 + $0x6b8] sm:$0xf0]  ;;  %v13162_v57 = vld [vmem:[%s14415_s8 + $0x7ac] sm:$0xf]  ;;  %v9421_v35 = vor.u32 %v13098_v58, %v9418_v30 }
 0x363   : > { %7793 = vmatpush.bf16.msra.mxu1 %v8845_v26  ;;  %v13066_v26 = vld [vmem:[%s14415_s8 + $0x4ac] sm:$0xf]  ;;  %v9674_v0 = vld [vmem:[%s14415_s8 + $0x7b8] sm:$0xf0] }
 0x364   : > { %7806 = vmatpush.bf16.msra.mxu2 %v8973_v28  ;;  %v9290_v28 = vld [vmem:[%s14415_s8 + $0x4b8] sm:$0xf0]  ;;  %v13094_v37 = vld [vmem:[%s14415_s8 + $0x58c] sm:$0xf] }
 0x365   : > { %7819 = vmatpush.bf16.msra.mxu3 %v9101_v31  ;;  %v13130_v31 = vld [vmem:[%s14415_s8 + $0x6ac] sm:$0xf]  ;;  %v9293_v34 = vor.u32 %v13066_v26, %v9290_v28  ;;  %v9274_v12 = vld [vmem:[%s14415_s8 + $0x498] sm:$0xf0] }
 0x366   : > { %7781 = vmatpush.bf16.msra.mxu0 %v8701_v39  ;;  %v9549_v36 = vor.u32 %v13130_v31, %v9546_v32  ;;  %v9677_v39 = vor.u32 %v13162_v57, %v9674_v0  ;;  %v9530_v6 = vld [vmem:[%s14415_s8 + $0x698] sm:$0xf0]  ;;  %v7575_v20 = vpop.f32.mrf.mxu0  ;;  %v13158_v33 = vld [vmem:[%s14415_s8 + $0x78c] sm:$0xf] }
 0x367   : > { %7794 = vmatpush.bf16.msra.mxu1 %v8829_v41  ;;  %v9658_v41 = vld [vmem:[%s14415_s8 + $0x798] sm:$0xf0]  ;;  %v7588_v29 = vpop.f32.mrf.mxu1  ;;  %v13154_v60 = vld [vmem:[%s14415_s8 + $0x76c] sm:$0xf] }
 0x368   : > { %7807 = vmatpush.bf16.msra.mxu2 %v8957_v43  ;;  %v9661_v40 = vor.u32 %v13158_v33, %v9658_v41  ;;  %v9386_v38 = vld [vmem:[%s14415_s8 + $0x578] sm:$0xf0]  ;;  %v13150_v57 = vld [vmem:[%s14415_s8 + $0x74c] sm:$0xf] }
 0x369   : > { %7820 = vmatpush.bf16.msra.mxu3 %v9085_v45  ;;  %7782 = vmatmul.bf16.vlgmr.msra.gmra.mxu0 %v14540_v22  ;;  %v9402_v22 = vld [vmem:[%s14415_s8 + $0x598] sm:$0xf0]  ;;  %v13114_v33 = vld [vmem:[%s14415_s8 + $0x62c] sm:$0xf] }
 0x36a   : > { %7826 = vmatpush.bf16.msrb.mxu0 %v9325_v46  ;;  %7795 = vmatmul.bf16.vlgmr.msra.gmra.mxu1 %v14547_v27  ;;  %v7576_v27 = vadd.f32 %v7575_v20, %v16202_v7  ;;  %v9405_v44 = vor.u32 %v13094_v37, %v9402_v22  ;;  %v13058_v46 = vld [vmem:[%s14415_s8 + $0x46c] sm:$0xf]  ;;  %v9514_v7 = vld [vmem:[%s14415_s8 + $0x678] sm:$0xf0] }
 0x36b   : > { %7839 = vmatpush.bf16.msrb.mxu1 %v9453_v52  ;;  %7808 = vmatmul.bf16.vlgmr.msra.gmra.mxu2 %v14538_v21  ;;  %v13062_v21 = vld [vmem:[%s14415_s8 + $0x48c] sm:$0xf]  ;;  %v9258_v52 = vld [vmem:[%s14415_s8 + $0x478] sm:$0xf0] }
 0x36c   : > { %7852 = vmatpush.bf16.msrb.mxu2 %v9581_v42  ;;  %7821 = vmatmul.bf16.vlgmr.msra.gmra.mxu3 %v14542_v23  ;;  %v13126_v23 = vld [vmem:[%s14415_s8 + $0x68c] sm:$0xf]  ;;  %v9277_v43 = vor.u32 %v13062_v21, %v9274_v12  ;;  %v7589_v55 = vadd.f32 %v7588_v29, %v7576_v27  ;;  %v9642_v62 = vld [vmem:[%s14415_s8 + $0x778] sm:$0xf0]  ;;  %v9261_v25 = vor.u32 %v13058_v46, %v9258_v52 }
 0x36d   : > { %7865 = vmatpush.bf16.msrb.mxu3 %v9709_v59  ;;  %v9533_v45 = vor.u32 %v13126_v23, %v9530_v6  ;;  %v13090_v42 = vld [vmem:[%s14415_s8 + $0x56c] sm:$0xf]  ;;  %v9645_v26 = vor.u32 %v13154_v60, %v9642_v62  ;;  %v9370_v58 = vld [vmem:[%s14415_s8 + $0x558] sm:$0xf0] }
 0x36e   : > { %7827 = vmatpush.bf16.msrb.mxu0 %v9309_v56  ;;  %v13122_v59 = vld [vmem:[%s14415_s8 + $0x66c] sm:$0xf]  ;;  %v9389_v51 = vor.u32 %v13090_v42, %v9386_v38  ;;  %v7601_v28 = vpop.f32.mrf.mxu2  ;;  %v9498_v30 = vld [vmem:[%s14415_s8 + $0x658] sm:$0xf0] }
 0x36f   : > { %7840 = vmatpush.bf16.msrb.mxu1 %v9437_v11  ;;  %v9517_v63 = vor.u32 %v13122_v59, %v9514_v7  ;;  %v13054_v56 = vld [vmem:[%s14415_s8 + $0x44c] sm:$0xf]  ;;  %v9242_v11 = vld [vmem:[%s14415_s8 + $0x458] sm:$0xf0]  ;;  %v7602_v31 = vadd.f32 %v7601_v28, %v7589_v55  ;;  %v7614_v32 = vpop.f32.mrf.mxu3 }
 0x370   : > { %7853 = vmatpush.bf16.msrb.mxu2 %v9565_v24  ;;  %v13086_v24 = vld [vmem:[%s14415_s8 + $0x54c] sm:$0xf]  ;;  %v9626_v0 = vld [vmem:[%s14415_s8 + $0x758] sm:$0xf0] }
 0x371   : > { %7866 = vmatpush.bf16.msrb.mxu3 %v9693_v54  ;;  %v13118_v54 = vld [vmem:[%s14415_s8 + $0x64c] sm:$0xf]  ;;  %v16273_v21 = vadd.f32 %v7614_v32, %v7602_v31  ;;  %v9373_v12 = vor.u32 %v13086_v24, %v9370_v58  ;;  %v9226_v22 = vld [vmem:[%s14415_s8 + $0x438] sm:$0xf0]  ;;  %v9629_v6 = vor.u32 %v13150_v57, %v9626_v0 }
 0x372   : > { %7828 = vmatpush.bf16.msrb.mxu0 %v9293_v34  ;;  %v7577_v34 = vpop.f32.mrf.mxu0  ;;  %v9501_v37 = vor.u32 %v13118_v54, %v9498_v30  ;;  %v13082_v23 = vld [vmem:[%s14415_s8 + $0x52c] sm:$0xf]  ;;  %v9354_v20 = vld [vmem:[%s14415_s8 + $0x538] sm:$0xf0] }
 0x373   : > { %7841 = vmatpush.bf16.msrb.mxu1 %v9421_v35  ;;  %v9245_v35 = vor.u32 %v13054_v56, %v9242_v11  ;;  %v9482_v41 = vld [vmem:[%s14415_s8 + $0x638] sm:$0xf0]  ;;  %v13146_v27 = vld [vmem:[%s14415_s8 + $0x72c] sm:$0xf]  ;;  %v9357_v46 = vor.u32 %v13082_v23, %v9354_v20 }
 0x374   : > { %7854 = vmatpush.bf16.msrb.mxu2 %v9549_v36  ;;  %v7590_v36 = vpop.f32.mrf.mxu1  ;;  %v9485_v52 = vor.u32 %v13114_v33, %v9482_v41  ;;  %v13078_v42 = vld [vmem:[%s14415_s8 + $0x50c] sm:$0xf]  ;;  %v9466_v59 = vld [vmem:[%s14415_s8 + $0x618] sm:$0xf0] }
 0x375   : > { %7867 = vmatpush.bf16.msrb.mxu3 %v9677_v39  ;;  %v13050_v39 = vld [vmem:[%s14415_s8 + $0x42c] sm:$0xf]  ;;  %v9594_v60 = vld [vmem:[%s14415_s8 + $0x718] sm:$0xf0] }
 0x376   : > { %7829 = vmatpush.bf16.msrb.mxu0 %v9277_v43  ;;  %v9610_v43 = vld [vmem:[%s14415_s8 + $0x738] sm:$0xf0]  ;;  %v9229_v29 = vor.u32 %v13050_v39, %v9226_v22  ;;  %v13110_v55 = vld [vmem:[%s14415_s8 + $0x60c] sm:$0xf]  ;;  %v7603_v62 = vpop.f32.mrf.mxu2 }
 0x377   : > { %7842 = vmatpush.bf16.msrb.mxu1 %v9405_v44  ;;  %v13046_v44 = vld [vmem:[%s14415_s8 + $0x40c] sm:$0xf]  ;;  %v9613_v38 = vor.u32 %v13146_v27, %v9610_v43  ;;  %v7616_v56 = vpop.f32.mrf.mxu3  ;;  %v9962_v24 = vld [vmem:[%s14415_s8 + $0x9f8] sm:$0xf0]  ;;  %v9469_v54 = vor.u32 %v13110_v55, %v9466_v59 }
 0x378   : > { %7855 = vmatpush.bf16.msrb.mxu2 %v9533_v45  ;;  %v9210_v45 = vld [vmem:[%s14415_s8 + $0x418] sm:$0xf0]  ;;  %v13142_v7 = vld [vmem:[%s14415_s8 + $0x70c] sm:$0xf] }
 0x379   : > { %7868 = vmatpush.bf16.msrb.mxu3 %v9661_v40  ;;  %v9338_v40 = vld [vmem:[%s14415_s8 + $0x518] sm:$0xf0]  ;;  %v9213_v11 = vor.u32 %v13046_v44, %v9210_v45  ;;  %v13298_v30 = vld [vmem:[%s14415_s8 + $0xbec] sm:$0xf]  ;;  %v9597_v32 = vor.u32 %v13142_v7, %v9594_v60 }
 0x37a   : > { %7830 = vmatpush.bf16.msrb.mxu0 %v9261_v25  ;;  %v13202_v25 = vld [vmem:[%s14415_s8 + $0x8ec] sm:$0xf]  ;;  %v10090_v28 = vld [vmem:[%s14415_s8 + $0xaf8] sm:$0xf0]  ;;  %v9341_v58 = vor.u32 %v13078_v42, %v9338_v40 }
 0x37b   : > { %7843 = vmatpush.bf16.msrb.mxu1 %v9389_v51  ;;  %v9834_v51 = vld [vmem:[%s14415_s8 + $0x8f8] sm:$0xf0]  ;;  %v13262_v22 = vld [vmem:[%s14415_s8 + $0xacc] sm:$0xf] }
 0x37c   : > { %7856 = vmatpush.bf16.msrb.mxu2 %v9517_v63  ;;  %v13234_v63 = vld [vmem:[%s14415_s8 + $0x9ec] sm:$0xf]  ;;  %v10218_v31 = vld [vmem:[%s14415_s8 + $0xbf8] sm:$0xf0]  ;;  %v9837_v57 = vor.u32 %v13202_v25, %v9834_v51 }
 0x37d   : > { %7869 = vmatpush.bf16.msrb.mxu3 %v9645_v26  ;;  %v13266_v26 = vld [vmem:[%s14415_s8 + $0xaec] sm:$0xf]  ;;  %v9965_v0 = vor.u32 %v13234_v63, %v9962_v24  ;;  %v9818_v36 = vld [vmem:[%s14415_s8 + $0x8d8] sm:$0xf0] }
 0x37e   : > { %7831 = vmatpush.bf16.msrb.mxu0 %v9245_v35  ;;  %v10093_v34 = vor.u32 %v13266_v26, %v10090_v28  ;;  %v13198_v35 = vld [vmem:[%s14415_s8 + $0x8cc] sm:$0xf]  ;;  %v9946_v39 = vld [vmem:[%s14415_s8 + $0x9d8] sm:$0xf0] }
 0x37f   : > { %7844 = vmatpush.bf16.msrb.mxu1 %v9373_v12  ;;  %v13230_v12 = vld [vmem:[%s14415_s8 + $0x9cc] sm:$0xf]  ;;  %v10074_v23 = vld [vmem:[%s14415_s8 + $0xad8] sm:$0xf0]  ;;  %v9821_v33 = vor.u32 %v13198_v35, %v9818_v36 }
 0x380   : > { %7857 = vmatpush.bf16.msrb.mxu2 %v9501_v37  ;;  %v10221_v37 = vor.u32 %v13298_v30, %v10218_v31  ;;  %v10202_v20 = vld [vmem:[%s14415_s8 + $0xbd8] sm:$0xf0]  ;;  %v9949_v41 = vor.u32 %v13230_v12, %v9946_v39  ;;  %v10077_v27 = vor.u32 %v13262_v22, %v10074_v23  ;;  %v13194_v43 = vld [vmem:[%s14415_s8 + $0x8ac] sm:$0xf] }
 0x381   : > { %7870 = vmatpush.bf16.msrb.mxu3 %v9629_v6  ;;  %v13294_v6 = vld [vmem:[%s14415_s8 + $0xbcc] sm:$0xf]  ;;  %v10058_v42 = vld [vmem:[%s14415_s8 + $0xab8] sm:$0xf0] }
 0x382   : > { %7832 = vmatpush.bf16.msrb.mxu0 %v9229_v29  ;;  %v9802_v29 = vld [vmem:[%s14415_s8 + $0x8b8] sm:$0xf0]  ;;  %v13226_v44 = vld [vmem:[%s14415_s8 + $0x9ac] sm:$0xf]  ;;  %v10205_v45 = vor.u32 %v13294_v6, %v10202_v20 }
 0x383   : > { %7845 = vmatpush.bf16.msrb.mxu1 %v9357_v46  ;;  %v9930_v46 = vld [vmem:[%s14415_s8 + $0x9b8] sm:$0xf0]  ;;  %v13290_v40 = vld [vmem:[%s14415_s8 + $0xbac] sm:$0xf] }
 0x384   : > { %7858 = vmatpush.bf16.msrb.mxu2 %v9485_v52  ;;  %v13258_v52 = vld [vmem:[%s14415_s8 + $0xaac] sm:$0xf]  ;;  %v10186_v55 = vld [vmem:[%s14415_s8 + $0xbb8] sm:$0xf0] }
 0x385   : > { %7871 = vmatpush.bf16.msrb.mxu3 %v9613_v38  ;;  %v9805_v38 = vor.u32 %v13194_v43, %v9802_v29  ;;  %v10061_v59 = vor.u32 %v13258_v52, %v10058_v42  ;;  %v13190_v7 = vld [vmem:[%s14415_s8 + $0x88c] sm:$0xf]  ;;  %v9786_v60 = vld [vmem:[%s14415_s8 + $0x898] sm:$0xf0] }
 0x386   : > { %7833 = vmatpush.bf16.msrb.mxu0 %v9213_v11  ;;  %v9914_v62 = vld [vmem:[%s14415_s8 + $0x998] sm:$0xf0]  ;;  %v13254_v25 = vld [vmem:[%s14415_s8 + $0xa8c] sm:$0xf]  ;;  %v7627_v63 = vpop.f32.mrf.mxu0  ;;  %v9789_v24 = vor.u32 %v13190_v7, %v9786_v60 }
 0x387   : > { %7846 = vmatpush.bf16.msrb.mxu1 %v9341_v58  ;;  %v10042_v51 = vld [vmem:[%s14415_s8 + $0xa98] sm:$0xf0]  ;;  %v13286_v56 = vld [vmem:[%s14415_s8 + $0xb8c] sm:$0xf]  ;;  %v7640_v26 = vpop.f32.mrf.mxu1 }
 0x388   : > { %7859 = vmatpush.bf16.msrb.mxu2 %v9469_v54  ;;  %v10170_v11 = vld [vmem:[%s14415_s8 + $0xb98] sm:$0xf0]  ;;  %v10045_v58 = vor.u32 %v13254_v25, %v10042_v51  ;;  %v13186_v54 = vld [vmem:[%s14415_s8 + $0x86c] sm:$0xf] }
 0x389   : > { %7872 = vmatpush.bf16.msrb.mxu3 %v9597_v32  ;;  %7834 = vmatmul.bf16.vlgmr.msrb.gmra.mxu0 %v14579_v1  ;;  %v13222_v1 = vld [vmem:[%s14415_s8 + $0x98c] sm:$0xf]  ;;  %v9770_v30 = vld [vmem:[%s14415_s8 + $0x878] sm:$0xf0]  ;;  %v10173_v32 = vor.u32 %v13286_v56, %v10170_v11 }
 0x38a   : > { %7878 = vmatpush.bf16.msra.mxu0 %v9837_v57  ;;  %7847 = vmatmul.bf16.vlgmr.msrb.gmra.mxu1 %v14583_v3  ;;  %v7628_v3 = vadd.f32 %v7627_v63, %v16273_v21  ;;  %v9917_v28 = vor.u32 %v13222_v1, %v9914_v62  ;;  %v13218_v31 = vld [vmem:[%s14415_s8 + $0x96c] sm:$0xf]  ;;  %v10026_v21 = vld [vmem:[%s14415_s8 + $0xa78] sm:$0xf0]  ;;  %v9773_v12 = vor.u32 %v13186_v54, %v9770_v30 }
 0x38b   : > { %7891 = vmatpush.bf16.msra.mxu1 %v9965_v0  ;;  %7860 = vmatmul.bf16.vlgmr.msrb.gmra.mxu2 %v14576_v61  ;;  %v9933_v61 = vor.u32 %v13226_v44, %v9930_v46  ;;  %v9898_v0 = vld [vmem:[%s14415_s8 + $0x978] sm:$0xf0]  ;;  %v13282_v35 = vld [vmem:[%s14415_s8 + $0xb6c] sm:$0xf] }
 0x38c   : > { %7904 = vmatpush.bf16.msra.mxu2 %v10093_v34  ;;  %7873 = vmatmul.bf16.vlgmr.msrb.gmra.mxu3 %v14581_v2  ;;  %v10189_v2 = vor.u32 %v13290_v40, %v10186_v55  ;;  %v7641_v57 = vadd.f32 %v7640_v26, %v7628_v3  ;;  %v13250_v34 = vld [vmem:[%s14415_s8 + $0xa6c] sm:$0xf]  ;;  %v10154_v36 = vld [vmem:[%s14415_s8 + $0xb78] sm:$0xf0] }
 0x38d   : > { %7917 = vmatpush.bf16.msra.mxu3 %v10221_v37  ;;  %v9901_v37 = vor.u32 %v13218_v31, %v9898_v0  ;;  %v10029_v39 = vor.u32 %v13250_v34, %v10026_v21  ;;  %v13182_v22 = vld [vmem:[%s14415_s8 + $0x84c] sm:$0xf]  ;;  %v9754_v23 = vld [vmem:[%s14415_s8 + $0x858] sm:$0xf0]  ;;  %v10157_v20 = vor.u32 %v13282_v35, %v10154_v36 }
 0x38e   : > { %7879 = vmatpush.bf16.msra.mxu0 %v9821_v33  ;;  %v13214_v6 = vld [vmem:[%s14415_s8 + $0x94c] sm:$0xf]  ;;  %v7653_v33 = vpop.f32.mrf.mxu2  ;;  %v10010_v43 = vld [vmem:[%s14415_s8 + $0xa58] sm:$0xf0]  ;;  %v7629_v52 = vpop.f32.mrf.mxu0  ;;  %v9757_v42 = vor.u32 %v13182_v22, %v9754_v23 }
 0x38f   : > { %7892 = vmatpush.bf16.msra.mxu1 %v9949_v41  ;;  %v9882_v41 = vld [vmem:[%s14415_s8 + $0x958] sm:$0xf0]  ;;  %v7654_v29 = vadd.f32 %v7653_v33, %v7641_v57  ;;  %v7666_v44 = vpop.f32.mrf.mxu3  ;;  %v7642_v40 = vpop.f32.mrf.mxu1  ;;  %v13210_v60 = vld [vmem:[%s14415_s8 + $0x92c] sm:$0xf] }
 0x390   : > { %7905 = vmatpush.bf16.msra.mxu2 %v10077_v27  ;;  %v13246_v27 = vld [vmem:[%s14415_s8 + $0xa4c] sm:$0xf]  ;;  %v10138_v46 = vld [vmem:[%s14415_s8 + $0xb58] sm:$0xf0] }
 0x391   : > { %7918 = vmatpush.bf16.msra.mxu3 %v10205_v45  ;;  %v13278_v45 = vld [vmem:[%s14415_s8 + $0xb4c] sm:$0xf]  ;;  %v16344_v55 = vadd.f32 %v7666_v44, %v7654_v29  ;;  %v9738_v7 = vld [vmem:[%s14415_s8 + $0x838] sm:$0xf0] }
 0x392   : > { %7880 = vmatpush.bf16.msra.mxu0 %v9805_v38  ;;  %v9885_v38 = vor.u32 %v13214_v6, %v9882_v41  ;;  %v10141_v1 = vor.u32 %v13278_v45, %v10138_v46  ;;  %v13242_v62 = vld [vmem:[%s14415_s8 + $0xa2c] sm:$0xf]  ;;  %v9994_v25 = vld [vmem:[%s14415_s8 + $0xa38] sm:$0xf0] }
 0x393   : > { %7893 = vmatpush.bf16.msra.mxu1 %v9933_v61  ;;  %v10013_v61 = vor.u32 %v13246_v27, %v10010_v43  ;;  %v13274_v51 = vld [vmem:[%s14415_s8 + $0xb2c] sm:$0xf]  ;;  %v10122_v63 = vld [vmem:[%s14415_s8 + $0xb38] sm:$0xf0]  ;;  %v9997_v26 = vor.u32 %v13242_v62, %v9994_v25 }
 0x394   : > { %7906 = vmatpush.bf16.msra.mxu2 %v10061_v59  ;;  %v13178_v59 = vld [vmem:[%s14415_s8 + $0x82c] sm:$0xf]  ;;  %v9722_v3 = vld [vmem:[%s14415_s8 + $0x818] sm:$0xf0]  ;;  %v10125_v30 = vor.u32 %v13274_v51, %v10122_v63 }
 0x395   : > { %7919 = vmatpush.bf16.msra.mxu3 %v10189_v2  ;;  %v9866_v2 = vld [vmem:[%s14415_s8 + $0x938] sm:$0xf0]  ;;  %v9741_v56 = vor.u32 %v13178_v59, %v9738_v7  ;;  %v13174_v11 = vld [vmem:[%s14415_s8 + $0x80c] sm:$0xf] }
 0x396   : > { %7881 = vmatpush.bf16.msra.mxu0 %v9789_v24  ;;  %v9869_v24 = vor.u32 %v13210_v60, %v9866_v2  ;;  %v13238_v54 = vld [vmem:[%s14415_s8 + $0xa0c] sm:$0xf]  ;;  %v9978_v31 = vld [vmem:[%s14415_s8 + $0xa18] sm:$0xf0]  ;;  %v7655_v0 = vpop.f32.mrf.mxu2 }
 0x397   : > { %7894 = vmatpush.bf16.msra.mxu1 %v9917_v28  ;;  %v13206_v28 = vld [vmem:[%s14415_s8 + $0x90c] sm:$0xf]  ;;  %v10106_v57 = vld [vmem:[%s14415_s8 + $0xb18] sm:$0xf0]  ;;  %v7668_v36 = vpop.f32.mrf.mxu3  ;;  %v9981_v6 = vor.u32 %v13238_v54, %v9978_v31 }
 0x398   : > { %7907 = vmatpush.bf16.msra.mxu2 %v10045_v58  ;;  %v9850_v58 = vld [vmem:[%s14415_s8 + $0x918] sm:$0xf0]  ;;  %v13330_v34 = vld [vmem:[%s14415_s8 + $0xcec] sm:$0xf] }
 0x399   : > { %7920 = vmatpush.bf16.msra.mxu3 %v10173_v32  ;;  %v13270_v32 = vld [vmem:[%s14415_s8 + $0xb0c] sm:$0xf]  ;;  %v10346_v21 = vld [vmem:[%s14415_s8 + $0xcf8] sm:$0xf0]  ;;  %v9853_v23 = vor.u32 %v13206_v28, %v9850_v58 }
 0x39a   : > { %7882 = vmatpush.bf16.msra.mxu0 %v9773_v12  ;;  %v13362_v35 = vld [vmem:[%s14415_s8 + $0xdec] sm:$0xf]  ;;  %v9725_v12 = vor.u32 %v13174_v11, %v9722_v3  ;;  %v10602_v22 = vld [vmem:[%s14415_s8 + $0xef8] sm:$0xf0]  ;;  %v10109_v41 = vor.u32 %v13270_v32, %v10106_v57  ;;  %v10349_v27 = vor.u32 %v13330_v34, %v10346_v21 }
 0x39b   : > { %7895 = vmatpush.bf16.msra.mxu1 %v9901_v37  ;;  %v10474_v37 = vld [vmem:[%s14415_s8 + $0xdf8] sm:$0xf0]  ;;  %v13326_v44 = vld [vmem:[%s14415_s8 + $0xccc] sm:$0xf] }
 0x39c   : > { %7908 = vmatpush.bf16.msra.mxu2 %v10029_v39  ;;  %v13394_v39 = vld [vmem:[%s14415_s8 + $0xeec] sm:$0xf]  ;;  %v10730_v33 = vld [vmem:[%s14415_s8 + $0xff8] sm:$0xf0]  ;;  %v10477_v43 = vor.u32 %v13362_v35, %v10474_v37 }
 0x39d   : > { %7921 = vmatpush.bf16.msra.mxu3 %v10157_v20  ;;  %v13426_v20 = vld [vmem:[%s14415_s8 + $0xfec] sm:$0xf]  ;;  %v10605_v29 = vor.u32 %v13394_v39, %v10602_v22  ;;  %v10330_v45 = vld [vmem:[%s14415_s8 + $0xcd8] sm:$0xf0] }
 0x39e   : > { %7883 = vmatpush.bf16.msra.mxu0 %v9757_v42  ;;  %v13358_v46 = vld [vmem:[%s14415_s8 + $0xdcc] sm:$0xf]  ;;  %v10733_v52 = vor.u32 %v13426_v20, %v10730_v33  ;;  %v10458_v42 = vld [vmem:[%s14415_s8 + $0xdd8] sm:$0xf0]  ;;  %v10333_v7 = vor.u32 %v13326_v44, %v10330_v45 }
 0x39f   : > { %7896 = vmatpush.bf16.msra.mxu1 %v9885_v38  ;;  %v13390_v40 = vld [vmem:[%s14415_s8 + $0xecc] sm:$0xf]  ;;  %v10586_v38 = vld [vmem:[%s14415_s8 + $0xed8] sm:$0xf0]  ;;  %v10461_v60 = vor.u32 %v13358_v46, %v10458_v42 }
 0x3a0   : > { %7909 = vmatpush.bf16.msra.mxu2 %v10013_v61  ;;  %v13422_v61 = vld [vmem:[%s14415_s8 + $0xfcc] sm:$0xf]  ;;  %v10714_v59 = vld [vmem:[%s14415_s8 + $0xfd8] sm:$0xf0] }
 0x3a1   : > { %7922 = vmatpush.bf16.msra.mxu3 %v10141_v1  ;;  %v10589_v1 = vor.u32 %v13390_v40, %v10586_v38  ;;  %v13322_v2 = vld [vmem:[%s14415_s8 + $0xcac] sm:$0xf]  ;;  %v10314_v62 = vld [vmem:[%s14415_s8 + $0xcb8] sm:$0xf0]  ;;  %v10717_v51 = vor.u32 %v13422_v61, %v10714_v59 }
 0x3a2   : > { %7884 = vmatpush.bf16.msra.mxu0 %v9741_v56  ;;  %v13354_v25 = vld [vmem:[%s14415_s8 + $0xdac] sm:$0xf]  ;;  %v10442_v63 = vld [vmem:[%s14415_s8 + $0xdb8] sm:$0xf0] }
 0x3a3   : > { %7897 = vmatpush.bf16.msra.mxu1 %v9869_v24  ;;  %v13386_v56 = vld [vmem:[%s14415_s8 + $0xeac] sm:$0xf]  ;;  %v10570_v11 = vld [vmem:[%s14415_s8 + $0xeb8] sm:$0xf0] }
 0x3a4   : > { %7910 = vmatpush.bf16.msra.mxu2 %v9997_v26  ;;  %v13418_v3 = vld [vmem:[%s14415_s8 + $0xfac] sm:$0xf]  ;;  %v10698_v24 = vld [vmem:[%s14415_s8 + $0xfb8] sm:$0xf0]  ;;  %v10445_v26 = vor.u32 %v13354_v25, %v10442_v63  ;;  %v10573_v28 = vor.u32 %v13386_v56, %v10570_v11 }
 0x3a5   : > { %7923 = vmatpush.bf16.msra.mxu3 %v10125_v30  ;;  %v13318_v58 = vld [vmem:[%s14415_s8 + $0xc8c] sm:$0xf]  ;;  %v10298_v54 = vld [vmem:[%s14415_s8 + $0xc98] sm:$0xf0] }
 0x3a6   : > { %7885 = vmatpush.bf16.msra.mxu0 %v9725_v12  ;;  %v10426_v30 = vld [vmem:[%s14415_s8 + $0xd98] sm:$0xf0]  ;;  %v13382_v31 = vld [vmem:[%s14415_s8 + $0xe8c] sm:$0xf]  ;;  %v10301_v21 = vor.u32 %v13318_v58, %v10298_v54 }
 0x3a7   : > { %7898 = vmatpush.bf16.msra.mxu1 %v9853_v23  ;;  %v10554_v32 = vld [vmem:[%s14415_s8 + $0xe98] sm:$0xf0]  ;;  %v13414_v57 = vld [vmem:[%s14415_s8 + $0xf8c] sm:$0xf]  ;;  %v7692_v35 = vpop.f32.mrf.mxu1 }
 0x3a8   : > { %7911 = vmatpush.bf16.msra.mxu2 %v9981_v6  ;;  %v10682_v0 = vld [vmem:[%s14415_s8 + $0xf98] sm:$0xf0]  ;;  %v10557_v12 = vor.u32 %v13382_v31, %v10554_v32  ;;  %v13314_v37 = vld [vmem:[%s14415_s8 + $0xc6c] sm:$0xf] }
 0x3a9   : > { %7924 = vmatpush.bf16.msra.mxu3 %v10109_v41  ;;  %7886 = vmatmul.bf16.vlgmr.msra.gmra.mxu0 %v14669_v13  ;;  %v10317_v13 = vor.u32 %v13322_v2, %v10314_v62  ;;  %v10282_v39 = vld [vmem:[%s14415_s8 + $0xc78] sm:$0xf0]  ;;  %v13346_v22 = vld [vmem:[%s14415_s8 + $0xd6c] sm:$0xf]  ;;  %v10685_v23 = vor.u32 %v13414_v57, %v10682_v0 }
 0x3aa   : > { %7930 = vmatpush.bf16.msrb.mxu0 %v10349_v27  ;;  %7899 = vmatmul.bf16.vlgmr.msra.gmra.mxu1 %v14675_v17  ;;  %v10701_v17 = vor.u32 %v13418_v3, %v10698_v24  ;;  %v10410_v20 = vld [vmem:[%s14415_s8 + $0xd78] sm:$0xf0]  ;;  %v13378_v33 = vld [vmem:[%s14415_s8 + $0xe6c] sm:$0xf] }
 0x3ab   : > { %7943 = vmatpush.bf16.msrb.mxu1 %v10477_v43  ;;  %7912 = vmatmul.bf16.vlgmr.msra.gmra.mxu2 %v14673_v16  ;;  %v13350_v16 = vld [vmem:[%s14415_s8 + $0xd8c] sm:$0xf]  ;;  %v10666_v27 = vld [vmem:[%s14415_s8 + $0xf78] sm:$0xf0]  ;;  %v10285_v43 = vor.u32 %v13314_v37, %v10282_v39 }
 0x3ac   : > { %7956 = vmatpush.bf16.msrb.mxu2 %v10605_v29  ;;  %7925 = vmatmul.bf16.vlgmr.msra.gmra.mxu3 %v14677_v18  ;;  %v7679_v18 = vpop.f32.mrf.mxu0  ;;  %v10429_v36 = vor.u32 %v13350_v16, %v10426_v30  ;;  %v13410_v41 = vld [vmem:[%s14415_s8 + $0xf6c] sm:$0xf]  ;;  %v10413_v29 = vor.u32 %v13346_v22, %v10410_v20  ;;  %v10266_v46 = vld [vmem:[%s14415_s8 + $0xc58] sm:$0xf0] }
 0x3ad   : > { %7969 = vmatpush.bf16.msrb.mxu3 %v10733_v52  ;;  %v7680_v34 = vadd.f32 %v7679_v18, %v16344_v55  ;;  %v10538_v55 = vld [vmem:[%s14415_s8 + $0xe78] sm:$0xf0]  ;;  %v13310_v45 = vld [vmem:[%s14415_s8 + $0xc4c] sm:$0xf]  ;;  %v10669_v42 = vor.u32 %v13410_v41, %v10666_v27 }
 0x3ae   : > { %7931 = vmatpush.bf16.msrb.mxu0 %v10333_v7  ;;  %v10541_v44 = vor.u32 %v13378_v33, %v10538_v55  ;;  %v13342_v52 = vld [vmem:[%s14415_s8 + $0xd4c] sm:$0xf]  ;;  %v7705_v40 = vpop.f32.mrf.mxu2  ;;  %v10394_v38 = vld [vmem:[%s14415_s8 + $0xd58] sm:$0xf0]  ;;  %v10269_v25 = vor.u32 %v13310_v45, %v10266_v46 }
 0x3af   : > { %7944 = vmatpush.bf16.msrb.mxu1 %v10461_v60  ;;  %v7693_v6 = vadd.f32 %v7692_v35, %v7680_v34  ;;  %v13374_v61 = vld [vmem:[%s14415_s8 + $0xe4c] sm:$0xf]  ;;  %v10522_v59 = vld [vmem:[%s14415_s8 + $0xe58] sm:$0xf0]  ;;  %v7718_v60 = vpop.f32.mrf.mxu3  ;;  %v10397_v56 = vor.u32 %v13342_v52, %v10394_v38 }
 0x3b0   : > { %7957 = vmatpush.bf16.msrb.mxu2 %v10589_v1  ;;  %v13406_v1 = vld [vmem:[%s14415_s8 + $0xf4c] sm:$0xf]  ;;  %v10650_v2 = vld [vmem:[%s14415_s8 + $0xf58] sm:$0xf0]  ;;  %v10525_v11 = vor.u32 %v13374_v61, %v10522_v59 }
 0x3b1   : > { %7970 = vmatpush.bf16.msrb.mxu3 %v10717_v51  ;;  %v7706_v7 = vadd.f32 %v7705_v40, %v7693_v6  ;;  %v7694_v51 = vpop.f32.mrf.mxu1  ;;  %v13306_v3 = vld [vmem:[%s14415_s8 + $0xc2c] sm:$0xf]  ;;  %v10250_v24 = vld [vmem:[%s14415_s8 + $0xc38] sm:$0xf0] }
 0x3b2   : > { %7932 = vmatpush.bf16.msrb.mxu0 %v10317_v13  ;;  %v13338_v13 = vld [vmem:[%s14415_s8 + $0xd2c] sm:$0xf]  ;;  %v10506_v54 = vld [vmem:[%s14415_s8 + $0xe38] sm:$0xf0]  ;;  %v10253_v30 = vor.u32 %v13306_v3, %v10250_v24 }
 0x3b3   : > { %7945 = vmatpush.bf16.msrb.mxu1 %v10445_v26  ;;  %v16415_v63 = vadd.f32 %v7718_v60, %v7706_v7  ;;  %v10653_v26 = vor.u32 %v13406_v1, %v10650_v2  ;;  %v13370_v58 = vld [vmem:[%s14415_s8 + $0xe2c] sm:$0xf]  ;;  %v10234_v32 = vld [vmem:[%s14415_s8 + $0xc18] sm:$0xf0] }
 0x3b4   : > { %7958 = vmatpush.bf16.msrb.mxu2 %v10573_v28  ;;  %v7681_v62 = vpop.f32.mrf.mxu0  ;;  %v10378_v28 = vld [vmem:[%s14415_s8 + $0xd38] sm:$0xf0]  ;;  %v13402_v16 = vld [vmem:[%s14415_s8 + $0xf2c] sm:$0xf]  ;;  %v10509_v57 = vor.u32 %v13370_v58, %v10506_v54 }
 0x3b5   : > { %7971 = vmatpush.bf16.msrb.mxu3 %v10701_v17  ;;  %v10634_v17 = vld [vmem:[%s14415_s8 + $0xf38] sm:$0xf0]  ;;  %v13302_v31 = vld [vmem:[%s14415_s8 + $0xc0c] sm:$0xf]  ;;  %v10381_v18 = vor.u32 %v13338_v13, %v10378_v28 }
 0x3b6   : > { %7933 = vmatpush.bf16.msrb.mxu0 %v10301_v21  ;;  %v13334_v0 = vld [vmem:[%s14415_s8 + $0xd0c] sm:$0xf]  ;;  %v10362_v34 = vld [vmem:[%s14415_s8 + $0xd18] sm:$0xf0]  ;;  %v10637_v35 = vor.u32 %v13402_v16, %v10634_v17  ;;  %v7707_v39 = vpop.f32.mrf.mxu2  ;;  %v10237_v33 = vor.u32 %v13302_v31, %v10234_v32 }
 0x3b7   : > { %7946 = vmatpush.bf16.msrb.mxu1 %v10429_v36  ;;  %v13366_v21 = vld [vmem:[%s14415_s8 + $0xe0c] sm:$0xf]  ;;  %v10490_v36 = vld [vmem:[%s14415_s8 + $0xe18] sm:$0xf0]  ;;  %v7720_v20 = vpop.f32.mrf.mxu3 }
 0x3b8   : > { %7959 = vmatpush.bf16.msrb.mxu2 %v10557_v12  ;;  %v13398_v12 = vld [vmem:[%s14415_s8 + $0xf0c] sm:$0xf]  ;;  %v10618_v37 = vld [vmem:[%s14415_s8 + $0xf18] sm:$0xf0] }
 0x3b9   : > { %7972 = vmatpush.bf16.msrb.mxu3 %v10685_v23  ;;  %v13458_v22 = vld [vmem:[%s14415_s8 + $0x10ec] sm:$0xf]  ;;  %v10858_v23 = vld [vmem:[%s14415_s8 + $0x10f8] sm:$0xf0]  ;;  %v10621_v46 = vor.u32 %v13398_v12, %v10618_v37 }
 0x3ba   : > { %7934 = vmatpush.bf16.msrb.mxu0 %v10285_v43  ;;  %v13490_v6 = vld [vmem:[%s14415_s8 + $0x11ec] sm:$0xf]  ;;  %v10986_v55 = vld [vmem:[%s14415_s8 + $0x11f8] sm:$0xf0]  ;;  %v10365_v43 = vor.u32 %v13334_v0, %v10362_v34  ;;  %v10861_v52 = vor.u32 %v13458_v22, %v10858_v23 }
 0x3bb   : > { %7947 = vmatpush.bf16.msrb.mxu1 %v10413_v29  ;;  %v13522_v41 = vld [vmem:[%s14415_s8 + $0x12ec] sm:$0xf]  ;;  %v11114_v27 = vld [vmem:[%s14415_s8 + $0x12f8] sm:$0xf0]  ;;  %v10493_v29 = vor.u32 %v13366_v21, %v10490_v36 }
 0x3bc   : > { %7960 = vmatpush.bf16.msrb.mxu2 %v10541_v44  ;;  %v13554_v44 = vld [vmem:[%s14415_s8 + $0x13ec] sm:$0xf]  ;;  %v11242_v45 = vld [vmem:[%s14415_s8 + $0x13f8] sm:$0xf0]  ;;  %v11117_v40 = vor.u32 %v13522_v41, %v11114_v27 }
 0x3bd   : > { %7973 = vmatpush.bf16.msrb.mxu3 %v10669_v42  ;;  %v10989_v42 = vor.u32 %v13490_v6, %v10986_v55  ;;  %v13454_v38 = vld [vmem:[%s14415_s8 + $0x10cc] sm:$0xf]  ;;  %v10842_v61 = vld [vmem:[%s14415_s8 + $0x10d8] sm:$0xf0]  ;;  %v11245_v7 = vor.u32 %v13554_v44, %v11242_v45 }
 0x3be   : > { %7935 = vmatpush.bf16.msrb.mxu0 %v10269_v25  ;;  %v13486_v59 = vld [vmem:[%s14415_s8 + $0x11cc] sm:$0xf]  ;;  %v10970_v60 = vld [vmem:[%s14415_s8 + $0x11d8] sm:$0xf0]  ;;  %v10845_v51 = vor.u32 %v13454_v38, %v10842_v61 }
 0x3bf   : > { %7948 = vmatpush.bf16.msrb.mxu1 %v10397_v56  ;;  %v13518_v1 = vld [vmem:[%s14415_s8 + $0x12cc] sm:$0xf]  ;;  %v11098_v2 = vld [vmem:[%s14415_s8 + $0x12d8] sm:$0xf0]  ;;  %v10973_v56 = vor.u32 %v13486_v59, %v10970_v60 }
 0x3c0   : > { %7961 = vmatpush.bf16.msrb.mxu2 %v10525_v11  ;;  %v13550_v62 = vld [vmem:[%s14415_s8 + $0x13cc] sm:$0xf]  ;;  %v11226_v25 = vld [vmem:[%s14415_s8 + $0x13d8] sm:$0xf0]  ;;  %v11101_v11 = vor.u32 %v13518_v1, %v11098_v2 }
 0x3c1   : > { %7974 = vmatpush.bf16.msrb.mxu3 %v10653_v26  ;;  %v13450_v3 = vld [vmem:[%s14415_s8 + $0x10ac] sm:$0xf]  ;;  %v10826_v24 = vld [vmem:[%s14415_s8 + $0x10b8] sm:$0xf0]  ;;  %v11229_v26 = vor.u32 %v13550_v62, %v11226_v25 }
 0x3c2   : > { %7936 = vmatpush.bf16.msrb.mxu0 %v10253_v30  ;;  %v13482_v13 = vld [vmem:[%s14415_s8 + $0x11ac] sm:$0xf]  ;;  %v10954_v28 = vld [vmem:[%s14415_s8 + $0x11b8] sm:$0xf0] }
 0x3c3   : > { %7949 = vmatpush.bf16.msrb.mxu1 %v10381_v18  ;;  %v13514_v58 = vld [vmem:[%s14415_s8 + $0x12ac] sm:$0xf]  ;;  %v11082_v54 = vld [vmem:[%s14415_s8 + $0x12b8] sm:$0xf0]  ;;  %v10957_v30 = vor.u32 %v13482_v13, %v10954_v28 }
 0x3c4   : > { %7962 = vmatpush.bf16.msrb.mxu2 %v10509_v57  ;;  %v13546_v16 = vld [vmem:[%s14415_s8 + $0x13ac] sm:$0xf]  ;;  %v11210_v17 = vld [vmem:[%s14415_s8 + $0x13b8] sm:$0xf0]  ;;  %v11085_v31 = vor.u32 %v13514_v58, %v11082_v54 }
 0x3c5   : > { %7975 = vmatpush.bf16.msrb.mxu3 %v10637_v35  ;;  %v13446_v32 = vld [vmem:[%s14415_s8 + $0x108c] sm:$0xf]  ;;  %v10810_v18 = vld [vmem:[%s14415_s8 + $0x1098] sm:$0xf0] }
 0x3c6   : > { %7937 = vmatpush.bf16.msrb.mxu0 %v10237_v33  ;;  %v10938_v57 = vld [vmem:[%s14415_s8 + $0x1198] sm:$0xf0]  ;;  %v13510_v0 = vld [vmem:[%s14415_s8 + $0x128c] sm:$0xf]  ;;  %v10813_v12 = vor.u32 %v13446_v32, %v10810_v18 }
 0x3c7   : > { %7950 = vmatpush.bf16.msrb.mxu1 %v10365_v43  ;;  %v11066_v34 = vld [vmem:[%s14415_s8 + $0x1298] sm:$0xf0]  ;;  %v13542_v21 = vld [vmem:[%s14415_s8 + $0x138c] sm:$0xf]  ;;  %v7744_v37 = vpop.f32.mrf.mxu1 }
 0x3c8   : > { %7963 = vmatpush.bf16.msrb.mxu2 %v10493_v29  ;;  %v11194_v35 = vld [vmem:[%s14415_s8 + $0x1398] sm:$0xf0]  ;;  %v11069_v22 = vor.u32 %v13510_v0, %v11066_v34  ;;  %v13442_v23 = vld [vmem:[%s14415_s8 + $0x106c] sm:$0xf] }
 0x3c9   : > { %7976 = vmatpush.bf16.msrb.mxu3 %v10621_v46  ;;  %7938 = vmatmul.bf16.vlgmr.msrb.gmra.mxu0 %v14735_v47  ;;  %v10829_v47 = vor.u32 %v13450_v3, %v10826_v24  ;;  %v10794_v6 = vld [vmem:[%s14415_s8 + $0x1078] sm:$0xf0]  ;;  %v13474_v20 = vld [vmem:[%s14415_s8 + $0x116c] sm:$0xf]  ;;  %v11197_v33 = vor.u32 %v13542_v21, %v11194_v35 }
 0x3ca   : > { %7982 = vmatpush.bf16.msra.mxu0 %v10861_v52  ;;  %7951 = vmatmul.bf16.vlgmr.msrb.gmra.mxu1 %v14739_v49  ;;  %v11213_v49 = vor.u32 %v13546_v16, %v11210_v17  ;;  %v10922_v41 = vld [vmem:[%s14415_s8 + $0x1178] sm:$0xf0]  ;;  %v13506_v27 = vld [vmem:[%s14415_s8 + $0x126c] sm:$0xf]  ;;  %v10797_v44 = vor.u32 %v13442_v23, %v10794_v6 }
 0x3cb   : > { %7995 = vmatpush.bf16.msra.mxu1 %v10989_v42  ;;  %7964 = vmatmul.bf16.vlgmr.msrb.gmra.mxu2 %v14737_v48  ;;  %v13478_v48 = vld [vmem:[%s14415_s8 + $0x118c] sm:$0xf]  ;;  %v11178_v29 = vld [vmem:[%s14415_s8 + $0x1378] sm:$0xf0]  ;;  %v10925_v45 = vor.u32 %v13474_v20, %v10922_v41 }
 0x3cc   : > { %8008 = vmatpush.bf16.msra.mxu2 %v11117_v40  ;;  %7977 = vmatmul.bf16.vlgmr.msrb.gmra.mxu3 %v14741_v50  ;;  %v7731_v50 = vpop.f32.mrf.mxu0  ;;  %v10941_v39 = vor.u32 %v13478_v48, %v10938_v57  ;;  %v13538_v43 = vld [vmem:[%s14415_s8 + $0x136c] sm:$0xf]  ;;  %v10778_v42 = vld [vmem:[%s14415_s8 + $0x1058] sm:$0xf0] }
 0x3cd   : > { %8021 = vmatpush.bf16.msra.mxu3 %v11245_v7  ;;  %v7732_v36 = vadd.f32 %v7731_v50, %v16415_v63  ;;  %v11050_v63 = vld [vmem:[%s14415_s8 + $0x1278] sm:$0xf0]  ;;  %v13438_v52 = vld [vmem:[%s14415_s8 + $0x104c] sm:$0xf]  ;;  %v11181_v38 = vor.u32 %v13538_v43, %v11178_v29 }
 0x3ce   : > { %7983 = vmatpush.bf16.msra.mxu0 %v10845_v51  ;;  %v11053_v46 = vor.u32 %v13506_v27, %v11050_v63  ;;  %v13470_v40 = vld [vmem:[%s14415_s8 + $0x114c] sm:$0xf]  ;;  %v7757_v61 = vpop.f32.mrf.mxu2  ;;  %v10906_v59 = vld [vmem:[%s14415_s8 + $0x1158] sm:$0xf0] }
 0x3cf   : > { %7996 = vmatpush.bf16.msra.mxu1 %v10973_v56  ;;  %v7745_v55 = vadd.f32 %v7744_v37, %v7732_v36  ;;  %v13502_v7 = vld [vmem:[%s14415_s8 + $0x124c] sm:$0xf]  ;;  %v11034_v60 = vld [vmem:[%s14415_s8 + $0x1258] sm:$0xf0]  ;;  %v7770_v2 = vpop.f32.mrf.mxu3  ;;  %v10781_v56 = vor.u32 %v13438_v52, %v10778_v42  ;;  %v10909_v24 = vor.u32 %v13470_v40, %v10906_v59 }
 0x3d0   : > { %8009 = vmatpush.bf16.msra.mxu2 %v11101_v11  ;;  %v13534_v62 = vld [vmem:[%s14415_s8 + $0x134c] sm:$0xf]  ;;  %v11162_v25 = vld [vmem:[%s14415_s8 + $0x1358] sm:$0xf0]  ;;  %v7746_v11 = vpop.f32.mrf.mxu1  ;;  %v11037_v13 = vor.u32 %v13502_v7, %v11034_v60 }
 0x3d1   : > { %8022 = vmatpush.bf16.msra.mxu3 %v11229_v26  ;;  %v7758_v1 = vadd.f32 %v7757_v61, %v7745_v55  ;;  %v13434_v26 = vld [vmem:[%s14415_s8 + $0x102c] sm:$0xf]  ;;  %v10762_v28 = vld [vmem:[%s14415_s8 + $0x1038] sm:$0xf0]  ;;  %v11165_v54 = vor.u32 %v13534_v62, %v11162_v25 }
 0x3d2   : > { %7984 = vmatpush.bf16.msra.mxu0 %v10829_v47  ;;  %v13466_v58 = vld [vmem:[%s14415_s8 + $0x112c] sm:$0xf]  ;;  %v10890_v16 = vld [vmem:[%s14415_s8 + $0x1138] sm:$0xf0]  ;;  %v10765_v32 = vor.u32 %v13434_v26, %v10762_v28 }
 0x3d3   : > { %7997 = vmatpush.bf16.msra.mxu1 %v10957_v30  ;;  %v16486_v3 = vadd.f32 %v7770_v2, %v7758_v1  ;;  %v13498_v17 = vld [vmem:[%s14415_s8 + $0x122c] sm:$0xf]  ;;  %v11018_v47 = vld [vmem:[%s14415_s8 + $0x1238] sm:$0xf0] }
 0x3d4   : > { %8010 = vmatpush.bf16.msra.mxu2 %v11085_v31  ;;  %v7733_v51 = vpop.f32.mrf.mxu0  ;;  %v13530_v30 = vld [vmem:[%s14415_s8 + $0x132c] sm:$0xf]  ;;  %v11146_v31 = vld [vmem:[%s14415_s8 + $0x1338] sm:$0xf0]  ;;  %v11021_v57 = vor.u32 %v13498_v17, %v11018_v47 }
 0x3d5   : > { %8023 = vmatpush.bf16.msra.mxu3 %v11213_v49  ;;  %v13430_v18 = vld [vmem:[%s14415_s8 + $0x100c] sm:$0xf]  ;;  %v10746_v48 = vld [vmem:[%s14415_s8 + $0x1018] sm:$0xf0]  ;;  %v10893_v49 = vor.u32 %v13466_v58, %v10890_v16  ;;  %v11149_v21 = vor.u32 %v13530_v30, %v11146_v31 }
 0x3d6   : > { %7985 = vmatpush.bf16.msra.mxu0 %v10813_v12  ;;  %v13462_v0 = vld [vmem:[%s14415_s8 + $0x110c] sm:$0xf]  ;;  %v10874_v34 = vld [vmem:[%s14415_s8 + $0x1118] sm:$0xf0]  ;;  %v7759_v37 = vpop.f32.mrf.mxu2  ;;  %v10749_v20 = vor.u32 %v13430_v18, %v10746_v48 }
 0x3d7   : > { %7998 = vmatpush.bf16.msra.mxu1 %v10941_v39  ;;  %v13494_v50 = vld [vmem:[%s14415_s8 + $0x120c] sm:$0xf]  ;;  %v11002_v35 = vld [vmem:[%s14415_s8 + $0x1218] sm:$0xf0]  ;;  %v7772_v6 = vpop.f32.mrf.mxu3  ;;  %v10877_v27 = vor.u32 %v13462_v0, %v10874_v34 }
 0x3d8   : > { %8011 = vmatpush.bf16.msra.mxu2 %v11069_v22  ;;  %v13526_v36 = vld [vmem:[%s14415_s8 + $0x130c] sm:$0xf]  ;;  %v11130_v12 = vld [vmem:[%s14415_s8 + $0x1318] sm:$0xf0]  ;;  %v11005_v63 = vor.u32 %v13494_v50, %v11002_v35 }
 0x3d9   : > { %8024 = vmatpush.bf16.msra.mxu3 %v11197_v33  ;;  %v13586_v39 = vld [vmem:[%s14415_s8 + $0x14ec] sm:$0xf]  ;;  %v11370_v22 = vld [vmem:[%s14415_s8 + $0x14f8] sm:$0xf0] }
 0x3da   : > { %7986 = vmatpush.bf16.msra.mxu0 %v10797_v44  ;;  %v13618_v23 = vld [vmem:[%s14415_s8 + $0x15ec] sm:$0xf]  ;;  %v11498_v33 = vld [vmem:[%s14415_s8 + $0x15f8] sm:$0xf0]  ;;  %v11133_v44 = vor.u32 %v13526_v36, %v11130_v12 }
 0x3db   : > { %7999 = vmatpush.bf16.msra.mxu1 %v10925_v45  ;;  %v13650_v55 = vld [vmem:[%s14415_s8 + $0x16ec] sm:$0xf]  ;;  %v11626_v41 = vld [vmem:[%s14415_s8 + $0x16f8] sm:$0xf0]  ;;  %v11373_v45 = vor.u32 %v13586_v39, %v11370_v22 }
 0x3dc   : > { %8012 = vmatpush.bf16.msra.mxu2 %v11053_v46  ;;  %v13682_v43 = vld [vmem:[%s14415_s8 + $0x17ec] sm:$0xf]  ;;  %v11754_v29 = vld [vmem:[%s14415_s8 + $0x17f8] sm:$0xf0]  ;;  %v11501_v46 = vor.u32 %v13618_v23, %v11498_v33  ;;  %v11629_v52 = vor.u32 %v13650_v55, %v11626_v41 }
 0x3dd   : > { %8025 = vmatpush.bf16.msra.mxu3 %v11181_v38  ;;  %v13582_v42 = vld [vmem:[%s14415_s8 + $0x14cc] sm:$0xf]  ;;  %v11354_v40 = vld [vmem:[%s14415_s8 + $0x14d8] sm:$0xf0]  ;;  %v11757_v61 = vor.u32 %v13682_v43, %v11754_v29 }
 0x3de   : > { %7987 = vmatpush.bf16.msra.mxu0 %v10781_v56  ;;  %v13614_v38 = vld [vmem:[%s14415_s8 + $0x15cc] sm:$0xf]  ;;  %v11482_v59 = vld [vmem:[%s14415_s8 + $0x15d8] sm:$0xf0]  ;;  %v11357_v62 = vor.u32 %v13582_v42, %v11354_v40 }
 0x3df   : > { %8000 = vmatpush.bf16.msra.mxu1 %v10909_v24  ;;  %v13646_v7 = vld [vmem:[%s14415_s8 + $0x16cc] sm:$0xf]  ;;  %v11610_v60 = vld [vmem:[%s14415_s8 + $0x16d8] sm:$0xf0]  ;;  %v11485_v25 = vor.u32 %v13614_v38, %v11482_v59 }
 0x3e0   : > { %8013 = vmatpush.bf16.msra.mxu2 %v11037_v13  ;;  %v13678_v1 = vld [vmem:[%s14415_s8 + $0x17cc] sm:$0xf]  ;;  %v11738_v2 = vld [vmem:[%s14415_s8 + $0x17d8] sm:$0xf0]  ;;  %v11613_v51 = vor.u32 %v13646_v7, %v11610_v60 }
 0x3e1   : > { %8026 = vmatpush.bf16.msra.mxu3 %v11165_v54  ;;  %v13578_v56 = vld [vmem:[%s14415_s8 + $0x14ac] sm:$0xf]  ;;  %v11338_v11 = vld [vmem:[%s14415_s8 + $0x14b8] sm:$0xf0]  ;;  %v11741_v13 = vor.u32 %v13678_v1, %v11738_v2 }
 0x3e2   : > { %7988 = vmatpush.bf16.msra.mxu0 %v10765_v32  ;;  %v13610_v24 = vld [vmem:[%s14415_s8 + $0x15ac] sm:$0xf]  ;;  %v11466_v26 = vld [vmem:[%s14415_s8 + $0x15b8] sm:$0xf0] }
 0x3e3   : > { %8001 = vmatpush.bf16.msra.mxu1 %v10893_v49  ;;  %v13642_v28 = vld [vmem:[%s14415_s8 + $0x16ac] sm:$0xf]  ;;  %v11594_v58 = vld [vmem:[%s14415_s8 + $0x16b8] sm:$0xf0]  ;;  %v11469_v17 = vor.u32 %v13610_v24, %v11466_v26 }
 0x3e4   : > { %8014 = vmatpush.bf16.msra.mxu2 %v11021_v57  ;;  %v13674_v54 = vld [vmem:[%s14415_s8 + $0x17ac] sm:$0xf]  ;;  %v11722_v16 = vld [vmem:[%s14415_s8 + $0x17b8] sm:$0xf0]  ;;  %v11597_v47 = vor.u32 %v13642_v28, %v11594_v58 }
 0x3e5   : > { %8027 = vmatpush.bf16.msra.mxu3 %v11149_v21  ;;  %v13574_v30 = vld [vmem:[%s14415_s8 + $0x148c] sm:$0xf]  ;;  %v11322_v31 = vld [vmem:[%s14415_s8 + $0x1498] sm:$0xf0] }
 0x3e6   : > { %7989 = vmatpush.bf16.msra.mxu0 %v10749_v20  ;;  %v11450_v32 = vld [vmem:[%s14415_s8 + $0x1598] sm:$0xf0]  ;;  %v13638_v18 = vld [vmem:[%s14415_s8 + $0x168c] sm:$0xf]  ;;  %v11325_v57 = vor.u32 %v13574_v30, %v11322_v31  ;;  %v7783_v0 = vpop.f32.mrf.mxu0 }
 0x3e7   : > { %8002 = vmatpush.bf16.msra.mxu1 %v10877_v27  ;;  %v11578_v48 = vld [vmem:[%s14415_s8 + $0x1698] sm:$0xf0]  ;;  %v13570_v21 = vld [vmem:[%s14415_s8 + $0x146c] sm:$0xf]  ;;  %v7796_v12 = vpop.f32.mrf.mxu1 }
 0x3e8   : > { %8015 = vmatpush.bf16.msra.mxu2 %v11005_v63  ;;  %v11706_v49 = vld [vmem:[%s14415_s8 + $0x1798] sm:$0xf0]  ;;  %v11581_v50 = vor.u32 %v13638_v18, %v11578_v48  ;;  %v13602_v36 = vld [vmem:[%s14415_s8 + $0x156c] sm:$0xf]  ;;  %v7797_v6 = vadd.f32 %v7796_v12, %v7783_v0 }
 0x3e9   : > { %8028 = vmatpush.bf16.msra.mxu3 %v11133_v44  ;;  %7990 = vmatmul.bf16.vlgmr.msra.gmra.mxu0 %v14822_v10  ;;  %v11341_v10 = vor.u32 %v13578_v56, %v11338_v11  ;;  %v11306_v35 = vld [vmem:[%s14415_s8 + $0x1478] sm:$0xf0]  ;;  %v13634_v22 = vld [vmem:[%s14415_s8 + $0x166c] sm:$0xf] }
 0x3ea   : > { %8034 = vmatpush.bf16.msrb.mxu0 %v11373_v45  ;;  %8003 = vmatmul.bf16.vlgmr.msra.gmra.mxu1 %v14828_v15  ;;  %v11725_v15 = vor.u32 %v13674_v54, %v11722_v16  ;;  %v11434_v39 = vld [vmem:[%s14415_s8 + $0x1578] sm:$0xf0]  ;;  %v13666_v20 = vld [vmem:[%s14415_s8 + $0x176c] sm:$0xf]  ;;  %v11309_v55 = vor.u32 %v13570_v21, %v11306_v35 }
 0x3eb   : > { %8047 = vmatpush.bf16.msrb.mxu1 %v11501_v46  ;;  %8016 = vmatmul.bf16.vlgmr.msra.gmra.mxu2 %v14826_v14  ;;  %v13606_v14 = vld [vmem:[%s14415_s8 + $0x158c] sm:$0xf]  ;;  %v11562_v23 = vld [vmem:[%s14415_s8 + $0x1678] sm:$0xf0]  ;;  %v11437_v41 = vor.u32 %v13602_v36, %v11434_v39 }
 0x3ec   : > { %8060 = vmatpush.bf16.msrb.mxu2 %v11629_v52  ;;  %8029 = vmatmul.bf16.vlgmr.msra.gmra.mxu3 %v14830_v19  ;;  %v13670_v19 = vld [vmem:[%s14415_s8 + $0x178c] sm:$0xf]  ;;  %v11453_v34 = vor.u32 %v13606_v14, %v11450_v32  ;;  %v11690_v33 = vld [vmem:[%s14415_s8 + $0x1778] sm:$0xf0]  ;;  %v11565_v27 = vor.u32 %v13634_v22, %v11562_v23 }
 0x3ed   : > { %8073 = vmatpush.bf16.msrb.mxu3 %v11757_v61  ;;  %v11709_v37 = vor.u32 %v13670_v19, %v11706_v49  ;;  %v13566_v63 = vld [vmem:[%s14415_s8 + $0x144c] sm:$0xf]  ;;  %v11290_v43 = vld [vmem:[%s14415_s8 + $0x1458] sm:$0xf0]  ;;  %v11693_v45 = vor.u32 %v13666_v20, %v11690_v33 }
 0x3ee   : > { %8035 = vmatpush.bf16.msrb.mxu0 %v11357_v62  ;;  %v13598_v29 = vld [vmem:[%s14415_s8 + $0x154c] sm:$0xf]  ;;  %v7809_v44 = vpop.f32.mrf.mxu2  ;;  %v11418_v46 = vld [vmem:[%s14415_s8 + $0x1558] sm:$0xf0]  ;;  %v11293_v7 = vor.u32 %v13566_v63, %v11290_v43  ;;  %v7785_v1 = vpop.f32.mrf.mxu0 }
 0x3ef   : > { %8048 = vmatpush.bf16.msrb.mxu1 %v11485_v25  ;;  %v13630_v52 = vld [vmem:[%s14415_s8 + $0x164c] sm:$0xf]  ;;  %v11546_v42 = vld [vmem:[%s14415_s8 + $0x1658] sm:$0xf0]  ;;  %v7810_v40 = vadd.f32 %v7809_v44, %v7797_v6  ;;  %v7822_v38 = vpop.f32.mrf.mxu3  ;;  %v11421_v2 = vor.u32 %v13598_v29, %v11418_v46  ;;  %v7798_v11 = vpop.f32.mrf.mxu1 }
 0x3f0   : > { %8061 = vmatpush.bf16.msrb.mxu2 %v11613_v51  ;;  %v13662_v61 = vld [vmem:[%s14415_s8 + $0x174c] sm:$0xf]  ;;  %v11674_v59 = vld [vmem:[%s14415_s8 + $0x1758] sm:$0xf0]  ;;  %v11549_v62 = vor.u32 %v13630_v52, %v11546_v42 }
 0x3f1   : > { %8074 = vmatpush.bf16.msrb.mxu3 %v11741_v13  ;;  %v16556_v60 = vadd.f32 %v7822_v38, %v7810_v40  ;;  %v13562_v25 = vld [vmem:[%s14415_s8 + $0x142c] sm:$0xf]  ;;  %v11274_v51 = vld [vmem:[%s14415_s8 + $0x1438] sm:$0xf0]  ;;  %v11677_v24 = vor.u32 %v13662_v61, %v11674_v59 }
 0x3f2   : > { %8036 = vmatpush.bf16.msrb.mxu0 %v11341_v10  ;;  %v13594_v56 = vld [vmem:[%s14415_s8 + $0x152c] sm:$0xf]  ;;  %v11402_v13 = vld [vmem:[%s14415_s8 + $0x1538] sm:$0xf0]  ;;  %v11277_v16 = vor.u32 %v13562_v25, %v11274_v51 }
 0x3f3   : > { %8049 = vmatpush.bf16.msrb.mxu1 %v11469_v17  ;;  %v13626_v26 = vld [vmem:[%s14415_s8 + $0x162c] sm:$0xf]  ;;  %v11530_v28 = vld [vmem:[%s14415_s8 + $0x1638] sm:$0xf0] }
 0x3f4   : > { %8062 = vmatpush.bf16.msrb.mxu2 %v11597_v47  ;;  %v13658_v58 = vld [vmem:[%s14415_s8 + $0x172c] sm:$0xf]  ;;  %v11658_v54 = vld [vmem:[%s14415_s8 + $0x1738] sm:$0xf0]  ;;  %v11405_v47 = vor.u32 %v13594_v56, %v11402_v13  ;;  %v11533_v30 = vor.u32 %v13626_v26, %v11530_v28 }
 0x3f5   : > { %8075 = vmatpush.bf16.msrb.mxu3 %v11725_v15  ;;  %v13558_v10 = vld [vmem:[%s14415_s8 + $0x140c] sm:$0xf]  ;;  %v11258_v17 = vld [vmem:[%s14415_s8 + $0x1418] sm:$0xf0]  ;;  %v11661_v18 = vor.u32 %v13658_v58, %v11658_v54 }
 0x3f6   : > { %8037 = vmatpush.bf16.msrb.mxu0 %v11325_v57  ;;  %v13590_v31 = vld [vmem:[%s14415_s8 + $0x150c] sm:$0xf]  ;;  %v11386_v14 = vld [vmem:[%s14415_s8 + $0x1518] sm:$0xf0]  ;;  %v7811_v32 = vpop.f32.mrf.mxu2  ;;  %v11261_v21 = vor.u32 %v13558_v10, %v11258_v17 }
 0x3f7   : > { %8050 = vmatpush.bf16.msrb.mxu1 %v11453_v34  ;;  %v13622_v15 = vld [vmem:[%s14415_s8 + $0x160c] sm:$0xf]  ;;  %v11514_v48 = vld [vmem:[%s14415_s8 + $0x1618] sm:$0xf0]  ;;  %v7824_v57 = vpop.f32.mrf.mxu3 }
 0x3f8   : > { %8063 = vmatpush.bf16.msrb.mxu2 %v11581_v50  ;;  %v13654_v19 = vld [vmem:[%s14415_s8 + $0x170c] sm:$0xf]  ;;  %v11642_v49 = vld [vmem:[%s14415_s8 + $0x1718] sm:$0xf0]  ;;  %v11517_v39 = vor.u32 %v13622_v15, %v11514_v48 }
 0x3f9   : > { %8076 = vmatpush.bf16.msrb.mxu3 %v11709_v37  ;;  %v13714_v0 = vld [vmem:[%s14415_s8 + $0x18ec] sm:$0xf]  ;;  %v11882_v34 = vld [vmem:[%s14415_s8 + $0x18f8] sm:$0xf0]  ;;  %v11389_v37 = vor.u32 %v13590_v31, %v11386_v14  ;;  %v11645_v6 = vor.u32 %v13654_v19, %v11642_v49 }
 0x3fa   : > { %8038 = vmatpush.bf16.msrb.mxu0 %v11309_v55  ;;  %v13746_v50 = vld [vmem:[%s14415_s8 + $0x19ec] sm:$0xf]  ;;  %v12010_v35 = vld [vmem:[%s14415_s8 + $0x19f8] sm:$0xf0]  ;;  %v11885_v20 = vor.u32 %v13714_v0, %v11882_v34 }
 0x3fb   : > { %8051 = vmatpush.bf16.msrb.mxu1 %v11437_v41  ;;  %v13778_v36 = vld [vmem:[%s14415_s8 + $0x1aec] sm:$0xf]  ;;  %v12138_v12 = vld [vmem:[%s14415_s8 + $0x1af8] sm:$0xf0]  ;;  %v12013_v33 = vor.u32 %v13746_v50, %v12010_v35 }
 0x3fc   : > { %8064 = vmatpush.bf16.msrb.mxu2 %v11565_v27  ;;  %v13810_v22 = vld [vmem:[%s14415_s8 + $0x1bec] sm:$0xf]  ;;  %v12266_v23 = vld [vmem:[%s14415_s8 + $0x1bf8] sm:$0xf0]  ;;  %v12141_v55 = vor.u32 %v13778_v36, %v12138_v12 }
 0x3fd   : > { %8077 = vmatpush.bf16.msrb.mxu3 %v11693_v45  ;;  %v13710_v41 = vld [vmem:[%s14415_s8 + $0x18cc] sm:$0xf]  ;;  %v11866_v27 = vld [vmem:[%s14415_s8 + $0x18d8] sm:$0xf0]  ;;  %v12269_v43 = vor.u32 %v13810_v22, %v12266_v23 }
 0x3fe   : > { %8039 = vmatpush.bf16.msrb.mxu0 %v11293_v7  ;;  %v13742_v63 = vld [vmem:[%s14415_s8 + $0x19cc] sm:$0xf]  ;;  %v11994_v29 = vld [vmem:[%s14415_s8 + $0x19d8] sm:$0xf0]  ;;  %v11869_v42 = vor.u32 %v13710_v41, %v11866_v27 }
 0x3ff   : > { %8052 = vmatpush.bf16.msrb.mxu1 %v11421_v2  ;;  %v13774_v44 = vld [vmem:[%s14415_s8 + $0x1acc] sm:$0xf]  ;;  %v12122_v45 = vld [vmem:[%s14415_s8 + $0x1ad8] sm:$0xf0]  ;;  %v11997_v40 = vor.u32 %v13742_v63, %v11994_v29 }
 0x400   : > { %8065 = vmatpush.bf16.msrb.mxu2 %v11549_v62  ;;  %v13806_v46 = vld [vmem:[%s14415_s8 + $0x1bcc] sm:$0xf]  ;;  %v12250_v52 = vld [vmem:[%s14415_s8 + $0x1bd8] sm:$0xf0]  ;;  %v12125_v38 = vor.u32 %v13774_v44, %v12122_v45 }
 0x401   : > { %8078 = vmatpush.bf16.msrb.mxu3 %v11677_v24  ;;  %v13706_v61 = vld [vmem:[%s14415_s8 + $0x18ac] sm:$0xf]  ;;  %v11850_v59 = vld [vmem:[%s14415_s8 + $0x18b8] sm:$0xf0]  ;;  %v12253_v1 = vor.u32 %v13806_v46, %v12250_v52 }
 0x402   : > { %8040 = vmatpush.bf16.msrb.mxu0 %v11277_v16  ;;  %v13738_v7 = vld [vmem:[%s14415_s8 + $0x19ac] sm:$0xf]  ;;  %v11978_v2 = vld [vmem:[%s14415_s8 + $0x19b8] sm:$0xf0] }
 0x403   : > { %8053 = vmatpush.bf16.msrb.mxu1 %v11405_v47  ;;  %v13770_v62 = vld [vmem:[%s14415_s8 + $0x1aac] sm:$0xf]  ;;  %v12106_v25 = vld [vmem:[%s14415_s8 + $0x1ab8] sm:$0xf0]  ;;  %v11981_v11 = vor.u32 %v13738_v7, %v11978_v2 }
 0x404   : > { %8066 = vmatpush.bf16.msrb.mxu2 %v11533_v30  ;;  %v13802_v51 = vld [vmem:[%s14415_s8 + $0x1bac] sm:$0xf]  ;;  %v12234_v56 = vld [vmem:[%s14415_s8 + $0x1bb8] sm:$0xf0]  ;;  %v12109_v24 = vor.u32 %v13770_v62, %v12106_v25 }
 0x405   : > { %8079 = vmatpush.bf16.msrb.mxu3 %v11661_v18  ;;  %v13702_v13 = vld [vmem:[%s14415_s8 + $0x188c] sm:$0xf]  ;;  %v11834_v26 = vld [vmem:[%s14415_s8 + $0x1898] sm:$0xf0] }
 0x406   : > { %8041 = vmatpush.bf16.msrb.mxu0 %v11261_v21  ;;  %v11962_v28 = vld [vmem:[%s14415_s8 + $0x1998] sm:$0xf0]  ;;  %v13766_v58 = vld [vmem:[%s14415_s8 + $0x1a8c] sm:$0xf]  ;;  %v11837_v10 = vor.u32 %v13702_v13, %v11834_v26  ;;  %v7835_v17 = vpop.f32.mrf.mxu0 }
 0x407   : > { %8054 = vmatpush.bf16.msrb.mxu1 %v11389_v37  ;;  %v12090_v54 = vld [vmem:[%s14415_s8 + $0x1a98] sm:$0xf0]  ;;  %v13798_v16 = vld [vmem:[%s14415_s8 + $0x1b8c] sm:$0xf]  ;;  %v7836_v32 = vadd.f32 %v7835_v17, %v16556_v60  ;;  %v7848_v18 = vpop.f32.mrf.mxu1 }
 0x408   : > { %8067 = vmatpush.bf16.msrb.mxu2 %v11517_v39  ;;  %v12093_v30 = vor.u32 %v13766_v58, %v12090_v54  ;;  %v13698_v31 = vld [vmem:[%s14415_s8 + $0x186c] sm:$0xf]  ;;  %v11818_v14 = vld [vmem:[%s14415_s8 + $0x1878] sm:$0xf0] }
 0x409   : > { %8080 = vmatpush.bf16.msrb.mxu3 %v11645_v6  ;;  %8042 = vmatmul.bf16.vlgmr.msrb.gmra.mxu0 %v14888_v4  ;;  %v11853_v4 = vor.u32 %v13706_v61, %v11850_v59  ;;  %v13730_v15 = vld [vmem:[%s14415_s8 + $0x196c] sm:$0xf]  ;;  %v11946_v19 = vld [vmem:[%s14415_s8 + $0x1978] sm:$0xf0]  ;;  %v7849_v50 = vadd.f32 %v7848_v18, %v7836_v32  ;;  %v11821_v21 = vor.u32 %v13698_v31, %v11818_v14 }
 0x40a   : > { %8086 = vmatpush.bf16.msra.mxu0 %v11885_v20  ;;  %8055 = vmatmul.bf16.vlgmr.msrb.gmra.mxu1 %v14892_v8  ;;  %v12237_v8 = vor.u32 %v13802_v51, %v12234_v56  ;;  %v13762_v49 = vld [vmem:[%s14415_s8 + $0x1a6c] sm:$0xf]  ;;  %v12074_v57 = vld [vmem:[%s14415_s8 + $0x1a78] sm:$0xf0]  ;;  %v11949_v60 = vor.u32 %v13730_v15, %v11946_v19 }
 0x40b   : > { %8099 = vmatpush.bf16.msra.mxu1 %v12013_v33  ;;  %8068 = vmatmul.bf16.vlgmr.msrb.gmra.mxu2 %v14890_v5  ;;  %v13734_v5 = vld [vmem:[%s14415_s8 + $0x198c] sm:$0xf]  ;;  %v12202_v34 = vld [vmem:[%s14415_s8 + $0x1b78] sm:$0xf0]  ;;  %v12077_v35 = vor.u32 %v13762_v49, %v12074_v57 }
 0x40c   : > { %8112 = vmatpush.bf16.msra.mxu2 %v12141_v55  ;;  %8081 = vmatmul.bf16.vlgmr.msrb.gmra.mxu3 %v14894_v9  ;;  %v12218_v9 = vld [vmem:[%s14415_s8 + $0x1b98] sm:$0xf0]  ;;  %v11965_v47 = vor.u32 %v13734_v5, %v11962_v28  ;;  %v13794_v0 = vld [vmem:[%s14415_s8 + $0x1b6c] sm:$0xf] }
 0x40d   : > { %8125 = vmatpush.bf16.msra.mxu3 %v12269_v43  ;;  %v12221_v48 = vor.u32 %v13798_v16, %v12218_v9  ;;  %v13694_v36 = vld [vmem:[%s14415_s8 + $0x184c] sm:$0xf]  ;;  %v11802_v12 = vld [vmem:[%s14415_s8 + $0x1858] sm:$0xf0]  ;;  %v12205_v22 = vor.u32 %v13794_v0, %v12202_v34 }
 0x40e   : > { %8087 = vmatpush.bf16.msra.mxu0 %v11869_v42  ;;  %v13726_v37 = vld [vmem:[%s14415_s8 + $0x194c] sm:$0xf]  ;;  %v7861_v39 = vpop.f32.mrf.mxu2  ;;  %v11930_v23 = vld [vmem:[%s14415_s8 + $0x1958] sm:$0xf0]  ;;  %v11805_v63 = vor.u32 %v13694_v36, %v11802_v12  ;;  %v7837_v29 = vpop.f32.mrf.mxu0 }
 0x40f   : > { %8100 = vmatpush.bf16.msra.mxu1 %v11997_v40  ;;  %v13758_v6 = vld [vmem:[%s14415_s8 + $0x1a4c] sm:$0xf]  ;;  %v12058_v20 = vld [vmem:[%s14415_s8 + $0x1a58] sm:$0xf0]  ;;  %v7862_v33 = vadd.f32 %v7861_v39, %v7849_v50  ;;  %v7874_v55 = vpop.f32.mrf.mxu3  ;;  %v11933_v44 = vor.u32 %v13726_v37, %v11930_v23  ;;  %v7850_v40 = vpop.f32.mrf.mxu1 }
 0x410   : > { %8113 = vmatpush.bf16.msra.mxu2 %v12125_v38  ;;  %v13790_v41 = vld [vmem:[%s14415_s8 + $0x1b4c] sm:$0xf]  ;;  %v12186_v27 = vld [vmem:[%s14415_s8 + $0x1b58] sm:$0xf0]  ;;  %v12061_v45 = vor.u32 %v13758_v6, %v12058_v20 }
 0x411   : > { %8126 = vmatpush.bf16.msra.mxu3 %v12253_v1  ;;  %v16627_v43 = vadd.f32 %v7874_v55, %v7862_v33  ;;  %v13690_v46 = vld [vmem:[%s14415_s8 + $0x182c] sm:$0xf]  ;;  %v11786_v52 = vld [vmem:[%s14415_s8 + $0x1838] sm:$0xf0]  ;;  %v12189_v38 = vor.u32 %v13790_v41, %v12186_v27  ;;  %v14073_v55 = vld [vmem:[#allocation1] sm:$0xff] }
 0x412   : > { %8088 = vmatpush.bf16.msra.mxu0 %v11853_v4  ;;  %v13722_v42 = vld [vmem:[%s14415_s8 + $0x192c] sm:$0xf]  ;;  %v11914_v61 = vld [vmem:[%s14415_s8 + $0x1938] sm:$0xf0]  ;;  %v11789_v62 = vor.u32 %v13690_v46, %v11786_v52 }
 0x413   : > { %8101 = vmatpush.bf16.msra.mxu1 %v11981_v11  ;;  %v13754_v59 = vld [vmem:[%s14415_s8 + $0x1a2c] sm:$0xf]  ;;  %v12042_v7 = vld [vmem:[%s14415_s8 + $0x1a38] sm:$0xf0]  ;;  %v11917_v56 = vor.u32 %v13722_v42, %v11914_v61 }
 0x414   : > { %8114 = vmatpush.bf16.msra.mxu2 %v12109_v24  ;;  %v13786_v1 = vld [vmem:[%s14415_s8 + $0x1b2c] sm:$0xf]  ;;  %v12170_v2 = vld [vmem:[%s14415_s8 + $0x1b38] sm:$0xf0]  ;;  %v12045_v4 = vor.u32 %v13754_v59, %v12042_v7 }
 0x415   : > { %8127 = vmatpush.bf16.msra.mxu3 %v12237_v8  ;;  %v13686_v25 = vld [vmem:[%s14415_s8 + $0x180c] sm:$0xf]  ;;  %v11770_v51 = vld [vmem:[%s14415_s8 + $0x1818] sm:$0xf0]  ;;  %v12173_v5 = vor.u32 %v13786_v1, %v12170_v2 }
 0x416   : > { %8089 = vmatpush.bf16.msra.mxu0 %v11837_v10  ;;  %v13718_v11 = vld [vmem:[%s14415_s8 + $0x190c] sm:$0xf]  ;;  %v11898_v24 = vld [vmem:[%s14415_s8 + $0x1918] sm:$0xf0]  ;;  %v7863_v26 = vpop.f32.mrf.mxu2  ;;  %v11773_v17 = vor.u32 %v13686_v25, %v11770_v51 }
 0x417   : > { %8102 = vmatpush.bf16.msra.mxu1 %v11965_v47  ;;  %v13750_v13 = vld [vmem:[%s14415_s8 + $0x1a0c] sm:$0xf]  ;;  %v12026_v8 = vld [vmem:[%s14415_s8 + $0x1a18] sm:$0xf0]  ;;  %v7876_v54 = vpop.f32.mrf.mxu3  ;;  %v11901_v14 = vor.u32 %v13718_v11, %v11898_v24 }
 0x418   : > { %8115 = vmatpush.bf16.msra.mxu2 %v12093_v30  ;;  %v13782_v28 = vld [vmem:[%s14415_s8 + $0x1b0c] sm:$0xf]  ;;  %v12154_v58 = vld [vmem:[%s14415_s8 + $0x1b18] sm:$0xf0]  ;;  %v12029_v15 = vor.u32 %v13750_v13, %v12026_v8 }
 0x419   : > { %8128 = vmatpush.bf16.msra.mxu3 %v12221_v48  ;;  %v13842_v16 = vld [vmem:[%s14415_s8 + $0x1cec] sm:$0xf]  ;;  %v12394_v9 = vld [vmem:[%s14415_s8 + $0x1cf8] sm:$0xf0]  ;;  %v12157_v48 = vor.u32 %v13782_v28, %v12154_v58 }
 0x41a   : > { %8090 = vmatpush.bf16.msra.mxu0 %v11821_v21  ;;  %v13874_v10 = vld [vmem:[%s14415_s8 + $0x1dec] sm:$0xf]  ;;  %v12522_v47 = vld [vmem:[%s14415_s8 + $0x1df8] sm:$0xf0]  ;;  %v12397_v19 = vor.u32 %v13842_v16, %v12394_v9 }
 0x41b   : > { %8103 = vmatpush.bf16.msra.mxu1 %v11949_v60  ;;  %v13906_v30 = vld [vmem:[%s14415_s8 + $0x1eec] sm:$0xf]  ;;  %v12650_v31 = vld [vmem:[%s14415_s8 + $0x1ef8] sm:$0xf0]  ;;  %v12525_v49 = vor.u32 %v13874_v10, %v12522_v47 }
 0x41c   : > { %8116 = vmatpush.bf16.msra.mxu2 %v12077_v35  ;;  %v13938_v32 = vld [vmem:[%s14415_s8 + $0x1fec] sm:$0xf]  ;;  %v12778_v18 = vld [vmem:[%s14415_s8 + $0x1ff8] sm:$0xf0]  ;;  %v12653_v57 = vor.u32 %v13906_v30, %v12650_v31 }
 0x41d   : > { %8129 = vmatpush.bf16.msra.mxu3 %v12205_v22  ;;  %v13838_v0 = vld [vmem:[%s14415_s8 + $0x1ccc] sm:$0xf]  ;;  %v12378_v34 = vld [vmem:[%s14415_s8 + $0x1cd8] sm:$0xf0]  ;;  %v12781_v21 = vor.u32 %v13938_v32, %v12778_v18 }
 0x41e   : > { %8091 = vmatpush.bf16.msra.mxu0 %v11805_v63  ;;  %v13870_v50 = vld [vmem:[%s14415_s8 + $0x1dcc] sm:$0xf]  ;;  %v12506_v60 = vld [vmem:[%s14415_s8 + $0x1dd8] sm:$0xf0]  ;;  %v12381_v39 = vor.u32 %v13838_v0, %v12378_v34 }
 0x41f   : > { %8104 = vmatpush.bf16.msra.mxu1 %v11933_v44  ;;  %v13902_v35 = vld [vmem:[%s14415_s8 + $0x1ecc] sm:$0xf]  ;;  %v12634_v36 = vld [vmem:[%s14415_s8 + $0x1ed8] sm:$0xf0]  ;;  %v12509_v22 = vor.u32 %v13870_v50, %v12506_v60  ;;  %v14074_v44 = vld [vmem:[#allocation1 + $0x12] sm:$0xff] }
 0x420   : > { %8117 = vmatpush.bf16.msra.mxu2 %v12061_v45  ;;  %v13934_v12 = vld [vmem:[%s14415_s8 + $0x1fcc] sm:$0xf]  ;;  %v12762_v37 = vld [vmem:[%s14415_s8 + $0x1fd8] sm:$0xf0]  ;;  %v12637_v23 = vor.u32 %v13902_v35, %v12634_v36 }
 0x421   : > { %8130 = vmatpush.bf16.msra.mxu3 %v12189_v38  ;;  %v13834_v6 = vld [vmem:[%s14415_s8 + $0x1cac] sm:$0xf]  ;;  %v12362_v20 = vld [vmem:[%s14415_s8 + $0x1cb8] sm:$0xf0]  ;;  %v12765_v41 = vor.u32 %v13934_v12, %v12762_v37 }
 0x422   : > { %8092 = vmatpush.bf16.msra.mxu0 %v11789_v62  ;;  %v13866_v33 = vld [vmem:[%s14415_s8 + $0x1dac] sm:$0xf]  ;;  %v12490_v27 = vld [vmem:[%s14415_s8 + $0x1db8] sm:$0xf0]  ;;  %v12365_v40 = vor.u32 %v13834_v6, %v12362_v20 }
 0x423   : > { %8105 = vmatpush.bf16.msra.mxu1 %v11917_v56  ;;  %v13898_v63 = vld [vmem:[%s14415_s8 + $0x1eac] sm:$0xf]  ;;  %v12618_v29 = vld [vmem:[%s14415_s8 + $0x1eb8] sm:$0xf0]  ;;  %v12493_v38 = vor.u32 %v13866_v33, %v12490_v27 }
 0x424   : > { %8118 = vmatpush.bf16.msra.mxu2 %v12045_v4  ;;  %v14075_v45 = vld [vmem:[#allocation1 + $0x9] sm:$0xff]  ;;  %v13930_v46 = vld [vmem:[%s14415_s8 + $0x1fac] sm:$0xf]  ;;  %v12621_v61 = vor.u32 %v13898_v63, %v12618_v29 }
 0x425   : > { %8131 = vmatpush.bf16.msra.mxu3 %v12173_v5  ;;  %v12746_v52 = vld [vmem:[%s14415_s8 + $0x1fb8] sm:$0xf0]  ;;  %v14076_v42 = vld [vmem:[#allocation1 + $0x1b] sm:$0xff] }
 0x426   : > { %8093 = vmatpush.bf16.msra.mxu0 %v11773_v17  ;;  %v13830_v59 = vld [vmem:[%s14415_s8 + $0x1c8c] sm:$0xf]  ;;  %v12346_v7 = vld [vmem:[%s14415_s8 + $0x1c98] sm:$0xf0]  ;;  %v12749_v2 = vor.u32 %v13930_v46, %v12746_v52  ;;  %v7887_v56 = vpop.f32.mrf.mxu0 }
 0x427   : > { %8106 = vmatpush.bf16.msra.mxu1 %v11901_v14  ;;  %v13862_v1 = vld [vmem:[%s14415_s8 + $0x1d8c] sm:$0xf]  ;;  %v12474_v62 = vld [vmem:[%s14415_s8 + $0x1d98] sm:$0xf0]  ;;  %v7888_v24 = vadd.f32 %v7887_v56, %v16627_v43  ;;  %v12349_v13 = vor.u32 %v13830_v59, %v12346_v7  ;;  %v7900_v26 = vpop.f32.mrf.mxu1 }
 0x428   : > { %8119 = vmatpush.bf16.msra.mxu2 %v12029_v15  ;;  %v13894_v25 = vld [vmem:[%s14415_s8 + $0x1e8c] sm:$0xf]  ;;  %v12602_v51 = vld [vmem:[%s14415_s8 + $0x1e98] sm:$0xf0]  ;;  %v12477_v5 = vor.u32 %v13862_v1, %v12474_v62 }
 0x429   : > { %8132 = vmatpush.bf16.msra.mxu3 %v12157_v48  ;;  %8094 = vmatmul.bf16.vlgmr.msra.gmra.mxu0 %v14073_v55  ;;  %v13926_v4 = vld [vmem:[%s14415_s8 + $0x1f8c] sm:$0xf]  ;;  %v12730_v11 = vld [vmem:[%s14415_s8 + $0x1f98] sm:$0xf0]  ;;  %v12605_v8 = vor.u32 %v13894_v25, %v12602_v51  ;;  %v7901_v9 = vadd.f32 %v7900_v26, %v7888_v24 }
 0x42a   : > { %8138 = vmatpush.bf16.msrb.mxu0 %v12397_v19  ;;  %8107 = vmatmul.bf16.vlgmr.msra.gmra.mxu1 %v14075_v45  ;;  %v13826_v28 = vld [vmem:[%s14415_s8 + $0x1c6c] sm:$0xf]  ;;  %v12330_v58 = vld [vmem:[%s14415_s8 + $0x1c78] sm:$0xf0]  ;;  %v12733_v16 = vor.u32 %v13926_v4, %v12730_v11 }
 0x42b   : > { %8151 = vmatpush.bf16.msrb.mxu1 %v12525_v49  ;;  %8120 = vmatmul.bf16.vlgmr.msra.gmra.mxu2 %v14074_v44  ;;  %v13858_v54 = vld [vmem:[%s14415_s8 + $0x1d6c] sm:$0xf]  ;;  %v12458_v10 = vld [vmem:[%s14415_s8 + $0x1d78] sm:$0xf0]  ;;  %v12333_v31 = vor.u32 %v13826_v28, %v12330_v58 }
 0x42c   : > { %8164 = vmatpush.bf16.msrb.mxu2 %v12653_v57  ;;  %8133 = vmatmul.bf16.vlgmr.msra.gmra.mxu3 %v14076_v42  ;;  %v13890_v17 = vld [vmem:[%s14415_s8 + $0x1e6c] sm:$0xf]  ;;  %v12586_v43 = vld [vmem:[%s14415_s8 + $0x1e78] sm:$0xf0]  ;;  %v12461_v14 = vor.u32 %v13858_v54, %v12458_v10 }
 0x42d   : > { %8177 = vmatpush.bf16.msrb.mxu3 %v12781_v21  ;;  %v13922_v47 = vld [vmem:[%s14415_s8 + $0x1f6c] sm:$0xf]  ;;  %v12714_v30 = vld [vmem:[%s14415_s8 + $0x1f78] sm:$0xf0]  ;;  %v12589_v15 = vor.u32 %v13890_v17, %v12586_v43 }
 0x42e   : > { %8139 = vmatpush.bf16.msrb.mxu0 %v12381_v39  ;;  %v13822_v32 = vld [vmem:[%s14415_s8 + $0x1c4c] sm:$0xf]  ;;  %v12314_v18 = vld [vmem:[%s14415_s8 + $0x1c58] sm:$0xf0]  ;;  %v12717_v19 = vor.u32 %v13922_v47, %v12714_v30  ;;  %v7913_v49 = vpop.f32.mrf.mxu2  ;;  %v7889_v36 = vpop.f32.mrf.mxu0 }
 0x42f   : > { %8152 = vmatpush.bf16.msrb.mxu1 %v12509_v22  ;;  %v13854_v48 = vld [vmem:[%s14415_s8 + $0x1d4c] sm:$0xf]  ;;  %v12442_v57 = vld [vmem:[%s14415_s8 + $0x1d58] sm:$0xf0]  ;;  %v7914_v50 = vadd.f32 %v7913_v49, %v7901_v9  ;;  %v7926_v21 = vpop.f32.mrf.mxu3  ;;  %v12317_v12 = vor.u32 %v13822_v32, %v12314_v18  ;;  %v7902_v37 = vpop.f32.mrf.mxu1 }
 0x430   : > { %8165 = vmatpush.bf16.msrb.mxu2 %v12637_v23  ;;  %v13886_v0 = vld [vmem:[%s14415_s8 + $0x1e4c] sm:$0xf]  ;;  %v12570_v34 = vld [vmem:[%s14415_s8 + $0x1e58] sm:$0xf0]  ;;  %v12445_v22 = vor.u32 %v13854_v48, %v12442_v57 }
 0x431   : > { %8178 = vmatpush.bf16.msrb.mxu3 %v12765_v41  ;;  %v13918_v60 = vld [vmem:[%s14415_s8 + $0x1f4c] sm:$0xf]  ;;  %v12698_v35 = vld [vmem:[%s14415_s8 + $0x1f58] sm:$0xf0]  ;;  %v7927_v39 = vadd.f32 %v7926_v21, %v7914_v50  ;;  %v12573_v23 = vor.u32 %v13886_v0, %v12570_v34 }
 0x432   : > { %8140 = vmatpush.bf16.msrb.mxu0 %v12365_v40  ;;  %v13818_v6 = vld [vmem:[%s14415_s8 + $0x1c2c] sm:$0xf]  ;;  %v12298_v20 = vld [vmem:[%s14415_s8 + $0x1c38] sm:$0xf0]  ;;  %v12701_v55 = vor.u32 %v13918_v60, %v12698_v35 }
 0x433   : > { %8153 = vmatpush.bf16.msrb.mxu1 %v12493_v38  ;;  %v13850_v33 = vld [vmem:[%s14415_s8 + $0x1d2c] sm:$0xf]  ;;  %v12426_v41 = vld [vmem:[%s14415_s8 + $0x1d38] sm:$0xf0]  ;;  %v12301_v45 = vor.u32 %v13818_v6, %v12298_v20 }
 0x434   : > { %8166 = vmatpush.bf16.msrb.mxu2 %v12621_v61  ;;  %v13882_v27 = vld [vmem:[%s14415_s8 + $0x1e2c] sm:$0xf]  ;;  %v12554_v63 = vld [vmem:[%s14415_s8 + $0x1e38] sm:$0xf0]  ;;  %v12429_v46 = vor.u32 %v13850_v33, %v12426_v41 }
 0x435   : > { %8179 = vmatpush.bf16.msrb.mxu3 %v12749_v2  ;;  %v13914_v29 = vld [vmem:[%s14415_s8 + $0x1f2c] sm:$0xf]  ;;  %v12682_v44 = vld [vmem:[%s14415_s8 + $0x1f38] sm:$0xf0]  ;;  %v12557_v52 = vor.u32 %v13882_v27, %v12554_v63 }
 0x436   : > { %8141 = vmatpush.bf16.msrb.mxu0 %v12349_v13  ;;  %v13814_v42 = vld [vmem:[%s14415_s8 + $0x1c0c] sm:$0xf]  ;;  %v12282_v40 = vld [vmem:[%s14415_s8 + $0x1c18] sm:$0xf0]  ;;  %v12685_v61 = vor.u32 %v13914_v29, %v12682_v44  ;;  %v7915_v2 = vpop.f32.mrf.mxu2  ;;  %v14077_v13 = vld [vmem:[#allocation1 + $0x24] sm:$0xff] }
 0x437   : > { %8154 = vmatpush.bf16.msrb.mxu1 %v12477_v5  ;;  %v13846_v38 = vld [vmem:[%s14415_s8 + $0x1d0c] sm:$0xf]  ;;  %v12410_v59 = vld [vmem:[%s14415_s8 + $0x1d18] sm:$0xf0]  ;;  %v7928_v51 = vpop.f32.mrf.mxu3  ;;  %v12285_v56 = vor.u32 %v13814_v42, %v12282_v40 }
 0x438   : > { %8167 = vmatpush.bf16.msrb.mxu2 %v12605_v8  ;;  %v13878_v7 = vld [vmem:[%s14415_s8 + $0x1e0c] sm:$0xf]  ;;  %v12538_v1 = vld [vmem:[%s14415_s8 + $0x1e18] sm:$0xf0]  ;;  %v12413_v4 = vor.u32 %v13846_v38, %v12410_v59 }
 0x439   : > { %8180 = vmatpush.bf16.msrb.mxu3 %v12733_v16  ;;  %v13910_v62 = vld [vmem:[%s14415_s8 + $0x1f0c] sm:$0xf]  ;;  %v12666_v25 = vld [vmem:[%s14415_s8 + $0x1f18] sm:$0xf0]  ;;  %v12541_v11 = vor.u32 %v13878_v7, %v12538_v1 }
 0x43a   : > { %8142 = vmatpush.bf16.msrb.mxu0 %v12333_v31  ;;  %v12669_v24 = vor.u32 %v13910_v62, %v12666_v25  ;;  %v14078_v26 = vld [vmem:[#allocation1 + $0x2d] sm:$0xff]  ;;  %v14079_v5 = vld [vmem:[#allocation1 + $0x36] sm:$0xff]  ;;  %v14080_v8 = vld [vmem:[#allocation1 + $0x3f] sm:$0xff] }
 0x43b   : > { %8155 = vmatpush.bf16.msrb.mxu1 %v12461_v14 }
 0x43c   : > { %8168 = vmatpush.bf16.msrb.mxu2 %v12589_v15 }
 0x43d   : > { %8181 = vmatpush.bf16.msrb.mxu3 %v12717_v19 }
 0x43e   : > { %8143 = vmatpush.bf16.msrb.mxu0 %v12317_v12 }
 0x43f   : > { %8156 = vmatpush.bf16.msrb.mxu1 %v12445_v22 }
 0x440   : > { %8169 = vmatpush.bf16.msrb.mxu2 %v12573_v23 }
 0x441   : > { %8182 = vmatpush.bf16.msrb.mxu3 %v12701_v55 }
 0x442   : > { %8144 = vmatpush.bf16.msrb.mxu0 %v12301_v45 }
 0x443   : > { %8157 = vmatpush.bf16.msrb.mxu1 %v12429_v46 }
 0x444   : > { %8170 = vmatpush.bf16.msrb.mxu2 %v12557_v52 }
 0x445   : > { %8183 = vmatpush.bf16.msrb.mxu3 %v12685_v61 }
 0x446   : > { %8145 = vmatpush.bf16.msrb.mxu0 %v12285_v56  ;;  %v7939_v28 = vpop.f32.mrf.mxu0 }
 0x447   : > { %8158 = vmatpush.bf16.msrb.mxu1 %v12413_v4  ;;  %v7940_v58 = vadd.f32 %v7939_v28, %v7927_v39  ;;  %v7952_v54 = vpop.f32.mrf.mxu1 }
 0x448   : > { %8171 = vmatpush.bf16.msrb.mxu2 %v12541_v11 }
 0x449   : > { %8184 = vmatpush.bf16.msrb.mxu3 %v12669_v24  ;;  %8146 = vmatmul.bf16.vlgmr.msrb.gmra.mxu0 %v14077_v13  ;;  %v7953_v16 = vadd.f32 %v7952_v54, %v7940_v58  ;;  %v8195_v13 = vrot.slane %v16486_v3, 4 }
 0x44a   : > { %8159 = vmatmul.bf16.vlgmr.msrb.gmra.mxu1 %v14078_v26 }
 0x44b   : > { %8172 = vmatmul.bf16.vlgmr.msrb.gmra.mxu2 %v14079_v5  ;;  %v305_v5 = vld [vmem:[#allocation2] sm:$0xff] }
 0x44c   : > { %8185 = vmatmul.bf16.vlgmr.msrb.gmra.mxu3 %v14080_v8 }
 0x44e   : > { %v7965_v9 = vpop.f32.mrf.mxu2  ;;  %v7941_v43 = vpop.f32.mrf.mxu0 }
 0x44f   : > { %v7966_v10 = vadd.f32 %v7965_v9, %v7953_v16  ;;  %v7978_v17 = vpop.f32.mrf.mxu3  ;;  %v7954_v47 = vpop.f32.mrf.mxu1 }
 0x451   : > { %v7979_v30 = vadd.f32 %v7978_v17, %v7966_v10 }
 0x456   : > { %v7967_v31 = vpop.f32.mrf.mxu2 }
 0x457   : > { %v7980_v14 = vpop.f32.mrf.mxu3 }
 0x466   : > { %v7991_v15 = vpop.f32.mrf.mxu0 }
 0x467   : > { %v7992_v32 = vadd.f32 %v7991_v15, %v7979_v30  ;;  %v8004_v18 = vpop.f32.mrf.mxu1 }
 0x469   : > { %v8005_v48 = vadd.f32 %v8004_v18, %v7992_v32 }
 0x46e   : > { %v8017_v19 = vpop.f32.mrf.mxu2  ;;  %v7993_v0 = vpop.f32.mrf.mxu0 }
 0x46f   : > { %v8018_v49 = vadd.f32 %v8017_v19, %v8005_v48  ;;  %v8030_v57 = vpop.f32.mrf.mxu3  ;;  %v8006_v34 = vpop.f32.mrf.mxu1 }
 0x471   : > { %v8031_v50 = vadd.f32 %v8030_v57, %v8018_v49 }
 0x476   : > { %v8019_v21 = vpop.f32.mrf.mxu2 }
 0x477   : > { %v8032_v60 = vpop.f32.mrf.mxu3 }
 0x486   : > { %v8043_v35 = vpop.f32.mrf.mxu0 }
 0x487   : > { %v8056_v36 = vpop.f32.mrf.mxu1  ;;  %v8044_v55 = vadd.f32 %v8043_v35, %v8031_v50 }
 0x489   : > { %v8057_v44 = vadd.f32 %v8056_v36, %v8044_v55 }
 0x48e   : > { %v8069_v12 = vpop.f32.mrf.mxu2  ;;  %v8045_v39 = vpop.f32.mrf.mxu0 }
 0x48f   : > { %v8082_v37 = vpop.f32.mrf.mxu3  ;;  %v8058_v22 = vpop.f32.mrf.mxu1  ;;  %v8070_v45 = vadd.f32 %v8069_v12, %v8057_v44 }
 0x491   : > { %v8083_v42 = vadd.f32 %v8082_v37, %v8070_v45 }
 0x496   : > { %v8071_v23 = vpop.f32.mrf.mxu2 }
 0x497   : > { %v8084_v6 = vpop.f32.mrf.mxu3 }
 0x4a6   : > { %v8095_v20 = vpop.f32.mrf.mxu0 }
 0x4a7   : > { %v8108_v33 = vpop.f32.mrf.mxu1  ;;  %v8096_v40 = vadd.f32 %v8095_v20, %v8083_v42 }
 0x4a9   : > { %v8109_v38 = vadd.f32 %v8108_v33, %v8096_v40 }
 0x4ae   : > { %v8121_v41 = vpop.f32.mrf.mxu2  ;;  %v8097_v63 = vpop.f32.mrf.mxu0 }
 0x4af   : > { %v8134_v27 = vpop.f32.mrf.mxu3  ;;  %v8110_v29 = vpop.f32.mrf.mxu1  ;;  %v8122_v61 = vadd.f32 %v8121_v41, %v8109_v38 }
 0x4b1   : > { %v8135_v59 = vadd.f32 %v8134_v27, %v8122_v61 }
 0x4b6   : > { %v8123_v46 = vpop.f32.mrf.mxu2 }
 0x4b7   : > { %v8136_v52 = vpop.f32.mrf.mxu3 }
 0x4c6   : > { %v8147_v7 = vpop.f32.mrf.mxu0 }
 0x4c7   : > { %v8160_v1 = vpop.f32.mrf.mxu1  ;;  %v8148_v2 = vadd.f32 %v8147_v7, %v8135_v59 }
 0x4c9   : > { %v8161_v62 = vadd.f32 %v8160_v1, %v8148_v2 }
 0x4ce   : > { %v8173_v25 = vpop.f32.mrf.mxu2  ;;  %v8149_v4 = vpop.f32.mrf.mxu0 }
 0x4cf   : > { %v8174_v51 = vadd.f32 %v8173_v25, %v8161_v62  ;;  %v8186_v56 = vpop.f32.mrf.mxu3  ;;  %v8162_v11 = vpop.f32.mrf.mxu1 }
 0x4d1   : > { %v8187_v24 = vadd.f32 %v8186_v56, %v8174_v51 }
 0x4d3   : > { %v8196_v26 = vrot.slane %v8187_v24, 2 }
 0x4d5   : > { %v8200_v8 = vsel %vm8199_vm1, %v8195_v13, %v8196_v26  ;;  %8209 = sbr.rel (%p12782_p1) target bundleno = 1764 (0x6e4), region = 64 }
 0x4d6   : > { %v8202_v28 = vsel %vm8201_vm2, %v15937_v53, %v8200_v8  ;;  %v8175_v58 = vpop.f32.mrf.mxu2 }
 0x4d7   : > { %v8204_v54 = vadd.f32 %v8202_v28, %v305_v5  ;;  %v8188_v16 = vpop.f32.mrf.mxu3 }
 0x4d9   : > { %8205 = vst [vmem:[#allocation2] sm:$0xff] %v8204_v54 }
 0x4da   : > { %v13948_v9 = vld [vmem:[#allocation8 + $0x38] sm:$0xff]  ;;  %v13947_v3 = vld [vmem:[#allocation8 + $0x30] sm:$0xff]  ;;  %v13946_v53 = vld [vmem:[#allocation8 + $0x28] sm:$0xff]  ;;  %v14288_v11 = vmov 0   ;;  %vm8561_vm3 = vcmask 41984  }
 0x4db   : > { %v13956_v10 = vld [vmem:[#allocation8 + $0x78] sm:$0xff]  ;;  %8500 = vmatpush.bf16.msra.mxu0 %v13948_v9  ;;  %v13955_v47 = vld [vmem:[#allocation8 + $0x70] sm:$0xff]  ;;  %v13954_v14 = vld [vmem:[#allocation8 + $0x68] sm:$0xff]  ;;  %14081 = vset.pattern.permute.xlu1 %v14288_v11 }
 0x4dc   : > { %v13964_v17 = vld [vmem:[#allocation8 + $0xb8] sm:$0xff]  ;;  %8513 = vmatpush.bf16.msra.mxu1 %v13956_v10  ;;  %v13963_v30 = vld [vmem:[#allocation8 + $0xb0] sm:$0xff]  ;;  %v13962_v15 = vld [vmem:[#allocation8 + $0xa8] sm:$0xff]  ;;  %14082 = vset.pattern.permute.xlu0 %v14288_v11 }
 0x4dd   : > { %v13972_v43 = vld [vmem:[#allocation8 + $0xf8] sm:$0xff]  ;;  %8526 = vmatpush.bf16.msra.mxu2 %v13964_v17  ;;  %v13971_v31 = vld [vmem:[#allocation8 + $0xf0] sm:$0xff]  ;;  %v13970_v32 = vld [vmem:[#allocation8 + $0xe8] sm:$0xff] }
 0x4de   : > { %8539 = vmatpush.bf16.msra.mxu3 %v13972_v43  ;;  %v13945_v18 = vld [vmem:[#allocation8 + $0x20] sm:$0xff]  ;;  %v8211_v57 = vld [vmem:[#allocation6] sm:$0xf]  ;;  %v13943_v55 = vld [vmem:[#allocation8 + $0x10] sm:$0xff] }
 0x4df   : > { %8501 = vmatpush.bf16.msra.mxu0 %v13947_v3  ;;  %v13953_v48 = vld [vmem:[#allocation8 + $0x60] sm:$0xff]  ;;  %v8213_v0 = vperm.slane %v8211_v57, 0  ;;  %v8214_v34 = vperm.slane %v8211_v57, 1  ;;  %v8215_v50 = vperm.slane %v8211_v57, 2  ;;  %v8216_v21 = vperm.slane %v8211_v57, 3  ;;  %v13944_v60 = vld [vmem:[#allocation8 + $0x18] sm:$0xff] }
 0x4e0   : > { %8514 = vmatpush.bf16.msra.mxu1 %v13955_v47  ;;  %v13961_v19 = vld [vmem:[#allocation8 + $0xa0] sm:$0xff]  ;;  %v13952_v35 = vld [vmem:[#allocation8 + $0x58] sm:$0xff]  ;;  %v13951_v41 = vld [vmem:[#allocation8 + $0x50] sm:$0xff] }
 0x4e1   : > { %8527 = vmatpush.bf16.msra.mxu2 %v13963_v30  ;;  %v13969_v49 = vld [vmem:[#allocation8 + $0xe0] sm:$0xff]  ;;  %v8217_v36 = vrot.slane %v8214_v34, 6  ;;  %v8218_v12 = vrot.slane %v8215_v50, 4  ;;  %v8219_v37 = vrot.slane %v8216_v21, 2  ;;  %v13960_v39 = vld [vmem:[#allocation8 + $0x98] sm:$0xff]  ;;  %v13959_v63 = vld [vmem:[#allocation8 + $0x90] sm:$0xff] }
 0x4e2   : > { %8540 = vmatpush.bf16.msra.mxu3 %v13971_v31  ;;  %v13968_v22 = vld [vmem:[#allocation8 + $0xd8] sm:$0xff]  ;;  %v13967_v29 = vld [vmem:[#allocation8 + $0xd0] sm:$0xff]  ;;  %v13942_v45 = vld [vmem:[#allocation8 + $0x8] sm:$0xff] }
 0x4e3   : > { %8502 = vmatpush.bf16.msra.mxu0 %v13946_v53  ;;  %v8210_v23 = vld [vmem:[#allocation2] sm:$0xff]  ;;  %v8220_v6 = vsel %vm8197_vm0, %v8213_v0, %v8217_v36  ;;  %v8221_v20 = vsel %vm8199_vm1, %v8218_v12, %v8219_v37  ;;  %v13950_v46 = vld [vmem:[#allocation8 + $0x48] sm:$0xff]  ;;  %v13941_v40 = vld [vmem:[#allocation8] sm:$0xff] }
 0x4e4   : > { %8515 = vmatpush.bf16.msra.mxu1 %v13954_v14  ;;  %v8222_v33 = vsel %vm8201_vm2, %v8220_v6, %v8221_v20  ;;  %v13958_v52 = vld [vmem:[#allocation8 + $0x88] sm:$0xff]  ;;  %v13949_v38 = vld [vmem:[#allocation8 + $0x40] sm:$0xff] }
 0x4e5   : > { %8528 = vmatpush.bf16.msra.mxu2 %v13962_v15  ;;  %v8224_v27 = vadd.f32 %v8222_v33, %v8210_v23  ;;  %v13966_v42 = vld [vmem:[#allocation8 + $0xc8] sm:$0xff]  ;;  %v13957_v61 = vld [vmem:[#allocation8 + $0x80] sm:$0xff] }
 0x4e6   : > { %8541 = vmatpush.bf16.msra.mxu3 %v13970_v32  ;;  %v13965_v59 = vld [vmem:[#allocation8 + $0xc0] sm:$0xff] }
 0x4e7   : > { %8503 = vmatpush.bf16.msra.mxu0 %v13945_v18  ;;  %v8225_v44 = vmax.f32 %v8224_v27, 0.0  ;;  %v14083_v24 = vld [vmem:[#allocation9] ss:$0 sm:$0xff] }
 0x4e8   : > { %8516 = vmatpush.bf16.msra.mxu1 %v13953_v48 }
 0x4e9   : > { %8529 = vmatpush.bf16.msra.mxu2 %v13961_v19  ;;  %8227 = vst [vmem:[#allocation1] ss:$4 sm:$0xff] %v8225_v44 }
 0x4ea   : > { %8542 = vmatpush.bf16.msra.mxu3 %v13969_v49 }
 0x4eb   : > { %8504 = vmatpush.bf16.msra.mxu0 %v13944_v60 }
 0x4ec   : > { %8517 = vmatpush.bf16.msra.mxu1 %v13952_v35 }
 0x4ed   : > { %8530 = vmatpush.bf16.msra.mxu2 %v13960_v39 }
 0x4ee   : > { %8543 = vmatpush.bf16.msra.mxu3 %v13968_v22 }
 0x4ef   : > { %8505 = vmatpush.bf16.msra.mxu0 %v13943_v55 }
 0x4f0   : > { %8518 = vmatpush.bf16.msra.mxu1 %v13951_v41  ;;  %v8228_v7 = vld.sshfl [vmem:[#allocation1] sm:$0xff pattern:$0x73625140]  ;;  %v8229_v1 = vld.sshfl [vmem:[#allocation1 + $0x8] sm:$0xff pattern:$0x73625140] }
 0x4f1   : > { %8531 = vmatpush.bf16.msra.mxu2 %v13959_v63  ;;  %v8236_v2 = vpack.c.bf16 %v8228_v7, %v8228_v7  ;;  %v8237_v62 = vpack.c.bf16 %v8229_v1, %v8229_v1  ;;  %v8230_v25 = vld.sshfl [vmem:[#allocation1 + $0x10] sm:$0xff pattern:$0x73625140]  ;;  %v8231_v51 = vld.sshfl [vmem:[#allocation1 + $0x18] sm:$0xff pattern:$0x73625140] }
 0x4f2   : > { %8544 = vmatpush.bf16.msra.mxu3 %v13967_v29  ;;  %v8238_v56 = vpack.c.bf16 %v8230_v25, %v8230_v25  ;;  %v8239_v4 = vpack.c.bf16 %v8231_v51, %v8231_v51 }
 0x4f3   : > { %8506 = vmatpush.bf16.msra.mxu0 %v13942_v45 }
 0x4f4   : > { %8519 = vmatpush.bf16.msra.mxu1 %v13950_v46 }
 0x4f5   : > { %8532 = vmatpush.bf16.msra.mxu2 %v13958_v52 }
 0x4f6   : > { %8545 = vmatpush.bf16.msra.mxu3 %v13966_v42 }
 0x4f7   : > { %8507 = vmatpush.bf16.msra.mxu0 %v13941_v40 }
 0x4f8   : > { %8520 = vmatpush.bf16.msra.mxu1 %v13949_v38 }
 0x4f9   : > { %8533 = vmatpush.bf16.msra.mxu2 %v13957_v61 }
 0x4fa   : > { %8546 = vmatpush.bf16.msra.mxu3 %v13965_v59  ;;  %8508 = vmatmul.bf16.vlgmr.msra.gmra.mxu0 %v8236_v2 }
 0x4fb   : > { %8521 = vmatmul.bf16.vlgmr.msra.gmra.mxu1 %v8237_v62 }
 0x4fc   : > { %8534 = vmatmul.bf16.vlgmr.msra.gmra.mxu2 %v8238_v56 }
 0x4fd   : > { %8547 = vmatmul.bf16.vlgmr.msra.gmra.mxu3 %v8239_v4 }
 0x577   : > { %v8509_v13 = vpop.f32.mrf.mxu0 }
 0x578   : > { %v8522_v26 = vpop.f32.mrf.mxu1  ;;  %v8510_v5 = vadd.f32 %v14083_v24, %v8509_v13 }
 0x57a   : > { %v8523_v8 = vadd.f32 %v8522_v26, %v8510_v5 }
 0x57f   : > { %v8535_v28 = vpop.f32.mrf.mxu2  ;;  %v8511_v16 = vpop.f32.mrf.mxu0 }
 0x580   : > { %v8548_v58 = vpop.f32.mrf.mxu3  ;;  %v8536_v54 = vadd.f32 %v8535_v28, %v8523_v8  ;;  %v8524_v9 = vpop.f32.mrf.mxu1 }
 0x582   : > { %v8549_v10 = vadd.f32 %v8548_v58, %v8536_v54 }
 0x584   : > { %8554 = vperm.xlu1 %14081, %v8549_v10   ;;  %8558 = vrot.lane.b32.xlu0 %v8549_v10, %s14289_s11 }
 0x587   : > { %v8537_v17 = vpop.f32.mrf.mxu2 }
 0x588   : > { %v8550_v43 = vpop.f32.mrf.mxu3 }
 0x5f6   : > { %v8559_v3 = vpop.permute.xlu0 %8558  ;;  %v8555_v30 = vpop.permute.xlu1 %8554 }
 0x5f7   : > { %v8562_v47 = vsel %vm8561_vm3, %v8559_v3, 0.0  ;;  %v8557_v53 = vadd.f32 %v8555_v30, %v8549_v10 }
 0x5f8   : > { %8563 = vadd.xlane.f32.xlu0 %v8562_v47 }
 0x66b   : > { %v8564_v31 = vpop.xlane.xlu0 %8563 }
 0x66c   : > { %v8565_v14 = vmul.f32 0.16666667, %v8564_v31 }
 0x66e   : > { %v8566_v15 = vsub.f32 %v8557_v53, %v8565_v14 }
 0x670   : > { %8568 = vrot.lane.b32.xlu1 %v8566_v15, %s14289_s11 }
 0x6e2   : > { %v8569_v32 = vpop.permute.xlu1 %8568 }
 0x6e3   : > { %8571 = vst.msk [vmem:[#allocation11] sm:$0x3] %vm8561_vm3, %v8569_v32 }
 0x6e4 PF: > { %p14012_p4 = scmp.eq.s32.totalorder %s14340_s22, 1  ;;  %s14290_s12 = smov [#allocation11]  }
 0x6e5   : > { %s8578_s13 = sshll.u32 %s14290_s12, 4  ;;  %s8580_s21 = sshll.u32 %s16740_s5, 4  ;;  %s8579_s13 = int_to_ptr.vmem [resolvable:$true] %s8578_s13  ;;  %s8581_s21 = int_to_ptr.hbm [resolvable:$true] %s8580_s21 }
 0x6e6   : > { %13988 = dma.vmem_to_hbm [thread:$0]  (%p14012_p4), %s8579_s13, 32, %s8581_s21, [#allocation5]  }
 0x6e7   : > { %14261 = dma.done.wait (%p14012_p4), [#allocation5], 32  }
 0x6e8   : > { %14263 = vsyncadd (%p14012_p4), [#allocation5], 4294967264 }
 0x6e9 PF: > { %s16745_s16 = smov %s14381_s18  ;;  %p18_p5 = scmp.ge.s32.totalorder %s14381_s18, 4  }
 0x6ea   : > { %s16746_s18 = smov %s14270_s19  ;;  %s16747_s19 = smov %s14274_s20 }
 0x6eb   : > { %s16748_s20 = smov %s14391_s26  ;;  %s16749_s21 = smov %s16745_s16 }
 0x6ec   :  { %20 = sbr.rel (!%p18_p5) target bundleno = 6 (0x6), region = 100 }
 0x6f1   :  { %8594 = vsyncpa [#allocation4], 1 }
 0x6f2   :  { %8596 = vsyncpa [#allocation4 + $0x1], 1 }
 0x6f3   :  { %8597 = vsyncpa [#allocation7], 1 }
 0x6f4   :  { %8598 = vsyncpa [#allocation10], 1 }
 0x6f5   :  { %8599 = vsyncpa [#allocation5], 1 }
 0x6f6   :  { %8601 = vsyncpa [#allocation5 + $0x1], 1 }

</bundles_post_ra>
